<compile_context>
chip_gen: v6e
topology: v6e:2x2x1
jax: 0.10.0
libtpu: 0.0.40
codegen_flags: <defaults>
</compile_context>

<pallas_src>
import functools

import numpy as np
import jax
import jax.numpy as jnp
from jax.experimental import pallas as pl
from jax.experimental.pallas import tpu as pltpu


def _round_up(x, m):
    return (x + m - 1) // m * m


def _pick_tile(size, cap, gran):
    """Largest tile (multiple of gran, <= cap) dividing the gran-padded size."""
    size_p = _round_up(max(size, 1), gran)
    cap = max(gran, (cap // gran) * gran)
    if size_p <= cap:
        return size_p, size_p
    t = cap
    while size_p % t:
        t -= gran
    return t, size_p


@functools.lru_cache(maxsize=None)
def _vmem_budget_bytes():
    """Generation-aware scoped-VMEM budget (~48 MiB on v7x, up to 96 MiB on v5e/v6e)."""
    try:
        cap = int(pltpu.get_tpu_info().vmem_capacity_bytes)
        return max(32 << 20, min(cap * 3 // 4, 96 << 20))
    except Exception:
        return 32 << 20


# ----------------------------------------------------------------------------
# Kernel 1: K-tiled fused matmul  Y = [relu]((X @ W) * scale + bias)  -> bf16
# ----------------------------------------------------------------------------
def _matmul_affine_kernel(x_ref, w_ref, s_ref, b_ref, o_ref, acc_ref, *, relu):
    k = pl.program_id(2)

    @pl.when(k == 0)
    def _init():
        acc_ref[...] = jnp.zeros_like(acc_ref)

    acc_ref[...] += jnp.dot(x_ref[...], w_ref[...],
                            preferred_element_type=jnp.float32)

    @pl.when(k == pl.num_programs(2) - 1)
    def _fin():
        y = acc_ref[...] * s_ref[...] + b_ref[...]      # f32 epilogue
        if relu:
            y = jnp.maximum(y, 0.0)
        o_ref[...] = y.astype(o_ref.dtype)


def matmul_affine(x, w, scale, bias, *, relu=True, out_dtype=jnp.bfloat16,
                  n_valid=None, slice_n=True):
    """Conv-as-matmul with folded BN affine and optional ReLU.

    x:[M,K], w:[Kw,N] (possibly pre-padded bf16), scale/bias:[1,N].  bf16 MXU inputs,
    f32 accumulation in a VMEM scratch, bf16 (or out_dtype) lane-dense output.
    """
    M, K = x.shape
    Kw, N = w.shape
    n_valid = N if n_valid is None else n_valid

    budget = _vmem_budget_bytes()
    tk_cap = 1024 if budget >= (64 << 20) else 512
    tm, Mp = _pick_tile(M, 512, 8)
    tn, Np = _pick_tile(N, 512, 128)
    tk, Kp = _pick_tile(max(K, Kw), tk_cap, 128)

    xp = x.astype(jnp.bfloat16)
    if (Mp, Kp) != (M, K):
        xp = jnp.pad(xp, ((0, Mp - M), (0, Kp - K)))
    wp = w.astype(jnp.bfloat16)
    if (Kp, Np) != (Kw, N):
        wp = jnp.pad(wp, ((0, Kp - Kw), (0, Np - N)))
    sp = scale.astype(jnp.float32)
    bp = bias.astype(jnp.float32)
    if Np != N:
        sp = jnp.pad(sp, ((0, 0), (0, Np - N)))
        bp = jnp.pad(bp, ((0, 0), (0, Np - N)))

    out = pl.pallas_call(
        functools.partial(_matmul_affine_kernel, relu=relu),
        out_shape=jax.ShapeDtypeStruct((Mp, Np), out_dtype),
        grid=(Mp // tm, Np // tn, Kp // tk),
        in_specs=[
            pl.BlockSpec((tm, tk), lambda i, j, k: (i, k)),
            pl.BlockSpec((tk, tn), lambda i, j, k: (k, j)),
            pl.BlockSpec((1, tn), lambda i, j, k: (0, j)),
            pl.BlockSpec((1, tn), lambda i, j, k: (0, j)),
        ],
        out_specs=pl.BlockSpec((tm, tn), lambda i, j, k: (i, j)),
        scratch_shapes=[pltpu.VMEM((tm, tn), jnp.float32)],
        compiler_params=pltpu.CompilerParams(
            dimension_semantics=("parallel", "parallel", "arbitrary"),
            vmem_limit_bytes=budget),
    )(xp, wp, sp, bp)

    out = out[:M] if Mp != M else out
    if slice_n and n_valid != Np:
        out = out[:, :n_valid]
    return out


# ----------------------------------------------------------------------------
# Kernel 2: batched spatial operator  O[b] = Mat @ (X[b] [* mask])
#   (separable adaptive pooling / bilinear interpolation); C tiled over lanes.
# ----------------------------------------------------------------------------
def _spatial_matmul_kernel(m_ref, x_ref, o_ref, *, bb):
    m = m_ref[...]
    for b in range(bb):                      # bb is small & static -> unrolled
        o_ref[b] = jnp.dot(m, x_ref[b],
                           preferred_element_type=jnp.float32).astype(o_ref.dtype)


def _spatial_matmul_masked_kernel(m_ref, x_ref, msk_ref, o_ref, *, bb):
    m = m_ref[...]
    msk = msk_ref[...]
    for b in range(bb):
        o_ref[b] = jnp.dot(m, x_ref[b] * msk,
                           preferred_element_type=jnp.float32).astype(o_ref.dtype)


def spatial_matmul(mat, x, mask=None, *, out_dtype=jnp.bfloat16, slice_c=True,
                   bb_max=8, tc_max=2048):
    """Apply [So, Si] operator along dim 1 of x:[Bd, Si, C] -> [Bd, So, C] (bf16)."""
    Bd, Si, C = x.shape
    So = mat.shape[0]
    tc, Cp = _pick_tile(C, tc_max, 128)
    bb = 1
    for d in range(min(bb_max, Bd), 0, -1):
        if Bd % d == 0:
            bb = d
            break

    xp = x.astype(jnp.bfloat16)
    if Cp != C:
        xp = jnp.pad(xp, ((0, 0), (0, 0), (0, Cp - C)))
    mp = jnp.asarray(mat, jnp.bfloat16)

    operands = [mp, xp]
    in_specs = [
        pl.BlockSpec((So, Si), lambda g, c: (0, 0)),        # operator stays resident
        pl.BlockSpec((bb, Si, tc), lambda g, c: (g, 0, c)),
    ]
    if mask is None:
        kernel = functools.partial(_spatial_matmul_kernel, bb=bb)
    else:
        mk = jnp.asarray(mask, jnp.bfloat16)
        if Cp != C:
            mk = jnp.pad(mk, ((0, 0), (0, Cp - C)))
        operands.append(mk)
        in_specs.append(pl.BlockSpec((Si, tc), lambda g, c: (0, c)))
        kernel = functools.partial(_spatial_matmul_masked_kernel, bb=bb)

    out = pl.pallas_call(
        kernel,
        out_shape=jax.ShapeDtypeStruct((Bd, So, Cp), out_dtype),
        grid=(Bd // bb, Cp // tc),
        in_specs=in_specs,
        out_specs=pl.BlockSpec((bb, So, tc), lambda g, c: (g, 0, c)),
        compiler_params=pltpu.CompilerParams(
            dimension_semantics=("parallel", "parallel"),
            vmem_limit_bytes=_vmem_budget_bytes()),
    )(*operands)

    if slice_c and Cp != C:
        out = out[..., :C]
    return out


# ----------------------------------------------------------------------------
# Kernel 3: fused 3x3 conv + folded BN + ReLU (Cin-reduction grid, VMEM accumulator)
# ----------------------------------------------------------------------------
def _conv3x3_kernel(x_ref, w_ref, s_ref, b_ref, o_ref, acc_ref, *, H, W, rh, relu):
    # x_ref: [1, H+2, W+2, tcin] (spatially pre-padded), w_ref: [9, tcin, tcout]
    k = pl.program_id(2)

    @pl.when(k == 0)
    def _init():
        acc_ref[...] = jnp.zeros_like(acc_ref)

    tcin = x_ref.shape[-1]
    for r0 in range(0, H, rh):                      # static row chunks bound vreg pressure
        rr = min(rh, H - r0)
        for kx in range(3):
            # one column-shifted slab per kx, reused across the three ky taps
            slab = x_ref[0, r0:r0 + rr + 2, kx:kx + W, :]          # [rr+2, W, tcin]
            for ky in range(3):
                patch = slab[ky:ky + rr].reshape(rr * W, tcin)
                acc_ref[r0 * W:(r0 + rr) * W, :] += jnp.dot(
                    patch, w_ref[ky * 3 + kx],
                    preferred_element_type=jnp.float32)

    @pl.when(k == pl.num_programs(2) - 1)
    def _fin():
        y = acc_ref[...] * s_ref[...] + b_ref[...]
        if relu:
            y = jnp.maximum(y, 0.0)
        o_ref[0] = y.astype(o_ref.dtype)


def conv3x3_affine(x, w9, scale, bias, *, relu=True, out_dtype=jnp.bfloat16):
    """x:[B,H,W,Cin] bf16, w9:[9,Cinp,Coutp] (pre-padded bf16) -> [B,H,W,Coutp] bf16.

    padding=1, stride=1.  Grid = (B, Cout tiles, Cin tiles); Cin is the reduction axis.
    TODO(synk): tile spatial rows with a 1-row halo DMA for very large H*W; PSPNet's
    3x3 convs run at the stride-8 feature resolution so the full map fits per block.
    """
    B, H, W, Cx = x.shape
    _, Cw, Coutp = w9.shape
    cin_all = max(_round_up(Cx, 128), Cw)
    tcin, Cinp = _pick_tile(cin_all, 256, 128)
    tcout, Coutp2 = _pick_tile(Coutp, 256, 128)

    xp = jnp.pad(x.astype(jnp.bfloat16), ((0, 0), (1, 1), (1, 1), (0, Cinp - Cx)))
    wp = w9.astype(jnp.bfloat16)
    if (Cinp, Coutp2) != (Cw, Coutp):
        wp = jnp.pad(wp, ((0, 0), (0, Cinp - Cw), (0, Coutp2 - Coutp)))
    sp = scale.astype(jnp.float32)
    bp = bias.astype(jnp.float32)
    if Coutp2 != Coutp:
        sp = jnp.pad(sp, ((0, 0), (0, Coutp2 - Coutp)))
        bp = jnp.pad(bp, ((0, 0), (0, Coutp2 - Coutp)))

    rh = min(H, 8)
    out = pl.pallas_call(
        functools.partial(_conv3x3_kernel, H=H, W=W, rh=rh, relu=relu),
        out_shape=jax.ShapeDtypeStruct((B, H * W, Coutp2), out_dtype),
        grid=(B, Coutp2 // tcout, Cinp // tcin),
        in_specs=[
            pl.BlockSpec((1, H + 2, W + 2, tcin), lambda b, j, k: (b, 0, 0, k)),
            pl.BlockSpec((9, tcin, tcout), lambda b, j, k: (0, k, j)),
            pl.BlockSpec((1, tcout), lambda b, j, k: (0, j)),
            pl.BlockSpec((1, tcout), lambda b, j, k: (0, j)),
        ],
        out_specs=pl.BlockSpec((1, H * W, tcout), lambda b, j, k: (b, 0, j)),
        scratch_shapes=[pltpu.VMEM((H * W, tcout), jnp.float32)],
        compiler_params=pltpu.CompilerParams(
            dimension_semantics=("parallel", "parallel", "arbitrary"),
            vmem_limit_bytes=_vmem_budget_bytes()),
    )(xp, wp, sp, bp)
    return out.reshape(B, H, W, Coutp2)


# ----------------------------------------------------------------------------
# 1-D spatial operator builders (trace-time numpy glue)
# ----------------------------------------------------------------------------
def _adaptive_pool_1d(in_size, out_size):
    m = np.zeros((out_size, in_size), np.float32)
    for i in range(out_size):
        start = (i * in_size) // out_size
        end = -(-((i + 1) * in_size) // out_size)
        m[i, start:end] = 1.0 / float(end - start)
    return m


def _bilinear_1d(in_size, out_size):
    # F.interpolate(mode='bilinear', align_corners=True) weights along one axis.
    m = np.zeros((out_size, in_size), np.float32)
    for i in range(out_size):
        s = 0.0 if (out_size == 1 or in_size == 1) else i * (in_size - 1) / (out_size - 1)
        lo = int(np.floor(s))
        hi = min(lo + 1, in_size - 1)
        f = s - lo
        m[i, lo] += 1.0 - f
        m[i, hi] += f
    return m


def _psp_block_matrices(Hf, Wf, sizes):
    """Row-pool operator, block column-pool operator and combined upsample operator."""
    Rcat = np.concatenate([_adaptive_pool_1d(Hf, s) for s in sizes], axis=0)   # [nrow, Hf]
    nrow = Rcat.shape[0]
    ntok = sum(s * s for s in sizes)
    P = np.zeros((ntok, nrow * Wf), np.float32)
    U = np.zeros((Hf * Wf, ntok), np.float32)
    roff = toff = 0
    for s in sizes:
        cpool = _adaptive_pool_1d(Wf, s)
        for i in range(s):
            for j in range(s):
                P[toff + i * s + j, (roff + i) * Wf:(roff + i + 1) * Wf] = cpool[j]
        U[:, toff:toff + s * s] = np.kron(_bilinear_1d(s, Hf), _bilinear_1d(s, Wf))
        roff += s
        toff += s * s
    return Rcat, P, U


def _branch_channel_mask(sizes, bc):
    """Token group i keeps only branch i's channel slice (fused all-branch conv)."""
    ntok = sum(s * s for s in sizes)
    m = np.zeros((ntok, len(sizes) * bc), np.float32)
    toff = 0
    for bi, s in enumerate(sizes):
        m[toff:toff + s * s, bi * bc:(bi + 1) * bc] = 1.0
        toff += s * s
    return m


# ----------------------------------------------------------------------------
# Parameter init (raw) + one-time preparation into kernel layouts
# ----------------------------------------------------------------------------
def init_conv_bn(key, cin, cout, ksize=1, with_bn=True):
    k1, k2, k3, k4, k5 = jax.random.split(key, 5)
    fan_in = cin * ksize * ksize
    if ksize == 1:
        w = jax.random.normal(k1, (cin, cout), jnp.float32) / np.sqrt(fan_in)
    else:
        w = jax.random.normal(k1, (ksize, ksize, cin, cout), jnp.float32) / np.sqrt(fan_in)
    if with_bn:
        gamma = 1.0 + 0.1 * jax.random.normal(k2, (cout,), jnp.float32)
        beta = 0.1 * jax.random.normal(k3, (cout,), jnp.float32)
        rmean = 0.1 * jax.random.normal(k4, (cout,), jnp.float32)
        rvar = jax.random.uniform(k5, (cout,), jnp.float32, 0.5, 1.5)
        scale = gamma / jnp.sqrt(rvar + 1e-5)
        bias = beta - rmean * scale
    else:
        scale = jnp.ones((cout,), jnp.float32)
        bias = 0.1 * jax.random.normal(k2, (cout,), jnp.float32)   # conv bias
    return {"w": w, "scale": scale[None, :], "bias": bias[None, :]}


def init_pspnet_params(key, in_ch_img, feat_ch, aux_ch, nbr_classes):
    keys = jax.random.split(key, 10)
    branch_ch = feat_ch // 4
    aux_mid = aux_ch // 4
    return {
        "stem_feat": init_conv_bn(keys[0], in_ch_img, feat_ch, 1),
        "stem_aux": init_conv_bn(keys[1], in_ch_img, aux_ch, 1),
        "branch_1": init_conv_bn(keys[2], feat_ch, branch_ch, 1),
        "branch_2": init_conv_bn(keys[3], feat_ch, branch_ch, 1),
        "branch_3": init_conv_bn(keys[4], feat_ch, branch_ch, 1),
        "branch_6": init_conv_bn(keys[5], feat_ch, branch_ch, 1),
        "tail_conv1": init_conv_bn(keys[6], 2 * feat_ch, branch_ch, 3),
        "tail_conv2": init_conv_bn(keys[7], branch_ch, nbr_classes, 1, with_bn=False),
        "aux_conv1": init_conv_bn(keys[8], aux_ch, aux_mid, 3),
        "aux_conv2": init_conv_bn(keys[9], aux_mid, nbr_classes, 1, with_bn=False),
    }


def prepare_params(raw):
    """Pad + cast parameters to kernel layouts ONCE (bf16 weights, 128-aligned dims)."""
    def pad_1x1(w, s, b):
        K, N = w.shape
        Kp, Np = _round_up(K, 128), _round_up(N, 128)
        return {"w": jnp.pad(w, ((0, Kp - K), (0, Np - N))).astype(jnp.bfloat16),
                "scale": jnp.pad(s, ((0, 0), (0, Np - N))).astype(jnp.float32),
                "bias": jnp.pad(b, ((0, 0), (0, Np - N))).astype(jnp.float32)}

    def pad_3x3(p):
        kh, kw, K, N = p["w"].shape
        Kp, Np = _round_up(K, 128), _round_up(N, 128)
        w9 = jnp.pad(p["w"].reshape(kh * kw, K, N),
                     ((0, 0), (0, Kp - K), (0, Np - N))).astype(jnp.bfloat16)
        return {"w": w9,
                "scale": jnp.pad(p["scale"], ((0, 0), (0, Np - N))).astype(jnp.float32),
                "bias": jnp.pad(p["bias"], ((0, 0), (0, Np - N))).astype(jnp.float32)}

    sizes = (1, 2, 3, 6)
    stem_w = jnp.concatenate([raw["stem_feat"]["w"], raw["stem_aux"]["w"]], axis=1)
    stem_s = jnp.concatenate([raw["stem_feat"]["scale"], raw["stem_aux"]["scale"]], axis=1)
    stem_b = jnp.concatenate([raw["stem_feat"]["bias"], raw["stem_aux"]["bias"]], axis=1)
    br_w = jnp.concatenate([raw[f"branch_{s}"]["w"] for s in sizes], axis=1)
    br_s = jnp.concatenate([raw[f"branch_{s}"]["scale"] for s in sizes], axis=1)
    br_b = jnp.concatenate([raw[f"branch_{s}"]["bias"] for s in sizes], axis=1)
    return {
        "stem": pad_1x1(stem_w, stem_s, stem_b),
        "branch": pad_1x1(br_w, br_s, br_b),
        "tail1": pad_3x3(raw["tail_conv1"]),
        "tail2": pad_1x1(raw["tail_conv2"]["w"], raw["tail_conv2"]["scale"],
                         raw["tail_conv2"]["bias"]),
        "aux1": pad_3x3(raw["aux_conv1"]),
        "aux2": pad_1x1(raw["aux_conv2"]["w"], raw["aux_conv2"]["scale"],
                        raw["aux_conv2"]["bias"]),
    }


# ----------------------------------------------------------------------------
# Forward pass
# ----------------------------------------------------------------------------
def class_upsample(logits, H, W):
    """[B, Hf, Wf, ncls] -> [B, ncls, H, W] (NCHW), align_corners=True bilinear.

    Classes move onto the batch axis so W (not a 128-padded class dim) carries the lane
    axis through the full-resolution intermediates.
    """
    B, Hf, Wf, ncls = logits.shape
    x = jnp.transpose(logits, (0, 3, 1, 2)).reshape(B * ncls * Hf, Wf)
    ucol_t = _bilinear_1d(Wf, W).T                                   # [Wf, W]
    ident_s = jnp.ones((1, W), jnp.float32)
    ident_b = jnp.zeros((1, W), jnp.float32)
    xc = matmul_affine(x, jnp.asarray(ucol_t), ident_s, ident_b,
                       relu=False, slice_n=False)                    # [B*ncls*Hf, Wp]
    Wp = xc.shape[1]
    xc = xc.reshape(B * ncls, Hf, Wp)
    urow = _bilinear_1d(Hf, H)                                       # [H, Hf]
    out = spatial_matmul(urow, xc, slice_c=False)                    # [B*ncls, H, Wp]
    return out[..., :W].reshape(B, ncls, H, W)


def psp_core_forward(feat, kp, nbr_classes):
    B, Hf, Wf, C = feat.shape
    bc = C // 4
    sizes = (1, 2, 3, 6)
    Rcat, P, U = _psp_block_matrices(Hf, Wf, sizes)
    mask = _branch_channel_mask(sizes, bc)
    nrow, ntok = Rcat.shape[0], P.shape[0]

    # pyramid pooling for all four branches: two separable passes
    y = spatial_matmul(Rcat, feat.reshape(B, Hf, Wf * C))            # [B, nrow, Wf*C]
    pooled = spatial_matmul(P, y.reshape(B, nrow * Wf, C))           # [B, ntok, C]

    # all four 1x1 branch convs (BN+ReLU folded) as ONE fused matmul
    conv = matmul_affine(pooled.reshape(B * ntok, C),
                         kp["branch"]["w"], kp["branch"]["scale"], kp["branch"]["bias"],
                         relu=True, n_valid=4 * bc)
    conv = conv.reshape(B, ntok, 4 * bc)

    # combined bilinear upsample of all branches; branch/channel mask applied in-kernel
    up = spatial_matmul(U, conv, mask=mask)                          # [B, Hf*Wf, 4*bc]
    cat = jnp.concatenate([feat, up.reshape(B, Hf, Wf, 4 * bc)], axis=-1)

    # tail: fused 3x3 conv + BN + ReLU (Dropout2d(0.1) == identity in eval) + 1x1 conv
    t1 = kp["tail1"]
    yt = conv3x3_affine(cat, t1["w"], t1["scale"], t1["bias"], relu=True)
    t2 = kp["tail2"]
    logits = matmul_affine(yt.reshape(B * Hf * Wf, yt.shape[-1]),
                           t2["w"], t2["scale"], t2["bias"],
                           relu=False, n_valid=nbr_classes)
    return logits.reshape(B, Hf, Wf, nbr_classes)


def aux_branch_forward(aux, kp, nbr_classes):
    B, Hf, Wf, _ = aux.shape
    a1 = kp["aux1"]
    y = conv3x3_affine(aux, a1["w"], a1["scale"], a1["bias"], relu=True)
    a2 = kp["aux2"]
    logits = matmul_affine(y.reshape(B * Hf * Wf, y.shape[-1]),
                           a2["w"], a2["scale"], a2["bias"],
                           relu=False, n_valid=nbr_classes)
    return logits.reshape(B, Hf, Wf, nbr_classes)


def pspnet_forward(x_nchw, kp, *, nbr_classes, feat_ch, aux_ch, deep_supervision=True):
    """x_nchw: [B, 3, H, W] f32.  Returns (out, aux) NCHW, both [B, classes, H, W] f32."""
    B, C_in, H, W = x_nchw.shape
    x = jnp.transpose(x_nchw, (0, 2, 3, 1))                          # NHWC

    # ---- backbone stand-in: stride-8 separable avg-pool + fused 1x1 stem ----
    # TODO(synk): replace with a real resnet50 backbone_forward (get_backbone).
    Hf, Wf = H // 8, W // 8
    pr = _adaptive_pool_1d(H, Hf)                                    # [Hf, H]
    y = spatial_matmul(pr, x.reshape(B, H, W * C_in))                # [B, Hf, W*C_in]
    pc = _adaptive_pool_1d(W, Wf)                                    # [Wf, W]
    wcol = np.kron(pc, np.eye(C_in, dtype=np.float32)).T             # [W*C_in, Wf*C_in]
    ident_s = jnp.ones((1, Wf * C_in), jnp.float32)
    ident_b = jnp.zeros((1, Wf * C_in), jnp.float32)
    xds = matmul_affine(y.reshape(B * Hf, W * C_in), jnp.asarray(wcol),
                        ident_s, ident_b, relu=False, n_valid=Wf * C_in)
    xds = xds.reshape(B * Hf * Wf, C_in)

    st = kp["stem"]
    fa = matmul_affine(xds, st["w"], st["scale"], st["bias"],
                       relu=True, n_valid=feat_ch + aux_ch)          # feat+aux fused
    feat = fa[:, :feat_ch].reshape(B, Hf, Wf, feat_ch)
    aux = fa[:, feat_ch:].reshape(B, Hf, Wf, aux_ch)

    # ---- PSP core + final separable bilinear upsample (classes on batch axis) ----
    core = psp_core_forward(feat, kp, nbr_classes)                   # [B,Hf,Wf,ncls]
    out = class_upsample(core, H, W).astype(jnp.float32)             # NCHW
    if not deep_supervision:
        return out

    aux_log = aux_branch_forward(aux, kp, nbr_classes)
    aux_out = class_upsample(aux_log, H, W).astype(jnp.float32)
    return out, aux_out


# ----------------------------------------------------------------------------
if __name__ == "__main__":
    # Small, deterministic configuration (real model: feat_ch=2048, aux_ch=1024).
    B, C_IMG, H, W = 2, 3, 64, 64
    FEAT_CH, AUX_CH, NBR_CLASSES = 256, 128, 5

    key = jax.random.PRNGKey(0)
    k_params, k_x = jax.random.split(key)
    raw = init_pspnet_params(k_params, C_IMG, FEAT_CH, AUX_CH, NBR_CLASSES)
    params = prepare_params(raw)
    x = jax.random.normal(k_x, (B, C_IMG, H, W), jnp.float32)

    fwd = jax.jit(functools.partial(pspnet_forward, nbr_classes=NBR_CLASSES,
                                    feat_ch=FEAT_CH, aux_ch=AUX_CH,
                                    deep_supervision=True))
    out, aux = fwd(x, params)
    out = jax.block_until_ready(out)
    aux = jax.block_until_ready(aux)

    assert out.shape == (B, NBR_CLASSES, H, W), out.shape
    assert aux.shape == (B, NBR_CLASSES, H, W), aux.shape
    assert jnp.all(jnp.isfinite(out)) and jnp.all(jnp.isfinite(aux))
    print("KERNEL_OK")
</pallas_src>

<mosaic_0001>
module attributes {stable_mosaic.version = 11 : i64} {
  func.func @_spatial_matmul_kernel(%arg0: i32, %arg1: i32, %arg2: memref<8x64xbf16, #tpu.memory_space<vmem>>, %arg3: memref<2x64x256xbf16, #tpu.memory_space<vmem>>, %arg4: memref<2x8x256xbf16, #tpu.memory_space<vmem>>) attributes {dimension_semantics = [#tpu.dimension_semantics<parallel>, #tpu.dimension_semantics<parallel>], iteration_bounds = array<i64: 1, 1>, scalar_prefetch = 0 : i64, scratch_operands = 0 : i64, tpu.core_type = #tpu.core_type<tc>, window_params = [{pipeline_mode = #tpu.pipeline_mode<synchronous>, transform_indices = @transform_0, window_bounds = array<i64: 8, 64>}, {transform_indices = @transform_1, window_bounds = array<i64: 2, 64, 256>}, {transform_indices = @transform_2, window_bounds = array<i64: 2, 8, 256>}]} {
    %c0 = arith.constant 0 : index
    %c0_0 = arith.constant 0 : index
    %0 = vector.load %arg2[%c0, %c0_0] : memref<8x64xbf16, #tpu.memory_space<vmem>>, vector<8x64xbf16>
    %c0_1 = arith.constant 0 : index
    %c0_2 = arith.constant 0 : index
    %c0_3 = arith.constant 0 : index
    %1 = vector.load %arg3[%c0_1, %c0_2, %c0_3] : memref<2x64x256xbf16, #tpu.memory_space<vmem>>, vector<1x64x256xbf16>
    %2 = vector.shape_cast %1 : vector<1x64x256xbf16> to vector<64x256xbf16>
    %cst = arith.constant dense<0.000000e+00> : vector<8x256xf32>
    %3 = tpu.matmul %0, %2, %cst {dimension_numbers = #tpu.dot_dimension_numbers<[1], [0], [0], [1], [0, 0, 1, 1], [], []>} : vector<8x64xbf16>, vector<64x256xbf16>, vector<8x256xf32> -> vector<8x256xf32>
    %4 = arith.truncf %3 : vector<8x256xf32> to vector<8x256xbf16>
    %c0_4 = arith.constant 0 : index
    %c0_5 = arith.constant 0 : index
    %c0_6 = arith.constant 0 : index
    %5 = vector.load %arg4[%c0_4, %c0_5, %c0_6] : memref<2x8x256xbf16, #tpu.memory_space<vmem>>, vector<1x8x256xbf16>
    %6 = vector.shape_cast %5 : vector<1x8x256xbf16> to vector<8x256xbf16>
    %7 = vector.shape_cast %4 : vector<8x256xbf16> to vector<1x8x256xbf16>
    tpu.vector_store %arg4[%c0_4, %c0_5, %c0_6], %7 {strides = array<i32>} : memref<2x8x256xbf16, #tpu.memory_space<vmem>>, vector<1x8x256xbf16>,
    %c1 = arith.constant 1 : index
    %c0_7 = arith.constant 0 : index
    %c0_8 = arith.constant 0 : index
    %8 = vector.load %arg3[%c1, %c0_7, %c0_8] : memref<2x64x256xbf16, #tpu.memory_space<vmem>>, vector<1x64x256xbf16>
    %9 = vector.shape_cast %8 : vector<1x64x256xbf16> to vector<64x256xbf16>
    %cst_9 = arith.constant dense<0.000000e+00> : vector<8x256xf32>
    %10 = tpu.matmul %0, %9, %cst_9 {dimension_numbers = #tpu.dot_dimension_numbers<[1], [0], [0], [1], [0, 0, 1, 1], [], []>} : vector<8x64xbf16>, vector<64x256xbf16>, vector<8x256xf32> -> vector<8x256xf32>
    %11 = arith.truncf %10 : vector<8x256xf32> to vector<8x256xbf16>
    %c1_10 = arith.constant 1 : index
    %c0_11 = arith.constant 0 : index
    %c0_12 = arith.constant 0 : index
    %12 = vector.load %arg4[%c1_10, %c0_11, %c0_12] : memref<2x8x256xbf16, #tpu.memory_space<vmem>>, vector<1x8x256xbf16>
    %13 = vector.shape_cast %12 : vector<1x8x256xbf16> to vector<8x256xbf16>
    %14 = vector.shape_cast %11 : vector<8x256xbf16> to vector<1x8x256xbf16>
    tpu.vector_store %arg4[%c1_10, %c0_11, %c0_12], %14 {strides = array<i32>} : memref<2x8x256xbf16, #tpu.memory_space<vmem>>, vector<1x8x256xbf16>,
    return
  }
  func.func @transform_0(%arg0: i32, %arg1: i32) -> (i32, i32) {
    %c0_i32 = arith.constant 0 : i32
    %c0_i32_0 = arith.constant 0 : i32
    %c0_i32_1 = arith.constant 0 : i32
    return %c0_i32, %c0_i32_0 : i32, i32
  }
  func.func @transform_1(%arg0: i32, %arg1: i32) -> (i32, i32, i32) {
    %c0_i32 = arith.constant 0 : i32
    %c0_i32_0 = arith.constant 0 : i32
    return %arg0, %c0_i32, %arg1 : i32, i32, i32
  }
  func.func @transform_2(%arg0: i32, %arg1: i32) -> (i32, i32, i32) {
    %c0_i32 = arith.constant 0 : i32
    %c0_i32_0 = arith.constant 0 : i32
    return %arg0, %c0_i32, %arg1 : i32, i32, i32
  }
}

module attributes {stable_mosaic.version = 11 : i64} {
  func.func @_matmul_affine_kernel(%arg0: i32, %arg1: i32, %arg2: i32, %arg3: memref<16x256xbf16, #tpu.memory_space<vmem>>, %arg4: memref<256x128xbf16, #tpu.memory_space<vmem>>, %arg5: memref<1x128xf32, #tpu.memory_space<vmem>>, %arg6: memref<1x128xf32, #tpu.memory_space<vmem>>, %arg7: memref<16x128xbf16, #tpu.memory_space<vmem>>, %arg8: memref<16x128xf32, #tpu.memory_space<vmem>>) attributes {dimension_semantics = [#tpu.dimension_semantics<parallel>, #tpu.dimension_semantics<parallel>, #tpu.dimension_semantics<arbitrary>], iteration_bounds = array<i64: 1, 1, 1>, scalar_prefetch = 0 : i64, scratch_operands = 1 : i64, tpu.core_type = #tpu.core_type<tc>, window_params = [{transform_indices = @transform_0, window_bounds = array<i64: 16, 256>}, {transform_indices = @transform_1, window_bounds = array<i64: 256, 128>}, {transform_indices = @transform_2, window_bounds = array<i64: 1, 128>}, {transform_indices = @transform_3, window_bounds = array<i64: 1, 128>}, {transform_indices = @transform_4, window_bounds = array<i64: 16, 128>}]} {
    %c0_i32 = arith.constant 0 : i32
    %0 = arith.cmpi eq, %arg2, %c0_i32 : i32
    %1 = arith.extui %0 : i1 to i32
    %c0_i32_0 = arith.constant 0 : i32
    %2 = arith.cmpi ne, %1, %c0_i32_0 : i32
    scf.if %2 {
      %cst_10 = arith.constant 0.000000e+00 : f32
      %12 = vector.broadcast %cst_10 : f32 to vector<16x128xf32>
      %c0_11 = arith.constant 0 : index
      %c0_12 = arith.constant 0 : index
      %13 = vector.load %arg8[%c0_11, %c0_12] : memref<16x128xf32, #tpu.memory_space<vmem>>, vector<16x128xf32>
      tpu.vector_store %arg8[%c0_11, %c0_12], %12 {strides = array<i32>} : memref<16x128xf32, #tpu.memory_space<vmem>>, vector<16x128xf32>,
    } else {
    }
    %c0 = arith.constant 0 : index
    %c0_1 = arith.constant 0 : index
    %3 = vector.load %arg8[%c0, %c0_1] : memref<16x128xf32, #tpu.memory_space<vmem>>, vector<16x128xf32>
    %c0_2 = arith.constant 0 : index
    %c0_3 = arith.constant 0 : index
    %4 = vector.load %arg3[%c0_2, %c0_3] : memref<16x256xbf16, #tpu.memory_space<vmem>>, vector<16x256xbf16>
    %c0_4 = arith.constant 0 : index
    %c0_5 = arith.constant 0 : index
    %5 = vector.load %arg4[%c0_4, %c0_5] : memref<256x128xbf16, #tpu.memory_space<vmem>>, vector<256x128xbf16>
    %cst = arith.constant dense<0.000000e+00> : vector<16x128xf32>
    %6 = tpu.matmul %4, %5, %cst {dimension_numbers = #tpu.dot_dimension_numbers<[1], [0], [0], [1], [0, 0, 1, 1], [], []>} : vector<16x256xbf16>, vector<256x128xbf16>, vector<16x128xf32> -> vector<16x128xf32>
    %7 = arith.addf %3, %6 : vector<16x128xf32>
    %c0_6 = arith.constant 0 : index
    %c0_7 = arith.constant 0 : index
    %8 = vector.load %arg8[%c0_6, %c0_7] : memref<16x128xf32, #tpu.memory_space<vmem>>, vector<16x128xf32>
    tpu.vector_store %arg8[%c0_6, %c0_7], %7 {strides = array<i32>} : memref<16x128xf32, #tpu.memory_space<vmem>>, vector<16x128xf32>,
    %c0_i32_8 = arith.constant 0 : i32
    %9 = arith.cmpi eq, %arg2, %c0_i32_8 : i32
    %10 = arith.extui %9 : i1 to i32
    %c0_i32_9 = arith.constant 0 : i32
    %11 = arith.cmpi ne, %10, %c0_i32_9 : i32
    scf.if %11 {
      %c0_10 = arith.constant 0 : index
      %c0_11 = arith.constant 0 : index
      %12 = vector.load %arg8[%c0_10, %c0_11] : memref<16x128xf32, #tpu.memory_space<vmem>>, vector<16x128xf32>
      %c0_12 = arith.constant 0 : index
      %c0_13 = arith.constant 0 : index
      %13 = vector.load %arg5[%c0_12, %c0_13] : memref<1x128xf32, #tpu.memory_space<vmem>>, vector<1x128xf32>
      %14 = vector.broadcast %13 : vector<1x128xf32> to vector<16x128xf32>
      %15 = arith.mulf %12, %14 : vector<16x128xf32>
      %c0_14 = arith.constant 0 : index
      %c0_15 = arith.constant 0 : index
      %16 = vector.load %arg6[%c0_14, %c0_15] : memref<1x128xf32, #tpu.memory_space<vmem>>, vector<1x128xf32>
      %17 = vector.broadcast %16 : vector<1x128xf32> to vector<16x128xf32>
      %18 = arith.addf %15, %17 : vector<16x128xf32>
      %19 = arith.truncf %18 : vector<16x128xf32> to vector<16x128xbf16>
      %c0_16 = arith.constant 0 : index
      %c0_17 = arith.constant 0 : index
      %20 = vector.load %arg7[%c0_16, %c0_17] : memref<16x128xbf16, #tpu.memory_space<vmem>>, vector<16x128xbf16>
      tpu.vector_store %arg7[%c0_16, %c0_17], %19 {strides = array<i32>} : memref<16x128xbf16, #tpu.memory_space<vmem>>, vector<16x128xbf16>,
    } else {
    }
    return
  }
  func.func @transform_0(%arg0: i32, %arg1: i32, %arg2: i32) -> (i32, i32) {
    %c0_i32 = arith.constant 0 : i32
    return %arg0, %arg2 : i32, i32
  }
  func.func @transform_1(%arg0: i32, %arg1: i32, %arg2: i32) -> (i32, i32) {
    %c0_i32 = arith.constant 0 : i32
    return %arg2, %arg1 : i32, i32
  }
  func.func @transform_2(%arg0: i32, %arg1: i32, %arg2: i32) -> (i32, i32) {
    %c0_i32 = arith.constant 0 : i32
    %c0_i32_0 = arith.constant 0 : i32
    return %c0_i32, %arg1 : i32, i32
  }
  func.func @transform_3(%arg0: i32, %arg1: i32, %arg2: i32) -> (i32, i32) {
    %c0_i32 = arith.constant 0 : i32
    %c0_i32_0 = arith.constant 0 : i32
    return %c0_i32, %arg1 : i32, i32
  }
  func.func @transform_4(%arg0: i32, %arg1: i32, %arg2: i32) -> (i32, i32) {
    %c0_i32 = arith.constant 0 : i32
    return %arg0, %arg1 : i32, i32
  }
}

module attributes {stable_mosaic.version = 11 : i64} {
  func.func @_matmul_affine_kernel(%arg0: i32, %arg1: i32, %arg2: i32, %arg3: memref<128x128xbf16, #tpu.memory_space<vmem>>, %arg4: memref<128x384xbf16, #tpu.memory_space<vmem>>, %arg5: memref<1x384xf32, #tpu.memory_space<vmem>>, %arg6: memref<1x384xf32, #tpu.memory_space<vmem>>, %arg7: memref<128x384xbf16, #tpu.memory_space<vmem>>, %arg8: memref<128x384xf32, #tpu.memory_space<vmem>>) attributes {dimension_semantics = [#tpu.dimension_semantics<parallel>, #tpu.dimension_semantics<parallel>, #tpu.dimension_semantics<arbitrary>], iteration_bounds = array<i64: 1, 1, 1>, scalar_prefetch = 0 : i64, scratch_operands = 1 : i64, tpu.core_type = #tpu.core_type<tc>, window_params = [{transform_indices = @transform_0, window_bounds = array<i64: 128, 128>}, {transform_indices = @transform_1, window_bounds = array<i64: 128, 384>}, {transform_indices = @transform_2, window_bounds = array<i64: 1, 384>}, {transform_indices = @transform_3, window_bounds = array<i64: 1, 384>}, {transform_indices = @transform_4, window_bounds = array<i64: 128, 384>}]} {
    %c0_i32 = arith.constant 0 : i32
    %0 = arith.cmpi eq, %arg2, %c0_i32 : i32
    %1 = arith.extui %0 : i1 to i32
    %c0_i32_0 = arith.constant 0 : i32
    %2 = arith.cmpi ne, %1, %c0_i32_0 : i32
    scf.if %2 {
      %cst_10 = arith.constant 0.000000e+00 : f32
      %12 = vector.broadcast %cst_10 : f32 to vector<128x384xf32>
      %c0_11 = arith.constant 0 : index
      %c0_12 = arith.constant 0 : index
      %13 = vector.load %arg8[%c0_11, %c0_12] : memref<128x384xf32, #tpu.memory_space<vmem>>, vector<128x384xf32>
      tpu.vector_store %arg8[%c0_11, %c0_12], %12 {strides = array<i32>} : memref<128x384xf32, #tpu.memory_space<vmem>>, vector<128x384xf32>,
    } else {
    }
    %c0 = arith.constant 0 : index
    %c0_1 = arith.constant 0 : index
    %3 = vector.load %arg8[%c0, %c0_1] : memref<128x384xf32, #tpu.memory_space<vmem>>, vector<128x384xf32>
    %c0_2 = arith.constant 0 : index
    %c0_3 = arith.constant 0 : index
    %4 = vector.load %arg3[%c0_2, %c0_3] : memref<128x128xbf16, #tpu.memory_space<vmem>>, vector<128x128xbf16>
    %c0_4 = arith.constant 0 : index
    %c0_5 = arith.constant 0 : index
    %5 = vector.load %arg4[%c0_4, %c0_5] : memref<128x384xbf16, #tpu.memory_space<vmem>>, vector<128x384xbf16>
    %cst = arith.constant dense<0.000000e+00> : vector<128x384xf32>
    %6 = tpu.matmul %4, %5, %cst {dimension_numbers = #tpu.dot_dimension_numbers<[1], [0], [0], [1], [0, 0, 1, 1], [], []>} : vector<128x128xbf16>, vector<128x384xbf16>, vector<128x384xf32> -> vector<128x384xf32>
    %7 = arith.addf %3, %6 : vector<128x384xf32>
    %c0_6 = arith.constant 0 : index
    %c0_7 = arith.constant 0 : index
    %8 = vector.load %arg8[%c0_6, %c0_7] : memref<128x384xf32, #tpu.memory_space<vmem>>, vector<128x384xf32>
    tpu.vector_store %arg8[%c0_6, %c0_7], %7 {strides = array<i32>} : memref<128x384xf32, #tpu.memory_space<vmem>>, vector<128x384xf32>,
    %c0_i32_8 = arith.constant 0 : i32
    %9 = arith.cmpi eq, %arg2, %c0_i32_8 : i32
    %10 = arith.extui %9 : i1 to i32
    %c0_i32_9 = arith.constant 0 : i32
    %11 = arith.cmpi ne, %10, %c0_i32_9 : i32
    scf.if %11 {
      %c0_10 = arith.constant 0 : index
      %c0_11 = arith.constant 0 : index
      %12 = vector.load %arg8[%c0_10, %c0_11] : memref<128x384xf32, #tpu.memory_space<vmem>>, vector<128x384xf32>
      %c0_12 = arith.constant 0 : index
      %c0_13 = arith.constant 0 : index
      %13 = vector.load %arg5[%c0_12, %c0_13] : memref<1x384xf32, #tpu.memory_space<vmem>>, vector<1x384xf32>
      %14 = vector.broadcast %13 : vector<1x384xf32> to vector<128x384xf32>
      %15 = arith.mulf %12, %14 : vector<128x384xf32>
      %c0_14 = arith.constant 0 : index
      %c0_15 = arith.constant 0 : index
      %16 = vector.load %arg6[%c0_14, %c0_15] : memref<1x384xf32, #tpu.memory_space<vmem>>, vector<1x384xf32>
      %17 = vector.broadcast %16 : vector<1x384xf32> to vector<128x384xf32>
      %18 = arith.addf %15, %17 : vector<128x384xf32>
      %cst_16 = arith.constant 0.000000e+00 : f32
      %19 = vector.broadcast %cst_16 : f32 to vector<128x384xf32>
      %20 = arith.maximumf %18, %19 : vector<128x384xf32>
      %21 = arith.truncf %20 : vector<128x384xf32> to vector<128x384xbf16>
      %c0_17 = arith.constant 0 : index
      %c0_18 = arith.constant 0 : index
      %22 = vector.load %arg7[%c0_17, %c0_18] : memref<128x384xbf16, #tpu.memory_space<vmem>>, vector<128x384xbf16>
      tpu.vector_store %arg7[%c0_17, %c0_18], %21 {strides = array<i32>} : memref<128x384xbf16, #tpu.memory_space<vmem>>, vector<128x384xbf16>,
    } else {
    }
    return
  }
  func.func @transform_0(%arg0: i32, %arg1: i32, %arg2: i32) -> (i32, i32) {
    %c0_i32 = arith.constant 0 : i32
    return %arg0, %arg2 : i32, i32
  }
  func.func @transform_1(%arg0: i32, %arg1: i32, %arg2: i32) -> (i32, i32) {
    %c0_i32 = arith.constant 0 : i32
    return %arg2, %arg1 : i32, i32
  }
  func.func @transform_2(%arg0: i32, %arg1: i32, %arg2: i32) -> (i32, i32) {
    %c0_i32 = arith.constant 0 : i32
    %c0_i32_0 = arith.constant 0 : i32
    return %c0_i32, %arg1 : i32, i32
  }
  func.func @transform_3(%arg0: i32, %arg1: i32, %arg2: i32) -> (i32, i32) {
    %c0_i32 = arith.constant 0 : i32
    %c0_i32_0 = arith.constant 0 : i32
    return %c0_i32, %arg1 : i32, i32
  }
  func.func @transform_4(%arg0: i32, %arg1: i32, %arg2: i32) -> (i32, i32) {
    %c0_i32 = arith.constant 0 : i32
    return %arg0, %arg1 : i32, i32
  }
}

module attributes {stable_mosaic.version = 11 : i64} {
  func.func @_matmul_affine_kernel(%arg0: i32, %arg1: i32, %arg2: i32, %arg3: memref<128x128xbf16, #tpu.memory_space<vmem>>, %arg4: memref<128x128xbf16, #tpu.memory_space<vmem>>, %arg5: memref<1x128xf32, #tpu.memory_space<vmem>>, %arg6: memref<1x128xf32, #tpu.memory_space<vmem>>, %arg7: memref<128x128xbf16, #tpu.memory_space<vmem>>, %arg8: memref<128x128xf32, #tpu.memory_space<vmem>>) attributes {dimension_semantics = [#tpu.dimension_semantics<parallel>, #tpu.dimension_semantics<parallel>, #tpu.dimension_semantics<arbitrary>], iteration_bounds = array<i64: 1, 1, 1>, scalar_prefetch = 0 : i64, scratch_operands = 1 : i64, tpu.core_type = #tpu.core_type<tc>, window_params = [{transform_indices = @transform_0, window_bounds = array<i64: 128, 128>}, {transform_indices = @transform_1, window_bounds = array<i64: 128, 128>}, {transform_indices = @transform_2, window_bounds = array<i64: 1, 128>}, {transform_indices = @transform_3, window_bounds = array<i64: 1, 128>}, {transform_indices = @transform_4, window_bounds = array<i64: 128, 128>}]} {
    %c0_i32 = arith.constant 0 : i32
    %0 = arith.cmpi eq, %arg2, %c0_i32 : i32
    %1 = arith.extui %0 : i1 to i32
    %c0_i32_0 = arith.constant 0 : i32
    %2 = arith.cmpi ne, %1, %c0_i32_0 : i32
    scf.if %2 {
      %cst_10 = arith.constant 0.000000e+00 : f32
      %12 = vector.broadcast %cst_10 : f32 to vector<128x128xf32>
      %c0_11 = arith.constant 0 : index
      %c0_12 = arith.constant 0 : index
      %13 = vector.load %arg8[%c0_11, %c0_12] : memref<128x128xf32, #tpu.memory_space<vmem>>, vector<128x128xf32>
      tpu.vector_store %arg8[%c0_11, %c0_12], %12 {strides = array<i32>} : memref<128x128xf32, #tpu.memory_space<vmem>>, vector<128x128xf32>,
    } else {
    }
    %c0 = arith.constant 0 : index
    %c0_1 = arith.constant 0 : index
    %3 = vector.load %arg8[%c0, %c0_1] : memref<128x128xf32, #tpu.memory_space<vmem>>, vector<128x128xf32>
    %c0_2 = arith.constant 0 : index
    %c0_3 = arith.constant 0 : index
    %4 = vector.load %arg3[%c0_2, %c0_3] : memref<128x128xbf16, #tpu.memory_space<vmem>>, vector<128x128xbf16>
    %c0_4 = arith.constant 0 : index
    %c0_5 = arith.constant 0 : index
    %5 = vector.load %arg4[%c0_4, %c0_5] : memref<128x128xbf16, #tpu.memory_space<vmem>>, vector<128x128xbf16>
    %cst = arith.constant dense<0.000000e+00> : vector<128x128xf32>
    %6 = tpu.matmul %4, %5, %cst {dimension_numbers = #tpu.dot_dimension_numbers<[1], [0], [0], [1], [0, 0, 1, 1], [], []>} : vector<128x128xbf16>, vector<128x128xbf16>, vector<128x128xf32> -> vector<128x128xf32>
    %7 = arith.addf %3, %6 : vector<128x128xf32>
    %c0_6 = arith.constant 0 : index
    %c0_7 = arith.constant 0 : index
    %8 = vector.load %arg8[%c0_6, %c0_7] : memref<128x128xf32, #tpu.memory_space<vmem>>, vector<128x128xf32>
    tpu.vector_store %arg8[%c0_6, %c0_7], %7 {strides = array<i32>} : memref<128x128xf32, #tpu.memory_space<vmem>>, vector<128x128xf32>,
    %c0_i32_8 = arith.constant 0 : i32
    %9 = arith.cmpi eq, %arg2, %c0_i32_8 : i32
    %10 = arith.extui %9 : i1 to i32
    %c0_i32_9 = arith.constant 0 : i32
    %11 = arith.cmpi ne, %10, %c0_i32_9 : i32
    scf.if %11 {
      %c0_10 = arith.constant 0 : index
      %c0_11 = arith.constant 0 : index
      %12 = vector.load %arg8[%c0_10, %c0_11] : memref<128x128xf32, #tpu.memory_space<vmem>>, vector<128x128xf32>
      %c0_12 = arith.constant 0 : index
      %c0_13 = arith.constant 0 : index
      %13 = vector.load %arg5[%c0_12, %c0_13] : memref<1x128xf32, #tpu.memory_space<vmem>>, vector<1x128xf32>
      %14 = vector.broadcast %13 : vector<1x128xf32> to vector<128x128xf32>
      %15 = arith.mulf %12, %14 : vector<128x128xf32>
      %c0_14 = arith.constant 0 : index
      %c0_15 = arith.constant 0 : index
      %16 = vector.load %arg6[%c0_14, %c0_15] : memref<1x128xf32, #tpu.memory_space<vmem>>, vector<1x128xf32>
      %17 = vector.broadcast %16 : vector<1x128xf32> to vector<128x128xf32>
      %18 = arith.addf %15, %17 : vector<128x128xf32>
      %19 = arith.truncf %18 : vector<128x128xf32> to vector<128x128xbf16>
      %c0_16 = arith.constant 0 : index
      %c0_17 = arith.constant 0 : index
      %20 = vector.load %arg7[%c0_16, %c0_17] : memref<128x128xbf16, #tpu.memory_space<vmem>>, vector<128x128xbf16>
      tpu.vector_store %arg7[%c0_16, %c0_17], %19 {strides = array<i32>} : memref<128x128xbf16, #tpu.memory_space<vmem>>, vector<128x128xbf16>,
    } else {
    }
    return
  }
  func.func @transform_0(%arg0: i32, %arg1: i32, %arg2: i32) -> (i32, i32) {
    %c0_i32 = arith.constant 0 : i32
    return %arg0, %arg2 : i32, i32
  }
  func.func @transform_1(%arg0: i32, %arg1: i32, %arg2: i32) -> (i32, i32) {
    %c0_i32 = arith.constant 0 : i32
    return %arg2, %arg1 : i32, i32
  }
  func.func @transform_2(%arg0: i32, %arg1: i32, %arg2: i32) -> (i32, i32) {
    %c0_i32 = arith.constant 0 : i32
    %c0_i32_0 = arith.constant 0 : i32
    return %c0_i32, %arg1 : i32, i32
  }
  func.func @transform_3(%arg0: i32, %arg1: i32, %arg2: i32) -> (i32, i32) {
    %c0_i32 = arith.constant 0 : i32
    %c0_i32_0 = arith.constant 0 : i32
    return %c0_i32, %arg1 : i32, i32
  }
  func.func @transform_4(%arg0: i32, %arg1: i32, %arg2: i32) -> (i32, i32) {
    %c0_i32 = arith.constant 0 : i32
    return %arg0, %arg1 : i32, i32
  }
}

module attributes {stable_mosaic.version = 11 : i64} {
  func.func @_conv3x3_kernel(%arg0: i32, %arg1: i32, %arg2: i32, %arg3: memref<1x10x10x128xbf16, #tpu.memory_space<vmem>>, %arg4: memref<9x128x128xbf16, #tpu.memory_space<vmem>>, %arg5: memref<1x128xf32, #tpu.memory_space<vmem>>, %arg6: memref<1x128xf32, #tpu.memory_space<vmem>>, %arg7: memref<1x64x128xbf16, #tpu.memory_space<vmem>>, %arg8: memref<64x128xf32, #tpu.memory_space<vmem>>) attributes {dimension_semantics = [#tpu.dimension_semantics<parallel>, #tpu.dimension_semantics<parallel>, #tpu.dimension_semantics<arbitrary>], iteration_bounds = array<i64: 2, 1, 1>, scalar_prefetch = 0 : i64, scratch_operands = 1 : i64, tpu.core_type = #tpu.core_type<tc>, window_params = [{transform_indices = @transform_0, window_bounds = array<i64: 1, 10, 10, 128>}, {transform_indices = @transform_1, window_bounds = array<i64: 9, 128, 128>}, {transform_indices = @transform_2, window_bounds = array<i64: 1, 128>}, {transform_indices = @transform_3, window_bounds = array<i64: 1, 128>}, {transform_indices = @transform_4, window_bounds = array<i64: 1, 64, 128>}]} {
    %c0_i32 = arith.constant 0 : i32
    %0 = arith.cmpi eq, %arg2, %c0_i32 : i32
    %1 = arith.extui %0 : i1 to i32
    %c0_i32_0 = arith.constant 0 : i32
    %2 = arith.cmpi ne, %1, %c0_i32_0 : i32
    scf.if %2 {
      %cst_77 = arith.constant 0.000000e+00 : f32
      %84 = vector.broadcast %cst_77 : f32 to vector<64x128xf32>
      %c0_78 = arith.constant 0 : index
      %c0_79 = arith.constant 0 : index
      %85 = vector.load %arg8[%c0_78, %c0_79] : memref<64x128xf32, #tpu.memory_space<vmem>>, vector<64x128xf32>
      tpu.vector_store %arg8[%c0_78, %c0_79], %84 {strides = array<i32>} : memref<64x128xf32, #tpu.memory_space<vmem>>, vector<64x128xf32>,
    } else {
    }
    %c0 = arith.constant 0 : index
    %c0_1 = arith.constant 0 : index
    %c0_2 = arith.constant 0 : index
    %c0_3 = arith.constant 0 : index
    %3 = vector.load %arg3[%c0, %c0_1, %c0_2, %c0_3] : memref<1x10x10x128xbf16, #tpu.memory_space<vmem>>, vector<1x10x8x128xbf16>
    %4 = vector.shape_cast %3 : vector<1x10x8x128xbf16> to vector<10x8x128xbf16>
    %5 = vector.extract_strided_slice %4 {offsets = [0, 0, 0], sizes = [8, 8, 128], strides = [1, 1, 1]} : vector<10x8x128xbf16> to vector<8x8x128xbf16>
    %6 = vector.shape_cast %5 : vector<8x8x128xbf16> to vector<64x128xbf16>
    %c0_4 = arith.constant 0 : index
    %c0_5 = arith.constant 0 : index
    %7 = vector.load %arg8[%c0_4, %c0_5] : memref<64x128xf32, #tpu.memory_space<vmem>>, vector<64x128xf32>
    %c0_6 = arith.constant 0 : index
    %c0_7 = arith.constant 0 : index
    %c0_8 = arith.constant 0 : index
    %8 = vector.load %arg4[%c0_6, %c0_7, %c0_8] : memref<9x128x128xbf16, #tpu.memory_space<vmem>>, vector<1x128x128xbf16>
    %9 = vector.shape_cast %8 : vector<1x128x128xbf16> to vector<128x128xbf16>
    %cst = arith.constant dense<0.000000e+00> : vector<64x128xf32>
    %10 = tpu.matmul %6, %9, %cst {dimension_numbers = #tpu.dot_dimension_numbers<[1], [0], [0], [1], [0, 0, 1, 1], [], []>} : vector<64x128xbf16>, vector<128x128xbf16>, vector<64x128xf32> -> vector<64x128xf32>
    %11 = arith.addf %7, %10 : vector<64x128xf32>
    %c0_9 = arith.constant 0 : index
    %c0_10 = arith.constant 0 : index
    %12 = vector.load %arg8[%c0_9, %c0_10] : memref<64x128xf32, #tpu.memory_space<vmem>>, vector<64x128xf32>
    tpu.vector_store %arg8[%c0_9, %c0_10], %11 {strides = array<i32>} : memref<64x128xf32, #tpu.memory_space<vmem>>, vector<64x128xf32>,
    %13 = vector.extract_strided_slice %4 {offsets = [1, 0, 0], sizes = [8, 8, 128], strides = [1, 1, 1]} : vector<10x8x128xbf16> to vector<8x8x128xbf16>
    %14 = vector.shape_cast %13 : vector<8x8x128xbf16> to vector<64x128xbf16>
    %c0_11 = arith.constant 0 : index
    %c0_12 = arith.constant 0 : index
    %15 = vector.load %arg8[%c0_11, %c0_12] : memref<64x128xf32, #tpu.memory_space<vmem>>, vector<64x128xf32>
    %c3 = arith.constant 3 : index
    %c0_13 = arith.constant 0 : index
    %c0_14 = arith.constant 0 : index
    %16 = vector.load %arg4[%c3, %c0_13, %c0_14] : memref<9x128x128xbf16, #tpu.memory_space<vmem>>, vector<1x128x128xbf16>
    %17 = vector.shape_cast %16 : vector<1x128x128xbf16> to vector<128x128xbf16>
    %cst_15 = arith.constant dense<0.000000e+00> : vector<64x128xf32>
    %18 = tpu.matmul %14, %17, %cst_15 {dimension_numbers = #tpu.dot_dimension_numbers<[1], [0], [0], [1], [0, 0, 1, 1], [], []>} : vector<64x128xbf16>, vector<128x128xbf16>, vector<64x128xf32> -> vector<64x128xf32>
    %19 = arith.addf %15, %18 : vector<64x128xf32>
    %c0_16 = arith.constant 0 : index
    %c0_17 = arith.constant 0 : index
    %20 = vector.load %arg8[%c0_16, %c0_17] : memref<64x128xf32, #tpu.memory_space<vmem>>, vector<64x128xf32>
    tpu.vector_store %arg8[%c0_16, %c0_17], %19 {strides = array<i32>} : memref<64x128xf32, #tpu.memory_space<vmem>>, vector<64x128xf32>,
    %21 = vector.extract_strided_slice %4 {offsets = [2, 0, 0], sizes = [8, 8, 128], strides = [1, 1, 1]} : vector<10x8x128xbf16> to vector<8x8x128xbf16>
    %22 = vector.shape_cast %21 : vector<8x8x128xbf16> to vector<64x128xbf16>
    %c0_18 = arith.constant 0 : index
    %c0_19 = arith.constant 0 : index
    %23 = vector.load %arg8[%c0_18, %c0_19] : memref<64x128xf32, #tpu.memory_space<vmem>>, vector<64x128xf32>
    %c6 = arith.constant 6 : index
    %c0_20 = arith.constant 0 : index
    %c0_21 = arith.constant 0 : index
    %24 = vector.load %arg4[%c6, %c0_20, %c0_21] : memref<9x128x128xbf16, #tpu.memory_space<vmem>>, vector<1x128x128xbf16>
    %25 = vector.shape_cast %24 : vector<1x128x128xbf16> to vector<128x128xbf16>
    %cst_22 = arith.constant dense<0.000000e+00> : vector<64x128xf32>
    %26 = tpu.matmul %22, %25, %cst_22 {dimension_numbers = #tpu.dot_dimension_numbers<[1], [0], [0], [1], [0, 0, 1, 1], [], []>} : vector<64x128xbf16>, vector<128x128xbf16>, vector<64x128xf32> -> vector<64x128xf32>
    %27 = arith.addf %23, %26 : vector<64x128xf32>
    %c0_23 = arith.constant 0 : index
    %c0_24 = arith.constant 0 : index
    %28 = vector.load %arg8[%c0_23, %c0_24] : memref<64x128xf32, #tpu.memory_space<vmem>>, vector<64x128xf32>
    tpu.vector_store %arg8[%c0_23, %c0_24], %27 {strides = array<i32>} : memref<64x128xf32, #tpu.memory_space<vmem>>, vector<64x128xf32>,
    %c0_25 = arith.constant 0 : index
    %c0_26 = arith.constant 0 : index
    %c1 = arith.constant 1 : index
    %c0_27 = arith.constant 0 : index
    %29 = vector.load %arg3[%c0_25, %c0_26, %c1, %c0_27] : memref<1x10x10x128xbf16, #tpu.memory_space<vmem>>, vector<1x10x8x128xbf16>
    %30 = vector.shape_cast %29 : vector<1x10x8x128xbf16> to vector<10x8x128xbf16>
    %31 = vector.extract_strided_slice %30 {offsets = [0, 0, 0], sizes = [8, 8, 128], strides = [1, 1, 1]} : vector<10x8x128xbf16> to vector<8x8x128xbf16>
    %32 = vector.shape_cast %31 : vector<8x8x128xbf16> to vector<64x128xbf16>
    %c0_28 = arith.constant 0 : index
    %c0_29 = arith.constant 0 : index
    %33 = vector.load %arg8[%c0_28, %c0_29] : memref<64x128xf32, #tpu.memory_space<vmem>>, vector<64x128xf32>
    %c1_30 = arith.constant 1 : index
    %c0_31 = arith.constant 0 : index
    %c0_32 = arith.constant 0 : index
    %34 = vector.load %arg4[%c1_30, %c0_31, %c0_32] : memref<9x128x128xbf16, #tpu.memory_space<vmem>>, vector<1x128x128xbf16>
    %35 = vector.shape_cast %34 : vector<1x128x128xbf16> to vector<128x128xbf16>
    %cst_33 = arith.constant dense<0.000000e+00> : vector<64x128xf32>
    %36 = tpu.matmul %32, %35, %cst_33 {dimension_numbers = #tpu.dot_dimension_numbers<[1], [0], [0], [1], [0, 0, 1, 1], [], []>} : vector<64x128xbf16>, vector<128x128xbf16>, vector<64x128xf32> -> vector<64x128xf32>
    %37 = arith.addf %33, %36 : vector<64x128xf32>
    %c0_34 = arith.constant 0 : index
    %c0_35 = arith.constant 0 : index
    %38 = vector.load %arg8[%c0_34, %c0_35] : memref<64x128xf32, #tpu.memory_space<vmem>>, vector<64x128xf32>
    tpu.vector_store %arg8[%c0_34, %c0_35], %37 {strides = array<i32>} : memref<64x128xf32, #tpu.memory_space<vmem>>, vector<64x128xf32>,
    %39 = vector.extract_strided_slice %30 {offsets = [1, 0, 0], sizes = [8, 8, 128], strides = [1, 1, 1]} : vector<10x8x128xbf16> to vector<8x8x128xbf16>
    %40 = vector.shape_cast %39 : vector<8x8x128xbf16> to vector<64x128xbf16>
    %c0_36 = arith.constant 0 : index
    %c0_37 = arith.constant 0 : index
    %41 = vector.load %arg8[%c0_36, %c0_37] : memref<64x128xf32, #tpu.memory_space<vmem>>, vector<64x128xf32>
    %c4 = arith.constant 4 : index
    %c0_38 = arith.constant 0 : index
    %c0_39 = arith.constant 0 : index
    %42 = vector.load %arg4[%c4, %c0_38, %c0_39] : memref<9x128x128xbf16, #tpu.memory_space<vmem>>, vector<1x128x128xbf16>
    %43 = vector.shape_cast %42 : vector<1x128x128xbf16> to vector<128x128xbf16>
    %cst_40 = arith.constant dense<0.000000e+00> : vector<64x128xf32>
    %44 = tpu.matmul %40, %43, %cst_40 {dimension_numbers = #tpu.dot_dimension_numbers<[1], [0], [0], [1], [0, 0, 1, 1], [], []>} : vector<64x128xbf16>, vector<128x128xbf16>, vector<64x128xf32> -> vector<64x128xf32>
    %45 = arith.addf %41, %44 : vector<64x128xf32>
    %c0_41 = arith.constant 0 : index
    %c0_42 = arith.constant 0 : index
    %46 = vector.load %arg8[%c0_41, %c0_42] : memref<64x128xf32, #tpu.memory_space<vmem>>, vector<64x128xf32>
    tpu.vector_store %arg8[%c0_41, %c0_42], %45 {strides = array<i32>} : memref<64x128xf32, #tpu.memory_space<vmem>>, vector<64x128xf32>,
    %47 = vector.extract_strided_slice %30 {offsets = [2, 0, 0], sizes = [8, 8, 128], strides = [1, 1, 1]} : vector<10x8x128xbf16> to vector<8x8x128xbf16>
    %48 = vector.shape_cast %47 : vector<8x8x128xbf16> to vector<64x128xbf16>
    %c0_43 = arith.constant 0 : index
    %c0_44 = arith.constant 0 : index
    %49 = vector.load %arg8[%c0_43, %c0_44] : memref<64x128xf32, #tpu.memory_space<vmem>>, vector<64x128xf32>
    %c7 = arith.constant 7 : index
    %c0_45 = arith.constant 0 : index
    %c0_46 = arith.constant 0 : index
    %50 = vector.load %arg4[%c7, %c0_45, %c0_46] : memref<9x128x128xbf16, #tpu.memory_space<vmem>>, vector<1x128x128xbf16>
    %51 = vector.shape_cast %50 : vector<1x128x128xbf16> to vector<128x128xbf16>
    %cst_47 = arith.constant dense<0.000000e+00> : vector<64x128xf32>
    %52 = tpu.matmul %48, %51, %cst_47 {dimension_numbers = #tpu.dot_dimension_numbers<[1], [0], [0], [1], [0, 0, 1, 1], [], []>} : vector<64x128xbf16>, vector<128x128xbf16>, vector<64x128xf32> -> vector<64x128xf32>
    %53 = arith.addf %49, %52 : vector<64x128xf32>
    %c0_48 = arith.constant 0 : index
    %c0_49 = arith.constant 0 : index
    %54 = vector.load %arg8[%c0_48, %c0_49] : memref<64x128xf32, #tpu.memory_space<vmem>>, vector<64x128xf32>
    tpu.vector_store %arg8[%c0_48, %c0_49], %53 {strides = array<i32>} : memref<64x128xf32, #tpu.memory_space<vmem>>, vector<64x128xf32>,
    %c0_50 = arith.constant 0 : index
    %c0_51 = arith.constant 0 : index
    %c2 = arith.constant 2 : index
    %c0_52 = arith.constant 0 : index
    %55 = vector.load %arg3[%c0_50, %c0_51, %c2, %c0_52] : memref<1x10x10x128xbf16, #tpu.memory_space<vmem>>, vector<1x10x8x128xbf16>
    %56 = vector.shape_cast %55 : vector<1x10x8x128xbf16> to vector<10x8x128xbf16>
    %57 = vector.extract_strided_slice %56 {offsets = [0, 0, 0], sizes = [8, 8, 128], strides = [1, 1, 1]} : vector<10x8x128xbf16> to vector<8x8x128xbf16>
    %58 = vector.shape_cast %57 : vector<8x8x128xbf16> to vector<64x128xbf16>
    %c0_53 = arith.constant 0 : index
    %c0_54 = arith.constant 0 : index
    %59 = vector.load %arg8[%c0_53, %c0_54] : memref<64x128xf32, #tpu.memory_space<vmem>>, vector<64x128xf32>
    %c2_55 = arith.constant 2 : index
    %c0_56 = arith.constant 0 : index
    %c0_57 = arith.constant 0 : index
    %60 = vector.load %arg4[%c2_55, %c0_56, %c0_57] : memref<9x128x128xbf16, #tpu.memory_space<vmem>>, vector<1x128x128xbf16>
    %61 = vector.shape_cast %60 : vector<1x128x128xbf16> to vector<128x128xbf16>
    %cst_58 = arith.constant dense<0.000000e+00> : vector<64x128xf32>
    %62 = tpu.matmul %58, %61, %cst_58 {dimension_numbers = #tpu.dot_dimension_numbers<[1], [0], [0], [1], [0, 0, 1, 1], [], []>} : vector<64x128xbf16>, vector<128x128xbf16>, vector<64x128xf32> -> vector<64x128xf32>
    %63 = arith.addf %59, %62 : vector<64x128xf32>
    %c0_59 = arith.constant 0 : index
    %c0_60 = arith.constant 0 : index
    %64 = vector.load %arg8[%c0_59, %c0_60] : memref<64x128xf32, #tpu.memory_space<vmem>>, vector<64x128xf32>
    tpu.vector_store %arg8[%c0_59, %c0_60], %63 {strides = array<i32>} : memref<64x128xf32, #tpu.memory_space<vmem>>, vector<64x128xf32>,
    %65 = vector.extract_strided_slice %56 {offsets = [1, 0, 0], sizes = [8, 8, 128], strides = [1, 1, 1]} : vector<10x8x128xbf16> to vector<8x8x128xbf16>
    %66 = vector.shape_cast %65 : vector<8x8x128xbf16> to vector<64x128xbf16>
    %c0_61 = arith.constant 0 : index
    %c0_62 = arith.constant 0 : index
    %67 = vector.load %arg8[%c0_61, %c0_62] : memref<64x128xf32, #tpu.memory_space<vmem>>, vector<64x128xf32>
    %c5 = arith.constant 5 : index
    %c0_63 = arith.constant 0 : index
    %c0_64 = arith.constant 0 : index
    %68 = vector.load %arg4[%c5, %c0_63, %c0_64] : memref<9x128x128xbf16, #tpu.memory_space<vmem>>, vector<1x128x128xbf16>
    %69 = vector.shape_cast %68 : vector<1x128x128xbf16> to vector<128x128xbf16>
    %cst_65 = arith.constant dense<0.000000e+00> : vector<64x128xf32>
    %70 = tpu.matmul %66, %69, %cst_65 {dimension_numbers = #tpu.dot_dimension_numbers<[1], [0], [0], [1], [0, 0, 1, 1], [], []>} : vector<64x128xbf16>, vector<128x128xbf16>, vector<64x128xf32> -> vector<64x128xf32>
    %71 = arith.addf %67, %70 : vector<64x128xf32>
    %c0_66 = arith.constant 0 : index
    %c0_67 = arith.constant 0 : index
    %72 = vector.load %arg8[%c0_66, %c0_67] : memref<64x128xf32, #tpu.memory_space<vmem>>, vector<64x128xf32>
    tpu.vector_store %arg8[%c0_66, %c0_67], %71 {strides = array<i32>} : memref<64x128xf32, #tpu.memory_space<vmem>>, vector<64x128xf32>,
    %73 = vector.extract_strided_slice %56 {offsets = [2, 0, 0], sizes = [8, 8, 128], strides = [1, 1, 1]} : vector<10x8x128xbf16> to vector<8x8x128xbf16>
    %74 = vector.shape_cast %73 : vector<8x8x128xbf16> to vector<64x128xbf16>
    %c0_68 = arith.constant 0 : index
    %c0_69 = arith.constant 0 : index
    %75 = vector.load %arg8[%c0_68, %c0_69] : memref<64x128xf32, #tpu.memory_space<vmem>>, vector<64x128xf32>
    %c8 = arith.constant 8 : index
    %c0_70 = arith.constant 0 : index
    %c0_71 = arith.constant 0 : index
    %76 = vector.load %arg4[%c8, %c0_70, %c0_71] : memref<9x128x128xbf16, #tpu.memory_space<vmem>>, vector<1x128x128xbf16>
    %77 = vector.shape_cast %76 : vector<1x128x128xbf16> to vector<128x128xbf16>
    %cst_72 = arith.constant dense<0.000000e+00> : vector<64x128xf32>
    %78 = tpu.matmul %74, %77, %cst_72 {dimension_numbers = #tpu.dot_dimension_numbers<[1], [0], [0], [1], [0, 0, 1, 1], [], []>} : vector<64x128xbf16>, vector<128x128xbf16>, vector<64x128xf32> -> vector<64x128xf32>
    %79 = arith.addf %75, %78 : vector<64x128xf32>
    %c0_73 = arith.constant 0 : index
    %c0_74 = arith.constant 0 : index
    %80 = vector.load %arg8[%c0_73, %c0_74] : memref<64x128xf32, #tpu.memory_space<vmem>>, vector<64x128xf32>
    tpu.vector_store %arg8[%c0_73, %c0_74], %79 {strides = array<i32>} : memref<64x128xf32, #tpu.memory_space<vmem>>, vector<64x128xf32>,
    %c0_i32_75 = arith.constant 0 : i32
    %81 = arith.cmpi eq, %arg2, %c0_i32_75 : i32
    %82 = arith.extui %81 : i1 to i32
    %c0_i32_76 = arith.constant 0 : i32
    %83 = arith.cmpi ne, %82, %c0_i32_76 : i32
    scf.if %83 {
      %c0_77 = arith.constant 0 : index
      %c0_78 = arith.constant 0 : index
      %84 = vector.load %arg8[%c0_77, %c0_78] : memref<64x128xf32, #tpu.memory_space<vmem>>, vector<64x128xf32>
      %c0_79 = arith.constant 0 : index
      %c0_80 = arith.constant 0 : index
      %85 = vector.load %arg5[%c0_79, %c0_80] : memref<1x128xf32, #tpu.memory_space<vmem>>, vector<1x128xf32>
      %86 = vector.broadcast %85 : vector<1x128xf32> to vector<64x128xf32>
      %87 = arith.mulf %84, %86 : vector<64x128xf32>
      %c0_81 = arith.constant 0 : index
      %c0_82 = arith.constant 0 : index
      %88 = vector.load %arg6[%c0_81, %c0_82] : memref<1x128xf32, #tpu.memory_space<vmem>>, vector<1x128xf32>
      %89 = vector.broadcast %88 : vector<1x128xf32> to vector<64x128xf32>
      %90 = arith.addf %87, %89 : vector<64x128xf32>
      %cst_83 = arith.constant 0.000000e+00 : f32
      %91 = vector.broadcast %cst_83 : f32 to vector<64x128xf32>
      %92 = arith.maximumf %90, %91 : vector<64x128xf32>
      %93 = arith.truncf %92 : vector<64x128xf32> to vector<64x128xbf16>
      %c0_84 = arith.constant 0 : index
      %c0_85 = arith.constant 0 : index
      %c0_86 = arith.constant 0 : index
      %94 = vector.load %arg7[%c0_84, %c0_85, %c0_86] : memref<1x64x128xbf16, #tpu.memory_space<vmem>>, vector<1x64x128xbf16>
      %95 = vector.shape_cast %94 : vector<1x64x128xbf16> to vector<64x128xbf16>
      %96 = vector.shape_cast %93 : vector<64x128xbf16> to vector<1x64x128xbf16>
      tpu.vector_store %arg7[%c0_84, %c0_85, %c0_86], %96 {strides = array<i32>} : memref<1x64x128xbf16, #tpu.memory_space<vmem>>, vector<1x64x128xbf16>,
    } else {
    }
    return
  }
  func.func @transform_0(%arg0: i32, %arg1: i32, %arg2: i32) -> (i32, i32, i32, i32) {
    %c0_i32 = arith.constant 0 : i32
    %c0_i32_0 = arith.constant 0 : i32
    %c0_i32_1 = arith.constant 0 : i32
    return %arg0, %c0_i32, %c0_i32_0, %arg2 : i32, i32, i32, i32
  }
  func.func @transform_1(%arg0: i32, %arg1: i32, %arg2: i32) -> (i32, i32, i32) {
    %c0_i32 = arith.constant 0 : i32
    %c0_i32_0 = arith.constant 0 : i32
    return %c0_i32, %arg2, %arg1 : i32, i32, i32
  }
  func.func @transform_2(%arg0: i32, %arg1: i32, %arg2: i32) -> (i32, i32) {
    %c0_i32 = arith.constant 0 : i32
    %c0_i32_0 = arith.constant 0 : i32
    return %c0_i32, %arg1 : i32, i32
  }
  func.func @transform_3(%arg0: i32, %arg1: i32, %arg2: i32) -> (i32, i32) {
    %c0_i32 = arith.constant 0 : i32
    %c0_i32_0 = arith.constant 0 : i32
    return %c0_i32, %arg1 : i32, i32
  }
  func.func @transform_4(%arg0: i32, %arg1: i32, %arg2: i32) -> (i32, i32, i32) {
    %c0_i32 = arith.constant 0 : i32
    %c0_i32_0 = arith.constant 0 : i32
    return %arg0, %c0_i32, %arg1 : i32, i32, i32
  }
}

module attributes {stable_mosaic.version = 11 : i64} {
  func.func @_matmul_affine_kernel(%arg0: i32, %arg1: i32, %arg2: i32, %arg3: memref<80x128xbf16, #tpu.memory_space<vmem>>, %arg4: memref<128x128xbf16, #tpu.memory_space<vmem>>, %arg5: memref<1x128xf32, #tpu.memory_space<vmem>>, %arg6: memref<1x128xf32, #tpu.memory_space<vmem>>, %arg7: memref<80x128xbf16, #tpu.memory_space<vmem>>, %arg8: memref<80x128xf32, #tpu.memory_space<vmem>>) attributes {dimension_semantics = [#tpu.dimension_semantics<parallel>, #tpu.dimension_semantics<parallel>, #tpu.dimension_semantics<arbitrary>], iteration_bounds = array<i64: 1, 1, 1>, scalar_prefetch = 0 : i64, scratch_operands = 1 : i64, tpu.core_type = #tpu.core_type<tc>, window_params = [{transform_indices = @transform_0, window_bounds = array<i64: 80, 128>}, {transform_indices = @transform_1, window_bounds = array<i64: 128, 128>}, {transform_indices = @transform_2, window_bounds = array<i64: 1, 128>}, {transform_indices = @transform_3, window_bounds = array<i64: 1, 128>}, {transform_indices = @transform_4, window_bounds = array<i64: 80, 128>}]} {
    %c0_i32 = arith.constant 0 : i32
    %0 = arith.cmpi eq, %arg2, %c0_i32 : i32
    %1 = arith.extui %0 : i1 to i32
    %c0_i32_0 = arith.constant 0 : i32
    %2 = arith.cmpi ne, %1, %c0_i32_0 : i32
    scf.if %2 {
      %cst_10 = arith.constant 0.000000e+00 : f32
      %12 = vector.broadcast %cst_10 : f32 to vector<80x128xf32>
      %c0_11 = arith.constant 0 : index
      %c0_12 = arith.constant 0 : index
      %13 = vector.load %arg8[%c0_11, %c0_12] : memref<80x128xf32, #tpu.memory_space<vmem>>, vector<80x128xf32>
      tpu.vector_store %arg8[%c0_11, %c0_12], %12 {strides = array<i32>} : memref<80x128xf32, #tpu.memory_space<vmem>>, vector<80x128xf32>,
    } else {
    }
    %c0 = arith.constant 0 : index
    %c0_1 = arith.constant 0 : index
    %3 = vector.load %arg8[%c0, %c0_1] : memref<80x128xf32, #tpu.memory_space<vmem>>, vector<80x128xf32>
    %c0_2 = arith.constant 0 : index
    %c0_3 = arith.constant 0 : index
    %4 = vector.load %arg3[%c0_2, %c0_3] : memref<80x128xbf16, #tpu.memory_space<vmem>>, vector<80x128xbf16>
    %c0_4 = arith.constant 0 : index
    %c0_5 = arith.constant 0 : index
    %5 = vector.load %arg4[%c0_4, %c0_5] : memref<128x128xbf16, #tpu.memory_space<vmem>>, vector<128x128xbf16>
    %cst = arith.constant dense<0.000000e+00> : vector<80x128xf32>
    %6 = tpu.matmul %4, %5, %cst {dimension_numbers = #tpu.dot_dimension_numbers<[1], [0], [0], [1], [0, 0, 1, 1], [], []>} : vector<80x128xbf16>, vector<128x128xbf16>, vector<80x128xf32> -> vector<80x128xf32>
    %7 = arith.addf %3, %6 : vector<80x128xf32>
    %c0_6 = arith.constant 0 : index
    %c0_7 = arith.constant 0 : index
    %8 = vector.load %arg8[%c0_6, %c0_7] : memref<80x128xf32, #tpu.memory_space<vmem>>, vector<80x128xf32>
    tpu.vector_store %arg8[%c0_6, %c0_7], %7 {strides = array<i32>} : memref<80x128xf32, #tpu.memory_space<vmem>>, vector<80x128xf32>,
    %c0_i32_8 = arith.constant 0 : i32
    %9 = arith.cmpi eq, %arg2, %c0_i32_8 : i32
    %10 = arith.extui %9 : i1 to i32
    %c0_i32_9 = arith.constant 0 : i32
    %11 = arith.cmpi ne, %10, %c0_i32_9 : i32
    scf.if %11 {
      %c0_10 = arith.constant 0 : index
      %c0_11 = arith.constant 0 : index
      %12 = vector.load %arg8[%c0_10, %c0_11] : memref<80x128xf32, #tpu.memory_space<vmem>>, vector<80x128xf32>
      %c0_12 = arith.constant 0 : index
      %c0_13 = arith.constant 0 : index
      %13 = vector.load %arg5[%c0_12, %c0_13] : memref<1x128xf32, #tpu.memory_space<vmem>>, vector<1x128xf32>
      %14 = vector.broadcast %13 : vector<1x128xf32> to vector<80x128xf32>
      %15 = arith.mulf %12, %14 : vector<80x128xf32>
      %c0_14 = arith.constant 0 : index
      %c0_15 = arith.constant 0 : index
      %16 = vector.load %arg6[%c0_14, %c0_15] : memref<1x128xf32, #tpu.memory_space<vmem>>, vector<1x128xf32>
      %17 = vector.broadcast %16 : vector<1x128xf32> to vector<80x128xf32>
      %18 = arith.addf %15, %17 : vector<80x128xf32>
      %19 = arith.truncf %18 : vector<80x128xf32> to vector<80x128xbf16>
      %c0_16 = arith.constant 0 : index
      %c0_17 = arith.constant 0 : index
      %20 = vector.load %arg7[%c0_16, %c0_17] : memref<80x128xbf16, #tpu.memory_space<vmem>>, vector<80x128xbf16>
      tpu.vector_store %arg7[%c0_16, %c0_17], %19 {strides = array<i32>} : memref<80x128xbf16, #tpu.memory_space<vmem>>, vector<80x128xbf16>,
    } else {
    }
    return
  }
  func.func @transform_0(%arg0: i32, %arg1: i32, %arg2: i32) -> (i32, i32) {
    %c0_i32 = arith.constant 0 : i32
    return %arg0, %arg2 : i32, i32
  }
  func.func @transform_1(%arg0: i32, %arg1: i32, %arg2: i32) -> (i32, i32) {
    %c0_i32 = arith.constant 0 : i32
    return %arg2, %arg1 : i32, i32
  }
  func.func @transform_2(%arg0: i32, %arg1: i32, %arg2: i32) -> (i32, i32) {
    %c0_i32 = arith.constant 0 : i32
    %c0_i32_0 = arith.constant 0 : i32
    return %c0_i32, %arg1 : i32, i32
  }
  func.func @transform_3(%arg0: i32, %arg1: i32, %arg2: i32) -> (i32, i32) {
    %c0_i32 = arith.constant 0 : i32
    %c0_i32_0 = arith.constant 0 : i32
    return %c0_i32, %arg1 : i32, i32
  }
  func.func @transform_4(%arg0: i32, %arg1: i32, %arg2: i32) -> (i32, i32) {
    %c0_i32 = arith.constant 0 : i32
    return %arg0, %arg1 : i32, i32
  }
}

module attributes {stable_mosaic.version = 11 : i64} {
  func.func @_spatial_matmul_kernel(%arg0: i32, %arg1: i32, %arg2: memref<12x8xbf16, #tpu.memory_space<vmem>>, %arg3: memref<2x8x2048xbf16, #tpu.memory_space<vmem>>, %arg4: memref<2x12x2048xbf16, #tpu.memory_space<vmem>>) attributes {dimension_semantics = [#tpu.dimension_semantics<parallel>, #tpu.dimension_semantics<parallel>], iteration_bounds = array<i64: 1, 1>, scalar_prefetch = 0 : i64, scratch_operands = 0 : i64, tpu.core_type = #tpu.core_type<tc>, window_params = [{pipeline_mode = #tpu.pipeline_mode<synchronous>, transform_indices = @transform_0, window_bounds = array<i64: 12, 8>}, {transform_indices = @transform_1, window_bounds = array<i64: 2, 8, 2048>}, {transform_indices = @transform_2, window_bounds = array<i64: 2, 12, 2048>}]} {
    %c0 = arith.constant 0 : index
    %c0_0 = arith.constant 0 : index
    %0 = vector.load %arg2[%c0, %c0_0] : memref<12x8xbf16, #tpu.memory_space<vmem>>, vector<12x8xbf16>
    %c0_1 = arith.constant 0 : index
    %c0_2 = arith.constant 0 : index
    %c0_3 = arith.constant 0 : index
    %1 = vector.load %arg3[%c0_1, %c0_2, %c0_3] : memref<2x8x2048xbf16, #tpu.memory_space<vmem>>, vector<1x8x2048xbf16>
    %2 = vector.shape_cast %1 : vector<1x8x2048xbf16> to vector<8x2048xbf16>
    %cst = arith.constant dense<0.000000e+00> : vector<12x2048xf32>
    %3 = tpu.matmul %0, %2, %cst {dimension_numbers = #tpu.dot_dimension_numbers<[1], [0], [0], [1], [0, 0, 1, 1], [], []>} : vector<12x8xbf16>, vector<8x2048xbf16>, vector<12x2048xf32> -> vector<12x2048xf32>
    %4 = arith.truncf %3 : vector<12x2048xf32> to vector<12x2048xbf16>
    %c0_4 = arith.constant 0 : index
    %c0_5 = arith.constant 0 : index
    %c0_6 = arith.constant 0 : index
    %5 = vector.load %arg4[%c0_4, %c0_5, %c0_6] : memref<2x12x2048xbf16, #tpu.memory_space<vmem>>, vector<1x12x2048xbf16>
    %6 = vector.shape_cast %5 : vector<1x12x2048xbf16> to vector<12x2048xbf16>
    %7 = vector.shape_cast %4 : vector<12x2048xbf16> to vector<1x12x2048xbf16>
    tpu.vector_store %arg4[%c0_4, %c0_5, %c0_6], %7 {strides = array<i32>} : memref<2x12x2048xbf16, #tpu.memory_space<vmem>>, vector<1x12x2048xbf16>,
    %c1 = arith.constant 1 : index
    %c0_7 = arith.constant 0 : index
    %c0_8 = arith.constant 0 : index
    %8 = vector.load %arg3[%c1, %c0_7, %c0_8] : memref<2x8x2048xbf16, #tpu.memory_space<vmem>>, vector<1x8x2048xbf16>
    %9 = vector.shape_cast %8 : vector<1x8x2048xbf16> to vector<8x2048xbf16>
    %cst_9 = arith.constant dense<0.000000e+00> : vector<12x2048xf32>
    %10 = tpu.matmul %0, %9, %cst_9 {dimension_numbers = #tpu.dot_dimension_numbers<[1], [0], [0], [1], [0, 0, 1, 1], [], []>} : vector<12x8xbf16>, vector<8x2048xbf16>, vector<12x2048xf32> -> vector<12x2048xf32>
    %11 = arith.truncf %10 : vector<12x2048xf32> to vector<12x2048xbf16>
    %c1_10 = arith.constant 1 : index
    %c0_11 = arith.constant 0 : index
    %c0_12 = arith.constant 0 : index
    %12 = vector.load %arg4[%c1_10, %c0_11, %c0_12] : memref<2x12x2048xbf16, #tpu.memory_space<vmem>>, vector<1x12x2048xbf16>
    %13 = vector.shape_cast %12 : vector<1x12x2048xbf16> to vector<12x2048xbf16>
    %14 = vector.shape_cast %11 : vector<12x2048xbf16> to vector<1x12x2048xbf16>
    tpu.vector_store %arg4[%c1_10, %c0_11, %c0_12], %14 {strides = array<i32>} : memref<2x12x2048xbf16, #tpu.memory_space<vmem>>, vector<1x12x2048xbf16>,
    return
  }
  func.func @transform_0(%arg0: i32, %arg1: i32) -> (i32, i32) {
    %c0_i32 = arith.constant 0 : i32
    %c0_i32_0 = arith.constant 0 : i32
    %c0_i32_1 = arith.constant 0 : i32
    return %c0_i32, %c0_i32_0 : i32, i32
  }
  func.func @transform_1(%arg0: i32, %arg1: i32) -> (i32, i32, i32) {
    %c0_i32 = arith.constant 0 : i32
    %c0_i32_0 = arith.constant 0 : i32
    return %arg0, %c0_i32, %arg1 : i32, i32, i32
  }
  func.func @transform_2(%arg0: i32, %arg1: i32) -> (i32, i32, i32) {
    %c0_i32 = arith.constant 0 : i32
    %c0_i32_0 = arith.constant 0 : i32
    return %arg0, %c0_i32, %arg1 : i32, i32, i32
  }
}

module attributes {stable_mosaic.version = 11 : i64} {
  func.func @_spatial_matmul_kernel(%arg0: i32, %arg1: i32, %arg2: memref<50x96xbf16, #tpu.memory_space<vmem>>, %arg3: memref<2x96x256xbf16, #tpu.memory_space<vmem>>, %arg4: memref<2x50x256xbf16, #tpu.memory_space<vmem>>) attributes {dimension_semantics = [#tpu.dimension_semantics<parallel>, #tpu.dimension_semantics<parallel>], iteration_bounds = array<i64: 1, 1>, scalar_prefetch = 0 : i64, scratch_operands = 0 : i64, tpu.core_type = #tpu.core_type<tc>, window_params = [{pipeline_mode = #tpu.pipeline_mode<synchronous>, transform_indices = @transform_0, window_bounds = array<i64: 50, 96>}, {transform_indices = @transform_1, window_bounds = array<i64: 2, 96, 256>}, {transform_indices = @transform_2, window_bounds = array<i64: 2, 50, 256>}]} {
    %c0 = arith.constant 0 : index
    %c0_0 = arith.constant 0 : index
    %0 = vector.load %arg2[%c0, %c0_0] : memref<50x96xbf16, #tpu.memory_space<vmem>>, vector<50x96xbf16>
    %c0_1 = arith.constant 0 : index
    %c0_2 = arith.constant 0 : index
    %c0_3 = arith.constant 0 : index
    %1 = vector.load %arg3[%c0_1, %c0_2, %c0_3] : memref<2x96x256xbf16, #tpu.memory_space<vmem>>, vector<1x96x256xbf16>
    %2 = vector.shape_cast %1 : vector<1x96x256xbf16> to vector<96x256xbf16>
    %cst = arith.constant dense<0.000000e+00> : vector<50x256xf32>
    %3 = tpu.matmul %0, %2, %cst {dimension_numbers = #tpu.dot_dimension_numbers<[1], [0], [0], [1], [0, 0, 1, 1], [], []>} : vector<50x96xbf16>, vector<96x256xbf16>, vector<50x256xf32> -> vector<50x256xf32>
    %4 = arith.truncf %3 : vector<50x256xf32> to vector<50x256xbf16>
    %c0_4 = arith.constant 0 : index
    %c0_5 = arith.constant 0 : index
    %c0_6 = arith.constant 0 : index
    %5 = vector.load %arg4[%c0_4, %c0_5, %c0_6] : memref<2x50x256xbf16, #tpu.memory_space<vmem>>, vector<1x50x256xbf16>
    %6 = vector.shape_cast %5 : vector<1x50x256xbf16> to vector<50x256xbf16>
    %7 = vector.shape_cast %4 : vector<50x256xbf16> to vector<1x50x256xbf16>
    tpu.vector_store %arg4[%c0_4, %c0_5, %c0_6], %7 {strides = array<i32>} : memref<2x50x256xbf16, #tpu.memory_space<vmem>>, vector<1x50x256xbf16>,
    %c1 = arith.constant 1 : index
    %c0_7 = arith.constant 0 : index
    %c0_8 = arith.constant 0 : index
    %8 = vector.load %arg3[%c1, %c0_7, %c0_8] : memref<2x96x256xbf16, #tpu.memory_space<vmem>>, vector<1x96x256xbf16>
    %9 = vector.shape_cast %8 : vector<1x96x256xbf16> to vector<96x256xbf16>
    %cst_9 = arith.constant dense<0.000000e+00> : vector<50x256xf32>
    %10 = tpu.matmul %0, %9, %cst_9 {dimension_numbers = #tpu.dot_dimension_numbers<[1], [0], [0], [1], [0, 0, 1, 1], [], []>} : vector<50x96xbf16>, vector<96x256xbf16>, vector<50x256xf32> -> vector<50x256xf32>
    %11 = arith.truncf %10 : vector<50x256xf32> to vector<50x256xbf16>
    %c1_10 = arith.constant 1 : index
    %c0_11 = arith.constant 0 : index
    %c0_12 = arith.constant 0 : index
    %12 = vector.load %arg4[%c1_10, %c0_11, %c0_12] : memref<2x50x256xbf16, #tpu.memory_space<vmem>>, vector<1x50x256xbf16>
    %13 = vector.shape_cast %12 : vector<1x50x256xbf16> to vector<50x256xbf16>
    %14 = vector.shape_cast %11 : vector<50x256xbf16> to vector<1x50x256xbf16>
    tpu.vector_store %arg4[%c1_10, %c0_11, %c0_12], %14 {strides = array<i32>} : memref<2x50x256xbf16, #tpu.memory_space<vmem>>, vector<1x50x256xbf16>,
    return
  }
  func.func @transform_0(%arg0: i32, %arg1: i32) -> (i32, i32) {
    %c0_i32 = arith.constant 0 : i32
    %c0_i32_0 = arith.constant 0 : i32
    %c0_i32_1 = arith.constant 0 : i32
    return %c0_i32, %c0_i32_0 : i32, i32
  }
  func.func @transform_1(%arg0: i32, %arg1: i32) -> (i32, i32, i32) {
    %c0_i32 = arith.constant 0 : i32
    %c0_i32_0 = arith.constant 0 : i32
    return %arg0, %c0_i32, %arg1 : i32, i32, i32
  }
  func.func @transform_2(%arg0: i32, %arg1: i32) -> (i32, i32, i32) {
    %c0_i32 = arith.constant 0 : i32
    %c0_i32_0 = arith.constant 0 : i32
    return %arg0, %c0_i32, %arg1 : i32, i32, i32
  }
}

module attributes {stable_mosaic.version = 11 : i64} {
  func.func @_matmul_affine_kernel(%arg0: i32, %arg1: i32, %arg2: i32, %arg3: memref<104x256xbf16, #tpu.memory_space<vmem>>, %arg4: memref<256x256xbf16, #tpu.memory_space<vmem>>, %arg5: memref<1x256xf32, #tpu.memory_space<vmem>>, %arg6: memref<1x256xf32, #tpu.memory_space<vmem>>, %arg7: memref<104x256xbf16, #tpu.memory_space<vmem>>, %arg8: memref<104x256xf32, #tpu.memory_space<vmem>>) attributes {dimension_semantics = [#tpu.dimension_semantics<parallel>, #tpu.dimension_semantics<parallel>, #tpu.dimension_semantics<arbitrary>], iteration_bounds = array<i64: 1, 1, 1>, scalar_prefetch = 0 : i64, scratch_operands = 1 : i64, tpu.core_type = #tpu.core_type<tc>, window_params = [{transform_indices = @transform_0, window_bounds = array<i64: 104, 256>}, {transform_indices = @transform_1, window_bounds = array<i64: 256, 256>}, {transform_indices = @transform_2, window_bounds = array<i64: 1, 256>}, {transform_indices = @transform_3, window_bounds = array<i64: 1, 256>}, {transform_indices = @transform_4, window_bounds = array<i64: 104, 256>}]} {
    %c0_i32 = arith.constant 0 : i32
    %0 = arith.cmpi eq, %arg2, %c0_i32 : i32
    %1 = arith.extui %0 : i1 to i32
    %c0_i32_0 = arith.constant 0 : i32
    %2 = arith.cmpi ne, %1, %c0_i32_0 : i32
    scf.if %2 {
      %cst_10 = arith.constant 0.000000e+00 : f32
      %12 = vector.broadcast %cst_10 : f32 to vector<104x256xf32>
      %c0_11 = arith.constant 0 : index
      %c0_12 = arith.constant 0 : index
      %13 = vector.load %arg8[%c0_11, %c0_12] : memref<104x256xf32, #tpu.memory_space<vmem>>, vector<104x256xf32>
      tpu.vector_store %arg8[%c0_11, %c0_12], %12 {strides = array<i32>} : memref<104x256xf32, #tpu.memory_space<vmem>>, vector<104x256xf32>,
    } else {
    }
    %c0 = arith.constant 0 : index
    %c0_1 = arith.constant 0 : index
    %3 = vector.load %arg8[%c0, %c0_1] : memref<104x256xf32, #tpu.memory_space<vmem>>, vector<104x256xf32>
    %c0_2 = arith.constant 0 : index
    %c0_3 = arith.constant 0 : index
    %4 = vector.load %arg3[%c0_2, %c0_3] : memref<104x256xbf16, #tpu.memory_space<vmem>>, vector<104x256xbf16>
    %c0_4 = arith.constant 0 : index
    %c0_5 = arith.constant 0 : index
    %5 = vector.load %arg4[%c0_4, %c0_5] : memref<256x256xbf16, #tpu.memory_space<vmem>>, vector<256x256xbf16>
    %cst = arith.constant dense<0.000000e+00> : vector<104x256xf32>
    %6 = tpu.matmul %4, %5, %cst {dimension_numbers = #tpu.dot_dimension_numbers<[1], [0], [0], [1], [0, 0, 1, 1], [], []>} : vector<104x256xbf16>, vector<256x256xbf16>, vector<104x256xf32> -> vector<104x256xf32>
    %7 = arith.addf %3, %6 : vector<104x256xf32>
    %c0_6 = arith.constant 0 : index
    %c0_7 = arith.constant 0 : index
    %8 = vector.load %arg8[%c0_6, %c0_7] : memref<104x256xf32, #tpu.memory_space<vmem>>, vector<104x256xf32>
    tpu.vector_store %arg8[%c0_6, %c0_7], %7 {strides = array<i32>} : memref<104x256xf32, #tpu.memory_space<vmem>>, vector<104x256xf32>,
    %c0_i32_8 = arith.constant 0 : i32
    %9 = arith.cmpi eq, %arg2, %c0_i32_8 : i32
    %10 = arith.extui %9 : i1 to i32
    %c0_i32_9 = arith.constant 0 : i32
    %11 = arith.cmpi ne, %10, %c0_i32_9 : i32
    scf.if %11 {
      %c0_10 = arith.constant 0 : index
      %c0_11 = arith.constant 0 : index
      %12 = vector.load %arg8[%c0_10, %c0_11] : memref<104x256xf32, #tpu.memory_space<vmem>>, vector<104x256xf32>
      %c0_12 = arith.constant 0 : index
      %c0_13 = arith.constant 0 : index
      %13 = vector.load %arg5[%c0_12, %c0_13] : memref<1x256xf32, #tpu.memory_space<vmem>>, vector<1x256xf32>
      %14 = vector.broadcast %13 : vector<1x256xf32> to vector<104x256xf32>
      %15 = arith.mulf %12, %14 : vector<104x256xf32>
      %c0_14 = arith.constant 0 : index
      %c0_15 = arith.constant 0 : index
      %16 = vector.load %arg6[%c0_14, %c0_15] : memref<1x256xf32, #tpu.memory_space<vmem>>, vector<1x256xf32>
      %17 = vector.broadcast %16 : vector<1x256xf32> to vector<104x256xf32>
      %18 = arith.addf %15, %17 : vector<104x256xf32>
      %cst_16 = arith.constant 0.000000e+00 : f32
      %19 = vector.broadcast %cst_16 : f32 to vector<104x256xf32>
      %20 = arith.maximumf %18, %19 : vector<104x256xf32>
      %21 = arith.truncf %20 : vector<104x256xf32> to vector<104x256xbf16>
      %c0_17 = arith.constant 0 : index
      %c0_18 = arith.constant 0 : index
      %22 = vector.load %arg7[%c0_17, %c0_18] : memref<104x256xbf16, #tpu.memory_space<vmem>>, vector<104x256xbf16>
      tpu.vector_store %arg7[%c0_17, %c0_18], %21 {strides = array<i32>} : memref<104x256xbf16, #tpu.memory_space<vmem>>, vector<104x256xbf16>,
    } else {
    }
    return
  }
  func.func @transform_0(%arg0: i32, %arg1: i32, %arg2: i32) -> (i32, i32) {
    %c0_i32 = arith.constant 0 : i32
    return %arg0, %arg2 : i32, i32
  }
  func.func @transform_1(%arg0: i32, %arg1: i32, %arg2: i32) -> (i32, i32) {
    %c0_i32 = arith.constant 0 : i32
    return %arg2, %arg1 : i32, i32
  }
  func.func @transform_2(%arg0: i32, %arg1: i32, %arg2: i32) -> (i32, i32) {
    %c0_i32 = arith.constant 0 : i32
    %c0_i32_0 = arith.constant 0 : i32
    return %c0_i32, %arg1 : i32, i32
  }
  func.func @transform_3(%arg0: i32, %arg1: i32, %arg2: i32) -> (i32, i32) {
    %c0_i32 = arith.constant 0 : i32
    %c0_i32_0 = arith.constant 0 : i32
    return %c0_i32, %arg1 : i32, i32
  }
  func.func @transform_4(%arg0: i32, %arg1: i32, %arg2: i32) -> (i32, i32) {
    %c0_i32 = arith.constant 0 : i32
    return %arg0, %arg1 : i32, i32
  }
}

module attributes {stable_mosaic.version = 11 : i64} {
  func.func @_spatial_matmul_kernel(%arg0: i32, %arg1: i32, %arg2: memref<64x8xbf16, #tpu.memory_space<vmem>>, %arg3: memref<5x8x128xbf16, #tpu.memory_space<vmem>>, %arg4: memref<5x64x128xbf16, #tpu.memory_space<vmem>>) attributes {dimension_semantics = [#tpu.dimension_semantics<parallel>, #tpu.dimension_semantics<parallel>], iteration_bounds = array<i64: 2, 1>, scalar_prefetch = 0 : i64, scratch_operands = 0 : i64, tpu.core_type = #tpu.core_type<tc>, window_params = [{pipeline_mode = #tpu.pipeline_mode<synchronous>, transform_indices = @transform_0, window_bounds = array<i64: 64, 8>}, {transform_indices = @transform_1, window_bounds = array<i64: 5, 8, 128>}, {transform_indices = @transform_2, window_bounds = array<i64: 5, 64, 128>}]} {
    %c0 = arith.constant 0 : index
    %c0_0 = arith.constant 0 : index
    %0 = vector.load %arg2[%c0, %c0_0] : memref<64x8xbf16, #tpu.memory_space<vmem>>, vector<64x8xbf16>
    %c0_1 = arith.constant 0 : index
    %c0_2 = arith.constant 0 : index
    %c0_3 = arith.constant 0 : index
    %1 = vector.load %arg3[%c0_1, %c0_2, %c0_3] : memref<5x8x128xbf16, #tpu.memory_space<vmem>>, vector<1x8x128xbf16>
    %2 = vector.shape_cast %1 : vector<1x8x128xbf16> to vector<8x128xbf16>
    %cst = arith.constant dense<0.000000e+00> : vector<64x128xf32>
    %3 = tpu.matmul %0, %2, %cst {dimension_numbers = #tpu.dot_dimension_numbers<[1], [0], [0], [1], [0, 0, 1, 1], [], []>} : vector<64x8xbf16>, vector<8x128xbf16>, vector<64x128xf32> -> vector<64x128xf32>
    %4 = arith.truncf %3 : vector<64x128xf32> to vector<64x128xbf16>
    %c0_4 = arith.constant 0 : index
    %c0_5 = arith.constant 0 : index
    %c0_6 = arith.constant 0 : index
    %5 = vector.load %arg4[%c0_4, %c0_5, %c0_6] : memref<5x64x128xbf16, #tpu.memory_space<vmem>>, vector<1x64x128xbf16>
    %6 = vector.shape_cast %5 : vector<1x64x128xbf16> to vector<64x128xbf16>
    %7 = vector.shape_cast %4 : vector<64x128xbf16> to vector<1x64x128xbf16>
    tpu.vector_store %arg4[%c0_4, %c0_5, %c0_6], %7 {strides = array<i32>} : memref<5x64x128xbf16, #tpu.memory_space<vmem>>, vector<1x64x128xbf16>,
    %c1 = arith.constant 1 : index
    %c0_7 = arith.constant 0 : index
    %c0_8 = arith.constant 0 : index
    %8 = vector.load %arg3[%c1, %c0_7, %c0_8] : memref<5x8x128xbf16, #tpu.memory_space<vmem>>, vector<1x8x128xbf16>
    %9 = vector.shape_cast %8 : vector<1x8x128xbf16> to vector<8x128xbf16>
    %cst_9 = arith.constant dense<0.000000e+00> : vector<64x128xf32>
    %10 = tpu.matmul %0, %9, %cst_9 {dimension_numbers = #tpu.dot_dimension_numbers<[1], [0], [0], [1], [0, 0, 1, 1], [], []>} : vector<64x8xbf16>, vector<8x128xbf16>, vector<64x128xf32> -> vector<64x128xf32>
    %11 = arith.truncf %10 : vector<64x128xf32> to vector<64x128xbf16>
    %c1_10 = arith.constant 1 : index
    %c0_11 = arith.constant 0 : index
    %c0_12 = arith.constant 0 : index
    %12 = vector.load %arg4[%c1_10, %c0_11, %c0_12] : memref<5x64x128xbf16, #tpu.memory_space<vmem>>, vector<1x64x128xbf16>
    %13 = vector.shape_cast %12 : vector<1x64x128xbf16> to vector<64x128xbf16>
    %14 = vector.shape_cast %11 : vector<64x128xbf16> to vector<1x64x128xbf16>
    tpu.vector_store %arg4[%c1_10, %c0_11, %c0_12], %14 {strides = array<i32>} : memref<5x64x128xbf16, #tpu.memory_space<vmem>>, vector<1x64x128xbf16>,
    %c2 = arith.constant 2 : index
    %c0_13 = arith.constant 0 : index
    %c0_14 = arith.constant 0 : index
    %15 = vector.load %arg3[%c2, %c0_13, %c0_14] : memref<5x8x128xbf16, #tpu.memory_space<vmem>>, vector<1x8x128xbf16>
    %16 = vector.shape_cast %15 : vector<1x8x128xbf16> to vector<8x128xbf16>
    %cst_15 = arith.constant dense<0.000000e+00> : vector<64x128xf32>
    %17 = tpu.matmul %0, %16, %cst_15 {dimension_numbers = #tpu.dot_dimension_numbers<[1], [0], [0], [1], [0, 0, 1, 1], [], []>} : vector<64x8xbf16>, vector<8x128xbf16>, vector<64x128xf32> -> vector<64x128xf32>
    %18 = arith.truncf %17 : vector<64x128xf32> to vector<64x128xbf16>
    %c2_16 = arith.constant 2 : index
    %c0_17 = arith.constant 0 : index
    %c0_18 = arith.constant 0 : index
    %19 = vector.load %arg4[%c2_16, %c0_17, %c0_18] : memref<5x64x128xbf16, #tpu.memory_space<vmem>>, vector<1x64x128xbf16>
    %20 = vector.shape_cast %19 : vector<1x64x128xbf16> to vector<64x128xbf16>
    %21 = vector.shape_cast %18 : vector<64x128xbf16> to vector<1x64x128xbf16>
    tpu.vector_store %arg4[%c2_16, %c0_17, %c0_18], %21 {strides = array<i32>} : memref<5x64x128xbf16, #tpu.memory_space<vmem>>, vector<1x64x128xbf16>,
    %c3 = arith.constant 3 : index
    %c0_19 = arith.constant 0 : index
    %c0_20 = arith.constant 0 : index
    %22 = vector.load %arg3[%c3, %c0_19, %c0_20] : memref<5x8x128xbf16, #tpu.memory_space<vmem>>, vector<1x8x128xbf16>
    %23 = vector.shape_cast %22 : vector<1x8x128xbf16> to vector<8x128xbf16>
    %cst_21 = arith.constant dense<0.000000e+00> : vector<64x128xf32>
    %24 = tpu.matmul %0, %23, %cst_21 {dimension_numbers = #tpu.dot_dimension_numbers<[1], [0], [0], [1], [0, 0, 1, 1], [], []>} : vector<64x8xbf16>, vector<8x128xbf16>, vector<64x128xf32> -> vector<64x128xf32>
    %25 = arith.truncf %24 : vector<64x128xf32> to vector<64x128xbf16>
    %c3_22 = arith.constant 3 : index
    %c0_23 = arith.constant 0 : index
    %c0_24 = arith.constant 0 : index
    %26 = vector.load %arg4[%c3_22, %c0_23, %c0_24] : memref<5x64x128xbf16, #tpu.memory_space<vmem>>, vector<1x64x128xbf16>
    %27 = vector.shape_cast %26 : vector<1x64x128xbf16> to vector<64x128xbf16>
    %28 = vector.shape_cast %25 : vector<64x128xbf16> to vector<1x64x128xbf16>
    tpu.vector_store %arg4[%c3_22, %c0_23, %c0_24], %28 {strides = array<i32>} : memref<5x64x128xbf16, #tpu.memory_space<vmem>>, vector<1x64x128xbf16>,
    %c4 = arith.constant 4 : index
    %c0_25 = arith.constant 0 : index
    %c0_26 = arith.constant 0 : index
    %29 = vector.load %arg3[%c4, %c0_25, %c0_26] : memref<5x8x128xbf16, #tpu.memory_space<vmem>>, vector<1x8x128xbf16>
    %30 = vector.shape_cast %29 : vector<1x8x128xbf16> to vector<8x128xbf16>
    %cst_27 = arith.constant dense<0.000000e+00> : vector<64x128xf32>
    %31 = tpu.matmul %0, %30, %cst_27 {dimension_numbers = #tpu.dot_dimension_numbers<[1], [0], [0], [1], [0, 0, 1, 1], [], []>} : vector<64x8xbf16>, vector<8x128xbf16>, vector<64x128xf32> -> vector<64x128xf32>
    %32 = arith.truncf %31 : vector<64x128xf32> to vector<64x128xbf16>
    %c4_28 = arith.constant 4 : index
    %c0_29 = arith.constant 0 : index
    %c0_30 = arith.constant 0 : index
    %33 = vector.load %arg4[%c4_28, %c0_29, %c0_30] : memref<5x64x128xbf16, #tpu.memory_space<vmem>>, vector<1x64x128xbf16>
    %34 = vector.shape_cast %33 : vector<1x64x128xbf16> to vector<64x128xbf16>
    %35 = vector.shape_cast %32 : vector<64x128xbf16> to vector<1x64x128xbf16>
    tpu.vector_store %arg4[%c4_28, %c0_29, %c0_30], %35 {strides = array<i32>} : memref<5x64x128xbf16, #tpu.memory_space<vmem>>, vector<1x64x128xbf16>,
    return
  }
  func.func @transform_0(%arg0: i32, %arg1: i32) -> (i32, i32) {
    %c0_i32 = arith.constant 0 : i32
    %c0_i32_0 = arith.constant 0 : i32
    %c0_i32_1 = arith.constant 0 : i32
    return %c0_i32, %c0_i32_0 : i32, i32
  }
  func.func @transform_1(%arg0: i32, %arg1: i32) -> (i32, i32, i32) {
    %c0_i32 = arith.constant 0 : i32
    %c0_i32_0 = arith.constant 0 : i32
    return %arg0, %c0_i32, %arg1 : i32, i32, i32
  }
  func.func @transform_2(%arg0: i32, %arg1: i32) -> (i32, i32, i32) {
    %c0_i32 = arith.constant 0 : i32
    %c0_i32_0 = arith.constant 0 : i32
    return %arg0, %c0_i32, %arg1 : i32, i32, i32
  }
}

module attributes {stable_mosaic.version = 11 : i64} {
  func.func @_spatial_matmul_masked_kernel(%arg0: i32, %arg1: i32, %arg2: memref<64x50xbf16, #tpu.memory_space<vmem>>, %arg3: memref<2x50x256xbf16, #tpu.memory_space<vmem>>, %arg4: memref<50x256xbf16, #tpu.memory_space<vmem>>, %arg5: memref<2x64x256xbf16, #tpu.memory_space<vmem>>) attributes {dimension_semantics = [#tpu.dimension_semantics<parallel>, #tpu.dimension_semantics<parallel>], iteration_bounds = array<i64: 1, 1>, scalar_prefetch = 0 : i64, scratch_operands = 0 : i64, tpu.core_type = #tpu.core_type<tc>, window_params = [{pipeline_mode = #tpu.pipeline_mode<synchronous>, transform_indices = @transform_0, window_bounds = array<i64: 64, 50>}, {transform_indices = @transform_1, window_bounds = array<i64: 2, 50, 256>}, {transform_indices = @transform_2, window_bounds = array<i64: 50, 256>}, {transform_indices = @transform_3, window_bounds = array<i64: 2, 64, 256>}]} {
    %c0 = arith.constant 0 : index
    %c0_0 = arith.constant 0 : index
    %0 = vector.load %arg2[%c0, %c0_0] : memref<64x50xbf16, #tpu.memory_space<vmem>>, vector<64x50xbf16>
    %c0_1 = arith.constant 0 : index
    %c0_2 = arith.constant 0 : index
    %1 = vector.load %arg4[%c0_1, %c0_2] : memref<50x256xbf16, #tpu.memory_space<vmem>>, vector<50x256xbf16>
    %c0_3 = arith.constant 0 : index
    %c0_4 = arith.constant 0 : index
    %c0_5 = arith.constant 0 : index
    %2 = vector.load %arg3[%c0_3, %c0_4, %c0_5] : memref<2x50x256xbf16, #tpu.memory_space<vmem>>, vector<1x50x256xbf16>
    %3 = vector.shape_cast %2 : vector<1x50x256xbf16> to vector<50x256xbf16>
    %4 = arith.mulf %3, %1 : vector<50x256xbf16>
    %cst = arith.constant dense<0.000000e+00> : vector<64x256xf32>
    %5 = tpu.matmul %0, %4, %cst {dimension_numbers = #tpu.dot_dimension_numbers<[1], [0], [0], [1], [0, 0, 1, 1], [], []>} : vector<64x50xbf16>, vector<50x256xbf16>, vector<64x256xf32> -> vector<64x256xf32>
    %6 = arith.truncf %5 : vector<64x256xf32> to vector<64x256xbf16>
    %c0_6 = arith.constant 0 : index
    %c0_7 = arith.constant 0 : index
    %c0_8 = arith.constant 0 : index
    %7 = vector.load %arg5[%c0_6, %c0_7, %c0_8] : memref<2x64x256xbf16, #tpu.memory_space<vmem>>, vector<1x64x256xbf16>
    %8 = vector.shape_cast %7 : vector<1x64x256xbf16> to vector<64x256xbf16>
    %9 = vector.shape_cast %6 : vector<64x256xbf16> to vector<1x64x256xbf16>
    tpu.vector_store %arg5[%c0_6, %c0_7, %c0_8], %9 {strides = array<i32>} : memref<2x64x256xbf16, #tpu.memory_space<vmem>>, vector<1x64x256xbf16>,
    %c1 = arith.constant 1 : index
    %c0_9 = arith.constant 0 : index
    %c0_10 = arith.constant 0 : index
    %10 = vector.load %arg3[%c1, %c0_9, %c0_10] : memref<2x50x256xbf16, #tpu.memory_space<vmem>>, vector<1x50x256xbf16>
    %11 = vector.shape_cast %10 : vector<1x50x256xbf16> to vector<50x256xbf16>
    %12 = arith.mulf %11, %1 : vector<50x256xbf16>
    %cst_11 = arith.constant dense<0.000000e+00> : vector<64x256xf32>
    %13 = tpu.matmul %0, %12, %cst_11 {dimension_numbers = #tpu.dot_dimension_numbers<[1], [0], [0], [1], [0, 0, 1, 1], [], []>} : vector<64x50xbf16>, vector<50x256xbf16>, vector<64x256xf32> -> vector<64x256xf32>
    %14 = arith.truncf %13 : vector<64x256xf32> to vector<64x256xbf16>
    %c1_12 = arith.constant 1 : index
    %c0_13 = arith.constant 0 : index
    %c0_14 = arith.constant 0 : index
    %15 = vector.load %arg5[%c1_12, %c0_13, %c0_14] : memref<2x64x256xbf16, #tpu.memory_space<vmem>>, vector<1x64x256xbf16>
    %16 = vector.shape_cast %15 : vector<1x64x256xbf16> to vector<64x256xbf16>
    %17 = vector.shape_cast %14 : vector<64x256xbf16> to vector<1x64x256xbf16>
    tpu.vector_store %arg5[%c1_12, %c0_13, %c0_14], %17 {strides = array<i32>} : memref<2x64x256xbf16, #tpu.memory_space<vmem>>, vector<1x64x256xbf16>,
    return
  }
  func.func @transform_0(%arg0: i32, %arg1: i32) -> (i32, i32) {
    %c0_i32 = arith.constant 0 : i32
    %c0_i32_0 = arith.constant 0 : i32
    %c0_i32_1 = arith.constant 0 : i32
    return %c0_i32, %c0_i32_0 : i32, i32
  }
  func.func @transform_1(%arg0: i32, %arg1: i32) -> (i32, i32, i32) {
    %c0_i32 = arith.constant 0 : i32
    %c0_i32_0 = arith.constant 0 : i32
    return %arg0, %c0_i32, %arg1 : i32, i32, i32
  }
  func.func @transform_2(%arg0: i32, %arg1: i32) -> (i32, i32) {
    %c0_i32 = arith.constant 0 : i32
    %c0_i32_0 = arith.constant 0 : i32
    return %c0_i32, %arg1 : i32, i32
  }
  func.func @transform_3(%arg0: i32, %arg1: i32) -> (i32, i32, i32) {
    %c0_i32 = arith.constant 0 : i32
    %c0_i32_0 = arith.constant 0 : i32
    return %arg0, %c0_i32, %arg1 : i32, i32, i32
  }
}

module attributes {stable_mosaic.version = 11 : i64} {
  func.func @_conv3x3_kernel(%arg0: i32, %arg1: i32, %arg2: i32, %arg3: memref<1x10x10x256xbf16, #tpu.memory_space<vmem>>, %arg4: memref<9x256x128xbf16, #tpu.memory_space<vmem>>, %arg5: memref<1x128xf32, #tpu.memory_space<vmem>>, %arg6: memref<1x128xf32, #tpu.memory_space<vmem>>, %arg7: memref<1x64x128xbf16, #tpu.memory_space<vmem>>, %arg8: memref<64x128xf32, #tpu.memory_space<vmem>>) attributes {dimension_semantics = [#tpu.dimension_semantics<parallel>, #tpu.dimension_semantics<parallel>, #tpu.dimension_semantics<arbitrary>], iteration_bounds = array<i64: 2, 1, 2>, scalar_prefetch = 0 : i64, scratch_operands = 1 : i64, tpu.core_type = #tpu.core_type<tc>, window_params = [{transform_indices = @transform_0, window_bounds = array<i64: 1, 10, 10, 256>}, {transform_indices = @transform_1, window_bounds = array<i64: 9, 256, 128>}, {transform_indices = @transform_2, window_bounds = array<i64: 1, 128>}, {transform_indices = @transform_3, window_bounds = array<i64: 1, 128>}, {transform_indices = @transform_4, window_bounds = array<i64: 1, 64, 128>}]} {
    %c0_i32 = arith.constant 0 : i32
    %0 = arith.cmpi eq, %arg2, %c0_i32 : i32
    %1 = arith.extui %0 : i1 to i32
    %c0_i32_0 = arith.constant 0 : i32
    %2 = arith.cmpi ne, %1, %c0_i32_0 : i32
    scf.if %2 {
      %cst_76 = arith.constant 0.000000e+00 : f32
      %84 = vector.broadcast %cst_76 : f32 to vector<64x128xf32>
      %c0_77 = arith.constant 0 : index
      %c0_78 = arith.constant 0 : index
      %85 = vector.load %arg8[%c0_77, %c0_78] : memref<64x128xf32, #tpu.memory_space<vmem>>, vector<64x128xf32>
      tpu.vector_store %arg8[%c0_77, %c0_78], %84 {strides = array<i32>} : memref<64x128xf32, #tpu.memory_space<vmem>>, vector<64x128xf32>,
    } else {
    }
    %c0 = arith.constant 0 : index
    %c0_1 = arith.constant 0 : index
    %c0_2 = arith.constant 0 : index
    %c0_3 = arith.constant 0 : index
    %3 = vector.load %arg3[%c0, %c0_1, %c0_2, %c0_3] : memref<1x10x10x256xbf16, #tpu.memory_space<vmem>>, vector<1x10x8x256xbf16>
    %4 = vector.shape_cast %3 : vector<1x10x8x256xbf16> to vector<10x8x256xbf16>
    %5 = vector.extract_strided_slice %4 {offsets = [0, 0, 0], sizes = [8, 8, 256], strides = [1, 1, 1]} : vector<10x8x256xbf16> to vector<8x8x256xbf16>
    %6 = vector.shape_cast %5 : vector<8x8x256xbf16> to vector<64x256xbf16>
    %c0_4 = arith.constant 0 : index
    %c0_5 = arith.constant 0 : index
    %7 = vector.load %arg8[%c0_4, %c0_5] : memref<64x128xf32, #tpu.memory_space<vmem>>, vector<64x128xf32>
    %c0_6 = arith.constant 0 : index
    %c0_7 = arith.constant 0 : index
    %c0_8 = arith.constant 0 : index
    %8 = vector.load %arg4[%c0_6, %c0_7, %c0_8] : memref<9x256x128xbf16, #tpu.memory_space<vmem>>, vector<1x256x128xbf16>
    %9 = vector.shape_cast %8 : vector<1x256x128xbf16> to vector<256x128xbf16>
    %cst = arith.constant dense<0.000000e+00> : vector<64x128xf32>
    %10 = tpu.matmul %6, %9, %cst {dimension_numbers = #tpu.dot_dimension_numbers<[1], [0], [0], [1], [0, 0, 1, 1], [], []>} : vector<64x256xbf16>, vector<256x128xbf16>, vector<64x128xf32> -> vector<64x128xf32>
    %11 = arith.addf %7, %10 : vector<64x128xf32>
    %c0_9 = arith.constant 0 : index
    %c0_10 = arith.constant 0 : index
    %12 = vector.load %arg8[%c0_9, %c0_10] : memref<64x128xf32, #tpu.memory_space<vmem>>, vector<64x128xf32>
    tpu.vector_store %arg8[%c0_9, %c0_10], %11 {strides = array<i32>} : memref<64x128xf32, #tpu.memory_space<vmem>>, vector<64x128xf32>,
    %13 = vector.extract_strided_slice %4 {offsets = [1, 0, 0], sizes = [8, 8, 256], strides = [1, 1, 1]} : vector<10x8x256xbf16> to vector<8x8x256xbf16>
    %14 = vector.shape_cast %13 : vector<8x8x256xbf16> to vector<64x256xbf16>
    %c0_11 = arith.constant 0 : index
    %c0_12 = arith.constant 0 : index
    %15 = vector.load %arg8[%c0_11, %c0_12] : memref<64x128xf32, #tpu.memory_space<vmem>>, vector<64x128xf32>
    %c3 = arith.constant 3 : index
    %c0_13 = arith.constant 0 : index
    %c0_14 = arith.constant 0 : index
    %16 = vector.load %arg4[%c3, %c0_13, %c0_14] : memref<9x256x128xbf16, #tpu.memory_space<vmem>>, vector<1x256x128xbf16>
    %17 = vector.shape_cast %16 : vector<1x256x128xbf16> to vector<256x128xbf16>
    %cst_15 = arith.constant dense<0.000000e+00> : vector<64x128xf32>
    %18 = tpu.matmul %14, %17, %cst_15 {dimension_numbers = #tpu.dot_dimension_numbers<[1], [0], [0], [1], [0, 0, 1, 1], [], []>} : vector<64x256xbf16>, vector<256x128xbf16>, vector<64x128xf32> -> vector<64x128xf32>
    %19 = arith.addf %15, %18 : vector<64x128xf32>
    %c0_16 = arith.constant 0 : index
    %c0_17 = arith.constant 0 : index
    %20 = vector.load %arg8[%c0_16, %c0_17] : memref<64x128xf32, #tpu.memory_space<vmem>>, vector<64x128xf32>
    tpu.vector_store %arg8[%c0_16, %c0_17], %19 {strides = array<i32>} : memref<64x128xf32, #tpu.memory_space<vmem>>, vector<64x128xf32>,
    %21 = vector.extract_strided_slice %4 {offsets = [2, 0, 0], sizes = [8, 8, 256], strides = [1, 1, 1]} : vector<10x8x256xbf16> to vector<8x8x256xbf16>
    %22 = vector.shape_cast %21 : vector<8x8x256xbf16> to vector<64x256xbf16>
    %c0_18 = arith.constant 0 : index
    %c0_19 = arith.constant 0 : index
    %23 = vector.load %arg8[%c0_18, %c0_19] : memref<64x128xf32, #tpu.memory_space<vmem>>, vector<64x128xf32>
    %c6 = arith.constant 6 : index
    %c0_20 = arith.constant 0 : index
    %c0_21 = arith.constant 0 : index
    %24 = vector.load %arg4[%c6, %c0_20, %c0_21] : memref<9x256x128xbf16, #tpu.memory_space<vmem>>, vector<1x256x128xbf16>
    %25 = vector.shape_cast %24 : vector<1x256x128xbf16> to vector<256x128xbf16>
    %cst_22 = arith.constant dense<0.000000e+00> : vector<64x128xf32>
    %26 = tpu.matmul %22, %25, %cst_22 {dimension_numbers = #tpu.dot_dimension_numbers<[1], [0], [0], [1], [0, 0, 1, 1], [], []>} : vector<64x256xbf16>, vector<256x128xbf16>, vector<64x128xf32> -> vector<64x128xf32>
    %27 = arith.addf %23, %26 : vector<64x128xf32>
    %c0_23 = arith.constant 0 : index
    %c0_24 = arith.constant 0 : index
    %28 = vector.load %arg8[%c0_23, %c0_24] : memref<64x128xf32, #tpu.memory_space<vmem>>, vector<64x128xf32>
    tpu.vector_store %arg8[%c0_23, %c0_24], %27 {strides = array<i32>} : memref<64x128xf32, #tpu.memory_space<vmem>>, vector<64x128xf32>,
    %c0_25 = arith.constant 0 : index
    %c0_26 = arith.constant 0 : index
    %c1 = arith.constant 1 : index
    %c0_27 = arith.constant 0 : index
    %29 = vector.load %arg3[%c0_25, %c0_26, %c1, %c0_27] : memref<1x10x10x256xbf16, #tpu.memory_space<vmem>>, vector<1x10x8x256xbf16>
    %30 = vector.shape_cast %29 : vector<1x10x8x256xbf16> to vector<10x8x256xbf16>
    %31 = vector.extract_strided_slice %30 {offsets = [0, 0, 0], sizes = [8, 8, 256], strides = [1, 1, 1]} : vector<10x8x256xbf16> to vector<8x8x256xbf16>
    %32 = vector.shape_cast %31 : vector<8x8x256xbf16> to vector<64x256xbf16>
    %c0_28 = arith.constant 0 : index
    %c0_29 = arith.constant 0 : index
    %33 = vector.load %arg8[%c0_28, %c0_29] : memref<64x128xf32, #tpu.memory_space<vmem>>, vector<64x128xf32>
    %c1_30 = arith.constant 1 : index
    %c0_31 = arith.constant 0 : index
    %c0_32 = arith.constant 0 : index
    %34 = vector.load %arg4[%c1_30, %c0_31, %c0_32] : memref<9x256x128xbf16, #tpu.memory_space<vmem>>, vector<1x256x128xbf16>
    %35 = vector.shape_cast %34 : vector<1x256x128xbf16> to vector<256x128xbf16>
    %cst_33 = arith.constant dense<0.000000e+00> : vector<64x128xf32>
    %36 = tpu.matmul %32, %35, %cst_33 {dimension_numbers = #tpu.dot_dimension_numbers<[1], [0], [0], [1], [0, 0, 1, 1], [], []>} : vector<64x256xbf16>, vector<256x128xbf16>, vector<64x128xf32> -> vector<64x128xf32>
    %37 = arith.addf %33, %36 : vector<64x128xf32>
    %c0_34 = arith.constant 0 : index
    %c0_35 = arith.constant 0 : index
    %38 = vector.load %arg8[%c0_34, %c0_35] : memref<64x128xf32, #tpu.memory_space<vmem>>, vector<64x128xf32>
    tpu.vector_store %arg8[%c0_34, %c0_35], %37 {strides = array<i32>} : memref<64x128xf32, #tpu.memory_space<vmem>>, vector<64x128xf32>,
    %39 = vector.extract_strided_slice %30 {offsets = [1, 0, 0], sizes = [8, 8, 256], strides = [1, 1, 1]} : vector<10x8x256xbf16> to vector<8x8x256xbf16>
    %40 = vector.shape_cast %39 : vector<8x8x256xbf16> to vector<64x256xbf16>
    %c0_36 = arith.constant 0 : index
    %c0_37 = arith.constant 0 : index
    %41 = vector.load %arg8[%c0_36, %c0_37] : memref<64x128xf32, #tpu.memory_space<vmem>>, vector<64x128xf32>
    %c4 = arith.constant 4 : index
    %c0_38 = arith.constant 0 : index
    %c0_39 = arith.constant 0 : index
    %42 = vector.load %arg4[%c4, %c0_38, %c0_39] : memref<9x256x128xbf16, #tpu.memory_space<vmem>>, vector<1x256x128xbf16>
    %43 = vector.shape_cast %42 : vector<1x256x128xbf16> to vector<256x128xbf16>
    %cst_40 = arith.constant dense<0.000000e+00> : vector<64x128xf32>
    %44 = tpu.matmul %40, %43, %cst_40 {dimension_numbers = #tpu.dot_dimension_numbers<[1], [0], [0], [1], [0, 0, 1, 1], [], []>} : vector<64x256xbf16>, vector<256x128xbf16>, vector<64x128xf32> -> vector<64x128xf32>
    %45 = arith.addf %41, %44 : vector<64x128xf32>
    %c0_41 = arith.constant 0 : index
    %c0_42 = arith.constant 0 : index
    %46 = vector.load %arg8[%c0_41, %c0_42] : memref<64x128xf32, #tpu.memory_space<vmem>>, vector<64x128xf32>
    tpu.vector_store %arg8[%c0_41, %c0_42], %45 {strides = array<i32>} : memref<64x128xf32, #tpu.memory_space<vmem>>, vector<64x128xf32>,
    %47 = vector.extract_strided_slice %30 {offsets = [2, 0, 0], sizes = [8, 8, 256], strides = [1, 1, 1]} : vector<10x8x256xbf16> to vector<8x8x256xbf16>
    %48 = vector.shape_cast %47 : vector<8x8x256xbf16> to vector<64x256xbf16>
    %c0_43 = arith.constant 0 : index
    %c0_44 = arith.constant 0 : index
    %49 = vector.load %arg8[%c0_43, %c0_44] : memref<64x128xf32, #tpu.memory_space<vmem>>, vector<64x128xf32>
    %c7 = arith.constant 7 : index
    %c0_45 = arith.constant 0 : index
    %c0_46 = arith.constant 0 : index
    %50 = vector.load %arg4[%c7, %c0_45, %c0_46] : memref<9x256x128xbf16, #tpu.memory_space<vmem>>, vector<1x256x128xbf16>
    %51 = vector.shape_cast %50 : vector<1x256x128xbf16> to vector<256x128xbf16>
    %cst_47 = arith.constant dense<0.000000e+00> : vector<64x128xf32>
    %52 = tpu.matmul %48, %51, %cst_47 {dimension_numbers = #tpu.dot_dimension_numbers<[1], [0], [0], [1], [0, 0, 1, 1], [], []>} : vector<64x256xbf16>, vector<256x128xbf16>, vector<64x128xf32> -> vector<64x128xf32>
    %53 = arith.addf %49, %52 : vector<64x128xf32>
    %c0_48 = arith.constant 0 : index
    %c0_49 = arith.constant 0 : index
    %54 = vector.load %arg8[%c0_48, %c0_49] : memref<64x128xf32, #tpu.memory_space<vmem>>, vector<64x128xf32>
    tpu.vector_store %arg8[%c0_48, %c0_49], %53 {strides = array<i32>} : memref<64x128xf32, #tpu.memory_space<vmem>>, vector<64x128xf32>,
    %c0_50 = arith.constant 0 : index
    %c0_51 = arith.constant 0 : index
    %c2 = arith.constant 2 : index
    %c0_52 = arith.constant 0 : index
    %55 = vector.load %arg3[%c0_50, %c0_51, %c2, %c0_52] : memref<1x10x10x256xbf16, #tpu.memory_space<vmem>>, vector<1x10x8x256xbf16>
    %56 = vector.shape_cast %55 : vector<1x10x8x256xbf16> to vector<10x8x256xbf16>
    %57 = vector.extract_strided_slice %56 {offsets = [0, 0, 0], sizes = [8, 8, 256], strides = [1, 1, 1]} : vector<10x8x256xbf16> to vector<8x8x256xbf16>
    %58 = vector.shape_cast %57 : vector<8x8x256xbf16> to vector<64x256xbf16>
    %c0_53 = arith.constant 0 : index
    %c0_54 = arith.constant 0 : index
    %59 = vector.load %arg8[%c0_53, %c0_54] : memref<64x128xf32, #tpu.memory_space<vmem>>, vector<64x128xf32>
    %c2_55 = arith.constant 2 : index
    %c0_56 = arith.constant 0 : index
    %c0_57 = arith.constant 0 : index
    %60 = vector.load %arg4[%c2_55, %c0_56, %c0_57] : memref<9x256x128xbf16, #tpu.memory_space<vmem>>, vector<1x256x128xbf16>
    %61 = vector.shape_cast %60 : vector<1x256x128xbf16> to vector<256x128xbf16>
    %cst_58 = arith.constant dense<0.000000e+00> : vector<64x128xf32>
    %62 = tpu.matmul %58, %61, %cst_58 {dimension_numbers = #tpu.dot_dimension_numbers<[1], [0], [0], [1], [0, 0, 1, 1], [], []>} : vector<64x256xbf16>, vector<256x128xbf16>, vector<64x128xf32> -> vector<64x128xf32>
    %63 = arith.addf %59, %62 : vector<64x128xf32>
    %c0_59 = arith.constant 0 : index
    %c0_60 = arith.constant 0 : index
    %64 = vector.load %arg8[%c0_59, %c0_60] : memref<64x128xf32, #tpu.memory_space<vmem>>, vector<64x128xf32>
    tpu.vector_store %arg8[%c0_59, %c0_60], %63 {strides = array<i32>} : memref<64x128xf32, #tpu.memory_space<vmem>>, vector<64x128xf32>,
    %65 = vector.extract_strided_slice %56 {offsets = [1, 0, 0], sizes = [8, 8, 256], strides = [1, 1, 1]} : vector<10x8x256xbf16> to vector<8x8x256xbf16>
    %66 = vector.shape_cast %65 : vector<8x8x256xbf16> to vector<64x256xbf16>
    %c0_61 = arith.constant 0 : index
    %c0_62 = arith.constant 0 : index
    %67 = vector.load %arg8[%c0_61, %c0_62] : memref<64x128xf32, #tpu.memory_space<vmem>>, vector<64x128xf32>
    %c5 = arith.constant 5 : index
    %c0_63 = arith.constant 0 : index
    %c0_64 = arith.constant 0 : index
    %68 = vector.load %arg4[%c5, %c0_63, %c0_64] : memref<9x256x128xbf16, #tpu.memory_space<vmem>>, vector<1x256x128xbf16>
    %69 = vector.shape_cast %68 : vector<1x256x128xbf16> to vector<256x128xbf16>
    %cst_65 = arith.constant dense<0.000000e+00> : vector<64x128xf32>
    %70 = tpu.matmul %66, %69, %cst_65 {dimension_numbers = #tpu.dot_dimension_numbers<[1], [0], [0], [1], [0, 0, 1, 1], [], []>} : vector<64x256xbf16>, vector<256x128xbf16>, vector<64x128xf32> -> vector<64x128xf32>
    %71 = arith.addf %67, %70 : vector<64x128xf32>
    %c0_66 = arith.constant 0 : index
    %c0_67 = arith.constant 0 : index
    %72 = vector.load %arg8[%c0_66, %c0_67] : memref<64x128xf32, #tpu.memory_space<vmem>>, vector<64x128xf32>
    tpu.vector_store %arg8[%c0_66, %c0_67], %71 {strides = array<i32>} : memref<64x128xf32, #tpu.memory_space<vmem>>, vector<64x128xf32>,
    %73 = vector.extract_strided_slice %56 {offsets = [2, 0, 0], sizes = [8, 8, 256], strides = [1, 1, 1]} : vector<10x8x256xbf16> to vector<8x8x256xbf16>
    %74 = vector.shape_cast %73 : vector<8x8x256xbf16> to vector<64x256xbf16>
    %c0_68 = arith.constant 0 : index
    %c0_69 = arith.constant 0 : index
    %75 = vector.load %arg8[%c0_68, %c0_69] : memref<64x128xf32, #tpu.memory_space<vmem>>, vector<64x128xf32>
    %c8 = arith.constant 8 : index
    %c0_70 = arith.constant 0 : index
    %c0_71 = arith.constant 0 : index
    %76 = vector.load %arg4[%c8, %c0_70, %c0_71] : memref<9x256x128xbf16, #tpu.memory_space<vmem>>, vector<1x256x128xbf16>
    %77 = vector.shape_cast %76 : vector<1x256x128xbf16> to vector<256x128xbf16>
    %cst_72 = arith.constant dense<0.000000e+00> : vector<64x128xf32>
    %78 = tpu.matmul %74, %77, %cst_72 {dimension_numbers = #tpu.dot_dimension_numbers<[1], [0], [0], [1], [0, 0, 1, 1], [], []>} : vector<64x256xbf16>, vector<256x128xbf16>, vector<64x128xf32> -> vector<64x128xf32>
    %79 = arith.addf %75, %78 : vector<64x128xf32>
    %c0_73 = arith.constant 0 : index
    %c0_74 = arith.constant 0 : index
    %80 = vector.load %arg8[%c0_73, %c0_74] : memref<64x128xf32, #tpu.memory_space<vmem>>, vector<64x128xf32>
    tpu.vector_store %arg8[%c0_73, %c0_74], %79 {strides = array<i32>} : memref<64x128xf32, #tpu.memory_space<vmem>>, vector<64x128xf32>,
    %c1_i32 = arith.constant 1 : i32
    %81 = arith.cmpi eq, %arg2, %c1_i32 : i32
    %82 = arith.extui %81 : i1 to i32
    %c0_i32_75 = arith.constant 0 : i32
    %83 = arith.cmpi ne, %82, %c0_i32_75 : i32
    scf.if %83 {
      %c0_76 = arith.constant 0 : index
      %c0_77 = arith.constant 0 : index
      %84 = vector.load %arg8[%c0_76, %c0_77] : memref<64x128xf32, #tpu.memory_space<vmem>>, vector<64x128xf32>
      %c0_78 = arith.constant 0 : index
      %c0_79 = arith.constant 0 : index
      %85 = vector.load %arg5[%c0_78, %c0_79] : memref<1x128xf32, #tpu.memory_space<vmem>>, vector<1x128xf32>
      %86 = vector.broadcast %85 : vector<1x128xf32> to vector<64x128xf32>
      %87 = arith.mulf %84, %86 : vector<64x128xf32>
      %c0_80 = arith.constant 0 : index
      %c0_81 = arith.constant 0 : index
      %88 = vector.load %arg6[%c0_80, %c0_81] : memref<1x128xf32, #tpu.memory_space<vmem>>, vector<1x128xf32>
      %89 = vector.broadcast %88 : vector<1x128xf32> to vector<64x128xf32>
      %90 = arith.addf %87, %89 : vector<64x128xf32>
      %cst_82 = arith.constant 0.000000e+00 : f32
      %91 = vector.broadcast %cst_82 : f32 to vector<64x128xf32>
      %92 = arith.maximumf %90, %91 : vector<64x128xf32>
      %93 = arith.truncf %92 : vector<64x128xf32> to vector<64x128xbf16>
      %c0_83 = arith.constant 0 : index
      %c0_84 = arith.constant 0 : index
      %c0_85 = arith.constant 0 : index
      %94 = vector.load %arg7[%c0_83, %c0_84, %c0_85] : memref<1x64x128xbf16, #tpu.memory_space<vmem>>, vector<1x64x128xbf16>
      %95 = vector.shape_cast %94 : vector<1x64x128xbf16> to vector<64x128xbf16>
      %96 = vector.shape_cast %93 : vector<64x128xbf16> to vector<1x64x128xbf16>
      tpu.vector_store %arg7[%c0_83, %c0_84, %c0_85], %96 {strides = array<i32>} : memref<1x64x128xbf16, #tpu.memory_space<vmem>>, vector<1x64x128xbf16>,
    } else {
    }
    return
  }
  func.func @transform_0(%arg0: i32, %arg1: i32, %arg2: i32) -> (i32, i32, i32, i32) {
    %c0_i32 = arith.constant 0 : i32
    %c0_i32_0 = arith.constant 0 : i32
    %c0_i32_1 = arith.constant 0 : i32
    return %arg0, %c0_i32, %c0_i32_0, %arg2 : i32, i32, i32, i32
  }
  func.func @transform_1(%arg0: i32, %arg1: i32, %arg2: i32) -> (i32, i32, i32) {
    %c0_i32 = arith.constant 0 : i32
    %c0_i32_0 = arith.constant 0 : i32
    return %c0_i32, %arg2, %arg1 : i32, i32, i32
  }
  func.func @transform_2(%arg0: i32, %arg1: i32, %arg2: i32) -> (i32, i32) {
    %c0_i32 = arith.constant 0 : i32
    %c0_i32_0 = arith.constant 0 : i32
    return %c0_i32, %arg1 : i32, i32
  }
  func.func @transform_3(%arg0: i32, %arg1: i32, %arg2: i32) -> (i32, i32) {
    %c0_i32 = arith.constant 0 : i32
    %c0_i32_0 = arith.constant 0 : i32
    return %c0_i32, %arg1 : i32, i32
  }
  func.func @transform_4(%arg0: i32, %arg1: i32, %arg2: i32) -> (i32, i32, i32) {
    %c0_i32 = arith.constant 0 : i32
    %c0_i32_0 = arith.constant 0 : i32
    return %arg0, %c0_i32, %arg1 : i32, i32, i32
  }
}

</mosaic_0001>

<bundles_post_ra>
// kernel: pspnet_forward.15
= control target key start
LH: loop header
LB: loop body
LE: loop exit
PB: predicated region body
PF: predicated region fallthrough
CT: control target
= control target key end

     0   :  { %7 = vsyncpa [#allocation3], 0  ;;  %s311_s9 = smov [#allocation2]   ;;  %s385_s0 = inlined_call_operand.hbm [shape: bf16[8,64], index: 0, kind: input, shape index: {}]   ;;  %s386_s1 = inlined_call_operand.vmem [shape: bf16[2,64,256], index: 1, kind: input, shape index: {}]   ;;  %s387_s2 = inlined_call_operand.vmem [shape: bf16[2,8,256], index: 2, kind: output, shape index: {}]  }
   0x1   :  { %s14_s10 = sshll.u32 %s311_s9, 4  ;;  %s15_s10 = int_to_ptr.vmem [resolvable:$true] %s14_s10 }
   0x2   :  { %s297_s11 = scalar_lea.vmem %s15_s10, 64  ;;  %p302_p1 = scmp.lt.s32.totalorder %s15_s10, %s15_s10 }
   0x3   :  { %p298_p0 = scmp.ne.s32.totalorder %s15_s10, %s297_s11  ;;  %p303_p2 = scmp.lt.s32.totalorder %s297_s11, %s297_s11 }
   0x5   :  { %p304_p3 = por %p303_p2, %p302_p1 }
   0x7   :  { %p305_p4 = pnand %p304_p3, %p298_p0 }
   0x9   :  { %308 = shalt.err (!%p305_p4)
}
   0xa   :  { %17 = dma.hbm_to_vmem [thread:$0]  %s385_s0, 64, %s15_s10, [#allocation3]  }
   0xb   :  { %309 = dma.done.wait [#allocation3], 64  }
   0xc   :  { %310 = vsyncadd [#allocation3], 4294967232  ;;  %v312_v0 = vmov 0   ;;  %v265_v1 = vld [vmem:[%s386_s1 + $0x34] ss:$8 sps:$4 sm:$0xff]   ;;  %vm73_vm0 = vcmask 523264  }
   0xd   :  { %109 = vmatprep.mubr.bf16.mxu0 %v312_v0  ;;  %208 = vmatprep.mubr.bf16.mxu1 %v312_v0  ;;  %v267_v2 = vld [vmem:[%s386_s1 + $0x74] ss:$8 sps:$4 sm:$0xff]   ;;  %v269_v3 = vld [vmem:[%s386_s1 + $0x30] ss:$8 sps:$4 sm:$0xff]   ;;  %v271_v5 = vld [vmem:[%s386_s1 + $0x24] ss:$8 sps:$4 sm:$0xff]  }
   0xe   :  { %85 = vmatprep.subr.bf16.mxu0 %v265_v1  ;;  %v270_v4 = vld [vmem:[%s386_s1 + $0x70] ss:$8 sps:$4 sm:$0xff]   ;;  %184 = vmatprep.subr.bf16.mxu1 %v267_v2  ;;  %v273_v6 = vld [vmem:[%s386_s1 + $0x64] ss:$8 sps:$4 sm:$0xff]   ;;  %v275_v7 = vld [vmem:[%s386_s1 + $0x20] ss:$8 sps:$4 sm:$0xff]  }
   0xf   :  { %86 = vmatpush1.bf16.msra.mxu0 %v269_v3  ;;  %185 = vmatpush1.bf16.msra.mxu1 %v270_v4  ;;  %v276_v8 = vld [vmem:[%s386_s1 + $0x60] ss:$8 sps:$4 sm:$0xff]   ;;  %v277_v9 = vld [vmem:[%s386_s1 + $0x14] ss:$8 sps:$4 sm:$0xff]   ;;  %v281_v11 = vld [vmem:[%s386_s1 + $0x10] ss:$8 sps:$4 sm:$0xff]  }
  0x10   :  { %87 = vmatprep.subr.bf16.mxu0 %v271_v5  ;;  %186 = vmatprep.subr.bf16.mxu1 %v273_v6  ;;  %v279_v10 = vld [vmem:[%s386_s1 + $0x54] ss:$8 sps:$4 sm:$0xff]   ;;  %v282_v12 = vld [vmem:[%s386_s1 + $0x50] ss:$8 sps:$4 sm:$0xff]   ;;  %v283_v13 = vld [vmem:[%s386_s1 + $0x4] ss:$8 sps:$4 sm:$0xff]  }
  0x11   :  { %v285_v14 = vld [vmem:[%s386_s1 + $0x44] ss:$8 sps:$4 sm:$0xff]   ;;  %v287_v15 = vld [vmem:[%s386_s1] ss:$8 sps:$4 sm:$0xff]  }
  0x12   :  { %v288_v16 = vld [vmem:[%s386_s1 + $0x40] ss:$8 sps:$4 sm:$0xff]  }
  0x13   :  { %88 = vmatpush1.bf16.msra.mxu0 %v275_v7  ;;  %187 = vmatpush1.bf16.msra.mxu1 %v276_v8  ;;  %v24_v17 = vld [vmem:[#allocation2] sm:$0xf] }
  0x14   :  { %89 = vmatprep.subr.bf16.mxu0 %v277_v9  ;;  %188 = vmatprep.subr.bf16.mxu1 %v279_v10 }
  0x17   :  { %90 = vmatpush1.bf16.msra.mxu0 %v281_v11  ;;  %189 = vmatpush1.bf16.msra.mxu1 %v282_v12 }
  0x18   :  { %91 = vmatprep.subr.bf16.mxu0 %v283_v13  ;;  %190 = vmatprep.subr.bf16.mxu1 %v285_v14 }
  0x1b   :  { %92 = vmatpush1.bf16.msra.mxu0 %v287_v15  ;;  %191 = vmatpush1.bf16.msra.mxu1 %v288_v16 }
  0x1e   :  { %240 = vmatmul.mubr.msk.bf16.vlgmr.msra.gmra.mxu0 %vm73_vm0, %v24_v17  ;;  %258 = vmatmul.mubr.msk.bf16.vlgmr.msra.gmra.mxu1 %vm73_vm0, %v24_v17 }
  0xde   :  { %v111_v18 = vpop.f32.mrf.mxu0  ;;  %v210_v19 = vpop.f32.mrf.mxu1 }
  0xe0   :  { %v113_v20 = vpop.f32.mrf.mxu0  ;;  %v212_v21 = vpop.f32.mrf.mxu1 }
  0xe1   :  { %v261_v22 = vpack.c.bf16 %v113_v20, %v111_v18  ;;  %v262_v23 = vpack.c.bf16 %v212_v21, %v210_v19 }
  0xe2   :  { %v115_v24 = vpop.f32.mrf.mxu0  ;;  %v214_v25 = vpop.f32.mrf.mxu1 }
  0xe3   :  { %126 = vst [vmem:[%s387_s2] sm:$0xff] %v261_v22  ;;  %260 = vst [vmem:[%s387_s2 + $0x8] sm:$0xff] %v262_v23 }
  0xe4   :  { %v116_v26 = vpop.f32.mrf.mxu0  ;;  %v215_v27 = vpop.f32.mrf.mxu1 }
  0xe5   :  { %231 = vsyncpa [#allocation3], 1 }

// kernel: pspnet_forward.16
= control target key start
LH: loop header
LB: loop body
LE: loop exit
PB: predicated region body
PF: predicated region fallthrough
CT: control target
= control target key end

     0   :  { %9 = vsyncpa [#allocation4], 0  ;;  %s358_s15 = smov [#allocation3]   ;;  %s404_s0 = inlined_call_operand.vmem [shape: bf16[16,256], index: 0, kind: input, shape index: {}]   ;;  %s405_s1 = inlined_call_operand.hbm [shape: bf16[256,128], index: 1, kind: input, shape index: {}]   ;;  %s406_s2 = inlined_call_operand.vmem [shape: f32[1,128], index: 2, kind: input, shape index: {}]   ;;  %s407_s3 = inlined_call_operand.vmem [shape: f32[1,128], index: 3, kind: input, shape index: {}]   ;;  %s408_s4 = inlined_call_operand.vmem [shape: bf16[16,128], index: 4, kind: output, shape index: {}]  }
   0x1   :  { %s17_s16 = sshll.u32 %s358_s15, 4  ;;  %s18_s16 = int_to_ptr.vmem [resolvable:$true] %s17_s16 }
   0x2   :  { %s344_s17 = scalar_lea.vmem %s18_s16, 2048  ;;  %p349_p1 = scmp.lt.s32.totalorder %s18_s16, %s18_s16 }
   0x3   :  { %p345_p0 = scmp.ne.s32.totalorder %s18_s16, %s344_s17  ;;  %p350_p2 = scmp.lt.s32.totalorder %s344_s17, %s344_s17 }
   0x5   :  { %p351_p3 = por %p350_p2, %p349_p1 }
   0x7   :  { %p352_p4 = pnand %p351_p3, %p345_p0 }
   0x9   :  { %355 = shalt.err (!%p352_p4)
}
   0xa   :  { %s359_s18 = smov 64   ;;  %s360_s19 = smov 4  }
   0xb   :  { %23 = dma.hbm_to_vmem [thread:$0]  %s405_s1, 2048, %s18_s16, [#allocation4], %s359_s18, %s359_s18, %s360_s19  }
   0xc   :  { %356 = dma.done.wait [#allocation4], 2048  }
   0xd   :  { %357 = vsyncadd [#allocation4], 4294965248  ;;  %v317_v0 = vld [vmem:[#allocation3 + $0x78] sm:$0xff]   ;;  %v319_v2 = vld [vmem:[#allocation3 + $0x70] sm:$0xff]  }
   0xe   :  { %v318_v1 = vld [vmem:[#allocation3 + $0x38] sm:$0xff]   ;;  %292 = vmatprep.subr.bf16.mxu0 %v317_v0  ;;  %v320_v3 = vld [vmem:[#allocation3 + $0x30] sm:$0xff]   ;;  %v321_v4 = vld [vmem:[#allocation3 + $0x68] sm:$0xff]  }
   0xf   :  { %293 = vmatpush3.bf16.msra.mxu0 %v318_v1  ;;  %v322_v5 = vld [vmem:[#allocation3 + $0x28] sm:$0xff]   ;;  %v323_v6 = vld [vmem:[#allocation3 + $0x60] sm:$0xff]   ;;  %v325_v8 = vld [vmem:[#allocation3 + $0x58] sm:$0xff]  }
  0x10   :  { %294 = vmatprep.subr.bf16.mxu0 %v319_v2  ;;  %v324_v7 = vld [vmem:[#allocation3 + $0x20] sm:$0xff]   ;;  %v326_v9 = vld [vmem:[#allocation3 + $0x18] sm:$0xff]   ;;  %v327_v10 = vld [vmem:[#allocation3 + $0x50] sm:$0xff]  }
  0x11   :  { %v335_v11 = vld [vmem:[%s404_s0 + $0x4] ss:$8 sps:$4 sm:$0xff]   ;;  %v328_v12 = vld [vmem:[#allocation3 + $0x10] sm:$0xff]   ;;  %v333_v17 = vld [vmem:[%s404_s0] ss:$8 sps:$4 sm:$0xff]  }
  0x12   :  { %212 = vmatprep.mubr.bf16.mxu0 %v335_v11  ;;  %v329_v13 = vld [vmem:[#allocation3 + $0x48] sm:$0xff]   ;;  %v331_v15 = vld [vmem:[#allocation3 + $0x40] sm:$0xff]  }
  0x13   :  { %295 = vmatpush3.bf16.msra.mxu0 %v320_v3  ;;  %v330_v14 = vld [vmem:[#allocation3 + $0x8] sm:$0xff]   ;;  %v332_v16 = vld [vmem:[#allocation3] sm:$0xff]  }
  0x14   :  { %296 = vmatprep.subr.bf16.mxu0 %v321_v4  ;;  %v281_v21 = vld [vmem:[%s406_s2] ss:$0 sm:$0xff] }
  0x15   :  { %v282_v26 = vld [vmem:[%s407_s3] ss:$0 sm:$0xff] }
  0x17   :  { %297 = vmatpush3.bf16.msra.mxu0 %v322_v5 }
  0x18   :  { %298 = vmatprep.subr.bf16.mxu0 %v323_v6 }
  0x1b   :  { %299 = vmatpush3.bf16.msra.mxu0 %v324_v7 }
  0x1c   :  { %300 = vmatprep.subr.bf16.mxu0 %v325_v8 }
  0x1f   :  { %301 = vmatpush3.bf16.msra.mxu0 %v326_v9 }
  0x20   :  { %302 = vmatprep.subr.bf16.mxu0 %v327_v10 }
  0x23   :  { %303 = vmatpush3.bf16.msra.mxu0 %v328_v12 }
  0x24   :  { %304 = vmatprep.subr.bf16.mxu0 %v329_v13 }
  0x27   :  { %305 = vmatpush3.bf16.msra.mxu0 %v330_v14 }
  0x28   :  { %306 = vmatprep.subr.bf16.mxu0 %v331_v15 }
  0x2b   :  { %307 = vmatpush3.bf16.msra.mxu0 %v332_v16 }
  0x2e   :  { %213 = vmatmul.mubr.bf16.vlgmr.msra.gmra.mxu0 %v333_v17 }
  0xee   :  { %v308_v18 = vpop.f32.mrf.mxu0 }
  0xf0   :  { %v309_v19 = vpop.f32.mrf.mxu0 }
  0xf1   :  { %v310_v20 = vadd.f32 %v309_v19, %v308_v18 }
  0xf2   :  { %v311_v22 = vpop.f32.mrf.mxu0 }
  0xf3   :  { %v237_v24 = vmul.f32 %v310_v20, %v281_v21 }
  0xf4   :  { %v312_v23 = vpop.f32.mrf.mxu0 }
  0xf5   :  { %v313_v25 = vadd.f32 %v312_v23, %v311_v22  ;;  %v246_v28 = vadd.f32 %v282_v26, %v237_v24 }
  0xf7   :  { %v238_v27 = vmul.f32 %v313_v25, %v281_v21 }
  0xf9   :  { %v247_v29 = vadd.f32 %v282_v26, %v238_v27 }
  0xfb   :  { %v290_v30 = vpack.c.bf16 %v247_v29, %v246_v28 }
  0xfd   :  { %291 = vst [vmem:[%s408_s4] sm:$0xff] %v290_v30  }
  0xfe   :  { %262 = vsyncpa [#allocation4], 1 }

// kernel: pspnet_forward.27
= control target key start
LH: loop header
LB: loop body
LE: loop exit
PB: predicated region body
PF: predicated region fallthrough
CT: control target
= control target key end

     0   :  { %s740_s1 = inlined_call_operand.vmem [shape: bf16[128,128], index: 1, kind: input, shape index: {}]   ;;  %s741_s0 = inlined_call_operand.vmem [shape: bf16[128,128], index: 0, kind: input, shape index: {}]   ;;  %s742_s2 = inlined_call_operand.vmem [shape: f32[1,128], index: 2, kind: input, shape index: {}]   ;;  %s743_s3 = inlined_call_operand.vmem [shape: f32[1,128], index: 3, kind: input, shape index: {}]   ;;  %s744_s4 = inlined_call_operand.vmem [shape: bf16[128,128], index: 4, kind: output, shape index: {}]  }
   0x1   :  { %v621_v0 = vld [vmem:[%s740_s1 + $0x38] sm:$0xff]   ;;  %v622_v1 = vld [vmem:[%s740_s1 + $0x30] sm:$0xff]   ;;  %v623_v2 = vld [vmem:[%s740_s1 + $0x28] sm:$0xff]  }
   0x2   :  { %573 = vmatprep.subr.bf16.mxu0 %v621_v0  ;;  %605 = vmatprep.subr.bf16.mxu1 %v621_v0  ;;  %v624_v3 = vld [vmem:[%s740_s1 + $0x20] sm:$0xff]   ;;  %v625_v6 = vld [vmem:[%s740_s1 + $0x18] sm:$0xff]   ;;  %v626_v7 = vld [vmem:[%s740_s1 + $0x10] sm:$0xff]  }
   0x3   :  { %574 = vmatpush3.bf16.msra.mxu0 %v621_v0  ;;  %613 = vmatpush3.bf16.msra.mxu1 %v621_v0  ;;  %v629_v4 = vld [vmem:[%s741_s0] sm:$0xff]   ;;  %v627_v8 = vld [vmem:[%s740_s1 + $0x8] sm:$0xff]   ;;  %v633_v12 = vld [vmem:[%s741_s0 + $0x10] sm:$0xff]  }
   0x4   :  { %575 = vmatprep.subr.bf16.mxu0 %v622_v1  ;;  %606 = vmatprep.subr.bf16.mxu1 %v622_v1  ;;  %v630_v5 = vld [vmem:[%s741_s0 + $0x20] sm:$0xff]   ;;  %v631_v10 = vld [vmem:[%s741_s0 + $0x8] sm:$0xff]   ;;  %v634_v13 = vld [vmem:[%s741_s0 + $0x30] sm:$0xff]  }
   0x5   :  { %589 = vmatprep.mubr.bf16.mxu0 %v629_v4  ;;  %597 = vmatprep.mubr.bf16.mxu1 %v630_v5  ;;  %v628_v9 = vld [vmem:[%s740_s1] sm:$0xff]   ;;  %v632_v11 = vld [vmem:[%s741_s0 + $0x28] sm:$0xff]   ;;  %v635_v14 = vld [vmem:[%s741_s0 + $0x18] sm:$0xff]  }
   0x6   :  { %v636_v15 = vld [vmem:[%s741_s0 + $0x38] sm:$0xff]   ;;  %v476_v16 = vld [vmem:[%s742_s2] ss:$0 sm:$0xff] }
   0x7   :  { %576 = vmatpush3.bf16.msra.mxu0 %v622_v1  ;;  %614 = vmatpush3.bf16.msra.mxu1 %v622_v1  ;;  %v477_v23 = vld [vmem:[%s743_s3] ss:$0 sm:$0xff] }
   0x8   :  { %577 = vmatprep.subr.bf16.mxu0 %v623_v2  ;;  %607 = vmatprep.subr.bf16.mxu1 %v623_v2 }
   0xb   :  { %578 = vmatpush3.bf16.msra.mxu0 %v623_v2  ;;  %615 = vmatpush3.bf16.msra.mxu1 %v623_v2 }
   0xc   :  { %579 = vmatprep.subr.bf16.mxu0 %v624_v3  ;;  %608 = vmatprep.subr.bf16.mxu1 %v624_v3 }
   0xf   :  { %580 = vmatpush3.bf16.msra.mxu0 %v624_v3  ;;  %616 = vmatpush3.bf16.msra.mxu1 %v624_v3 }
  0x10   :  { %581 = vmatprep.subr.bf16.mxu0 %v625_v6  ;;  %609 = vmatprep.subr.bf16.mxu1 %v625_v6 }
  0x13   :  { %582 = vmatpush3.bf16.msra.mxu0 %v625_v6  ;;  %617 = vmatpush3.bf16.msra.mxu1 %v625_v6 }
  0x14   :  { %583 = vmatprep.subr.bf16.mxu0 %v626_v7  ;;  %610 = vmatprep.subr.bf16.mxu1 %v626_v7 }
  0x17   :  { %584 = vmatpush3.bf16.msra.mxu0 %v626_v7  ;;  %618 = vmatpush3.bf16.msra.mxu1 %v626_v7 }
  0x18   :  { %585 = vmatprep.subr.bf16.mxu0 %v627_v8  ;;  %611 = vmatprep.subr.bf16.mxu1 %v627_v8 }
  0x1b   :  { %586 = vmatpush3.bf16.msra.mxu0 %v627_v8  ;;  %619 = vmatpush3.bf16.msra.mxu1 %v627_v8 }
  0x1c   :  { %587 = vmatprep.subr.bf16.mxu0 %v628_v9  ;;  %612 = vmatprep.subr.bf16.mxu1 %v628_v9 }
  0x1f   :  { %588 = vmatpush3.bf16.msra.mxu0 %v628_v9  ;;  %620 = vmatpush3.bf16.msra.mxu1 %v628_v9 }
  0x22   :  { %590 = vmatmul.mubr.bf16.vlgmr.msra.gmra.mxu0 %v631_v10  ;;  %598 = vmatmul.mubr.bf16.vlgmr.msra.gmra.mxu1 %v632_v11 }
  0x23   :  { %593 = vmatprep.mubr.bf16.mxu0 %v633_v12  ;;  %601 = vmatprep.mubr.bf16.mxu1 %v634_v13 }
  0x2a   :  { %594 = vmatmul.mubr.bf16.gmra.mxu0 %v635_v14  ;;  %602 = vmatmul.mubr.bf16.gmra.mxu1 %v636_v15 }
  0xe2   :  { %v591_v17 = vpop.f32.mrf.mxu0  ;;  %v599_v18 = vpop.f32.mrf.mxu1 }
  0xe3   :  { %v339_v19 = vmul.f32 %v591_v17, %v476_v16  ;;  %v347_v20 = vmul.f32 %v599_v18, %v476_v16 }
  0xe4   :  { %v216_v21 = vpop.f32.mrf.mxu0  ;;  %v248_v22 = vpop.f32.mrf.mxu1 }
  0xe5   :  { %v337_v24 = vmul.f32 %v476_v16, %v216_v21  ;;  %v345_v25 = vmul.f32 %v476_v16, %v248_v22  ;;  %v362_v30 = vadd.f32 %v477_v23, %v339_v19  ;;  %v370_v31 = vadd.f32 %v477_v23, %v347_v20 }
  0xe6   :  { %v592_v26 = vpop.f32.mrf.mxu0  ;;  %v600_v27 = vpop.f32.mrf.mxu1 }
  0xe7   :  { %v340_v28 = vmul.f32 %v592_v26, %v476_v16  ;;  %v348_v29 = vmul.f32 %v600_v27, %v476_v16  ;;  %v360_v38 = vadd.f32 %v477_v23, %v337_v24  ;;  %v368_v39 = vadd.f32 %v477_v23, %v345_v25 }
  0xe8   :  { %v219_v32 = vpop.f32.mrf.mxu0  ;;  %v251_v33 = vpop.f32.mrf.mxu1 }
  0xe9   :  { %v363_v34 = vadd.f32 %v477_v23, %v340_v28  ;;  %v371_v35 = vadd.f32 %v477_v23, %v348_v29  ;;  %v338_v36 = vmul.f32 %v476_v16, %v219_v32  ;;  %v346_v37 = vmul.f32 %v476_v16, %v251_v33 }
  0xea   :  { %v595_v40 = vpop.f32.mrf.mxu0  ;;  %v603_v41 = vpop.f32.mrf.mxu1 }
  0xeb   :  { %v518_v42 = vpack.c.bf16 %v363_v34, %v362_v30  ;;  %v538_v43 = vpack.c.bf16 %v371_v35, %v370_v31  ;;  %v361_v44 = vadd.f32 %v477_v23, %v338_v36  ;;  %v369_v45 = vadd.f32 %v477_v23, %v346_v37 }
  0xec   :  { %v343_v46 = vmul.f32 %v595_v40, %v476_v16  ;;  %v351_v47 = vmul.f32 %v603_v41, %v476_v16  ;;  %v232_v48 = vpop.f32.mrf.mxu0  ;;  %v264_v49 = vpop.f32.mrf.mxu1 }
  0xed   :  { %550 = vst [vmem:[%s744_s4 + $0x8] sm:$0xff] %v518_v42   ;;  %554 = vst [vmem:[%s744_s4 + $0x28] sm:$0xff] %v538_v43   ;;  %v513_v50 = vpack.c.bf16 %v361_v44, %v360_v38  ;;  %v533_v51 = vpack.c.bf16 %v369_v45, %v368_v39  ;;  %v341_v52 = vmul.f32 %v476_v16, %v232_v48 }
  0xee   :  { %v349_v53 = vmul.f32 %v476_v16, %v264_v49  ;;  %v596_v54 = vpop.f32.mrf.mxu0  ;;  %v604_v55 = vpop.f32.mrf.mxu1  ;;  %v366_v58 = vadd.f32 %v477_v23, %v343_v46  ;;  %v374_v59 = vadd.f32 %v477_v23, %v351_v47 }
  0xef   :  { %514 = vst [vmem:[%s744_s4] sm:$0xff] %v513_v50   ;;  %553 = vst [vmem:[%s744_s4 + $0x20] sm:$0xff] %v533_v51   ;;  %v344_v56 = vmul.f32 %v596_v54, %v476_v16  ;;  %v352_v57 = vmul.f32 %v604_v55, %v476_v16  ;;  %v364_v2 = vadd.f32 %v477_v23, %v341_v52 }
  0xf0   :  { %v235_v60 = vpop.f32.mrf.mxu0  ;;  %v267_v61 = vpop.f32.mrf.mxu1  ;;  %v372_v3 = vadd.f32 %v477_v23, %v349_v53 }
  0xf1   :  { %v367_v62 = vadd.f32 %v477_v23, %v344_v56  ;;  %v375_v63 = vadd.f32 %v477_v23, %v352_v57  ;;  %v342_v0 = vmul.f32 %v476_v16, %v235_v60  ;;  %v350_v1 = vmul.f32 %v476_v16, %v267_v61 }
  0xf3   :  { %v528_v4 = vpack.c.bf16 %v367_v62, %v366_v58  ;;  %v548_v5 = vpack.c.bf16 %v375_v63, %v374_v59  ;;  %v365_v6 = vadd.f32 %v477_v23, %v342_v0  ;;  %v373_v7 = vadd.f32 %v477_v23, %v350_v1 }
  0xf5   :  { %552 = vst [vmem:[%s744_s4 + $0x18] sm:$0xff] %v528_v4   ;;  %556 = vst [vmem:[%s744_s4 + $0x38] sm:$0xff] %v548_v5   ;;  %v523_v8 = vpack.c.bf16 %v365_v6, %v364_v2  ;;  %v543_v9 = vpack.c.bf16 %v373_v7, %v372_v3 }
  0xf7   :  { %551 = vst [vmem:[%s744_s4 + $0x10] sm:$0xff] %v523_v8   ;;  %555 = vst [vmem:[%s744_s4 + $0x30] sm:$0xff] %v543_v9  }

// kernel: pspnet_forward.17
= control target key start
LH: loop header
LB: loop body
LE: loop exit
PB: predicated region body
PF: predicated region fallthrough
CT: control target
= control target key end

     0   :  { %9 = vsyncpa [#allocation4], 0  ;;  %s1672_s0 = inlined_call_operand.vmem [shape: bf16[128,128], index: 0, kind: input, shape index: {}]   ;;  %s1673_s1 = inlined_call_operand.vmem [shape: bf16[128,384], index: 1, kind: input, shape index: {}]   ;;  %s1674_s2 = inlined_call_operand.hbm [shape: f32[1,384], index: 2, kind: input, shape index: {}]   ;;  %s1675_s3 = inlined_call_operand.hbm [shape: f32[1,384], index: 3, kind: input, shape index: {}]   ;;  %s1676_s4 = inlined_call_operand.vmem [shape: bf16[128,384], index: 4, kind: output, shape index: {}]  }
   0x1   :  { %10 = vsyncpa [#allocation6], 0  ;;  %s1330_s15 = smov [#allocation3]   ;;  %s1331_s17 = smov [#allocation5]  }
   0x2   :  { %s21_s16 = sshll.u32 %s1330_s15, 4  ;;  %s31_s18 = sshll.u32 %s1331_s17, 4  ;;  %s22_s16 = int_to_ptr.vmem [resolvable:$true] %s21_s16  ;;  %s32_s18 = int_to_ptr.vmem [resolvable:$true] %s31_s18 }
   0x3   :  { %s1294_s19 = scalar_lea.vmem %s22_s16, 48  ;;  %s1298_s20 = scalar_lea.vmem %s22_s16, 64 }
   0x4   :  { %p1295_p0 = scmp.ne.s32.totalorder %s22_s16, %s1294_s19  ;;  %p1299_p1 = scmp.lt.s32.totalorder %s22_s16, %s22_s16 }
   0x5   :  { %p1300_p2 = scmp.lt.s32.totalorder %s1298_s20, %s1294_s19 }
   0x7   :  { %p1301_p3 = por %p1300_p2, %p1299_p1 }
   0x9   :  { %p1302_p4 = pnand %p1301_p3, %p1295_p0 }
   0xb   :  { %1305 = shalt.err (!%p1302_p4)
}
   0xc   :  { %24 = dma.hbm_to_vmem [thread:$0]  %s1674_s2, 48, %s22_s16, [#allocation4]  }
   0xd   :  { %s1314_s23 = scalar_lea.vmem %s32_s18, 48  ;;  %s1318_s24 = scalar_lea.vmem %s32_s18, 64 }
   0xe   :  { %p1315_p5 = scmp.ne.s32.totalorder %s32_s18, %s1314_s23  ;;  %p1319_p6 = scmp.lt.s32.totalorder %s32_s18, %s32_s18 }
   0xf   :  { %p1320_p7 = scmp.lt.s32.totalorder %s1318_s24, %s1314_s23 }
  0x11   :  { %p1321_p8 = por %p1320_p7, %p1319_p6 }
  0x13   :  { %p1322_p9 = pnand %p1321_p8, %p1315_p5 }
  0x15   :  { %1325 = shalt.err (!%p1322_p9)
}
  0x16   :  { %34 = dma.hbm_to_vmem [thread:$0]  %s1675_s3, 48, %s32_s18, [#allocation6]  }
  0x17   :  { %1326 = dma.done.wait [#allocation4], 48  }
  0x18   :  { %1327 = vsyncadd [#allocation4], 4294967248 }
  0x19   :  { %1328 = dma.done.wait [#allocation6], 48  }
  0x1a   :  { %1329 = vsyncadd [#allocation6], 4294967248  ;;  %v1332_v0 = vmov 0   ;;  %v1246_v1 = vld [vmem:[%s1673_s1 + $0xac] ss:$12 sps:$4 sm:$0xff]   ;;  %v1272_v12 = vld [vmem:[%s1672_s0] sm:$0xff]   ;;  %v725_v33 = vlaneseq }
  0x1b   :  { %398 = vmatprep.mubr.bf16.mxu0 %v1332_v0  ;;  %v1248_v2 = vld [vmem:[%s1673_s1 + $0xa8] ss:$12 sps:$4 sm:$0xff]   ;;  %366 = vmatprep.subr.bf16.mxu0 %v1246_v1  ;;  %v1251_v4 = vld [vmem:[%s1673_s1 + $0x90] ss:$12 sps:$4 sm:$0xff]   ;;  %v1254_v6 = vld [vmem:[%s1673_s1 + $0x78] ss:$12 sps:$4 sm:$0xff]  }
  0x1c   :  { %v1249_v3 = vld [vmem:[%s1673_s1 + $0x94] ss:$12 sps:$4 sm:$0xff]   ;;  %367 = vmatpush1.bf16.msra.mxu0 %v1248_v2  ;;  %v1252_v5 = vld [vmem:[%s1673_s1 + $0x7c] ss:$12 sps:$4 sm:$0xff]   ;;  %v1255_v7 = vld [vmem:[%s1673_s1 + $0x64] ss:$12 sps:$4 sm:$0xff]   ;;  %1227 = vmatprep.mubr.bf16.mxu1 %v1272_v12 }
  0x1d   :  { %368 = vmatprep.subr.bf16.mxu0 %v1249_v3  ;;  %v1267_v8 = vld [vmem:[%s1673_s1 + $0xb0] ss:$12 sps:$4 sm:$0xff]   ;;  %v1257_v9 = vld [vmem:[%s1673_s1 + $0x60] ss:$12 sps:$4 sm:$0xff]   ;;  %v1271_v11 = vld [vmem:[%s1673_s1 + $0x98] ss:$12 sps:$4 sm:$0xff]  }
  0x1e   :  { %v1258_v10 = vld [vmem:[%s1673_s1 + $0x4c] ss:$12 sps:$4 sm:$0xff]   ;;  %1211 = vmatprep.subr.bf16.mxu1 %v1267_v8  ;;  %v1260_v14 = vld [vmem:[%s1673_s1 + $0x48] ss:$12 sps:$4 sm:$0xff]   ;;  %v1263_v17 = vld [vmem:[%s1673_s1 + $0x30] ss:$12 sps:$4 sm:$0xff]  }
  0x1f   :  { %1212 = vmatpush3.bf16.msra.mxu1 %v1267_v8  ;;  %v1273_v13 = vld [vmem:[%s1673_s1 + $0x80] ss:$12 sps:$4 sm:$0xff]   ;;  %v1274_v16 = vld [vmem:[%s1673_s1 + $0x68] ss:$12 sps:$4 sm:$0xff]   ;;  %v1276_v19 = vld [vmem:[%s1673_s1 + $0x50] ss:$12 sps:$4 sm:$0xff]  }
  0x20   :  { %369 = vmatpush1.bf16.msra.mxu0 %v1251_v4  ;;  %1213 = vmatprep.subr.bf16.mxu1 %v1271_v11  ;;  %v1261_v15 = vld [vmem:[%s1673_s1 + $0x34] ss:$12 sps:$4 sm:$0xff]   ;;  %v1264_v18 = vld [vmem:[%s1673_s1 + $0x1c] ss:$12 sps:$4 sm:$0xff]   ;;  %v1266_v20 = vld [vmem:[%s1673_s1 + $0x18] ss:$12 sps:$4 sm:$0xff]  }
  0x21   :  { %370 = vmatprep.subr.bf16.mxu0 %v1252_v5  ;;  %v1268_v21 = vld [vmem:[%s1673_s1 + $0x4] ss:$12 sps:$4 sm:$0xff]   ;;  %v1270_v23 = vld [vmem:[%s1673_s1] ss:$12 sps:$4 sm:$0xff]   ;;  %v1280_v25 = vld [vmem:[%s1673_s1 + $0x8] ss:$12 sps:$4 sm:$0xff]  }
  0x22   :  { %v1277_v22 = vld [vmem:[%s1673_s1 + $0x38] ss:$12 sps:$4 sm:$0xff]   ;;  %v1279_v24 = vld [vmem:[%s1673_s1 + $0x20] ss:$12 sps:$4 sm:$0xff]   ;;  %v1278_v27 = vld [vmem:[%s1672_s0 + $0x10] sm:$0xff]   ;;  %v726_v34 = vshrl.u32 %v725_v33, 7 }
  0x23   :  { %1214 = vmatpush3.bf16.msra.mxu1 %v1271_v11  ;;  %v1275_v26 = vld [vmem:[%s1672_s0 + $0x8] sm:$0xff]   ;;  %v1281_v28 = vld [vmem:[%s1672_s0 + $0x18] sm:$0xff]   ;;  %v1282_v29 = vld [vmem:[%s1672_s0 + $0x20] sm:$0xff]  }
  0x24   :  { %371 = vmatpush1.bf16.msra.mxu0 %v1254_v6  ;;  %1215 = vmatprep.subr.bf16.mxu1 %v1273_v13  ;;  %v1284_v30 = vld [vmem:[%s1672_s0 + $0x30] sm:$0xff]   ;;  %v1283_v31 = vld [vmem:[%s1672_s0 + $0x28] sm:$0xff]   ;;  %v1285_v32 = vld [vmem:[%s1672_s0 + $0x38] sm:$0xff]   ;;  %v727_v35 = vsub.s32 0, %v726_v34  ;;  %v731_v37 = vsub.s32 1, %v726_v34  ;;  %v735_v46 = vsub.s32 2, %v726_v34 }
  0x25   :  { %372 = vmatprep.subr.bf16.mxu0 %v1255_v7  ;;  %v723_v36 = vld [vmem:[#allocation3] sm:$0x7]  ;;  %v788_v38 = vld [vmem:[#allocation5] sm:$0x7] }
  0x26   :  { %v1468_v39 = vrot.slane %v723_v36, %v727_v35  ;;  %v1470_v40 = vrot.slane %v788_v38, %v727_v35  ;;  %v1472_v41 = vrot.slane %v723_v36, %v731_v37  ;;  %v1475_v44 = vrot.slane %v788_v38, %v731_v37 }
  0x27   :  { %1216 = vmatpush3.bf16.msra.mxu1 %v1273_v13  ;;  %v1481_v53 = vrot.slane %v723_v36, %v735_v46  ;;  %v1487_v1 = vrot.slane %v788_v38, %v735_v46 }
  0x28   :  { %373 = vmatpush1.bf16.msra.mxu0 %v1257_v9  ;;  %1217 = vmatprep.subr.bf16.mxu1 %v1274_v16 }
  0x29   :  { %374 = vmatprep.subr.bf16.mxu0 %v1258_v10 }
  0x2b   :  { %1218 = vmatpush3.bf16.msra.mxu1 %v1274_v16 }
  0x2c   :  { %375 = vmatpush1.bf16.msra.mxu0 %v1260_v14  ;;  %1219 = vmatprep.subr.bf16.mxu1 %v1276_v19 }
  0x2d   :  { %376 = vmatprep.subr.bf16.mxu0 %v1261_v15 }
  0x2f   :  { %1220 = vmatpush3.bf16.msra.mxu1 %v1276_v19 }
  0x30   :  { %377 = vmatpush1.bf16.msra.mxu0 %v1263_v17  ;;  %1221 = vmatprep.subr.bf16.mxu1 %v1277_v22 }
  0x31   :  { %378 = vmatprep.subr.bf16.mxu0 %v1264_v18 }
  0x33   :  { %1222 = vmatpush3.bf16.msra.mxu1 %v1277_v22 }
  0x34   :  { %379 = vmatpush1.bf16.msra.mxu0 %v1266_v20  ;;  %1223 = vmatprep.subr.bf16.mxu1 %v1279_v24 }
  0x35   :  { %380 = vmatprep.subr.bf16.mxu0 %v1268_v21 }
  0x37   :  { %1224 = vmatpush3.bf16.msra.mxu1 %v1279_v24 }
  0x38   :  { %381 = vmatpush1.bf16.msra.mxu0 %v1270_v23  ;;  %1225 = vmatprep.subr.bf16.mxu1 %v1280_v25 }
  0x3b   :  { %399 = vmatmul.mubr.bf16.vlgmr.msra.gmra.mxu0 %v1272_v12  ;;  %1226 = vmatpush3.bf16.msra.mxu1 %v1280_v25 }
  0x3c   :  { %408 = vmatprep.mubr.bf16.mxu0 %v1332_v0 }
  0x3e   :  { %1228 = vmatmul.mubr.bf16.vlgmr.msra.gmra.mxu1 %v1275_v26 }
  0x3f   :  { %1231 = vmatprep.mubr.bf16.mxu1 %v1278_v27 }
  0x43   :  { %409 = vmatmul.mubr.bf16.gmra.mxu0 %v1275_v26 }
  0x44   :  { %418 = vmatprep.mubr.bf16.mxu0 %v1332_v0 }
  0x46   :  { %1232 = vmatmul.mubr.bf16.gmra.mxu1 %v1281_v28 }
  0x47   :  { %1235 = vmatprep.mubr.bf16.mxu1 %v1282_v29 }
  0x4b   :  { %419 = vmatmul.mubr.bf16.gmra.mxu0 %v1278_v27 }
  0x4c   :  { %428 = vmatprep.mubr.bf16.mxu0 %v1332_v0 }
  0x4e   :  { %1236 = vmatmul.mubr.bf16.gmra.mxu1 %v1283_v31 }
  0x4f   :  { %1239 = vmatprep.mubr.bf16.mxu1 %v1284_v30 }
  0x53   :  { %429 = vmatmul.mubr.bf16.gmra.mxu0 %v1281_v28 }
  0x54   :  { %438 = vmatprep.mubr.bf16.mxu0 %v1332_v0 }
  0x56   :  { %1240 = vmatmul.mubr.bf16.gmra.mxu1 %v1285_v32 }
  0x5b   :  { %439 = vmatmul.mubr.bf16.gmra.mxu0 %v1282_v29 }
  0x5c   :  { %448 = vmatprep.mubr.bf16.mxu0 %v1332_v0 }
  0x63   :  { %449 = vmatmul.mubr.bf16.gmra.mxu0 %v1283_v31 }
  0x64   :  { %458 = vmatprep.mubr.bf16.mxu0 %v1332_v0 }
  0x6b   :  { %459 = vmatmul.mubr.bf16.gmra.mxu0 %v1284_v30 }
  0x6c   :  { %468 = vmatprep.mubr.bf16.mxu0 %v1332_v0 }
  0x73   :  { %469 = vmatmul.mubr.bf16.gmra.mxu0 %v1285_v32 }
  0xfb   :  { %v400_v42 = vpop.f32.mrf.mxu0 }
  0xfc   :  { %v740_v43 = vmul.f32 %v1468_v39, %v400_v42 }
  0xfd   :  { %v402_v45 = vpop.f32.mrf.mxu0 }
  0xfe   :  { %v805_v47 = vadd.f32 %v1470_v40, %v740_v43  ;;  %v741_v48 = vmul.f32 %v1472_v41, %v402_v45  ;;  %v1229_v0 = vpop.f32.mrf.mxu1 }
  0xff   :  { %v404_v49 = vpop.f32.mrf.mxu0  ;;  %v748_v5 = vmul.f32 %v1229_v0, %v1481_v53 }
 0x100   :  { %v806_v50 = vadd.f32 %v1475_v44, %v741_v48  ;;  %v743_v51 = vmul.f32 %v1468_v39, %v404_v49  ;;  %v853_v54 = vmax.f32 %v805_v47, 0.0  ;;  %v513_v7 = vpop.f32.mrf.mxu1 }
 0x101   :  { %v406_v52 = vpop.f32.mrf.mxu0  ;;  %v813_v13 = vadd.f32 %v1487_v1, %v748_v5  ;;  %v742_v14 = vmul.f32 %v1481_v53, %v513_v7 }
 0x102   :  { %v854_v55 = vmax.f32 %v806_v50, 0.0  ;;  %v808_v56 = vadd.f32 %v1470_v40, %v743_v51  ;;  %v744_v57 = vmul.f32 %v1472_v41, %v406_v52  ;;  %v1230_v15 = vpop.f32.mrf.mxu1 }
 0x103   :  { %v410_v58 = vpop.f32.mrf.mxu0  ;;  %v751_v19 = vmul.f32 %v1230_v15, %v1481_v53  ;;  %v861_v21 = vmax.f32 %v813_v13, 0.0  ;;  %v807_v22 = vadd.f32 %v1487_v1, %v742_v14 }
 0x104   :  { %v1163_v59 = vpack.c.bf16 %v854_v55, %v853_v54  ;;  %v809_v60 = vadd.f32 %v1475_v44, %v744_v57  ;;  %v746_v61 = vmul.f32 %v1468_v39, %v410_v58  ;;  %v856_v62 = vmax.f32 %v808_v56, 0.0  ;;  %v516_v23 = vpop.f32.mrf.mxu1 }
 0x105   :  { %v412_v63 = vpop.f32.mrf.mxu0  ;;  %v1168_v29 = vpack.c.bf16 %v861_v21, %v861_v21  ;;  %v855_v30 = vmax.f32 %v807_v22, 0.0  ;;  %v816_v31 = vadd.f32 %v1487_v1, %v751_v19  ;;  %v745_v32 = vmul.f32 %v1481_v53, %v516_v23 }
 0x106   :  { %1061 = vst [vmem:[%s1676_s4] sm:$0xff] %v1163_v59  ;;  %v857_v2 = vmax.f32 %v809_v60, 0.0  ;;  %v811_v3 = vadd.f32 %v1470_v40, %v746_v61  ;;  %v747_v4 = vmul.f32 %v1472_v41, %v412_v63  ;;  %v1233_v33 = vpop.f32.mrf.mxu1 }
 0x107   :  { %v414_v6 = vpop.f32.mrf.mxu0  ;;  %v760_v37 = vmul.f32 %v1233_v33, %v1481_v53  ;;  %1066 = vst [vmem:[%s1676_s4 + $0x20] sm:$0xf] %v1168_v29  ;;  %v1164_v42 = vpack.c.bf16 %v855_v30, %v855_v30  ;;  %v864_v43 = vmax.f32 %v816_v31, 0.0  ;;  %v810_v45 = vadd.f32 %v1487_v1, %v745_v32 }
 0x108   :  { %v1165_v8 = vpack.c.bf16 %v857_v2, %v856_v62  ;;  %v812_v9 = vadd.f32 %v1475_v44, %v747_v4  ;;  %v749_v10 = vmul.f32 %v1468_v39, %v414_v6  ;;  %v859_v11 = vmax.f32 %v811_v3, 0.0  ;;  %v529_v46 = vpop.f32.mrf.mxu1 }
 0x109   :  { %v416_v12 = vpop.f32.mrf.mxu0  ;;  %1062 = vst [vmem:[%s1676_s4 + $0x8] sm:$0xf] %v1164_v42  ;;  %v1170_v52 = vpack.c.bf16 %v864_v43, %v864_v43  ;;  %v858_v54 = vmax.f32 %v810_v45, 0.0  ;;  %v825_v55 = vadd.f32 %v1487_v1, %v760_v37  ;;  %v754_v56 = vmul.f32 %v1481_v53, %v529_v46 }
 0x10a   :  { %1063 = vst [vmem:[%s1676_s4 + $0xc] sm:$0xff] %v1165_v8  ;;  %v860_v16 = vmax.f32 %v812_v9, 0.0  ;;  %v814_v17 = vadd.f32 %v1470_v40, %v749_v10  ;;  %v750_v18 = vmul.f32 %v1472_v41, %v416_v12  ;;  %v1234_v57 = vpop.f32.mrf.mxu1 }
 0x10b   :  { %v420_v20 = vpop.f32.mrf.mxu0  ;;  %v763_v61 = vmul.f32 %v1234_v57, %v1481_v53  ;;  %1068 = vst [vmem:[%s1676_s4 + $0x2c] sm:$0xf] %v1170_v52  ;;  %v1166_v63 = vpack.c.bf16 %v858_v54, %v858_v54  ;;  %v873_v0 = vmax.f32 %v825_v55, 0.0  ;;  %v819_v2 = vadd.f32 %v1487_v1, %v754_v56 }
 0x10c   :  { %v1167_v24 = vpack.c.bf16 %v860_v16, %v859_v11  ;;  %v862_v25 = vmax.f32 %v814_v17, 0.0  ;;  %v815_v26 = vadd.f32 %v1475_v44, %v750_v18  ;;  %v752_v27 = vmul.f32 %v1468_v39, %v420_v20  ;;  %v532_v3 = vpop.f32.mrf.mxu1 }
 0x10d   :  { %v422_v28 = vpop.f32.mrf.mxu0  ;;  %1064 = vst [vmem:[%s1676_s4 + $0x14] sm:$0xf] %v1166_v63  ;;  %v1176_v9 = vpack.c.bf16 %v873_v0, %v873_v0  ;;  %v867_v10 = vmax.f32 %v819_v2, 0.0  ;;  %v828_v11 = vadd.f32 %v1487_v1, %v763_v61  ;;  %v757_v12 = vmul.f32 %v1481_v53, %v532_v3 }
 0x10e   :  { %1065 = vst [vmem:[%s1676_s4 + $0x18] sm:$0xff] %v1167_v24  ;;  %v863_v34 = vmax.f32 %v815_v26, 0.0  ;;  %v817_v35 = vadd.f32 %v1470_v40, %v752_v27  ;;  %v753_v36 = vmul.f32 %v1472_v41, %v422_v28  ;;  %v1237_v13 = vpop.f32.mrf.mxu1 }
 0x10f   :  { %v424_v38 = vpop.f32.mrf.mxu0  ;;  %v772_v17 = vmul.f32 %v1237_v13, %v1481_v53  ;;  %1074 = vst [vmem:[%s1676_s4 + $0x50] sm:$0xf] %v1176_v9  ;;  %v1172_v19 = vpack.c.bf16 %v867_v10, %v867_v10  ;;  %v876_v20 = vmax.f32 %v828_v11, 0.0  ;;  %v822_v21 = vadd.f32 %v1487_v1, %v757_v12 }
 0x110   :  { %v1169_v47 = vpack.c.bf16 %v863_v34, %v862_v25  ;;  %v865_v48 = vmax.f32 %v817_v35, 0.0  ;;  %v818_v49 = vadd.f32 %v1475_v44, %v753_v36  ;;  %v755_v50 = vmul.f32 %v1468_v39, %v424_v38  ;;  %v545_v22 = vpop.f32.mrf.mxu1 }
 0x111   :  { %v426_v51 = vpop.f32.mrf.mxu0  ;;  %1070 = vst [vmem:[%s1676_s4 + $0x38] sm:$0xf] %v1172_v19  ;;  %v1178_v28 = vpack.c.bf16 %v876_v20, %v876_v20  ;;  %v870_v29 = vmax.f32 %v822_v21, 0.0  ;;  %v837_v30 = vadd.f32 %v1487_v1, %v772_v17  ;;  %v766_v31 = vmul.f32 %v1481_v53, %v545_v22 }
 0x112   :  { %1067 = vst [vmem:[%s1676_s4 + $0x24] sm:$0xff] %v1169_v47  ;;  %v866_v58 = vmax.f32 %v818_v49, 0.0  ;;  %v820_v59 = vadd.f32 %v1470_v40, %v755_v50  ;;  %v756_v60 = vmul.f32 %v1472_v41, %v426_v51  ;;  %v1238_v32 = vpop.f32.mrf.mxu1 }
 0x113   :  { %v430_v62 = vpop.f32.mrf.mxu0  ;;  %v775_v36 = vmul.f32 %v1238_v32, %v1481_v53  ;;  %1076 = vst [vmem:[%s1676_s4 + $0x5c] sm:$0xf] %v1178_v28  ;;  %v1174_v38 = vpack.c.bf16 %v870_v29, %v870_v29  ;;  %v885_v42 = vmax.f32 %v837_v30, 0.0  ;;  %v831_v43 = vadd.f32 %v1487_v1, %v766_v31 }
 0x114   :  { %v1171_v4 = vpack.c.bf16 %v866_v58, %v865_v48  ;;  %v868_v5 = vmax.f32 %v820_v59, 0.0  ;;  %v821_v6 = vadd.f32 %v1475_v44, %v756_v60  ;;  %v758_v7 = vmul.f32 %v1468_v39, %v430_v62  ;;  %v548_v45 = vpop.f32.mrf.mxu1 }
 0x115   :  { %v432_v8 = vpop.f32.mrf.mxu0  ;;  %1072 = vst [vmem:[%s1676_s4 + $0x44] sm:$0xf] %v1174_v38  ;;  %v1184_v51 = vpack.c.bf16 %v885_v42, %v885_v42  ;;  %v879_v52 = vmax.f32 %v831_v43, 0.0  ;;  %v840_v54 = vadd.f32 %v1487_v1, %v775_v36  ;;  %v769_v55 = vmul.f32 %v1481_v53, %v548_v45 }
 0x116   :  { %1069 = vst [vmem:[%s1676_s4 + $0x30] sm:$0xff] %v1171_v4  ;;  %v869_v14 = vmax.f32 %v821_v6, 0.0  ;;  %v823_v15 = vadd.f32 %v1470_v40, %v758_v7  ;;  %v759_v16 = vmul.f32 %v1472_v41, %v432_v8  ;;  %v1241_v56 = vpop.f32.mrf.mxu1 }
 0x117   :  { %v434_v18 = vpop.f32.mrf.mxu0  ;;  %v784_v60 = vmul.f32 %v1241_v56, %v1481_v53  ;;  %1082 = vst [vmem:[%s1676_s4 + $0x80] sm:$0xf] %v1184_v51  ;;  %v1180_v62 = vpack.c.bf16 %v879_v52, %v879_v52  ;;  %v888_v63 = vmax.f32 %v840_v54, 0.0  ;;  %v834_v0 = vadd.f32 %v1487_v1, %v769_v55 }
 0x118   :  { %v1173_v23 = vpack.c.bf16 %v869_v14, %v868_v5  ;;  %v871_v24 = vmax.f32 %v823_v15, 0.0  ;;  %v824_v25 = vadd.f32 %v1475_v44, %v759_v16  ;;  %v761_v26 = vmul.f32 %v1468_v39, %v434_v18  ;;  %v561_v2 = vpop.f32.mrf.mxu1 }
 0x119   :  { %v436_v27 = vpop.f32.mrf.mxu0  ;;  %1078 = vst [vmem:[%s1676_s4 + $0x68] sm:$0xf] %v1180_v62  ;;  %v1186_v8 = vpack.c.bf16 %v888_v63, %v888_v63  ;;  %v882_v9 = vmax.f32 %v834_v0, 0.0  ;;  %v849_v10 = vadd.f32 %v1487_v1, %v784_v60  ;;  %v778_v11 = vmul.f32 %v1481_v53, %v561_v2 }
 0x11a   :  { %1071 = vst [vmem:[%s1676_s4 + $0x3c] sm:$0xff] %v1173_v23  ;;  %v872_v33 = vmax.f32 %v824_v25, 0.0  ;;  %v826_v34 = vadd.f32 %v1470_v40, %v761_v26  ;;  %v762_v35 = vmul.f32 %v1472_v41, %v436_v27  ;;  %v1242_v12 = vpop.f32.mrf.mxu1 }
 0x11b   :  { %v440_v37 = vpop.f32.mrf.mxu0  ;;  %v787_v16 = vmul.f32 %v1242_v12, %v1481_v53  ;;  %1084 = vst [vmem:[%s1676_s4 + $0x8c] sm:$0xf] %v1186_v8  ;;  %v1182_v18 = vpack.c.bf16 %v882_v9, %v882_v9  ;;  %v897_v19 = vmax.f32 %v849_v10, 0.0  ;;  %v843_v20 = vadd.f32 %v1487_v1, %v778_v11 }
 0x11c   :  { %v1175_v46 = vpack.c.bf16 %v872_v33, %v871_v24  ;;  %v874_v47 = vmax.f32 %v826_v34, 0.0  ;;  %v827_v48 = vadd.f32 %v1475_v44, %v762_v35  ;;  %v764_v49 = vmul.f32 %v1468_v39, %v440_v37  ;;  %v564_v21 = vpop.f32.mrf.mxu1 }
 0x11d   :  { %v442_v50 = vpop.f32.mrf.mxu0  ;;  %1080 = vst [vmem:[%s1676_s4 + $0x74] sm:$0xf] %v1182_v18  ;;  %v1192_v26 = vpack.c.bf16 %v897_v19, %v897_v19  ;;  %v891_v27 = vmax.f32 %v843_v20, 0.0  ;;  %v852_v28 = vadd.f32 %v1487_v1, %v787_v16  ;;  %v781_v29 = vmul.f32 %v1481_v53, %v564_v21 }
 0x11e   :  { %1073 = vst [vmem:[%s1676_s4 + $0x48] sm:$0xff] %v1175_v46  ;;  %v875_v57 = vmax.f32 %v827_v48, 0.0  ;;  %v829_v58 = vadd.f32 %v1470_v40, %v764_v49  ;;  %v765_v59 = vmul.f32 %v1472_v41, %v442_v50 }
 0x11f   :  { %v444_v61 = vpop.f32.mrf.mxu0  ;;  %1090 = vst [vmem:[%s1676_s4 + $0xb0] sm:$0xf] %v1192_v26  ;;  %v1188_v35 = vpack.c.bf16 %v891_v27, %v891_v27  ;;  %v900_v36 = vmax.f32 %v852_v28, 0.0  ;;  %v846_v37 = vadd.f32 %v1487_v1, %v781_v29 }
 0x120   :  { %v1177_v3 = vpack.c.bf16 %v875_v57, %v874_v47  ;;  %v877_v4 = vmax.f32 %v829_v58, 0.0  ;;  %v830_v5 = vadd.f32 %v1475_v44, %v765_v59  ;;  %v767_v6 = vmul.f32 %v1468_v39, %v444_v61 }
 0x121   :  { %v446_v7 = vpop.f32.mrf.mxu0  ;;  %1086 = vst [vmem:[%s1676_s4 + $0x98] sm:$0xf] %v1188_v35  ;;  %v1194_v45 = vpack.c.bf16 %v900_v36, %v900_v36  ;;  %v894_v46 = vmax.f32 %v846_v37, 0.0 }
 0x122   :  { %1075 = vst [vmem:[%s1676_s4 + $0x54] sm:$0xff] %v1177_v3  ;;  %v878_v13 = vmax.f32 %v830_v5, 0.0  ;;  %v832_v14 = vadd.f32 %v1470_v40, %v767_v6  ;;  %v768_v15 = vmul.f32 %v1472_v41, %v446_v7 }
 0x123   :  { %v450_v17 = vpop.f32.mrf.mxu0  ;;  %1092 = vst [vmem:[%s1676_s4 + $0xbc] sm:$0xf] %v1194_v45  ;;  %v1190_v51 = vpack.c.bf16 %v894_v46, %v894_v46 }
 0x124   :  { %v1179_v22 = vpack.c.bf16 %v878_v13, %v877_v4  ;;  %v833_v23 = vadd.f32 %v1475_v44, %v768_v15  ;;  %v770_v24 = vmul.f32 %v1468_v39, %v450_v17  ;;  %v880_v30 = vmax.f32 %v832_v14, 0.0 }
 0x125   :  { %v452_v25 = vpop.f32.mrf.mxu0  ;;  %1088 = vst [vmem:[%s1676_s4 + $0xa4] sm:$0xf] %v1190_v51 }
 0x126   :  { %1077 = vst [vmem:[%s1676_s4 + $0x60] sm:$0xff] %v1179_v22  ;;  %v881_v31 = vmax.f32 %v833_v23, 0.0  ;;  %v835_v32 = vadd.f32 %v1470_v40, %v770_v24  ;;  %v771_v33 = vmul.f32 %v1472_v41, %v452_v25 }
 0x127   :  { %v454_v34 = vpop.f32.mrf.mxu0 }
 0x128   :  { %v1181_v53 = vpack.c.bf16 %v881_v31, %v880_v30  ;;  %v836_v38 = vadd.f32 %v1475_v44, %v771_v33  ;;  %v773_v42 = vmul.f32 %v1468_v39, %v454_v34  ;;  %v883_v47 = vmax.f32 %v835_v32, 0.0 }
 0x129   :  { %v456_v43 = vpop.f32.mrf.mxu0 }
 0x12a   :  { %1079 = vst [vmem:[%s1676_s4 + $0x6c] sm:$0xff] %v1181_v53  ;;  %v884_v48 = vmax.f32 %v836_v38, 0.0  ;;  %v838_v1 = vadd.f32 %v1470_v40, %v773_v42  ;;  %v774_v49 = vmul.f32 %v1472_v41, %v456_v43 }
 0x12b   :  { %v460_v50 = vpop.f32.mrf.mxu0 }
 0x12c   :  { %v1183_v52 = vpack.c.bf16 %v884_v48, %v883_v47  ;;  %v839_v54 = vadd.f32 %v1475_v44, %v774_v49  ;;  %v776_v55 = vmul.f32 %v1468_v39, %v460_v50  ;;  %v886_v57 = vmax.f32 %v838_v1, 0.0 }
 0x12d   :  { %v462_v56 = vpop.f32.mrf.mxu0 }
 0x12e   :  { %1081 = vst [vmem:[%s1676_s4 + $0x78] sm:$0xff] %v1183_v52  ;;  %v887_v58 = vmax.f32 %v839_v54, 0.0  ;;  %v841_v59 = vadd.f32 %v1470_v40, %v776_v55  ;;  %v777_v60 = vmul.f32 %v1472_v41, %v462_v56 }
 0x12f   :  { %v464_v61 = vpop.f32.mrf.mxu0 }
 0x130   :  { %v1185_v62 = vpack.c.bf16 %v887_v58, %v886_v57  ;;  %v842_v63 = vadd.f32 %v1475_v44, %v777_v60  ;;  %v779_v0 = vmul.f32 %v1468_v39, %v464_v61  ;;  %v889_v3 = vmax.f32 %v841_v59, 0.0 }
 0x131   :  { %v466_v2 = vpop.f32.mrf.mxu0 }
 0x132   :  { %1083 = vst [vmem:[%s1676_s4 + $0x84] sm:$0xff] %v1185_v62  ;;  %v890_v4 = vmax.f32 %v842_v63, 0.0  ;;  %v844_v5 = vadd.f32 %v1470_v40, %v779_v0  ;;  %v780_v6 = vmul.f32 %v1472_v41, %v466_v2 }
 0x133   :  { %v470_v7 = vpop.f32.mrf.mxu0 }
 0x134   :  { %v1187_v8 = vpack.c.bf16 %v890_v4, %v889_v3  ;;  %v845_v9 = vadd.f32 %v1475_v44, %v780_v6  ;;  %v782_v10 = vmul.f32 %v1468_v39, %v470_v7  ;;  %v892_v12 = vmax.f32 %v844_v5, 0.0 }
 0x135   :  { %v472_v11 = vpop.f32.mrf.mxu0 }
 0x136   :  { %1085 = vst [vmem:[%s1676_s4 + $0x90] sm:$0xff] %v1187_v8  ;;  %v893_v13 = vmax.f32 %v845_v9, 0.0  ;;  %v847_v14 = vadd.f32 %v1470_v40, %v782_v10  ;;  %v783_v15 = vmul.f32 %v1472_v41, %v472_v11 }
 0x137   :  { %v474_v16 = vpop.f32.mrf.mxu0 }
 0x138   :  { %v1189_v17 = vpack.c.bf16 %v893_v13, %v892_v12  ;;  %v848_v18 = vadd.f32 %v1475_v44, %v783_v15  ;;  %v785_v19 = vmul.f32 %v1468_v39, %v474_v16  ;;  %v895_v21 = vmax.f32 %v847_v14, 0.0 }
 0x139   :  { %v476_v20 = vpop.f32.mrf.mxu0 }
 0x13a   :  { %1087 = vst [vmem:[%s1676_s4 + $0x9c] sm:$0xff] %v1189_v17  ;;  %v896_v22 = vmax.f32 %v848_v18, 0.0  ;;  %v850_v23 = vadd.f32 %v1470_v40, %v785_v19  ;;  %v786_v24 = vmul.f32 %v1472_v41, %v476_v20 }
 0x13c   :  { %v1191_v25 = vpack.c.bf16 %v896_v22, %v895_v21  ;;  %v851_v26 = vadd.f32 %v1475_v44, %v786_v24  ;;  %v898_v27 = vmax.f32 %v850_v23, 0.0 }
 0x13e   :  { %1089 = vst [vmem:[%s1676_s4 + $0xa8] sm:$0xff] %v1191_v25  ;;  %v899_v39 = vmax.f32 %v851_v26, 0.0 }
 0x140   :  { %v1193_v28 = vpack.c.bf16 %v899_v39, %v898_v27 }
 0x142   :  { %1091 = vst [vmem:[%s1676_s4 + $0xb4] sm:$0xff] %v1193_v28 }
 0x143   :  { %1097 = vsyncpa [#allocation4], 1 }
 0x144   :  { %1098 = vsyncpa [#allocation6], 1 }

// kernel: pspnet_forward.28
= control target key start
LH: loop header
LB: loop body
LE: loop exit
PB: predicated region body
PF: predicated region fallthrough
CT: control target
= control target key end

     0   :  { %v484_v0 = vmov 0.0   ;;  %vm485_vm0 = vmmov 0   ;;  %s576_s1 = inlined_call_operand.vmem [shape: bf16[128,128], index: 1, kind: input, shape index: {}]   ;;  %s577_s0 = inlined_call_operand.vmem [shape: bf16[80,128], index: 0, kind: input, shape index: {}]   ;;  %s578_s2 = inlined_call_operand.vmem [shape: f32[1,128], index: 2, kind: input, shape index: {}]   ;;  %s579_s3 = inlined_call_operand.vmem [shape: f32[1,128], index: 3, kind: input, shape index: {}]   ;;  %s580_s4 = inlined_call_operand.vmem [shape: bf16[80,128], index: 4, kind: output, shape index: {}]  }
   0x1   :  { %417 = vmatprep.subr.bf16.mxu0 %v484_v0  ;;  %v471_v1 = vld [vmem:[%s576_s1 + $0x38] sm:$0xff]   ;;  %453 = vmatprep.subr.bf16.mxu1 %v484_v0  ;;  %v472_v2 = vld [vmem:[%s576_s1 + $0x30] sm:$0xff]   ;;  %v473_v3 = vld [vmem:[%s576_s1 + $0x28] sm:$0xff]  }
   0x2   :  { %433 = vmatprep.mubr.msk.bf16.mxu0 %vm485_vm0, %v484_v0  ;;  %445 = vmatprep.mubr.msk.bf16.mxu1 %vm485_vm0, %v484_v0  ;;  %v474_v4 = vld [vmem:[%s576_s1 + $0x20] sm:$0xff]   ;;  %v475_v5 = vld [vmem:[%s576_s1 + $0x18] sm:$0xff]   ;;  %v476_v6 = vld [vmem:[%s576_s1 + $0x10] sm:$0xff]  }
   0x3   :  { %418 = vmatpush3.bf16.msra.mxu0 %v471_v1  ;;  %461 = vmatpush3.bf16.msra.mxu1 %v471_v1  ;;  %v477_v7 = vld [vmem:[%s576_s1 + $0x8] sm:$0xff]   ;;  %v478_v8 = vld [vmem:[%s576_s1] sm:$0xff]   ;;  %v480_v10 = vld [vmem:[%s577_s0 + $0x18] sm:$0xff]  }
   0x4   :  { %419 = vmatprep.subr.bf16.mxu0 %v484_v0  ;;  %454 = vmatprep.subr.bf16.mxu1 %v484_v0  ;;  %v479_v9 = vld [vmem:[%s577_s0] sm:$0xff]   ;;  %v481_v11 = vld [vmem:[%s577_s0 + $0x8] sm:$0xff]   ;;  %v483_v13 = vld [vmem:[%s577_s0 + $0x10] sm:$0xff]  }
   0x5   :  { %v482_v12 = vld [vmem:[%s577_s0 + $0x20] sm:$0xff]  }
   0x6   :  { %v353_v15 = vld [vmem:[%s578_s2] ss:$0 sm:$0xff] }
   0x7   :  { %420 = vmatpush3.bf16.msra.mxu0 %v472_v2  ;;  %462 = vmatpush3.bf16.msra.mxu1 %v472_v2  ;;  %v354_v21 = vld [vmem:[%s579_s3] ss:$0 sm:$0xff] }
   0x8   :  { %421 = vmatprep.subr.bf16.mxu0 %v484_v0  ;;  %455 = vmatprep.subr.bf16.mxu1 %v484_v0 }
   0xb   :  { %422 = vmatpush3.bf16.msra.mxu0 %v473_v3  ;;  %463 = vmatpush3.bf16.msra.mxu1 %v473_v3 }
   0xc   :  { %423 = vmatprep.subr.bf16.mxu0 %v484_v0  ;;  %456 = vmatprep.subr.bf16.mxu1 %v484_v0 }
   0xf   :  { %424 = vmatpush3.bf16.msra.mxu0 %v474_v4  ;;  %464 = vmatpush3.bf16.msra.mxu1 %v474_v4 }
  0x10   :  { %425 = vmatprep.subr.bf16.mxu0 %v484_v0  ;;  %457 = vmatprep.subr.bf16.mxu1 %v484_v0 }
  0x13   :  { %426 = vmatpush3.bf16.msra.mxu0 %v475_v5  ;;  %465 = vmatpush3.bf16.msra.mxu1 %v475_v5 }
  0x14   :  { %427 = vmatprep.subr.bf16.mxu0 %v484_v0  ;;  %458 = vmatprep.subr.bf16.mxu1 %v484_v0 }
  0x17   :  { %428 = vmatpush3.bf16.msra.mxu0 %v476_v6  ;;  %466 = vmatpush3.bf16.msra.mxu1 %v476_v6 }
  0x18   :  { %429 = vmatprep.subr.bf16.mxu0 %v484_v0  ;;  %459 = vmatprep.subr.bf16.mxu1 %v484_v0 }
  0x1b   :  { %430 = vmatpush3.bf16.msra.mxu0 %v477_v7  ;;  %467 = vmatpush3.bf16.msra.mxu1 %v477_v7 }
  0x1c   :  { %431 = vmatprep.subr.bf16.mxu0 %v484_v0  ;;  %460 = vmatprep.subr.bf16.mxu1 %v484_v0 }
  0x1f   :  { %432 = vmatpush3.bf16.msra.mxu0 %v478_v8  ;;  %468 = vmatpush3.bf16.msra.mxu1 %v478_v8 }
  0x22   :  { %434 = vmatmul.mubr.bf16.vlgmr.msra.gmra.mxu0 %v479_v9  ;;  %446 = vmatmul.mubr.bf16.vlgmr.msra.gmra.mxu1 %v480_v10 }
  0x23   :  { %437 = vmatprep.mubr.msk.bf16.mxu0 %vm485_vm0, %v484_v0  ;;  %449 = vmatprep.mubr.msk.bf16.mxu1 %vm485_vm0, %v484_v0 }
  0x2a   :  { %438 = vmatmul.mubr.bf16.gmra.mxu0 %v481_v11  ;;  %450 = vmatmul.mubr.bf16.gmra.mxu1 %v482_v12 }
  0x2b   :  { %441 = vmatprep.mubr.msk.bf16.mxu0 %vm485_vm0, %v484_v0 }
  0x32   :  { %442 = vmatmul.mubr.bf16.gmra.mxu0 %v483_v13 }
  0xe2   :  { %v180_v14 = vpop.f32.mrf.mxu0  ;;  %v204_v16 = vpop.f32.mrf.mxu1 }
  0xe3   :  { %v265_v17 = vmul.f32 %v353_v15, %v204_v16  ;;  %v259_v20 = vmul.f32 %v353_v15, %v180_v14 }
  0xe4   :  { %v435_v18 = vpop.f32.mrf.mxu0  ;;  %v447_v19 = vpop.f32.mrf.mxu1 }
  0xe5   :  { %v282_v24 = vadd.f32 %v354_v21, %v265_v17  ;;  %v276_v29 = vadd.f32 %v354_v21, %v259_v20 }
  0xe6   :  { %v183_v22 = vpop.f32.mrf.mxu0  ;;  %v207_v23 = vpop.f32.mrf.mxu1 }
  0xe7   :  { %v260_v25 = vmul.f32 %v353_v15, %v183_v22  ;;  %v266_v26 = vmul.f32 %v353_v15, %v207_v23 }
  0xe8   :  { %v436_v27 = vpop.f32.mrf.mxu0  ;;  %v448_v28 = vpop.f32.mrf.mxu1 }
  0xe9   :  { %v277_v30 = vadd.f32 %v354_v21, %v260_v25  ;;  %v283_v31 = vadd.f32 %v354_v21, %v266_v26 }
  0xea   :  { %v188_v32 = vpop.f32.mrf.mxu0  ;;  %v212_v33 = vpop.f32.mrf.mxu1 }
  0xeb   :  { %v378_v34 = vpack.c.bf16 %v277_v30, %v276_v29  ;;  %v393_v35 = vpack.c.bf16 %v283_v31, %v282_v24  ;;  %v267_v36 = vmul.f32 %v353_v15, %v212_v33  ;;  %v261_v39 = vmul.f32 %v353_v15, %v188_v32 }
  0xec   :  { %v439_v37 = vpop.f32.mrf.mxu0  ;;  %v451_v38 = vpop.f32.mrf.mxu1 }
  0xed   :  { %379 = vst [vmem:[%s580_s4] sm:$0xff] %v378_v34   ;;  %402 = vst [vmem:[%s580_s4 + $0x18] sm:$0xff] %v393_v35   ;;  %v284_v42 = vadd.f32 %v354_v21, %v267_v36  ;;  %v278_v47 = vadd.f32 %v354_v21, %v261_v39 }
  0xee   :  { %v191_v40 = vpop.f32.mrf.mxu0  ;;  %v215_v41 = vpop.f32.mrf.mxu1 }
  0xef   :  { %v262_v43 = vmul.f32 %v353_v15, %v191_v40  ;;  %v268_v44 = vmul.f32 %v353_v15, %v215_v41 }
  0xf0   :  { %v440_v45 = vpop.f32.mrf.mxu0  ;;  %v452_v46 = vpop.f32.mrf.mxu1 }
  0xf1   :  { %v279_v48 = vadd.f32 %v354_v21, %v262_v43  ;;  %v285_v49 = vadd.f32 %v354_v21, %v268_v44 }
  0xf2   :  { %v196_v50 = vpop.f32.mrf.mxu0 }
  0xf3   :  { %v383_v51 = vpack.c.bf16 %v279_v48, %v278_v47  ;;  %v398_v52 = vpack.c.bf16 %v285_v49, %v284_v42  ;;  %v263_v54 = vmul.f32 %v353_v15, %v196_v50 }
  0xf4   :  { %v443_v53 = vpop.f32.mrf.mxu0 }
  0xf5   :  { %400 = vst [vmem:[%s580_s4 + $0x8] sm:$0xff] %v383_v51   ;;  %403 = vst [vmem:[%s580_s4 + $0x20] sm:$0xff] %v398_v52   ;;  %v280_v58 = vadd.f32 %v354_v21, %v263_v54 }
  0xf6   :  { %v199_v55 = vpop.f32.mrf.mxu0 }
  0xf7   :  { %v264_v56 = vmul.f32 %v353_v15, %v199_v55 }
  0xf8   :  { %v444_v57 = vpop.f32.mrf.mxu0 }
  0xf9   :  { %v281_v59 = vadd.f32 %v354_v21, %v264_v56 }
  0xfb   :  { %v388_v60 = vpack.c.bf16 %v281_v59, %v280_v58 }
  0xfd   :  { %401 = vst [vmem:[%s580_s4 + $0x10] sm:$0xff] %v388_v60  }

// kernel: pspnet_forward.26
= control target key start
LH: loop header
LB: loop body
LE: loop exit
PB: predicated region body
PF: predicated region fallthrough
CT: control target
= control target key end

     0   :  { %s3050_s15 = smov 0   ;;  %s3052_s16 = smov 0   ;;  %s3477_s0 = inlined_call_operand.vmem [shape: bf16[2,10,10,128], index: 0, kind: input, shape index: {}]   ;;  %s3478_s1 = inlined_call_operand.vmem [shape: bf16[9,128,128], index: 1, kind: input, shape index: {}]   ;;  %s3479_s2 = inlined_call_operand.vmem [shape: f32[1,128], index: 2, kind: input, shape index: {}]   ;;  %s3480_s3 = inlined_call_operand.vmem [shape: f32[1,128], index: 3, kind: input, shape index: {}]   ;;  %s3481_s4 = inlined_call_operand.vmem [shape: bf16[2,64,128], index: 4, kind: output, shape index: {}]  }
   0x1   :  { %s3054_s17 = smov 0  }
   0x2 LB: > { %s33_s18 = sadd.s32 1, %s3019_s16  ;;  %p2270_p0 = scmp.ge.s32.totalorder %s3023_s17, 1  ;;  %s3023_s17 = sphi %s3054_s17, %s14_s17   ;;  %s3019_s16 = sphi %s3052_s16, %s3495_s16   ;;  %s3015_s15 = sphi %s3050_s15, %s3494_s15  }
   0x3   : > { %p35_p1 = scmp.ge.s32.totalorder %s33_s18, 2  ;;  %p220_p2 = scmp.lt.s32.totalorder %s3023_s17, 3 }
   0x5   : > { %s3497_s18 = smov (%p35_p1, %s33_s18), 0  ;;  %p221_p3 = pnand %p2270_p0, %p220_p2 }
   0x7   : > { %224 = sbr.rel (%p221_p3) target bundleno = 384 (0x180), region = 36 }
   0xc   : > { %v2920_v0 = vld [vmem:[%s3478_s1 + $0x38] sm:$0xff]   ;;  %p266_p4 = scmp.lt.s32.totalorder %s3015_s15, 1  ;;  %v2922_v2 = vld [vmem:[%s3478_s1 + $0x30] sm:$0xff]   ;;  %v2924_v4 = vld [vmem:[%s3478_s1 + $0x28] sm:$0xff]   ;;  %vm839_vm0 = vsmask.f32 3328 }
   0xd   : > { %v2921_v1 = vld [vmem:[%s3478_s1 + $0xf8] sm:$0xff]   ;;  %2663 = vmatprep.subr.bf16.mxu0 %v2920_v0  ;;  %v2923_v3 = vld [vmem:[%s3478_s1 + $0xf0] sm:$0xff]   ;;  %v2925_v5 = vld [vmem:[%s3478_s1 + $0xe8] sm:$0xff]   ;;  %vm840_vm1 = vsmask.f32 7440  ;;  %vm1508_vm3 = vcmask 1042432  }
   0xe   : > { %2687 = vmatprep.subr.bf16.mxu1 %v2921_v1  ;;  %2664 = vmatpush3.bf16.msra.mxu0 %v2920_v0  ;;  %s3499_s15 = smov (!%p266_p4, %s3015_s15), 1  ;;  %v2926_v6 = vld [vmem:[%s3478_s1 + $0x20] sm:$0xff]   ;;  %v2928_v8 = vld [vmem:[%s3478_s1 + $0x18] sm:$0xff]   ;;  %v2930_v10 = vld [vmem:[%s3478_s1 + $0x10] sm:$0xff]   ;;  %vm1509_vm4 = vcmask 1046532  }
   0xf   : > { %2688 = vmatpush3.bf16.msra.mxu1 %v2921_v1  ;;  %2665 = vmatprep.subr.bf16.mxu0 %v2922_v2  ;;  %v2927_v7 = vld [vmem:[%s3478_s1 + $0xe0] sm:$0xff]   ;;  %s2895_s9 = smul.u32 80, %s3499_s15  ;;  %v2929_v9 = vld [vmem:[%s3478_s1 + $0xd8] sm:$0xff]   ;;  %v2931_v14 = vld [vmem:[%s3478_s1 + $0xd0] sm:$0xff]   ;;  %s2523_s22 = sshll.u32 %s3499_s15, 5 }
  0x10   : > { %2689 = vmatprep.subr.bf16.mxu1 %v2923_v3  ;;  %v2932_v17 = vld [vmem:[%s3478_s1 + $0x8] sm:$0xff]   ;;  %v2934_v19 = vld [vmem:[%s3478_s1] sm:$0xff]   ;;  %v2940_v23 = vld [vmem:[%s3478_s1 + $0x1b8] sm:$0xff]   ;;  %s296_s25 = scalar_lea.vmem %s3481_s4, %s2523_s22 }
  0x11   : > { %s3104_s20 = scalar_lea.vmem %s3477_s0, %s2895_s9  ;;  %v2933_v18 = vld [vmem:[%s3478_s1 + $0xc8] sm:$0xff]   ;;  %v2935_v20 = vld [vmem:[%s3478_s1 + $0xc0] sm:$0xff]   ;;  %v2941_v24 = vld [vmem:[%s3478_s1 + $0x78] sm:$0xff]  }
  0x12   : > { %2666 = vmatpush3.bf16.msra.mxu0 %v2922_v2  ;;  %v310_v11 = vld [vmem:[%s3104_s20] sm:$0xf]  ;;  %v311_v12 = vld [vmem:[%s3104_s20 + $0x8] sm:$0xf]  ;;  %v312_v13 = vld [vmem:[%s3104_s20 + $0x10] sm:$0xf] }
  0x13   : > { %2690 = vmatpush3.bf16.msra.mxu1 %v2923_v3  ;;  %2667 = vmatprep.subr.bf16.mxu0 %v2924_v4  ;;  %v2274_v15 = vcombine.low %v310_v11, %v311_v12  ;;  %v2302_v16 = vcombine.low %v311_v12, %v312_v13  ;;  %v313_v21 = vld [vmem:[%s3104_s20 + $0x18] sm:$0xf]  ;;  %v314_v22 = vld [vmem:[%s3104_s20 + $0x20] sm:$0xf]  ;;  %v2942_v26 = vld [vmem:[%s3478_s1 + $0x1b0] sm:$0xff]  }
  0x14   : > { %2691 = vmatprep.subr.bf16.mxu1 %v2925_v5  ;;  %v3135_v25 = vcombine.low %v312_v13, %v313_v21  ;;  %v315_v27 = vld [vmem:[%s3104_s20 + $0x28] sm:$0xf]  ;;  %v2303_v28 = vcombine.low %v313_v21, %v314_v22  ;;  %v316_v29 = vld [vmem:[%s3104_s20 + $0x30] sm:$0xf]  ;;  %v317_v32 = vld [vmem:[%s3104_s20 + $0x38] sm:$0xf] }
  0x15   : > { %2679 = vmatprep.mubr.bf16.mxu0 %v2274_v15  ;;  %2703 = vmatprep.mubr.bf16.mxu1 %v2302_v16  ;;  %v2943_v30 = vld [vmem:[%s3478_s1 + $0x70] sm:$0xff]   ;;  %v3145_v31 = vcombine.low %v314_v22, %v315_v27  ;;  %v2304_v33 = vcombine.low %v315_v27, %v316_v29  ;;  %v819_v34 = vld [vmem:[%s3104_s20] sm:$0xf]  ;;  %v820_v35 = vld [vmem:[%s3104_s20 + $0x4] sm:$0x1]  ;;  %v3155_v38 = vcombine.low %v316_v29, %v317_v32 }
  0x16   : > { %2668 = vmatpush3.bf16.msra.mxu0 %v2924_v4  ;;  %v821_v36 = vld [vmem:[%s3104_s20 + $0x8] sm:$0xf]  ;;  %v3158_v39 = vld [vmem:[%s3104_s20 + $0x40] sm:$0xf]  ;;  %v822_v40 = vld [vmem:[%s3104_s20 + $0xc] sm:$0x1] }
  0x17   : > { %2692 = vmatpush3.bf16.msra.mxu1 %v2925_v5  ;;  %2669 = vmatprep.subr.bf16.mxu0 %v2926_v6  ;;  %v2944_v37 = vld [vmem:[%s3478_s1 + $0x1a8] sm:$0xff]   ;;  %v843_v42 = vshrl.u32 %v819_v34, 16  ;;  %v846_v43 = vshll.u32 %v819_v34, 16  ;;  %v852_v44 = vshll.u32 %v820_v35, 16  ;;  %v857_v45 = vshrl.u32 %v821_v36, 16  ;;  %v2946_v53 = vld [vmem:[%s3478_s1 + $0x1a0] sm:$0xff]   ;;  %vm3178_vm2 = vmor %vm839_vm0, %vm840_vm1 }
  0x18   : > { %2693 = vmatprep.subr.bf16.mxu1 %v2927_v7  ;;  %v2945_v41 = vld [vmem:[%s3478_s1 + $0x68] sm:$0xff]   ;;  %v860_v46 = vshll.u32 %v821_v36, 16  ;;  %v866_v47 = vshll.u32 %v822_v40, 16  ;;  %v2305_v48 = vcombine.low %v317_v32, %v3158_v39  ;;  %v823_v52 = vld [vmem:[%s3104_s20 + $0x10] sm:$0xf]  ;;  %v2947_v56 = vld [vmem:[%s3478_s1 + $0x60] sm:$0xff]  }
  0x19   : > { %v845_v49 = vrot.slane %v843_v42, 4  ;;  %v848_v50 = vrot.slane %v846_v43, 5  ;;  %v859_v51 = vrot.slane %v857_v45, 4  ;;  %v825_v55 = vld [vmem:[%s3104_s20 + $0x18] sm:$0xf]  ;;  %v854_v58 = vrot.slane %v852_v44, 5  ;;  %vm3340_vm5 = vmor %vm1508_vm3, %vm1509_vm4 }
  0x1a   : > { %2670 = vmatpush3.bf16.msra.mxu0 %v2926_v6  ;;  %v862_v54 = vrot.slane %v860_v46, 5  ;;  %v824_v59 = vld [vmem:[%s3104_s20 + $0x14] sm:$0x1]  ;;  %v868_v62 = vrot.slane %v866_v47, 5  ;;  %v871_v63 = vshrl.u32 %v823_v52, 16  ;;  %v874_v0 = vshll.u32 %v823_v52, 16 }
  0x1b   : > { %2694 = vmatpush3.bf16.msra.mxu1 %v2927_v7  ;;  %2671 = vmatprep.subr.bf16.mxu0 %v2928_v8  ;;  %v849_v57 = vor.u32 %v848_v50, %v845_v49  ;;  %v885_v2 = vshrl.u32 %v825_v55, 16  ;;  %v888_v3 = vshll.u32 %v825_v55, 16  ;;  %v2948_v4 = vld [vmem:[%s3478_s1 + $0x198] sm:$0xff]   ;;  %v828_v21 = vld [vmem:[%s3104_s20 + $0x24] sm:$0x1]  ;;  %v2957_v29 = vld [vmem:[%s3478_s1 + $0x48] sm:$0xff]  }
  0x1c   : > { %2695 = vmatprep.subr.bf16.mxu1 %v2929_v9  ;;  %v863_v61 = vor.u32 %v862_v54, %v859_v51  ;;  %v2949_v6 = vld [vmem:[%s3478_s1 + $0x58] sm:$0xff]   ;;  %v873_v12 = vrot.slane %v871_v63, 4  ;;  %v876_v13 = vrot.slane %v874_v0, 5  ;;  %v829_v22 = vld [vmem:[%s3104_s20 + $0x28] sm:$0xf]  ;;  %v908_v32 = vshll.u32 %v828_v21, 16 }
  0x1d   : > { %v850_v1 = vrot.slane %v849_v57, 4  ;;  %v826_v11 = vld [vmem:[%s3104_s20 + $0x1c] sm:$0x1]  ;;  %v887_v15 = vrot.slane %v885_v2, 4  ;;  %v890_v16 = vrot.slane %v888_v3, 5  ;;  %v916_v34 = vshll.u32 %v829_v22, 16 }
  0x1e   : > { %2672 = vmatpush3.bf16.msra.mxu0 %v2928_v8  ;;  %v864_v5 = vrot.slane %v863_v61, 4  ;;  %v880_v8 = vshll.u32 %v824_v59, 16  ;;  %v831_v27 = vld [vmem:[%s3104_s20 + $0x30] sm:$0xf]  ;;  %v832_v46 = vld [vmem:[%s3104_s20 + $0x34] sm:$0x1] }
  0x1f   : > { %2696 = vmatpush3.bf16.msra.mxu1 %v2929_v9  ;;  %2673 = vmatprep.subr.bf16.mxu0 %v2930_v10  ;;  %v855_v7 = vsel %vm3178_vm2, %v850_v1, %v854_v58  ;;  %v2954_v9 = vld [vmem:[%s3478_s1 + $0x190] sm:$0xff]   ;;  %v927_v40 = vshrl.u32 %v831_v27, 16  ;;  %v918_v44 = vrot.slane %v916_v34, 5  ;;  %v2958_v47 = vld [vmem:[%s3478_s1 + $0x180] sm:$0xff]   ;;  %v834_v50 = vld [vmem:[%s3104_s20 + $0x3c] sm:$0x1] }
  0x20   : > { %2697 = vmatprep.subr.bf16.mxu1 %v2931_v14  ;;  %v2959_v52 = vld [vmem:[%s3478_s1 + $0x40] sm:$0xff]   ;;  %v950_v0 = vshll.u32 %v834_v50, 16  ;;  %v2965_v21 = vld [vmem:[%s3478_s1 + $0x128] sm:$0xff]  }
  0x21   : > { %v929_v57 = vrot.slane %v927_v40, 4  ;;  %v2974_v40 = vld [vmem:[%s3478_s1 + $0x1c8] sm:$0xff]  }
  0x22   : > { %2674 = vmatpush3.bf16.msra.mxu0 %v2930_v10  ;;  %v3196_v10 = vsel %vm3178_vm2, %v864_v5, %v868_v62  ;;  %v936_v62 = vshll.u32 %v832_v46, 16  ;;  %v2960_v5 = vld [vmem:[%s3478_s1 + $0x138] sm:$0xff]   ;;  %v838_v46 = vld [vmem:[%s3104_s20 + $0x4c] sm:$0x1] }
  0x23   : > { %2698 = vmatpush3.bf16.msra.mxu1 %v2931_v14  ;;  %2675 = vmatprep.subr.bf16.mxu0 %v2932_v17  ;;  %v2355_v14 = vcombine.low %v855_v7, %v3196_v10 }
  0x24   : > { %2699 = vmatprep.subr.bf16.mxu1 %v2933_v18 }
  0x26   : > { %2676 = vmatpush3.bf16.msra.mxu0 %v2932_v17  ;;  %v2955_v17 = vld [vmem:[%s3478_s1 + $0x50] sm:$0xff]  }
  0x27   : > { %2700 = vmatpush3.bf16.msra.mxu1 %v2933_v18  ;;  %2677 = vmatprep.subr.bf16.mxu0 %v2934_v19  ;;  %v827_v18 = vld [vmem:[%s3104_s20 + $0x20] sm:$0xf] }
  0x28   : > { %2701 = vmatprep.subr.bf16.mxu1 %v2935_v20 }
  0x2a   : > { %2678 = vmatpush3.bf16.msra.mxu0 %v2934_v19  ;;  %v882_v19 = vrot.slane %v880_v8, 5  ;;  %v2961_v8 = vld [vmem:[%s3478_s1 + $0x1f8] sm:$0xff]  }
  0x2b   : > { %2702 = vmatpush3.bf16.msra.mxu1 %v2935_v20  ;;  %2711 = vmatprep.subr.bf16.mxu0 %v2940_v23  ;;  %v894_v20 = vshll.u32 %v826_v11, 16  ;;  %v2962_v11 = vld [vmem:[%s3478_s1 + $0x130] sm:$0xff]  }
  0x2c   : > { %2735 = vmatprep.subr.bf16.mxu1 %v2941_v24 }
  0x2d   : > { %2680 = vmatmul.mubr.bf16.vlgmr.msra.gmra.mxu0 %v3135_v25  ;;  %v896_v42 = vrot.slane %v894_v20, 5  ;;  %v319_v20 = vld [vmem:[%s3104_s20 + $0x48] sm:$0xf] }
  0x2e   : > { %2704 = vmatmul.mubr.bf16.vlgmr.msra.gmra.mxu1 %v2303_v28  ;;  %2712 = vmatpush3.bf16.msra.mxu0 %v2940_v23  ;;  %v877_v23 = vor.u32 %v876_v13, %v873_v12  ;;  %v2956_v28 = vld [vmem:[%s3478_s1 + $0x188] sm:$0xff]  }
  0x2f   : > { %2736 = vmatpush3.bf16.msra.mxu1 %v2941_v24  ;;  %2713 = vmatprep.subr.bf16.mxu0 %v2942_v26  ;;  %v830_v24 = vld [vmem:[%s3104_s20 + $0x2c] sm:$0x1] }
  0x30   : > { %2737 = vmatprep.subr.bf16.mxu1 %v2943_v30  ;;  %2683 = vmatprep.mubr.bf16.mxu0 %v3145_v31  ;;  %v922_v45 = vshll.u32 %v830_v24, 16  ;;  %v2330_v24 = vcombine.low %v3158_v39, %v319_v20  ;;  %v2968_v39 = vld [vmem:[%s3478_s1 + $0x1e0] sm:$0xff]  }
  0x31   : > { %2707 = vmatprep.mubr.bf16.mxu1 %v2304_v33  ;;  %v913_v33 = vshrl.u32 %v829_v22, 16 }
  0x32   : > { %2714 = vmatpush3.bf16.msra.mxu0 %v2942_v26  ;;  %v902_v26 = vshll.u32 %v827_v18, 16  ;;  %v924_v61 = vrot.slane %v922_v45, 5 }
  0x33   : > { %2738 = vmatpush3.bf16.msra.mxu1 %v2943_v30  ;;  %2715 = vmatprep.subr.bf16.mxu0 %v2944_v37  ;;  %v891_v30 = vor.u32 %v890_v16, %v887_v15  ;;  %v915_v43 = vrot.slane %v913_v33, 4  ;;  %v952_v15 = vrot.slane %v950_v0, 5  ;;  %v2980_v0 = vld [vmem:[%s3478_s1 + $0x170] sm:$0xff]  }
  0x34   : > { %2739 = vmatprep.subr.bf16.mxu1 %v2945_v41  ;;  %v904_v36 = vrot.slane %v902_v26, 5 }
  0x35   : > { %2684 = vmatmul.mubr.bf16.gmra.mxu0 %v3155_v38  ;;  %v919_v54 = vor.u32 %v918_v44, %v915_v43  ;;  %v836_v43 = vld [vmem:[%s3104_s20 + $0x44] sm:$0x1] }
  0x36   : > { %2716 = vmatpush3.bf16.msra.mxu0 %v2944_v37  ;;  %2708 = vmatmul.mubr.bf16.gmra.mxu1 %v2305_v48  ;;  %v833_v37 = vld [vmem:[%s3104_s20 + $0x38] sm:$0xf]  ;;  %v878_v48 = vrot.slane %v877_v23, 4  ;;  %v2966_v23 = vld [vmem:[%s3478_s1 + $0x1e8] sm:$0xff]   ;;  %v1134_v50 = vshll.u32 %v836_v43, 16 }
  0x37   : > { %2740 = vmatpush3.bf16.msra.mxu1 %v2945_v41  ;;  %2717 = vmatprep.subr.bf16.mxu0 %v2946_v53  ;;  %v930_v41 = vshll.u32 %v831_v27, 16  ;;  %v941_v51 = vshrl.u32 %v833_v37, 16  ;;  %v944_v55 = vshll.u32 %v833_v37, 16  ;;  %v920_v2 = vrot.slane %v919_v54, 4  ;;  %v2969_v27 = vld [vmem:[%s3478_s1 + $0x118] sm:$0xff]   ;;  %v2973_v37 = vld [vmem:[%s3478_s1 + $0x108] sm:$0xff]  }
  0x38   : > { %2741 = vmatprep.subr.bf16.mxu1 %v2947_v56  ;;  %2727 = vmatprep.mubr.bf16.mxu0 %v3135_v25  ;;  %v899_v25 = vshrl.u32 %v827_v18, 16  ;;  %v883_v3 = vsel %vm3178_vm2, %v878_v48, %v882_v19  ;;  %v2963_v18 = vld [vmem:[%s3478_s1 + $0x1f0] sm:$0xff]   ;;  %v2976_v48 = vld [vmem:[%s3478_s1 + $0x1c0] sm:$0xff]   ;;  %v2978_v54 = vld [vmem:[%s3478_s1 + $0x178] sm:$0xff]  }
  0x39   : > { %2751 = vmatprep.mubr.bf16.mxu1 %v2355_v14  ;;  %v932_v58 = vrot.slane %v930_v41, 5  ;;  %v943_v59 = vrot.slane %v941_v51, 4  ;;  %v946_v63 = vrot.slane %v944_v55, 5  ;;  %v3245_v13 = vsel %vm3178_vm2, %v920_v2, %v924_v61  ;;  %v1475_v2 = vld [vmem:[%s3104_s20 + $0xc] sm:$0x1] }
  0x3a   : > { %2718 = vmatpush3.bf16.msra.mxu0 %v2946_v53  ;;  %v901_v35 = vrot.slane %v899_v25, 4  ;;  %v892_v53 = vrot.slane %v891_v30, 4  ;;  %v938_v14 = vrot.slane %v936_v62, 5  ;;  %v2383_v26 = vcombine.low %v3196_v10, %v883_v3  ;;  %v2971_v10 = vld [vmem:[%s3478_s1 + $0x110] sm:$0xff]   ;;  %v837_v30 = vld [vmem:[%s3104_s20 + $0x48] sm:$0xf] }
  0x3b   : > { %2742 = vmatpush3.bf16.msra.mxu1 %v2947_v56  ;;  %2719 = vmatprep.subr.bf16.mxu0 %v2948_v4  ;;  %v910_v56 = vrot.slane %v908_v32, 5  ;;  %v947_v7 = vor.u32 %v946_v63, %v943_v59  ;;  %v2972_v32 = vld [vmem:[%s3478_s1 + $0x1d0] sm:$0xff]   ;;  %v1472_v62 = vld [vmem:[%s3104_s20] sm:$0xe]  ;;  %v1473_v63 = vld [vmem:[%s3104_s20 + $0x4] sm:$0x1] }
  0x3c   : > { %2743 = vmatprep.subr.bf16.mxu1 %v2949_v6  ;;  %v905_v49 = vor.u32 %v904_v36, %v901_v35  ;;  %v1302_v35 = vshrl.u32 %v837_v30, 16  ;;  %v1305_v36 = vshll.u32 %v837_v30, 16  ;;  %v1480_v30 = vld [vmem:[%s3104_s20 + $0x20] sm:$0xe]  ;;  %v1485_v43 = vld [vmem:[%s3104_s20 + $0x34] sm:$0x1] }
  0x3e   : > { %2720 = vmatpush3.bf16.msra.mxu0 %v2948_v4  ;;  %v906_v1 = vrot.slane %v905_v49, 4  ;;  %v3227_v4 = vsel %vm3178_vm2, %v892_v53, %v896_v42  ;;  %v1304_v44 = vrot.slane %v1302_v35, 4  ;;  %v1307_v45 = vrot.slane %v1305_v36, 5  ;;  %v2977_v53 = vld [vmem:[%s3478_s1 + $0xb8] sm:$0xff]   ;;  %v1482_v36 = vld [vmem:[%s3104_s20 + $0x28] sm:$0xe] }
  0x3f   : > { %2744 = vmatpush3.bf16.msra.mxu1 %v2949_v6  ;;  %2721 = vmatprep.subr.bf16.mxu0 %v2954_v9  ;;  %v933_v6 = vor.u32 %v932_v58, %v929_v57  ;;  %v2979_v58 = vld [vmem:[%s3478_s1 + $0xb0] sm:$0xff]  }
  0x40   : > { %2745 = vmatprep.subr.bf16.mxu1 %v2955_v17  ;;  %v3241_v12 = vsel %vm3178_vm2, %v906_v1, %v910_v56  ;;  %v1308_v51 = vor.u32 %v1307_v45, %v1304_v44  ;;  %v1136_v56 = vrot.slane %v1134_v50, 5  ;;  %v1474_v1 = vld [vmem:[%s3104_s20 + $0x8] sm:$0xe]  ;;  %v2992_v44 = vld [vmem:[%s3478_s1 + $0x140] sm:$0xff]   ;;  %v2425_v45 = vrot.slane %v1482_v36, 9 }
  0x41   : > { %v934_v16 = vrot.slane %v933_v6, 4  ;;  %v3253_v19 = vcombine.low %v3241_v12, %v3245_v13  ;;  %v2384_v57 = vcombine.low %v3227_v4, %v3241_v12  ;;  %v2420_v6 = vrot.slane %v1472_v62, 9 }
  0x42   : > { %2722 = vmatpush3.bf16.msra.mxu0 %v2954_v9  ;;  %v2356_v9 = vcombine.low %v883_v3, %v3227_v4  ;;  %v1309_v59 = vrot.slane %v1308_v51, 4  ;;  %v1476_v3 = vld [vmem:[%s3104_s20 + $0x10] sm:$0xe]  ;;  %v2993_v51 = vld [vmem:[%s3478_s1 + $0x238] sm:$0xff]  }
  0x43   : > { %2746 = vmatpush3.bf16.msra.mxu1 %v2955_v17  ;;  %2723 = vmatprep.subr.bf16.mxu0 %v2956_v28  ;;  %v948_v17 = vrot.slane %v947_v7, 4  ;;  %v3261_v22 = vsel %vm3178_vm2, %v934_v16, %v938_v14  ;;  %v1513_v7 = vrot.slane %v1473_v63, 5  ;;  %v2422_v14 = vrot.slane %v1476_v3, 9  ;;  %v2994_v63 = vld [vmem:[%s3478_s1 + $0x230] sm:$0xff]  }
  0x44   : > { %2747 = vmatprep.subr.bf16.mxu1 %v2957_v29  ;;  %v2385_v4 = vcombine.low %v3245_v13, %v3261_v22  ;;  %v2981_v13 = vld [vmem:[%s3478_s1 + $0xa8] sm:$0xff]  }
  0x46   : > { %2724 = vmatpush3.bf16.msra.mxu0 %v2956_v28  ;;  %v2970_v28 = vld [vmem:[%s3478_s1 + $0x1d8] sm:$0xff]  }
  0x47   : > { %2748 = vmatpush3.bf16.msra.mxu1 %v2957_v29  ;;  %2725 = vmatprep.subr.bf16.mxu0 %v2958_v47  ;;  %v835_v29 = vld [vmem:[%s3104_s20 + $0x40] sm:$0xf] }
  0x48   : > { %2749 = vmatprep.subr.bf16.mxu1 %v2959_v52  ;;  %v1125_v33 = vshrl.u32 %v835_v29, 16  ;;  %v1128_v34 = vshll.u32 %v835_v29, 16  ;;  %v2990_v29 = vld [vmem:[%s3478_s1 + $0x148] sm:$0xff]  }
  0x4a   : > { %2726 = vmatpush3.bf16.msra.mxu0 %v2958_v47  ;;  %v1127_v41 = vrot.slane %v1125_v33, 4  ;;  %v1130_v42 = vrot.slane %v1128_v34, 5  ;;  %v2975_v47 = vld [vmem:[%s3478_s1 + $0x100] sm:$0xff]  }
  0x4b   : > { %2750 = vmatpush3.bf16.msra.mxu1 %v2959_v52  ;;  %2759 = vmatprep.subr.bf16.mxu0 %v2960_v5  ;;  %v1311_v52 = vshll.u32 %v838_v46, 16  ;;  %v2991_v33 = vld [vmem:[%s3478_s1 + $0x80] sm:$0xff]  }
  0x4c   : > { %2783 = vmatprep.subr.bf16.mxu1 %v2961_v8  ;;  %v1131_v49 = vor.u32 %v1130_v42, %v1127_v41  ;;  %v1484_v42 = vld [vmem:[%s3104_s20 + $0x30] sm:$0xe] }
  0x4d   : > { %2728 = vmatmul.mubr.bf16.vlgmr.msra.gmra.mxu0 %v3145_v31  ;;  %v3265_v31 = vsel %vm3178_vm2, %v948_v17, %v952_v15  ;;  %v1313_v61 = vrot.slane %v1311_v52, 5  ;;  %v2982_v17 = vld [vmem:[%s3478_s1 + $0x168] sm:$0xff]   ;;  %v1486_v52 = vld [vmem:[%s3104_s20 + $0x38] sm:$0xe] }
  0x4e   : > { %2752 = vmatmul.mubr.bf16.vlgmr.msra.gmra.mxu1 %v2356_v9  ;;  %2760 = vmatpush3.bf16.msra.mxu0 %v2960_v5  ;;  %v3275_v25 = vcombine.low %v3261_v22, %v3265_v31  ;;  %v1132_v55 = vrot.slane %v1131_v49, 4  ;;  %v1477_v5 = vld [vmem:[%s3104_s20 + $0x14] sm:$0x1]  ;;  %v2983_v22 = vld [vmem:[%s3478_s1 + $0xa0] sm:$0xff]   ;;  %v1537_v49 = vrot.slane %v1485_v43, 5 }
  0x4f   : > { %2784 = vmatpush3.bf16.msra.mxu1 %v2961_v8  ;;  %2761 = vmatprep.subr.bf16.mxu0 %v2962_v11  ;;  %v2421_v8 = vrot.slane %v1474_v1, 9  ;;  %v1521_v15 = vrot.slane %v1477_v5, 5  ;;  %v1314_v16 = vsel %vm3178_vm2, %v1309_v59, %v1313_v61  ;;  %v2427_v61 = vrot.slane %v1486_v52, 9 }
  0x50   : > { %2785 = vmatprep.subr.bf16.mxu1 %v2963_v18  ;;  %2731 = vmatprep.mubr.bf16.mxu0 %v3155_v38  ;;  %v2967_v38 = vld [vmem:[%s3478_s1 + $0x120] sm:$0xff]  }
  0x51   : > { %2755 = vmatprep.mubr.bf16.mxu1 %v3253_v19  ;;  %v3360_v60 = vsel %vm3340_vm5, %v2422_v14, %v1521_v15  ;;  %v2998_v14 = vld [vmem:[%s3478_s1 + $0x210] sm:$0xff]   ;;  %v2999_v15 = vld [vmem:[%s3478_s1 + $0x208] sm:$0xff]  }
  0x52   : > { %2762 = vmatpush3.bf16.msra.mxu0 %v2962_v11  ;;  %v1137_v11 = vsel %vm3178_vm2, %v1132_v55, %v1136_v56  ;;  %v1489_v55 = vld [vmem:[%s3104_s20 + $0x44] sm:$0x1] }
  0x53   : > { %2786 = vmatpush3.bf16.msra.mxu1 %v2963_v18  ;;  %2763 = vmatprep.subr.bf16.mxu0 %v2965_v21  ;;  %v2386_v18 = vcombine.low %v3265_v31, %v1137_v11  ;;  %v2984_v31 = vld [vmem:[%s3478_s1 + $0x160] sm:$0xff]   ;;  %v1717_v1 = vrot.slane %v1489_v55, 5 }
  0x54   : > { %2787 = vmatprep.subr.bf16.mxu1 %v2966_v23 }
  0x55   : > { %2732 = vmatmul.mubr.bf16.gmra.mxu0 %v2330_v24 }
  0x56   : > { %2764 = vmatpush3.bf16.msra.mxu0 %v2965_v21  ;;  %2756 = vmatmul.mubr.bf16.gmra.mxu1 %v3275_v25  ;;  %v2411_v21 = vcombine.low %v1137_v11, %v1314_v16  ;;  %v2997_v11 = vld [vmem:[%s3478_s1 + $0x218] sm:$0xff]   ;;  %v1491_v16 = vld [vmem:[%s3104_s20 + $0x4c] sm:$0x1] }
  0x57   : > { %2788 = vmatpush3.bf16.msra.mxu1 %v2966_v23  ;;  %2765 = vmatprep.subr.bf16.mxu0 %v2967_v38 }
  0x58   : > { %2789 = vmatprep.subr.bf16.mxu1 %v2968_v39  ;;  %2775 = vmatprep.mubr.bf16.mxu0 %v2383_v26  ;;  %v2988_v26 = vld [vmem:[%s3478_s1 + $0x150] sm:$0xff]  }
  0x59   : > { %2799 = vmatprep.mubr.bf16.mxu1 %v2356_v9  ;;  %v1517_v9 = vrot.slane %v1475_v2, 5 }
  0x5a   : > { %2766 = vmatpush3.bf16.msra.mxu0 %v2967_v38  ;;  %v2986_v38 = vld [vmem:[%s3478_s1 + $0x158] sm:$0xff]  }
  0x5b   : > { %2790 = vmatpush3.bf16.msra.mxu1 %v2968_v39  ;;  %2767 = vmatprep.subr.bf16.mxu0 %v2969_v27  ;;  %v1518_v20 = vsel %vm3340_vm5, %v2421_v8, %v1517_v9  ;;  %v2987_v39 = vld [vmem:[%s3478_s1 + $0x90] sm:$0xff]   ;;  %v2996_v9 = vld [vmem:[%s3478_s1 + $0x220] sm:$0xff]  }
  0x5c   : > { %2791 = vmatprep.subr.bf16.mxu1 %v2970_v28  ;;  %v2473_v24 = vcombine.low %v1518_v20, %v3360_v60 }
  0x5e   : > { %2768 = vmatpush3.bf16.msra.mxu0 %v2969_v27  ;;  %v2989_v27 = vld [vmem:[%s3478_s1 + $0x88] sm:$0xff]  }
  0x5f   : > { %2792 = vmatpush3.bf16.msra.mxu1 %v2970_v28  ;;  %2769 = vmatprep.subr.bf16.mxu0 %v2971_v10  ;;  %v1478_v28 = vld [vmem:[%s3104_s20 + $0x18] sm:$0xe] }
  0x60   : > { %2793 = vmatprep.subr.bf16.mxu1 %v2972_v32  ;;  %v2423_v34 = vrot.slane %v1478_v28, 9 }
  0x62   : > { %2770 = vmatpush3.bf16.msra.mxu0 %v2971_v10  ;;  %v1479_v10 = vld [vmem:[%s3104_s20 + $0x1c] sm:$0x1] }
  0x63   : > { %2794 = vmatpush3.bf16.msra.mxu1 %v2972_v32  ;;  %2771 = vmatprep.subr.bf16.mxu0 %v2973_v37  ;;  %v1481_v32 = vld [vmem:[%s3104_s20 + $0x24] sm:$0x1]  ;;  %v1525_v35 = vrot.slane %v1479_v10, 5 }
  0x64   : > { %2795 = vmatprep.subr.bf16.mxu1 %v2974_v40  ;;  %v1529_v41 = vrot.slane %v1481_v32, 5 }
  0x66   : > { %2772 = vmatpush3.bf16.msra.mxu0 %v2973_v37  ;;  %v1483_v37 = vld [vmem:[%s3104_s20 + $0x2c] sm:$0x1] }
  0x67   : > { %2796 = vmatpush3.bf16.msra.mxu1 %v2974_v40  ;;  %2773 = vmatprep.subr.bf16.mxu0 %v2975_v47  ;;  %v2424_v40 = vrot.slane %v1480_v30, 9  ;;  %v1533_v46 = vrot.slane %v1483_v37, 5 }
  0x68   : > { %2797 = vmatprep.subr.bf16.mxu1 %v2976_v48 }
  0x69   : > { %v1530_v50 = vsel %vm3340_vm5, %v2424_v40, %v1529_v41 }
  0x6a   : > { %2774 = vmatpush3.bf16.msra.mxu0 %v2975_v47  ;;  %v1526_v47 = vsel %vm3340_vm5, %v2423_v34, %v1525_v35 }
  0x6b   : > { %2798 = vmatpush3.bf16.msra.mxu1 %v2976_v48  ;;  %2807 = vmatprep.subr.bf16.mxu0 %v2977_v53  ;;  %v2426_v48 = vrot.slane %v1484_v42, 9  ;;  %v2445_v56 = vcombine.low %v3360_v60, %v1526_v47 }
  0x6c   : > { %2831 = vmatprep.subr.bf16.mxu1 %v2978_v54 }
  0x6d   : > { %2776 = vmatmul.mubr.bf16.vlgmr.msra.gmra.mxu0 %v2384_v57  ;;  %v1534_v57 = vsel %vm3340_vm5, %v2425_v45, %v1533_v46  ;;  %v1538_v59 = vsel %vm3340_vm5, %v2426_v48, %v1537_v49 }
  0x6e   : > { %2800 = vmatmul.mubr.bf16.vlgmr.msra.gmra.mxu1 %v3253_v19  ;;  %2808 = vmatpush3.bf16.msra.mxu0 %v2977_v53  ;;  %v1514_v19 = vsel %vm3340_vm5, %v2420_v6, %v1513_v7  ;;  %v1487_v53 = vld [vmem:[%s3104_s20 + $0x3c] sm:$0x1]  ;;  %v2446_v2 = vcombine.low %v1530_v50, %v1534_v57  ;;  %v2475_v3 = vcombine.low %v1534_v57, %v1538_v59 }
  0x6f   : > { %2832 = vmatpush3.bf16.msra.mxu1 %v2978_v54  ;;  %2809 = vmatprep.subr.bf16.mxu0 %v2979_v58  ;;  %v2444_v23 = vcombine.low %v1514_v19, %v1518_v20  ;;  %v1488_v54 = vld [vmem:[%s3104_s20 + $0x40] sm:$0xe]  ;;  %v1541_v62 = vrot.slane %v1487_v53, 5 }
  0x70   : > { %2833 = vmatprep.subr.bf16.mxu1 %v2980_v0  ;;  %2779 = vmatprep.mubr.bf16.mxu0 %v2385_v4  ;;  %v2995_v4 = vld [vmem:[%s3478_s1 + $0x228] sm:$0xff]   ;;  %v3000_v19 = vld [vmem:[%s3478_s1 + $0x200] sm:$0xff]  }
  0x71   : > { %2803 = vmatprep.mubr.bf16.mxu1 %v3275_v25  ;;  %v2985_v25 = vld [vmem:[%s3478_s1 + $0x98] sm:$0xff]   ;;  %v1542_v5 = vsel %vm3340_vm5, %v2427_v61, %v1541_v62 }
  0x72   : > { %2810 = vmatpush3.bf16.msra.mxu0 %v2979_v58  ;;  %v2474_v58 = vcombine.low %v1526_v47, %v1530_v50  ;;  %v2447_v7 = vcombine.low %v1538_v59, %v1542_v5 }
  0x73   : > { %2834 = vmatpush3.bf16.msra.mxu1 %v2980_v0  ;;  %2811 = vmatprep.subr.bf16.mxu0 %v2981_v13  ;;  %v2456_v0 = vrot.slane %v1488_v54, 9 }
  0x74   : > { %2835 = vmatprep.subr.bf16.mxu1 %v2982_v17 }
  0x75   : > { %2780 = vmatmul.mubr.bf16.gmra.mxu0 %v2386_v18  ;;  %v1718_v6 = vsel %vm3340_vm5, %v2456_v0, %v1717_v1  ;;  %v1886_v18 = vrot.slane %v1491_v16, 5 }
  0x76   : > { %2812 = vmatpush3.bf16.msra.mxu0 %v2981_v13  ;;  %2804 = vmatmul.mubr.bf16.gmra.mxu1 %v2411_v21  ;;  %v2476_v8 = vcombine.low %v1542_v5, %v1718_v6  ;;  %v1490_v13 = vld [vmem:[%s3104_s20 + $0x48] sm:$0xe] }
  0x77   : > { %2836 = vmatpush3.bf16.msra.mxu1 %v2982_v17  ;;  %2813 = vmatprep.subr.bf16.mxu0 %v2983_v22  ;;  %v2485_v17 = vrot.slane %v1490_v13, 9 }
  0x78   : > { %2837 = vmatprep.subr.bf16.mxu1 %v2984_v31  ;;  %2823 = vmatprep.mubr.bf16.mxu0 %v2444_v23 }
  0x79   : > { %2847 = vmatprep.mubr.bf16.mxu1 %v2473_v24  ;;  %v1887_v20 = vsel %vm3340_vm5, %v2485_v17, %v1886_v18 }
  0x7a   : > { %2814 = vmatpush3.bf16.msra.mxu0 %v2983_v22  ;;  %v2502_v21 = vcombine.low %v1718_v6, %v1887_v20 }
  0x7b   : > { %2838 = vmatpush3.bf16.msra.mxu1 %v2984_v31  ;;  %2815 = vmatprep.subr.bf16.mxu0 %v2985_v25 }
  0x7c   : > { %2839 = vmatprep.subr.bf16.mxu1 %v2986_v38 }
  0x7e   : > { %2816 = vmatpush3.bf16.msra.mxu0 %v2985_v25 }
  0x7f   : > { %2840 = vmatpush3.bf16.msra.mxu1 %v2986_v38  ;;  %2817 = vmatprep.subr.bf16.mxu0 %v2987_v39 }
  0x80   : > { %2841 = vmatprep.subr.bf16.mxu1 %v2988_v26 }
  0x82   : > { %2818 = vmatpush3.bf16.msra.mxu0 %v2987_v39 }
  0x83   : > { %2842 = vmatpush3.bf16.msra.mxu1 %v2988_v26  ;;  %2819 = vmatprep.subr.bf16.mxu0 %v2989_v27 }
  0x84   : > { %2843 = vmatprep.subr.bf16.mxu1 %v2990_v29 }
  0x86   : > { %2820 = vmatpush3.bf16.msra.mxu0 %v2989_v27 }
  0x87   : > { %2844 = vmatpush3.bf16.msra.mxu1 %v2990_v29  ;;  %2821 = vmatprep.subr.bf16.mxu0 %v2991_v33 }
  0x88   : > { %2845 = vmatprep.subr.bf16.mxu1 %v2992_v44 }
  0x8a   : > { %2822 = vmatpush3.bf16.msra.mxu0 %v2991_v33 }
  0x8b   : > { %2846 = vmatpush3.bf16.msra.mxu1 %v2992_v44  ;;  %2855 = vmatprep.subr.bf16.mxu0 %v2993_v51 }
  0x8c   : > { %2879 = vmatprep.subr.bf16.mxu1 %v2993_v51 }
  0x8d   : > { %2824 = vmatmul.mubr.bf16.vlgmr.msra.gmra.mxu0 %v2445_v56 }
  0x8e   : > { %2848 = vmatmul.mubr.bf16.vlgmr.msra.gmra.mxu1 %v2474_v58  ;;  %2856 = vmatpush3.bf16.msra.mxu0 %v2993_v51 }
  0x8f   : > { %2887 = vmatpush3.bf16.msra.mxu1 %v2993_v51  ;;  %2857 = vmatprep.subr.bf16.mxu0 %v2994_v63 }
  0x90   : > { %2880 = vmatprep.subr.bf16.mxu1 %v2994_v63  ;;  %2827 = vmatprep.mubr.bf16.mxu0 %v2446_v2 }
  0x91   : > { %2851 = vmatprep.mubr.bf16.mxu1 %v2475_v3 }
  0x92   : > { %2858 = vmatpush3.bf16.msra.mxu0 %v2994_v63 }
  0x93   : > { %2888 = vmatpush3.bf16.msra.mxu1 %v2994_v63  ;;  %2859 = vmatprep.subr.bf16.mxu0 %v2995_v4 }
  0x94   : > { %2881 = vmatprep.subr.bf16.mxu1 %v2995_v4 }
  0x95   : > { %2828 = vmatmul.mubr.bf16.gmra.mxu0 %v2447_v7 }
  0x96   : > { %2860 = vmatpush3.bf16.msra.mxu0 %v2995_v4  ;;  %2852 = vmatmul.mubr.bf16.gmra.mxu1 %v2476_v8 }
  0x97   : > { %2889 = vmatpush3.bf16.msra.mxu1 %v2995_v4  ;;  %2861 = vmatprep.subr.bf16.mxu0 %v2996_v9 }
  0x98   : > { %2882 = vmatprep.subr.bf16.mxu1 %v2996_v9  ;;  %2871 = vmatprep.mubr.bf16.mxu0 %v2445_v56 }
  0x99   : > { %2875 = vmatprep.mubr.bf16.mxu1 %v2447_v7 }
  0x9a   : > { %2862 = vmatpush3.bf16.msra.mxu0 %v2996_v9 }
  0x9b   : > { %2890 = vmatpush3.bf16.msra.mxu1 %v2996_v9  ;;  %2863 = vmatprep.subr.bf16.mxu0 %v2997_v11 }
  0x9c   : > { %2883 = vmatprep.subr.bf16.mxu1 %v2997_v11 }
  0x9e   : > { %2864 = vmatpush3.bf16.msra.mxu0 %v2997_v11 }
  0x9f   : > { %2891 = vmatpush3.bf16.msra.mxu1 %v2997_v11  ;;  %2865 = vmatprep.subr.bf16.mxu0 %v2998_v14 }
  0xa0   : > { %2884 = vmatprep.subr.bf16.mxu1 %v2998_v14 }
  0xa2   : > { %2866 = vmatpush3.bf16.msra.mxu0 %v2998_v14 }
  0xa3   : > { %2892 = vmatpush3.bf16.msra.mxu1 %v2998_v14  ;;  %2867 = vmatprep.subr.bf16.mxu0 %v2999_v15 }
  0xa4   : > { %2885 = vmatprep.subr.bf16.mxu1 %v2999_v15 }
  0xa6   : > { %2868 = vmatpush3.bf16.msra.mxu0 %v2999_v15 }
  0xa7   : > { %2893 = vmatpush3.bf16.msra.mxu1 %v2999_v15  ;;  %2869 = vmatprep.subr.bf16.mxu0 %v3000_v19 }
  0xa8   : > { %2886 = vmatprep.subr.bf16.mxu1 %v3000_v19 }
  0xaa   : > { %2870 = vmatpush3.bf16.msra.mxu0 %v3000_v19 }
  0xab   : > { %2894 = vmatpush3.bf16.msra.mxu1 %v3000_v19 }
  0xad   : > { %2872 = vmatmul.mubr.bf16.vlgmr.msra.gmra.mxu0 %v2446_v2 }
  0xae   : > { %2876 = vmatmul.mubr.bf16.vlgmr.msra.gmra.mxu1 %v2502_v21 }
  0xed   : > { %v2681_v60 = vpop.f32.mrf.mxu0 }
  0xee   : > { %v2705_v31 = vpop.f32.mrf.mxu1 }
  0xef   : > { %v450_v22 = vpop.f32.mrf.mxu0  ;;  %v647_v9 = vadd.f32 %v2705_v31, %v2681_v60 }
  0xf0   : > { %v614_v24 = vpop.f32.mrf.mxu1 }
  0xf1   : > { %v2682_v23 = vpop.f32.mrf.mxu0  ;;  %v645_v13 = vadd.f32 %v614_v24, %v450_v22 }
  0xf2   : > { %v2706_v39 = vpop.f32.mrf.mxu1 }
  0xf3   : > { %v453_v25 = vpop.f32.mrf.mxu0  ;;  %v648_v19 = vadd.f32 %v2706_v39, %v2682_v23 }
  0xf4   : > { %v617_v27 = vpop.f32.mrf.mxu1 }
  0xf5   : > { %v2685_v38 = vpop.f32.mrf.mxu0  ;;  %v646_v60 = vadd.f32 %v617_v27, %v453_v25 }
  0xf6   : > { %v2709_v12 = vpop.f32.mrf.mxu1 }
  0xf7   : > { %v466_v26 = vpop.f32.mrf.mxu0  ;;  %v651_v14 = vadd.f32 %v2709_v12, %v2685_v38 }
  0xf8   : > { %v630_v10 = vpop.f32.mrf.mxu1 }
  0xf9   : > { %v2686_v28 = vpop.f32.mrf.mxu0  ;;  %v649_v17 = vadd.f32 %v630_v10, %v466_v26 }
  0xfa   : > { %v2710_v32 = vpop.f32.mrf.mxu1 }
  0xfb   : > { %v469_v29 = vpop.f32.mrf.mxu0 }
  0xfc   : > { %v633_v34 = vpop.f32.mrf.mxu1 }
  0xfd   : > { %v650_v22 = vadd.f32 %v633_v34, %v469_v29 }
 0x10d   : > { %v2729_v30 = vpop.f32.mrf.mxu0 }
 0x10e   : > { %v2753_v35 = vpop.f32.mrf.mxu1  ;;  %v805_v16 = vadd.f32 %v2729_v30, %v647_v9 }
 0x10f   : > { %v772_v33 = vpop.f32.mrf.mxu0 }
 0x110   : > { %v1077_v37 = vpop.f32.mrf.mxu1  ;;  %v803_v20 = vadd.f32 %v772_v33, %v645_v13 }
 0x111   : > { %v2730_v36 = vpop.f32.mrf.mxu0 }
 0x112   : > { %v2754_v41 = vpop.f32.mrf.mxu1  ;;  %v806_v12 = vadd.f32 %v2730_v36, %v648_v19  ;;  %v1108_v30 = vadd.f32 %v1077_v37, %v803_v20 }
 0x113   : > { %v775_v40 = vpop.f32.mrf.mxu0 }
 0x114   : > { %v1080_v43 = vpop.f32.mrf.mxu1  ;;  %v804_v10 = vadd.f32 %v775_v40, %v646_v60  ;;  %v1111_v33 = vadd.f32 %v2754_v41, %v806_v12 }
 0x115   : > { %v2733_v42 = vpop.f32.mrf.mxu0 }
 0x116   : > { %v2757_v45 = vpop.f32.mrf.mxu1  ;;  %v809_v18 = vadd.f32 %v2733_v42, %v651_v14 }
 0x117   : > { %v788_v44 = vpop.f32.mrf.mxu0 }
 0x118   : > { %v1093_v47 = vpop.f32.mrf.mxu1  ;;  %v1114_v24 = vadd.f32 %v2757_v45, %v809_v18 }
 0x119   : > { %v2734_v46 = vpop.f32.mrf.mxu0 }
 0x11a   : > { %v2758_v49 = vpop.f32.mrf.mxu1 }
 0x11b   : > { %v791_v48 = vpop.f32.mrf.mxu0 }
 0x11c   : > { %v1096_v51 = vpop.f32.mrf.mxu1  ;;  %v808_v42 = vadd.f32 %v791_v48, %v650_v22 }
 0x12d   : > { %v2777_v50 = vpop.f32.mrf.mxu0 }
 0x12e   : > { %v2801_v53 = vpop.f32.mrf.mxu1 }
 0x12f   : > { %v1254_v52 = vpop.f32.mrf.mxu0 }
 0x130   : > { %v1425_v55 = vpop.f32.mrf.mxu1  ;;  %v1285_v13 = vadd.f32 %v1254_v52, %v1108_v30 }
 0x131   : > { %v2778_v54 = vpop.f32.mrf.mxu0 }
 0x132   : > { %v2802_v57 = vpop.f32.mrf.mxu1  ;;  %v1288_v27 = vadd.f32 %v2778_v54, %v1111_v33  ;;  %v1456_v45 = vadd.f32 %v1425_v55, %v1285_v13 }
 0x133   : > { %v1257_v56 = vpop.f32.mrf.mxu0 }
 0x134   : > { %v3446_v59 = vpop.f32.mrf.mxu1 }
 0x135   : > { %v2781_v58 = vpop.f32.mrf.mxu0  ;;  %3486 = vst [vmem:[#allocation3_spill] sm:$0xff] %v3446_v59  ;;  %v652_v59 = vadd.f32 %v2710_v32, %v2686_v28 }
 0x136   : > { %v2805_v61 = vpop.f32.mrf.mxu1  ;;  %v1291_v23 = vadd.f32 %v2781_v58, %v1114_v24  ;;  %v1459_v58 = vadd.f32 %v2802_v57, %v1288_v27 }
 0x137   : > { %v1270_v62 = vpop.f32.mrf.mxu0  ;;  %v810_v9 = vadd.f32 %v2734_v46, %v652_v59 }
 0x138   : > { %v1441_v63 = vpop.f32.mrf.mxu1  ;;  %v1462_v36 = vadd.f32 %v2805_v61, %v1291_v23 }
 0x139   : > { %v2782_v0 = vpop.f32.mrf.mxu0  ;;  %v1115_v28 = vadd.f32 %v2758_v49, %v810_v9 }
 0x13a   : > { %v2806_v1 = vpop.f32.mrf.mxu1 }
 0x13b   : > { %v1273_v2 = vpop.f32.mrf.mxu0  ;;  %v1292_v29 = vadd.f32 %v2782_v0, %v1115_v28 }
 0x13c   : > { %v1444_v5 = vpop.f32.mrf.mxu1 }
 0x13d   : > { %v1463_v52 = vadd.f32 %v2806_v1, %v1292_v29 }
 0x14d   : > { %v2825_v3 = vpop.f32.mrf.mxu0 }
 0x14e   : > { %v2849_v4 = vpop.f32.mrf.mxu1 }
 0x14f   : > { %v1666_v6 = vpop.f32.mrf.mxu0 }
 0x150   : > { %v3448_v7 = vpop.f32.mrf.mxu1  ;;  %v1697_v41 = vadd.f32 %v1666_v6, %v1456_v45 }
 0x151   : > { %3487 = vst [vmem:[#allocation4_spill] sm:$0xff] %v3448_v7  ;;  %v2826_v8 = vpop.f32.mrf.mxu0  ;;  %v807_v7 = vadd.f32 %v788_v44, %v649_v17  ;;  %v1109_v44 = vadd.f32 %v1080_v43, %v804_v10 }
 0x152   : > { %v3450_v11 = vpop.f32.mrf.mxu1  ;;  %v1700_v54 = vadd.f32 %v2826_v8, %v1459_v58 }
 0x153   : > { %3488 = vst [vmem:[#allocation5_spill] sm:$0xff] %v3450_v11  ;;  %v1669_v15 = vpop.f32.mrf.mxu0  ;;  %v1110_v11 = vadd.f32 %v2753_v35, %v805_v16  ;;  %v1112_v14 = vadd.f32 %v1093_v47, %v807_v7  ;;  %v1113_v35 = vadd.f32 %v1096_v51, %v808_v42  ;;  %v1286_v37 = vadd.f32 %v1257_v56, %v1109_v44  ;;  %v2511_v56 = vld [vmem:[%s3479_s2] ss:$0 sm:$0xff] }
 0x154   : > { %v3452_v21 = vpop.f32.mrf.mxu1 }
 0x155   : > { %3489 = vst [vmem:[#allocation6_spill] sm:$0xff] %v3452_v21  ;;  %v2829_v31 = vpop.f32.mrf.mxu0  ;;  %v1287_v26 = vadd.f32 %v2777_v50, %v1110_v11  ;;  %v1289_v32 = vadd.f32 %v1270_v62, %v1112_v14  ;;  %v1290_v48 = vadd.f32 %v1273_v2, %v1113_v35  ;;  %v3490_v62 = vld [vmem:[#allocation3_spill] sm:$0xff] }
 0x156   : > { %v2853_v38 = vpop.f32.mrf.mxu1  ;;  %v1703_v50 = vadd.f32 %v2829_v31, %v1462_v36  ;;  %v1457_v43 = vadd.f32 %v3490_v62, %v1286_v37  ;;  %v2512_v31 = vld [vmem:[%s3480_s3] ss:$0 sm:$0xff] }
 0x157   : > { %v1682_v39 = vpop.f32.mrf.mxu0  ;;  %v1458_v25 = vadd.f32 %v2801_v53, %v1287_v26  ;;  %v1460_v47 = vadd.f32 %v1441_v63, %v1289_v32  ;;  %v1461_v61 = vadd.f32 %v1444_v5, %v1290_v48 }
 0x158   : > { %v1851_v21 = vpop.f32.mrf.mxu1  ;;  %v1872_v0 = vadd.f32 %v2853_v38, %v1703_v50  ;;  %v3491_v63 = vld [vmem:[#allocation4_spill] sm:$0xff]  ;;  %v1698_v57 = vadd.f32 %v1669_v15, %v1457_v43 }
 0x159   : > { %v2830_v34 = vpop.f32.mrf.mxu0  ;;  %v1699_v40 = vadd.f32 %v2825_v3, %v1458_v25  ;;  %v1701_v59 = vadd.f32 %v1682_v39, %v1460_v47  ;;  %v1866_v2 = vadd.f32 %v3491_v63, %v1697_v41 }
 0x15a   : > { %v2854_v46 = vpop.f32.mrf.mxu1  ;;  %v1704_v7 = vadd.f32 %v2830_v34, %v1463_v52 }
 0x15b   : > { %v1685_v49 = vpop.f32.mrf.mxu0  ;;  %v1868_v53 = vadd.f32 %v2849_v4, %v1699_v40  ;;  %v1870_v6 = vadd.f32 %v1851_v21, %v1701_v59  ;;  %v3492_v4 = vld [vmem:[#allocation5_spill] sm:$0xff] }
 0x15c   : > { %v1854_v51 = vpop.f32.mrf.mxu1  ;;  %v1702_v11 = vadd.f32 %v1685_v49, %v1461_v61  ;;  %v1869_v8 = vadd.f32 %v3492_v4, %v1700_v54  ;;  %v1873_v20 = vadd.f32 %v2854_v46, %v1704_v7  ;;  %v3493_v15 = vld [vmem:[#allocation6_spill] sm:$0xff] }
 0x15d   : > { %v1867_v22 = vadd.f32 %v3493_v15, %v1698_v57 }
 0x15e   : > { %v1871_v30 = vadd.f32 %v1854_v51, %v1702_v11 }
 0x16d   : > { %v2873_v55 = vpop.f32.mrf.mxu0 }
 0x16e   : > { %v2031_v3 = vadd.f32 %v2873_v55, %v1868_v53  ;;  %v2877_v1 = vpop.f32.mrf.mxu1 }
 0x16f   : > { %v2035_v16 = vadd.f32 %v2877_v1, %v1872_v0  ;;  %v1998_v17 = vpop.f32.mrf.mxu0 }
 0x170   : > { %v2065_v18 = vmul.f32 %v2511_v56, %v2031_v3  ;;  %v2029_v5 = vadd.f32 %v1998_v17, %v1866_v2  ;;  %v2014_v19 = vpop.f32.mrf.mxu1 }
 0x171   : > { %v2069_v60 = vmul.f32 %v2511_v56, %v2035_v16  ;;  %v2033_v12 = vadd.f32 %v2014_v19, %v1870_v6  ;;  %v2874_v38 = vpop.f32.mrf.mxu0 }
 0x172   : > { %v2063_v21 = vmul.f32 %v2511_v56, %v2029_v5  ;;  %v2032_v24 = vadd.f32 %v2874_v38, %v1869_v8  ;;  %v2878_v9 = vpop.f32.mrf.mxu1  ;;  %v2080_v42 = vadd.f32 %v2512_v31, %v2065_v18 }
 0x173   : > { %v2067_v10 = vmul.f32 %v2511_v56, %v2033_v12  ;;  %v2036_v26 = vadd.f32 %v2878_v9, %v1873_v20  ;;  %v2001_v14 = vpop.f32.mrf.mxu0  ;;  %v2084_v13 = vadd.f32 %v2512_v31, %v2069_v60 }
 0x174   : > { %v2066_v23 = vmul.f32 %v2511_v56, %v2032_v24  ;;  %v2030_v39 = vadd.f32 %v2001_v14, %v1867_v22  ;;  %v2017_v33 = vpop.f32.mrf.mxu1  ;;  %v2078_v44 = vadd.f32 %v2512_v31, %v2063_v21  ;;  %v2088_v34 = vmax.f32 %v2080_v42, 0.0 }
 0x175   : > { %v2070_v28 = vmul.f32 %v2511_v56, %v2036_v26  ;;  %v2034_v32 = vadd.f32 %v2017_v33, %v1871_v30  ;;  %v2082_v35 = vadd.f32 %v2512_v31, %v2067_v10  ;;  %v2092_v40 = vmax.f32 %v2084_v13, 0.0 }
 0x176   : > { %v2081_v25 = vadd.f32 %v2512_v31, %v2066_v23  ;;  %v2064_v27 = vmul.f32 %v2511_v56, %v2030_v39  ;;  %v2086_v48 = vmax.f32 %v2078_v44, 0.0 }
 0x177   : > { %v2085_v36 = vadd.f32 %v2512_v31, %v2070_v28  ;;  %v2068_v29 = vmul.f32 %v2511_v56, %v2034_v32  ;;  %v2090_v41 = vmax.f32 %v2082_v35, 0.0 }
 0x178   : > { %v2089_v45 = vmax.f32 %v2081_v25, 0.0  ;;  %v2079_v37 = vadd.f32 %v2512_v31, %v2064_v27 }
 0x179   : > { %v2093_v46 = vmax.f32 %v2085_v36, 0.0  ;;  %v2083_v47 = vadd.f32 %v2512_v31, %v2068_v29 }
 0x17a   : > { %v2540_v50 = vpack.c.bf16 %v2089_v45, %v2088_v34  ;;  %v2087_v58 = vmax.f32 %v2079_v37, 0.0 }
 0x17b   : > { %v2550_v52 = vpack.c.bf16 %v2093_v46, %v2092_v40  ;;  %v2091_v59 = vmax.f32 %v2083_v47, 0.0 }
 0x17c   : > { %2552 = vst [vmem:[%s296_s25 + $0x8] sm:$0xff] %v2540_v50   ;;  %v2535_v49 = vpack.c.bf16 %v2087_v58, %v2086_v48 }
 0x17d   : > { %2554 = vst [vmem:[%s296_s25 + $0x18] sm:$0xff] %v2550_v52   ;;  %v2545_v62 = vpack.c.bf16 %v2091_v59, %v2090_v41 }
 0x17e   : > { %2536 = vst [vmem:[%s296_s25] sm:$0xff] %v2535_v49  }
 0x17f   : > { %2553 = vst [vmem:[%s296_s25 + $0x10] sm:$0xff] %v2545_v62  }
 0x180 PF: > { %s14_s17 = sadd.s32 1, %s3023_s17   ;;  %s3494_s15 = smov %s3019_s16 }
 0x181   : > { %p11_p5 = scmp.ge.s32.totalorder %s14_s17, 4   ;;  %s3495_s16 = smov %s3497_s18 }
 0x183   :  { %13 = sbr.rel (!%p11_p5) target bundleno = 2 (0x2), region = 91 }

// kernel: pspnet_forward.18
= control target key start
LH: loop header
LB: loop body
LE: loop exit
PB: predicated region body
PF: predicated region fallthrough
CT: control target
= control target key end

     0   :  { %vm71_vm0 = vcmask 1043456   ;;  %v1321_v2 = vmov 0   ;;  %vm67_vm1 = vcmask 64512   ;;  %s1566_s1 = inlined_call_operand.vmem [shape: bf16[2,8,2048], index: 1, kind: input, shape index: {}]   ;;  %s1567_s0 = inlined_call_operand.vmem [shape: bf16[12,8], index: 0, kind: input, shape index: {}]   ;;  %s1568_s2 = inlined_call_operand.vmem [shape: bf16[2,12,2048], index: 2, kind: output, shape index: {}]  }
   0x1   :  { %v14_v0 = vld [vmem:[%s1566_s1] sm:$0xff]  ;;  %v15_v1 = vld [vmem:[%s1566_s1 + $0x8] sm:$0xff]  ;;  %152 = vmatprep.mubr.bf16.mxu0 %v1321_v2  ;;  %195 = vmatprep.mubr.bf16.mxu1 %v1321_v2  ;;  %v16_v7 = vld [vmem:[%s1566_s1 + $0x10] sm:$0xff] }
   0x2   :  { %v1136_v3 = vcombine.high %v14_v0, %v14_v0  ;;  %v1138_v4 = vcombine.high %v15_v1, %v15_v1  ;;  %v1135_v5 = vcombine.low %v14_v0, %v14_v0  ;;  %v1137_v6 = vcombine.low %v15_v1, %v15_v1  ;;  %v17_v9 = vld [vmem:[%s1566_s1 + $0x18] sm:$0xff]  ;;  %v1358_v13 = vld [vmem:[%s1567_s0] sm:$0x3f]   ;;  %v19_v17 = vld [vmem:[%s1566_s1 + $0x28] sm:$0xff] }
   0x3   :  { %v1140_v8 = vcombine.high %v16_v7, %v16_v7  ;;  %v1139_v10 = vcombine.low %v16_v7, %v16_v7  ;;  %v1142_v14 = vcombine.high %v17_v9, %v17_v9  ;;  %v1141_v15 = vcombine.low %v17_v9, %v17_v9  ;;  %v18_v16 = vld [vmem:[%s1566_s1 + $0x20] sm:$0xff]  ;;  %v20_v24 = vld [vmem:[%s1566_s1 + $0x30] sm:$0xff]  ;;  %v21_v25 = vld [vmem:[%s1566_s1 + $0x38] sm:$0xff] }
   0x4   :  { %1151 = vmatprep.subr.msk.bf16.mxu0 %vm71_vm0, %v1136_v3  ;;  %1153 = vmatprep.subr.msk.bf16.mxu1 %vm71_vm0, %v1138_v4  ;;  %v73_v11 = vsel %vm71_vm0, %v1135_v5, 0  ;;  %v79_v12 = vsel %vm71_vm0, %v1137_v6, 0  ;;  %v1144_v20 = vcombine.high %v18_v16, %v18_v16  ;;  %v1146_v21 = vcombine.high %v19_v17, %v19_v17  ;;  %v1183_v32 = vld [vmem:[%s1566_s1 + $0x40] sm:$0xff]  ;;  %v1184_v33 = vld [vmem:[%s1566_s1 + $0x48] sm:$0xff]  ;;  %v1185_v40 = vld [vmem:[%s1566_s1 + $0x50] sm:$0xff] }
   0x5   :  { %135 = vmatpush1.bf16.msra.mxu0 %v73_v11  ;;  %178 = vmatpush1.bf16.msra.mxu1 %v79_v12  ;;  %v85_v18 = vsel %vm71_vm0, %v1139_v10, 0  ;;  %v91_v19 = vsel %vm71_vm0, %v1141_v15, 0  ;;  %v1143_v22 = vcombine.low %v18_v16, %v18_v16  ;;  %v1145_v23 = vcombine.low %v19_v17, %v19_v17  ;;  %v1186_v41 = vld [vmem:[%s1566_s1 + $0x58] sm:$0xff]  ;;  %v1187_v48 = vld [vmem:[%s1566_s1 + $0x60] sm:$0xff]  ;;  %v1188_v49 = vld [vmem:[%s1566_s1 + $0x68] sm:$0xff] }
   0x6   :  { %1155 = vmatprep.subr.msk.bf16.mxu0 %vm71_vm0, %v1140_v8  ;;  %1157 = vmatprep.subr.msk.bf16.mxu1 %vm71_vm0, %v1142_v14  ;;  %v1148_v28 = vcombine.high %v20_v24, %v20_v24  ;;  %v1150_v29 = vcombine.high %v21_v25, %v21_v25  ;;  %v1147_v30 = vcombine.low %v20_v24, %v20_v24  ;;  %v1189_v56 = vld [vmem:[%s1566_s1 + $0x70] sm:$0xff]  ;;  %v1190_v57 = vld [vmem:[%s1566_s1 + $0x78] sm:$0xff] }
   0x7   :  { %v97_v26 = vsel %vm71_vm0, %v1143_v22, 0  ;;  %v103_v27 = vsel %vm71_vm0, %v1145_v23, 0  ;;  %v1149_v31 = vcombine.low %v21_v25, %v21_v25  ;;  %v1192_v36 = vcombine.high %v1183_v32, %v1183_v32 }
   0x8   :  { %1152 = vmatmul.mubr.msk.bf16.vlgmr.msra.gmra.mxu0 %vm67_vm1, %v1358_v13  ;;  %1154 = vmatmul.mubr.msk.bf16.vlgmr.msra.gmra.mxu1 %vm67_vm1, %v1358_v13  ;;  %v109_v34 = vsel %vm71_vm0, %v1147_v30, 0  ;;  %v1194_v37 = vcombine.high %v1184_v33, %v1184_v33  ;;  %v1191_v38 = vcombine.low %v1183_v32, %v1183_v32  ;;  %v1193_v39 = vcombine.low %v1184_v33, %v1184_v33 }
   0x9   :  { %221 = vmatpush1.bf16.msra.mxu0 %v85_v18  ;;  %264 = vmatpush1.bf16.msra.mxu1 %v91_v19  ;;  %v115_v35 = vsel %vm71_vm0, %v1149_v31, 0  ;;  %v1196_v44 = vcombine.high %v1185_v40, %v1185_v40  ;;  %v1198_v45 = vcombine.high %v1186_v41, %v1186_v41  ;;  %v1195_v46 = vcombine.low %v1185_v40, %v1185_v40 }
   0xa   :  { %238 = vmatprep.mubr.bf16.mxu0 %v1321_v2  ;;  %281 = vmatprep.mubr.bf16.mxu1 %v1321_v2  ;;  %v626_v42 = vsel %vm71_vm0, %v1191_v38, 0  ;;  %v632_v43 = vsel %vm71_vm0, %v1193_v39, 0  ;;  %v1197_v47 = vcombine.low %v1186_v41, %v1186_v41  ;;  %v1200_v52 = vcombine.high %v1187_v48, %v1187_v48 }
   0xb   :  { %1159 = vmatprep.subr.msk.bf16.mxu0 %vm71_vm0, %v1144_v20  ;;  %1161 = vmatprep.subr.msk.bf16.mxu1 %vm71_vm0, %v1146_v21  ;;  %v638_v50 = vsel %vm71_vm0, %v1195_v46, 0  ;;  %v1202_v53 = vcombine.high %v1188_v49, %v1188_v49  ;;  %v1199_v54 = vcombine.low %v1187_v48, %v1187_v48  ;;  %v1201_v55 = vcombine.low %v1188_v49, %v1188_v49 }
   0xc   :  { %v644_v51 = vsel %vm71_vm0, %v1197_v47, 0  ;;  %v1204_v60 = vcombine.high %v1189_v56, %v1189_v56  ;;  %v1206_v61 = vcombine.high %v1190_v57, %v1190_v57  ;;  %v1203_v62 = vcombine.low %v1189_v56, %v1189_v56 }
   0xd   :  { %v650_v58 = vsel %vm71_vm0, %v1199_v54, 0  ;;  %v656_v59 = vsel %vm71_vm0, %v1201_v55, 0  ;;  %v1205_v63 = vcombine.low %v1190_v57, %v1190_v57 }
   0xe   :  { %v662_v0 = vsel %vm71_vm0, %v1203_v62, 0 }
   0xf   :  { %v668_v1 = vsel %vm71_vm0, %v1205_v63, 0 }
  0x10   :  { %1156 = vmatmul.mubr.msk.bf16.vlgmr.msra.gmra.mxu0 %vm67_vm1, %v1358_v13  ;;  %1158 = vmatmul.mubr.msk.bf16.vlgmr.msra.gmra.mxu1 %vm67_vm1, %v1358_v13 }
  0x11   :  { %307 = vmatpush1.bf16.msra.mxu0 %v97_v26  ;;  %350 = vmatpush1.bf16.msra.mxu1 %v103_v27 }
  0x12   :  { %324 = vmatprep.mubr.bf16.mxu0 %v1321_v2  ;;  %367 = vmatprep.mubr.bf16.mxu1 %v1321_v2 }
  0x13   :  { %1163 = vmatprep.subr.msk.bf16.mxu0 %vm71_vm0, %v1148_v28  ;;  %1165 = vmatprep.subr.msk.bf16.mxu1 %vm71_vm0, %v1150_v29 }
  0x18   :  { %1160 = vmatmul.mubr.msk.bf16.vlgmr.msra.gmra.mxu0 %vm67_vm1, %v1358_v13  ;;  %1162 = vmatmul.mubr.msk.bf16.vlgmr.msra.gmra.mxu1 %vm67_vm1, %v1358_v13 }
  0x19   :  { %393 = vmatpush1.bf16.msra.mxu0 %v109_v34  ;;  %436 = vmatpush1.bf16.msra.mxu1 %v115_v35 }
  0x1a   :  { %410 = vmatprep.mubr.bf16.mxu0 %v1321_v2  ;;  %453 = vmatprep.mubr.bf16.mxu1 %v1321_v2 }
  0x1b   :  { %1207 = vmatprep.subr.msk.bf16.mxu0 %vm71_vm0, %v1192_v36  ;;  %1209 = vmatprep.subr.msk.bf16.mxu1 %vm71_vm0, %v1194_v37 }
  0x20   :  { %1164 = vmatmul.mubr.msk.bf16.vlgmr.msra.gmra.mxu0 %vm67_vm1, %v1358_v13  ;;  %1166 = vmatmul.mubr.msk.bf16.vlgmr.msra.gmra.mxu1 %vm67_vm1, %v1358_v13 }
  0x21   :  { %688 = vmatpush1.bf16.msra.mxu0 %v626_v42  ;;  %731 = vmatpush1.bf16.msra.mxu1 %v632_v43 }
  0x22   :  { %705 = vmatprep.mubr.bf16.mxu0 %v1321_v2  ;;  %748 = vmatprep.mubr.bf16.mxu1 %v1321_v2 }
  0x23   :  { %1211 = vmatprep.subr.msk.bf16.mxu0 %vm71_vm0, %v1196_v44  ;;  %1213 = vmatprep.subr.msk.bf16.mxu1 %vm71_vm0, %v1198_v45 }
  0x28   :  { %1208 = vmatmul.mubr.msk.bf16.vlgmr.msra.gmra.mxu0 %vm67_vm1, %v1358_v13  ;;  %1210 = vmatmul.mubr.msk.bf16.vlgmr.msra.gmra.mxu1 %vm67_vm1, %v1358_v13 }
  0x29   :  { %774 = vmatpush1.bf16.msra.mxu0 %v638_v50  ;;  %817 = vmatpush1.bf16.msra.mxu1 %v644_v51 }
  0x2a   :  { %791 = vmatprep.mubr.bf16.mxu0 %v1321_v2  ;;  %834 = vmatprep.mubr.bf16.mxu1 %v1321_v2 }
  0x2b   :  { %1215 = vmatprep.subr.msk.bf16.mxu0 %vm71_vm0, %v1200_v52  ;;  %1217 = vmatprep.subr.msk.bf16.mxu1 %vm71_vm0, %v1202_v53 }
  0x30   :  { %1212 = vmatmul.mubr.msk.bf16.vlgmr.msra.gmra.mxu0 %vm67_vm1, %v1358_v13  ;;  %1214 = vmatmul.mubr.msk.bf16.vlgmr.msra.gmra.mxu1 %vm67_vm1, %v1358_v13 }
  0x31   :  { %860 = vmatpush1.bf16.msra.mxu0 %v650_v58  ;;  %903 = vmatpush1.bf16.msra.mxu1 %v656_v59 }
  0x32   :  { %877 = vmatprep.mubr.bf16.mxu0 %v1321_v2  ;;  %920 = vmatprep.mubr.bf16.mxu1 %v1321_v2 }
  0x33   :  { %1219 = vmatprep.subr.msk.bf16.mxu0 %vm71_vm0, %v1204_v60  ;;  %1221 = vmatprep.subr.msk.bf16.mxu1 %vm71_vm0, %v1206_v61 }
  0x38   :  { %1216 = vmatmul.mubr.msk.bf16.vlgmr.msra.gmra.mxu0 %vm67_vm1, %v1358_v13  ;;  %1218 = vmatmul.mubr.msk.bf16.vlgmr.msra.gmra.mxu1 %vm67_vm1, %v1358_v13 }
  0x39   :  { %946 = vmatpush1.bf16.msra.mxu0 %v662_v0  ;;  %989 = vmatpush1.bf16.msra.mxu1 %v668_v1 }
  0x3a   :  { %963 = vmatprep.mubr.bf16.mxu0 %v1321_v2  ;;  %1006 = vmatprep.mubr.bf16.mxu1 %v1321_v2 }
  0x40   :  { %1220 = vmatmul.mubr.msk.bf16.vlgmr.msra.gmra.mxu0 %vm67_vm1, %v1358_v13  ;;  %1222 = vmatmul.mubr.msk.bf16.vlgmr.msra.gmra.mxu1 %vm67_vm1, %v1358_v13 }
  0xc8   :  { %v154_v3 = vpop.f32.mrf.mxu0  ;;  %v197_v4 = vpop.f32.mrf.mxu1 }
  0xca   :  { %v156_v5 = vpop.f32.mrf.mxu0  ;;  %v199_v6 = vpop.f32.mrf.mxu1 }
  0xcb   :  { %v1255_v7 = vpack.c.bf16 %v156_v5, %v154_v3  ;;  %v1256_v8 = vpack.c.bf16 %v199_v6, %v197_v4 }
  0xcc   :  { %v158_v9 = vpop.f32.mrf.mxu0  ;;  %v201_v10 = vpop.f32.mrf.mxu1 }
  0xcd   :  { %560 = vst [vmem:[%s1568_s2] sm:$0xff] %v1255_v7  ;;  %561 = vst [vmem:[%s1568_s2 + $0x8] sm:$0xff] %v1256_v8 }
  0xce   :  { %v160_v2 = vpop.f32.mrf.mxu0  ;;  %v203_v11 = vpop.f32.mrf.mxu1 }
  0xcf   :  { %v1263_v12 = vpack.c.bf16 %v160_v2, %v158_v9  ;;  %v1264_v13 = vpack.c.bf16 %v203_v11, %v201_v10 }
  0xd0   :  { %v240_v14 = vpop.f32.mrf.mxu0  ;;  %v283_v15 = vpop.f32.mrf.mxu1 }
  0xd1   :  { %568 = vst [vmem:[%s1568_s2 + $0x40] sm:$0x33] %v1263_v12  ;;  %569 = vst [vmem:[%s1568_s2 + $0x48] sm:$0x33] %v1264_v13 }
  0xd2   :  { %v242_v16 = vpop.f32.mrf.mxu0  ;;  %v285_v17 = vpop.f32.mrf.mxu1 }
  0xd3   :  { %v1257_v18 = vpack.c.bf16 %v242_v16, %v240_v14  ;;  %v1258_v19 = vpack.c.bf16 %v285_v17, %v283_v15 }
  0xd4   :  { %v244_v20 = vpop.f32.mrf.mxu0  ;;  %v287_v21 = vpop.f32.mrf.mxu1 }
  0xd5   :  { %562 = vst [vmem:[%s1568_s2 + $0x10] sm:$0xff] %v1257_v18  ;;  %563 = vst [vmem:[%s1568_s2 + $0x18] sm:$0xff] %v1258_v19 }
  0xd6   :  { %v246_v22 = vpop.f32.mrf.mxu0  ;;  %v289_v23 = vpop.f32.mrf.mxu1 }
  0xd7   :  { %v1265_v24 = vpack.c.bf16 %v246_v22, %v244_v20  ;;  %v1266_v25 = vpack.c.bf16 %v289_v23, %v287_v21 }
  0xd8   :  { %v326_v26 = vpop.f32.mrf.mxu0  ;;  %v369_v27 = vpop.f32.mrf.mxu1 }
  0xd9   :  { %570 = vst [vmem:[%s1568_s2 + $0x50] sm:$0x33] %v1265_v24  ;;  %571 = vst [vmem:[%s1568_s2 + $0x58] sm:$0x33] %v1266_v25 }
  0xda   :  { %v328_v28 = vpop.f32.mrf.mxu0  ;;  %v371_v29 = vpop.f32.mrf.mxu1 }
  0xdb   :  { %v1259_v30 = vpack.c.bf16 %v328_v28, %v326_v26  ;;  %v1260_v31 = vpack.c.bf16 %v371_v29, %v369_v27 }
  0xdc   :  { %v330_v32 = vpop.f32.mrf.mxu0  ;;  %v373_v33 = vpop.f32.mrf.mxu1 }
  0xdd   :  { %564 = vst [vmem:[%s1568_s2 + $0x20] sm:$0xff] %v1259_v30  ;;  %565 = vst [vmem:[%s1568_s2 + $0x28] sm:$0xff] %v1260_v31 }
  0xde   :  { %v332_v34 = vpop.f32.mrf.mxu0  ;;  %v375_v35 = vpop.f32.mrf.mxu1 }
  0xdf   :  { %v1267_v36 = vpack.c.bf16 %v332_v34, %v330_v32  ;;  %v1268_v37 = vpack.c.bf16 %v375_v35, %v373_v33 }
  0xe0   :  { %v412_v38 = vpop.f32.mrf.mxu0  ;;  %v455_v39 = vpop.f32.mrf.mxu1 }
  0xe1   :  { %572 = vst [vmem:[%s1568_s2 + $0x60] sm:$0x33] %v1267_v36  ;;  %573 = vst [vmem:[%s1568_s2 + $0x68] sm:$0x33] %v1268_v37 }
  0xe2   :  { %v414_v40 = vpop.f32.mrf.mxu0  ;;  %v457_v41 = vpop.f32.mrf.mxu1 }
  0xe3   :  { %v1261_v42 = vpack.c.bf16 %v414_v40, %v412_v38  ;;  %v1262_v43 = vpack.c.bf16 %v457_v41, %v455_v39 }
  0xe4   :  { %v416_v44 = vpop.f32.mrf.mxu0  ;;  %v459_v45 = vpop.f32.mrf.mxu1 }
  0xe5   :  { %566 = vst [vmem:[%s1568_s2 + $0x30] sm:$0xff] %v1261_v42  ;;  %567 = vst [vmem:[%s1568_s2 + $0x38] sm:$0xff] %v1262_v43 }
  0xe6   :  { %v418_v46 = vpop.f32.mrf.mxu0  ;;  %v461_v47 = vpop.f32.mrf.mxu1 }
  0xe7   :  { %v1269_v48 = vpack.c.bf16 %v418_v46, %v416_v44  ;;  %v1270_v49 = vpack.c.bf16 %v461_v47, %v459_v45 }
  0xe8   :  { %v707_v50 = vpop.f32.mrf.mxu0  ;;  %v750_v51 = vpop.f32.mrf.mxu1 }
  0xe9   :  { %574 = vst [vmem:[%s1568_s2 + $0x70] sm:$0x33] %v1269_v48  ;;  %575 = vst [vmem:[%s1568_s2 + $0x78] sm:$0x33] %v1270_v49 }
  0xea   :  { %v709_v52 = vpop.f32.mrf.mxu0  ;;  %v752_v53 = vpop.f32.mrf.mxu1 }
  0xeb   :  { %v1271_v54 = vpack.c.bf16 %v709_v52, %v707_v50  ;;  %v1272_v55 = vpack.c.bf16 %v752_v53, %v750_v51 }
  0xec   :  { %v711_v56 = vpop.f32.mrf.mxu0  ;;  %v754_v57 = vpop.f32.mrf.mxu1 }
  0xed   :  { %1239 = vst [vmem:[%s1568_s2 + $0x80] sm:$0xff] %v1271_v54  ;;  %1240 = vst [vmem:[%s1568_s2 + $0x88] sm:$0xff] %v1272_v55 }
  0xee   :  { %v713_v58 = vpop.f32.mrf.mxu0  ;;  %v756_v59 = vpop.f32.mrf.mxu1 }
  0xef   :  { %v1279_v60 = vpack.c.bf16 %v713_v58, %v711_v56  ;;  %v1280_v61 = vpack.c.bf16 %v756_v59, %v754_v57 }
  0xf0   :  { %v793_v62 = vpop.f32.mrf.mxu0  ;;  %v836_v63 = vpop.f32.mrf.mxu1 }
  0xf1   :  { %1247 = vst [vmem:[%s1568_s2 + $0xc0] sm:$0x33] %v1279_v60  ;;  %1248 = vst [vmem:[%s1568_s2 + $0xc8] sm:$0x33] %v1280_v61 }
  0xf2   :  { %v795_v0 = vpop.f32.mrf.mxu0  ;;  %v838_v1 = vpop.f32.mrf.mxu1 }
  0xf3   :  { %v1273_v3 = vpack.c.bf16 %v795_v0, %v793_v62  ;;  %v1274_v4 = vpack.c.bf16 %v838_v1, %v836_v63 }
  0xf4   :  { %v797_v5 = vpop.f32.mrf.mxu0  ;;  %v840_v6 = vpop.f32.mrf.mxu1 }
  0xf5   :  { %1241 = vst [vmem:[%s1568_s2 + $0x90] sm:$0xff] %v1273_v3  ;;  %1242 = vst [vmem:[%s1568_s2 + $0x98] sm:$0xff] %v1274_v4 }
  0xf6   :  { %v799_v7 = vpop.f32.mrf.mxu0  ;;  %v842_v8 = vpop.f32.mrf.mxu1 }
  0xf7   :  { %v1281_v9 = vpack.c.bf16 %v799_v7, %v797_v5  ;;  %v1282_v10 = vpack.c.bf16 %v842_v8, %v840_v6 }
  0xf8   :  { %v879_v2 = vpop.f32.mrf.mxu0  ;;  %v922_v11 = vpop.f32.mrf.mxu1 }
  0xf9   :  { %1249 = vst [vmem:[%s1568_s2 + $0xd0] sm:$0x33] %v1281_v9  ;;  %1250 = vst [vmem:[%s1568_s2 + $0xd8] sm:$0x33] %v1282_v10 }
  0xfa   :  { %v881_v12 = vpop.f32.mrf.mxu0  ;;  %v924_v13 = vpop.f32.mrf.mxu1 }
  0xfb   :  { %v1275_v14 = vpack.c.bf16 %v881_v12, %v879_v2  ;;  %v1276_v15 = vpack.c.bf16 %v924_v13, %v922_v11 }
  0xfc   :  { %v883_v16 = vpop.f32.mrf.mxu0  ;;  %v926_v17 = vpop.f32.mrf.mxu1 }
  0xfd   :  { %1243 = vst [vmem:[%s1568_s2 + $0xa0] sm:$0xff] %v1275_v14  ;;  %1244 = vst [vmem:[%s1568_s2 + $0xa8] sm:$0xff] %v1276_v15 }
  0xfe   :  { %v885_v18 = vpop.f32.mrf.mxu0  ;;  %v928_v19 = vpop.f32.mrf.mxu1 }
  0xff   :  { %v1283_v20 = vpack.c.bf16 %v885_v18, %v883_v16  ;;  %v1284_v21 = vpack.c.bf16 %v928_v19, %v926_v17 }
 0x100   :  { %v965_v22 = vpop.f32.mrf.mxu0  ;;  %v1008_v23 = vpop.f32.mrf.mxu1 }
 0x101   :  { %1251 = vst [vmem:[%s1568_s2 + $0xe0] sm:$0x33] %v1283_v20  ;;  %1252 = vst [vmem:[%s1568_s2 + $0xe8] sm:$0x33] %v1284_v21 }
 0x102   :  { %v967_v24 = vpop.f32.mrf.mxu0  ;;  %v1010_v25 = vpop.f32.mrf.mxu1 }
 0x103   :  { %v1277_v26 = vpack.c.bf16 %v967_v24, %v965_v22  ;;  %v1278_v27 = vpack.c.bf16 %v1010_v25, %v1008_v23 }
 0x104   :  { %v969_v28 = vpop.f32.mrf.mxu0  ;;  %v1012_v29 = vpop.f32.mrf.mxu1 }
 0x105   :  { %1245 = vst [vmem:[%s1568_s2 + $0xb0] sm:$0xff] %v1277_v26  ;;  %1246 = vst [vmem:[%s1568_s2 + $0xb8] sm:$0xff] %v1278_v27 }
 0x106   :  { %v971_v30 = vpop.f32.mrf.mxu0  ;;  %v1014_v31 = vpop.f32.mrf.mxu1 }
 0x107   :  { %v1285_v32 = vpack.c.bf16 %v971_v30, %v969_v28  ;;  %v1286_v33 = vpack.c.bf16 %v1014_v31, %v1012_v29 }
 0x109   :  { %1253 = vst [vmem:[%s1568_s2 + $0xf0] sm:$0x33] %v1285_v32  ;;  %1254 = vst [vmem:[%s1568_s2 + $0xf8] sm:$0x33] %v1286_v33 }

// kernel: pspnet_forward.19
= control target key start
LH: loop header
LB: loop body
LE: loop exit
PB: predicated region body
PF: predicated region fallthrough
CT: control target
= control target key end

     0   :  { %v568_v1 = vmov 0   ;;  %vm109_vm0 = vcmask 785408   ;;  %s726_s1 = inlined_call_operand.vmem [shape: bf16[2,96,256], index: 1, kind: input, shape index: {}]   ;;  %s727_s0 = inlined_call_operand.vmem [shape: bf16[50,96], index: 0, kind: input, shape index: {}]   ;;  %s728_s2 = inlined_call_operand.vmem [shape: bf16[2,50,256], index: 2, kind: output, shape index: {}]  }
   0x1   :  { %v528_v0 = vld [vmem:[%s726_s1 + $0x54] ss:$8 sps:$4 sm:$0xff]   ;;  %154 = vmatprep.mubr.bf16.mxu0 %v568_v1  ;;  %349 = vmatprep.mubr.bf16.mxu1 %v568_v1  ;;  %v532_v3 = vld [vmem:[%s726_s1 + $0x50] ss:$8 sps:$4 sm:$0xff]   ;;  %v534_v5 = vld [vmem:[%s726_s1 + $0x44] ss:$8 sps:$4 sm:$0xff]  }
   0x2   :  { %v530_v2 = vld [vmem:[%s726_s1 + $0xb4] ss:$8 sps:$4 sm:$0xff]   ;;  %126 = vmatprep.subr.bf16.mxu0 %v528_v0  ;;  %v533_v4 = vld [vmem:[%s726_s1 + $0xb0] ss:$8 sps:$4 sm:$0xff]   ;;  %v536_v6 = vld [vmem:[%s726_s1 + $0xa4] ss:$8 sps:$4 sm:$0xff]  }
   0x3   :  { %321 = vmatprep.subr.bf16.mxu1 %v530_v2  ;;  %127 = vmatpush1.bf16.msra.mxu0 %v532_v3  ;;  %v538_v7 = vld [vmem:[%s726_s1 + $0x40] ss:$8 sps:$4 sm:$0xff]   ;;  %v540_v9 = vld [vmem:[%s726_s1 + $0x34] ss:$8 sps:$4 sm:$0xff]   ;;  %v544_v11 = vld [vmem:[%s726_s1 + $0x30] ss:$8 sps:$4 sm:$0xff]  }
   0x4   :  { %322 = vmatpush1.bf16.msra.mxu1 %v533_v4  ;;  %128 = vmatprep.subr.bf16.mxu0 %v534_v5  ;;  %v539_v8 = vld [vmem:[%s726_s1 + $0xa0] ss:$8 sps:$4 sm:$0xff]   ;;  %v542_v10 = vld [vmem:[%s726_s1 + $0x94] ss:$8 sps:$4 sm:$0xff]   ;;  %v545_v12 = vld [vmem:[%s726_s1 + $0x90] ss:$8 sps:$4 sm:$0xff]  }
   0x5   :  { %323 = vmatprep.subr.bf16.mxu1 %v536_v6  ;;  %v546_v13 = vld [vmem:[%s726_s1 + $0x24] ss:$8 sps:$4 sm:$0xff]   ;;  %v550_v15 = vld [vmem:[%s726_s1 + $0x20] ss:$8 sps:$4 sm:$0xff]   ;;  %v552_v17 = vld [vmem:[%s726_s1 + $0x14] ss:$8 sps:$4 sm:$0xff]  }
   0x6   :  { %v548_v14 = vld [vmem:[%s726_s1 + $0x84] ss:$8 sps:$4 sm:$0xff]   ;;  %v551_v16 = vld [vmem:[%s726_s1 + $0x80] ss:$8 sps:$4 sm:$0xff]   ;;  %v554_v18 = vld [vmem:[%s726_s1 + $0x74] ss:$8 sps:$4 sm:$0xff]  }
   0x7   :  { %129 = vmatpush1.bf16.msra.mxu0 %v538_v7  ;;  %v556_v19 = vld [vmem:[%s726_s1 + $0x10] ss:$8 sps:$4 sm:$0xff]   ;;  %v558_v21 = vld [vmem:[%s726_s1 + $0x4] ss:$8 sps:$4 sm:$0xff]   ;;  %v562_v23 = vld [vmem:[%s726_s1] ss:$8 sps:$4 sm:$0xff]  }
   0x8   :  { %324 = vmatpush1.bf16.msra.mxu1 %v539_v8  ;;  %130 = vmatprep.subr.bf16.mxu0 %v540_v9  ;;  %v557_v20 = vld [vmem:[%s726_s1 + $0x70] ss:$8 sps:$4 sm:$0xff]   ;;  %v560_v22 = vld [vmem:[%s726_s1 + $0x64] ss:$8 sps:$4 sm:$0xff]   ;;  %v563_v24 = vld [vmem:[%s726_s1 + $0x60] ss:$8 sps:$4 sm:$0xff]  }
   0x9   :  { %325 = vmatprep.subr.bf16.mxu1 %v542_v10  ;;  %v564_v25 = vld [vmem:[%s727_s0] sm:$0xff]   ;;  %v565_v26 = vld [vmem:[%s727_s0 + $0x8] sm:$0xff]   ;;  %v566_v27 = vld [vmem:[%s727_s0 + $0x10] sm:$0xff]  }
   0xa   :  { %v567_v28 = vld [vmem:[%s727_s0 + $0x18] ss:$0 sps:$4 sm:$0x11]  }
   0xb   :  { %131 = vmatpush1.bf16.msra.mxu0 %v544_v11 }
   0xc   :  { %326 = vmatpush1.bf16.msra.mxu1 %v545_v12  ;;  %132 = vmatprep.subr.bf16.mxu0 %v546_v13 }
   0xd   :  { %327 = vmatprep.subr.bf16.mxu1 %v548_v14 }
   0xf   :  { %133 = vmatpush1.bf16.msra.mxu0 %v550_v15 }
  0x10   :  { %328 = vmatpush1.bf16.msra.mxu1 %v551_v16  ;;  %134 = vmatprep.subr.bf16.mxu0 %v552_v17 }
  0x11   :  { %329 = vmatprep.subr.bf16.mxu1 %v554_v18 }
  0x13   :  { %135 = vmatpush1.bf16.msra.mxu0 %v556_v19 }
  0x14   :  { %330 = vmatpush1.bf16.msra.mxu1 %v557_v20  ;;  %136 = vmatprep.subr.bf16.mxu0 %v558_v21 }
  0x15   :  { %331 = vmatprep.subr.bf16.mxu1 %v560_v22 }
  0x17   :  { %137 = vmatpush1.bf16.msra.mxu0 %v562_v23 }
  0x18   :  { %332 = vmatpush1.bf16.msra.mxu1 %v563_v24 }
  0x1a   :  { %460 = vmatmul.mubr.msk.bf16.vlgmr.msra.gmra.mxu0 %vm109_vm0, %v564_v25 }
  0x1b   :  { %495 = vmatmul.mubr.msk.bf16.vlgmr.msra.gmra.mxu1 %vm109_vm0, %v564_v25  ;;  %164 = vmatprep.mubr.bf16.mxu0 %v568_v1 }
  0x1c   :  { %359 = vmatprep.mubr.bf16.mxu1 %v568_v1 }
  0x22   :  { %461 = vmatmul.mubr.msk.bf16.gmra.mxu0 %vm109_vm0, %v565_v26 }
  0x23   :  { %496 = vmatmul.mubr.msk.bf16.gmra.mxu1 %vm109_vm0, %v565_v26  ;;  %174 = vmatprep.mubr.bf16.mxu0 %v568_v1 }
  0x24   :  { %369 = vmatprep.mubr.bf16.mxu1 %v568_v1 }
  0x2a   :  { %462 = vmatmul.mubr.msk.bf16.gmra.mxu0 %vm109_vm0, %v566_v27 }
  0x2b   :  { %497 = vmatmul.mubr.msk.bf16.gmra.mxu1 %vm109_vm0, %v566_v27  ;;  %184 = vmatprep.mubr.bf16.mxu0 %v568_v1 }
  0x2c   :  { %379 = vmatprep.mubr.bf16.mxu1 %v568_v1 }
  0x32   :  { %463 = vmatmul.mubr.msk.bf16.gmra.mxu0 %vm109_vm0, %v567_v28 }
  0x33   :  { %498 = vmatmul.mubr.msk.bf16.gmra.mxu1 %vm109_vm0, %v567_v28 }
  0xda   :  { %v156_v29 = vpop.f32.mrf.mxu0 }
  0xdb   :  { %v351_v30 = vpop.f32.mrf.mxu1 }
  0xdc   :  { %v158_v31 = vpop.f32.mrf.mxu0 }
  0xdd   :  { %v353_v32 = vpop.f32.mrf.mxu1  ;;  %v513_v33 = vpack.c.bf16 %v158_v31, %v156_v29 }
  0xde   :  { %v520_v34 = vpack.c.bf16 %v353_v32, %v351_v30  ;;  %v160_v35 = vpop.f32.mrf.mxu0 }
  0xdf   :  { %v355_v36 = vpop.f32.mrf.mxu1  ;;  %237 = vst [vmem:[%s728_s2] sm:$0xff] %v513_v33 }
  0xe0   :  { %506 = vst [vmem:[%s728_s2 + $0x38] sm:$0xff] %v520_v34  ;;  %v162_v37 = vpop.f32.mrf.mxu0 }
  0xe1   :  { %v357_v38 = vpop.f32.mrf.mxu1  ;;  %v514_v39 = vpack.c.bf16 %v162_v37, %v160_v35 }
  0xe2   :  { %v521_v40 = vpack.c.bf16 %v357_v38, %v355_v36  ;;  %v166_v41 = vpop.f32.mrf.mxu0 }
  0xe3   :  { %v361_v42 = vpop.f32.mrf.mxu1  ;;  %238 = vst [vmem:[%s728_s2 + $0x8] sm:$0xff] %v514_v39 }
  0xe4   :  { %507 = vst [vmem:[%s728_s2 + $0x40] sm:$0xff] %v521_v40  ;;  %v168_v43 = vpop.f32.mrf.mxu0 }
  0xe5   :  { %v363_v44 = vpop.f32.mrf.mxu1  ;;  %v515_v45 = vpack.c.bf16 %v168_v43, %v166_v41 }
  0xe6   :  { %v522_v46 = vpack.c.bf16 %v363_v44, %v361_v42  ;;  %v170_v47 = vpop.f32.mrf.mxu0 }
  0xe7   :  { %v365_v48 = vpop.f32.mrf.mxu1  ;;  %239 = vst [vmem:[%s728_s2 + $0x10] sm:$0xff] %v515_v45 }
  0xe8   :  { %508 = vst [vmem:[%s728_s2 + $0x48] sm:$0xff] %v522_v46  ;;  %v172_v49 = vpop.f32.mrf.mxu0 }
  0xe9   :  { %v367_v50 = vpop.f32.mrf.mxu1  ;;  %v516_v51 = vpack.c.bf16 %v172_v49, %v170_v47 }
  0xea   :  { %v523_v52 = vpack.c.bf16 %v367_v50, %v365_v48  ;;  %v176_v53 = vpop.f32.mrf.mxu0 }
  0xeb   :  { %v371_v54 = vpop.f32.mrf.mxu1  ;;  %240 = vst [vmem:[%s728_s2 + $0x18] sm:$0xff] %v516_v51 }
  0xec   :  { %509 = vst [vmem:[%s728_s2 + $0x50] sm:$0xff] %v523_v52  ;;  %v178_v55 = vpop.f32.mrf.mxu0 }
  0xed   :  { %v373_v56 = vpop.f32.mrf.mxu1  ;;  %v517_v57 = vpack.c.bf16 %v178_v55, %v176_v53 }
  0xee   :  { %v524_v58 = vpack.c.bf16 %v373_v56, %v371_v54  ;;  %v180_v59 = vpop.f32.mrf.mxu0 }
  0xef   :  { %v375_v60 = vpop.f32.mrf.mxu1  ;;  %241 = vst [vmem:[%s728_s2 + $0x20] sm:$0xff] %v517_v57 }
  0xf0   :  { %510 = vst [vmem:[%s728_s2 + $0x58] sm:$0xff] %v524_v58  ;;  %v182_v61 = vpop.f32.mrf.mxu0 }
  0xf1   :  { %v377_v62 = vpop.f32.mrf.mxu1  ;;  %v518_v63 = vpack.c.bf16 %v182_v61, %v180_v59 }
  0xf2   :  { %v525_v0 = vpack.c.bf16 %v377_v62, %v375_v60  ;;  %v186_v1 = vpop.f32.mrf.mxu0 }
  0xf3   :  { %v381_v2 = vpop.f32.mrf.mxu1  ;;  %242 = vst [vmem:[%s728_s2 + $0x28] sm:$0xff] %v518_v63 }
  0xf4   :  { %511 = vst [vmem:[%s728_s2 + $0x60] sm:$0xff] %v525_v0  ;;  %v188_v3 = vpop.f32.mrf.mxu0 }
  0xf5   :  { %v383_v4 = vpop.f32.mrf.mxu1  ;;  %v519_v5 = vpack.c.bf16 %v188_v3, %v186_v1 }
  0xf6   :  { %v526_v6 = vpack.c.bf16 %v383_v4, %v381_v2  ;;  %v190_v7 = vpop.f32.mrf.mxu0 }
  0xf7   :  { %v385_v8 = vpop.f32.mrf.mxu1  ;;  %243 = vst [vmem:[%s728_s2 + $0x30] sm:$0x11] %v519_v5 }
  0xf8   :  { %512 = vst [vmem:[%s728_s2 + $0x68] sm:$0x11] %v526_v6  ;;  %v191_v9 = vpop.f32.mrf.mxu0 }
  0xf9   :  { %v386_v10 = vpop.f32.mrf.mxu1 }

// kernel: pspnet_forward.20
= control target key start
LH: loop header
LB: loop body
LE: loop exit
PB: predicated region body
PF: predicated region fallthrough
CT: control target
= control target key end

     0   :  { %v529_v47 = vlaneseq  ;;  %s1163_s1 = inlined_call_operand.vmem [shape: bf16[256,256], index: 1, kind: input, shape index: {}]   ;;  %s1164_s0 = inlined_call_operand.vmem [shape: bf16[104,256], index: 0, kind: input, shape index: {}]   ;;  %s1165_s2 = inlined_call_operand.vmem [shape: f32[1,256], index: 2, kind: input, shape index: {}]   ;;  %s1166_s3 = inlined_call_operand.vmem [shape: f32[1,256], index: 3, kind: input, shape index: {}]   ;;  %s1167_s4 = inlined_call_operand.vmem [shape: bf16[104,256], index: 4, kind: output, shape index: {}]  }
   0x1   :  { %v830_v0 = vld [vmem:[%s1163_s1 + $0x74] ss:$8 sps:$4 sm:$0xff]   ;;  %v832_v1 = vld [vmem:[%s1163_s1 + $0x70] ss:$8 sps:$4 sm:$0xff]   ;;  %v833_v2 = vld [vmem:[%s1163_s1 + $0x64] ss:$8 sps:$4 sm:$0xff]  }
   0x2   :  { %345 = vmatprep.subr.bf16.mxu0 %v830_v0  ;;  %798 = vmatprep.subr.bf16.mxu1 %v830_v0  ;;  %v835_v3 = vld [vmem:[%s1163_s1 + $0x60] ss:$8 sps:$4 sm:$0xff]   ;;  %v836_v4 = vld [vmem:[%s1163_s1 + $0x54] ss:$8 sps:$4 sm:$0xff]   ;;  %v838_v5 = vld [vmem:[%s1163_s1 + $0x50] ss:$8 sps:$4 sm:$0xff]  }
   0x3   :  { %346 = vmatpush1.bf16.msra.mxu0 %v832_v1  ;;  %814 = vmatpush1.bf16.msra.mxu1 %v832_v1  ;;  %v839_v6 = vld [vmem:[%s1163_s1 + $0x44] ss:$8 sps:$4 sm:$0xff]   ;;  %v841_v7 = vld [vmem:[%s1163_s1 + $0x40] ss:$8 sps:$4 sm:$0xff]   ;;  %v842_v8 = vld [vmem:[%s1163_s1 + $0x34] ss:$8 sps:$4 sm:$0xff]  }
   0x4   :  { %347 = vmatprep.subr.bf16.mxu0 %v833_v2  ;;  %799 = vmatprep.subr.bf16.mxu1 %v833_v2  ;;  %v844_v9 = vld [vmem:[%s1163_s1 + $0x30] ss:$8 sps:$4 sm:$0xff]   ;;  %v845_v10 = vld [vmem:[%s1163_s1 + $0x24] ss:$8 sps:$4 sm:$0xff]   ;;  %v847_v11 = vld [vmem:[%s1163_s1 + $0x20] ss:$8 sps:$4 sm:$0xff]  }
   0x5   :  { %v848_v12 = vld [vmem:[%s1163_s1 + $0x14] ss:$8 sps:$4 sm:$0xff]   ;;  %v880_v13 = vld [vmem:[%s1164_s0 + $0x4] ss:$8 sps:$4 sm:$0xff]   ;;  %v850_v14 = vld [vmem:[%s1163_s1 + $0x10] ss:$8 sps:$4 sm:$0xff]  }
   0x6   :  { %v883_v15 = vld [vmem:[%s1164_s0 + $0x44] ss:$8 sps:$4 sm:$0xff]   ;;  %377 = vmatprep.mubr.bf16.mxu0 %v880_v13  ;;  %v853_v17 = vld [vmem:[%s1163_s1] ss:$8 sps:$4 sm:$0xff]   ;;  %v854_v18 = vld [vmem:[%s1163_s1 + $0xf4] ss:$8 sps:$4 sm:$0xff]  }
   0x7   :  { %348 = vmatpush1.bf16.msra.mxu0 %v835_v3  ;;  %815 = vmatpush1.bf16.msra.mxu1 %v835_v3  ;;  %v851_v16 = vld [vmem:[%s1163_s1 + $0x4] ss:$8 sps:$4 sm:$0xff]   ;;  %v856_v19 = vld [vmem:[%s1163_s1 + $0xf0] ss:$8 sps:$4 sm:$0xff]   ;;  %v859_v21 = vld [vmem:[%s1163_s1 + $0xe0] ss:$8 sps:$4 sm:$0xff]  }
   0x8   :  { %349 = vmatprep.subr.bf16.mxu0 %v836_v4  ;;  %800 = vmatprep.subr.bf16.mxu1 %v836_v4  ;;  %v857_v20 = vld [vmem:[%s1163_s1 + $0xe4] ss:$8 sps:$4 sm:$0xff]   ;;  %v860_v22 = vld [vmem:[%s1163_s1 + $0xd4] ss:$8 sps:$4 sm:$0xff]   ;;  %v862_v23 = vld [vmem:[%s1163_s1 + $0xd0] ss:$8 sps:$4 sm:$0xff]  }
   0x9   :  { %417 = vmatprep.mubr.bf16.mxu1 %v883_v15  ;;  %v863_v24 = vld [vmem:[%s1163_s1 + $0xc4] ss:$8 sps:$4 sm:$0xff]   ;;  %v865_v25 = vld [vmem:[%s1163_s1 + $0xc0] ss:$8 sps:$4 sm:$0xff]   ;;  %v866_v26 = vld [vmem:[%s1163_s1 + $0xb4] ss:$8 sps:$4 sm:$0xff]  }
   0xa   :  { %v868_v27 = vld [vmem:[%s1163_s1 + $0xb0] ss:$8 sps:$4 sm:$0xff]   ;;  %v869_v28 = vld [vmem:[%s1163_s1 + $0xa4] ss:$8 sps:$4 sm:$0xff]   ;;  %v871_v29 = vld [vmem:[%s1163_s1 + $0xa0] ss:$8 sps:$4 sm:$0xff]  }
   0xb   :  { %350 = vmatpush1.bf16.msra.mxu0 %v838_v5  ;;  %816 = vmatpush1.bf16.msra.mxu1 %v838_v5  ;;  %v872_v30 = vld [vmem:[%s1163_s1 + $0x94] ss:$8 sps:$4 sm:$0xff]   ;;  %v874_v31 = vld [vmem:[%s1163_s1 + $0x90] ss:$8 sps:$4 sm:$0xff]   ;;  %v875_v32 = vld [vmem:[%s1163_s1 + $0x84] ss:$8 sps:$4 sm:$0xff]  }
   0xc   :  { %351 = vmatprep.subr.bf16.mxu0 %v839_v6  ;;  %801 = vmatprep.subr.bf16.mxu1 %v839_v6  ;;  %v877_v33 = vld [vmem:[%s1163_s1 + $0x80] ss:$8 sps:$4 sm:$0xff]   ;;  %v884_v36 = vld [vmem:[%s1164_s0 + $0x14] ss:$8 sps:$4 sm:$0xff]   ;;  %v886_v39 = vld [vmem:[%s1164_s0 + $0x10] ss:$8 sps:$4 sm:$0xff]  }
   0xd   :  { %v878_v34 = vld [vmem:[%s1164_s0] ss:$8 sps:$4 sm:$0xff]   ;;  %v887_v37 = vld [vmem:[%s1164_s0 + $0x54] ss:$8 sps:$4 sm:$0xff]   ;;  %v889_v40 = vld [vmem:[%s1164_s0 + $0x50] ss:$8 sps:$4 sm:$0xff]  }
   0xe   :  { %v881_v35 = vld [vmem:[%s1164_s0 + $0x40] ss:$8 sps:$4 sm:$0xff]   ;;  %v890_v41 = vld [vmem:[%s1164_s0 + $0x24] ss:$8 sps:$4 sm:$0xff]   ;;  %v895_v45 = vld [vmem:[%s1164_s0 + $0x34] ss:$8 sps:$4 sm:$0xff]  }
   0xf   :  { %352 = vmatpush1.bf16.msra.mxu0 %v841_v7  ;;  %817 = vmatpush1.bf16.msra.mxu1 %v841_v7  ;;  %v85_v38 = vld [vmem:[%s1164_s0 + $0x60] sm:$0xff]  ;;  %v897_v46 = vld [vmem:[%s1164_s0 + $0x30] ss:$8 sps:$4 sm:$0xff]   ;;  %v530_v48 = vshrl.u32 %v529_v47, 7 }
  0x10   :  { %353 = vmatprep.subr.bf16.mxu0 %v842_v8  ;;  %802 = vmatprep.subr.bf16.mxu1 %v842_v8  ;;  %v739_v42 = vcombine.high %v85_v38, %v85_v38  ;;  %v892_v43 = vld [vmem:[%s1164_s0 + $0x20] ss:$8 sps:$4 sm:$0xff]   ;;  %v738_v44 = vcombine.low %v85_v38, %v85_v38 }
  0x11   :  { %v531_v49 = vsub.s32 0, %v530_v48  ;;  %v527_v50 = vld [vmem:[%s1165_s2] sm:$0x3]  ;;  %v535_v51 = vsub.s32 1, %v530_v48 }
  0x12   :  { %v565_v52 = vld [vmem:[%s1166_s3] sm:$0x3] }
  0x13   :  { %354 = vmatpush1.bf16.msra.mxu0 %v844_v9  ;;  %818 = vmatpush1.bf16.msra.mxu1 %v844_v9  ;;  %v1064_v53 = vrot.slane %v527_v50, %v531_v49  ;;  %v1066_v54 = vrot.slane %v565_v52, %v531_v49  ;;  %v1068_v55 = vrot.slane %v527_v50, %v535_v51 }
  0x14   :  { %355 = vmatprep.subr.bf16.mxu0 %v845_v10  ;;  %803 = vmatprep.subr.bf16.mxu1 %v845_v10  ;;  %v1071_v59 = vrot.slane %v565_v52, %v535_v51 }
  0x17   :  { %356 = vmatpush1.bf16.msra.mxu0 %v847_v11  ;;  %819 = vmatpush1.bf16.msra.mxu1 %v847_v11 }
  0x18   :  { %357 = vmatprep.subr.bf16.mxu0 %v848_v12  ;;  %804 = vmatprep.subr.bf16.mxu1 %v848_v12 }
  0x1b   :  { %358 = vmatpush1.bf16.msra.mxu0 %v850_v14  ;;  %820 = vmatpush1.bf16.msra.mxu1 %v850_v14 }
  0x1c   :  { %359 = vmatprep.subr.bf16.mxu0 %v851_v16  ;;  %805 = vmatprep.subr.bf16.mxu1 %v851_v16 }
  0x1f   :  { %360 = vmatpush1.bf16.msra.mxu0 %v853_v17  ;;  %821 = vmatpush1.bf16.msra.mxu1 %v853_v17 }
  0x20   :  { %361 = vmatprep.subr.bf16.mxu0 %v854_v18  ;;  %806 = vmatprep.subr.bf16.mxu1 %v854_v18 }
  0x23   :  { %362 = vmatpush2.bf16.msra.mxu0 %v856_v19  ;;  %822 = vmatpush2.bf16.msra.mxu1 %v856_v19 }
  0x24   :  { %363 = vmatprep.subr.bf16.mxu0 %v857_v20  ;;  %807 = vmatprep.subr.bf16.mxu1 %v857_v20 }
  0x27   :  { %364 = vmatpush2.bf16.msra.mxu0 %v859_v21  ;;  %823 = vmatpush2.bf16.msra.mxu1 %v859_v21 }
  0x28   :  { %365 = vmatprep.subr.bf16.mxu0 %v860_v22  ;;  %808 = vmatprep.subr.bf16.mxu1 %v860_v22 }
  0x2b   :  { %366 = vmatpush2.bf16.msra.mxu0 %v862_v23  ;;  %824 = vmatpush2.bf16.msra.mxu1 %v862_v23 }
  0x2c   :  { %367 = vmatprep.subr.bf16.mxu0 %v863_v24  ;;  %809 = vmatprep.subr.bf16.mxu1 %v863_v24 }
  0x2f   :  { %368 = vmatpush2.bf16.msra.mxu0 %v865_v25  ;;  %825 = vmatpush2.bf16.msra.mxu1 %v865_v25 }
  0x30   :  { %369 = vmatprep.subr.bf16.mxu0 %v866_v26  ;;  %810 = vmatprep.subr.bf16.mxu1 %v866_v26 }
  0x33   :  { %370 = vmatpush2.bf16.msra.mxu0 %v868_v27  ;;  %826 = vmatpush2.bf16.msra.mxu1 %v868_v27 }
  0x34   :  { %371 = vmatprep.subr.bf16.mxu0 %v869_v28  ;;  %811 = vmatprep.subr.bf16.mxu1 %v869_v28 }
  0x37   :  { %372 = vmatpush2.bf16.msra.mxu0 %v871_v29  ;;  %827 = vmatpush2.bf16.msra.mxu1 %v871_v29 }
  0x38   :  { %373 = vmatprep.subr.bf16.mxu0 %v872_v30  ;;  %812 = vmatprep.subr.bf16.mxu1 %v872_v30 }
  0x3b   :  { %374 = vmatpush2.bf16.msra.mxu0 %v874_v31  ;;  %828 = vmatpush2.bf16.msra.mxu1 %v874_v31 }
  0x3c   :  { %375 = vmatprep.subr.bf16.mxu0 %v875_v32  ;;  %813 = vmatprep.subr.bf16.mxu1 %v875_v32 }
  0x3f   :  { %376 = vmatpush2.bf16.msra.mxu0 %v877_v33  ;;  %829 = vmatpush2.bf16.msra.mxu1 %v877_v33 }
  0x42   :  { %378 = vmatmul.mubr.bf16.vlgmr.msra.gmra.mxu0 %v878_v34  ;;  %418 = vmatmul.mubr.bf16.vlgmr.msra.gmra.mxu1 %v881_v35 }
  0x43   :  { %387 = vmatprep.mubr.bf16.mxu0 %v884_v36  ;;  %427 = vmatprep.mubr.bf16.mxu1 %v887_v37 }
  0x4a   :  { %388 = vmatmul.mubr.bf16.gmra.mxu0 %v886_v39  ;;  %428 = vmatmul.mubr.bf16.gmra.mxu1 %v889_v40 }
  0x4b   :  { %397 = vmatprep.mubr.bf16.mxu0 %v890_v41  ;;  %437 = vmatprep.mubr.bf16.mxu1 %v739_v42 }
  0x52   :  { %398 = vmatmul.mubr.bf16.gmra.mxu0 %v892_v43  ;;  %438 = vmatmul.mubr.bf16.gmra.mxu1 %v738_v44 }
  0x53   :  { %407 = vmatprep.mubr.bf16.mxu0 %v895_v45 }
  0x5a   :  { %408 = vmatmul.mubr.bf16.gmra.mxu0 %v897_v46 }
 0x102   :  { %v379_v56 = vpop.f32.mrf.mxu0  ;;  %v419_v57 = vpop.f32.mrf.mxu1 }
 0x103   :  { %v539_v58 = vmul.f32 %v1064_v53, %v379_v56  ;;  %v555_v60 = vmul.f32 %v1064_v53, %v419_v57 }
 0x104   :  { %v381_v61 = vpop.f32.mrf.mxu0  ;;  %v421_v62 = vpop.f32.mrf.mxu1 }
 0x105   :  { %v577_v63 = vadd.f32 %v1066_v54, %v539_v58  ;;  %v540_v0 = vmul.f32 %v1068_v55, %v381_v61  ;;  %v593_v1 = vadd.f32 %v1066_v54, %v555_v60  ;;  %v556_v2 = vmul.f32 %v1068_v55, %v421_v62 }
 0x106   :  { %v383_v3 = vpop.f32.mrf.mxu0  ;;  %v423_v4 = vpop.f32.mrf.mxu1 }
 0x107   :  { %v578_v5 = vadd.f32 %v1071_v59, %v540_v0  ;;  %v541_v6 = vmul.f32 %v1064_v53, %v383_v3  ;;  %v603_v7 = vmax.f32 %v577_v63, 0.0  ;;  %v619_v9 = vmax.f32 %v593_v1, 0.0 }
 0x108   :  { %v385_v8 = vpop.f32.mrf.mxu0  ;;  %v594_v10 = vadd.f32 %v1071_v59, %v556_v2  ;;  %v557_v11 = vmul.f32 %v1064_v53, %v423_v4  ;;  %v425_v12 = vpop.f32.mrf.mxu1 }
 0x109   :  { %v604_v13 = vmax.f32 %v578_v5, 0.0  ;;  %v579_v14 = vadd.f32 %v1066_v54, %v541_v6  ;;  %v542_v15 = vmul.f32 %v1068_v55, %v385_v8  ;;  %v558_v16 = vmul.f32 %v1068_v55, %v425_v12 }
 0x10a   :  { %v389_v17 = vpop.f32.mrf.mxu0  ;;  %v620_v18 = vmax.f32 %v594_v10, 0.0  ;;  %v595_v19 = vadd.f32 %v1066_v54, %v557_v11  ;;  %v429_v20 = vpop.f32.mrf.mxu1 }
 0x10b   :  { %v785_v21 = vpack.c.bf16 %v604_v13, %v603_v7  ;;  %v605_v22 = vmax.f32 %v579_v14, 0.0  ;;  %v580_v23 = vadd.f32 %v1071_v59, %v542_v15  ;;  %v543_v24 = vmul.f32 %v1064_v53, %v389_v17 }
 0x10c   :  { %v793_v25 = vpack.c.bf16 %v620_v18, %v619_v9  ;;  %v391_v26 = vpop.f32.mrf.mxu0  ;;  %v621_v27 = vmax.f32 %v595_v19, 0.0  ;;  %v596_v28 = vadd.f32 %v1071_v59, %v558_v16  ;;  %v559_v29 = vmul.f32 %v1064_v53, %v429_v20  ;;  %v431_v30 = vpop.f32.mrf.mxu1 }
 0x10d   :  { %709 = vst [vmem:[%s1167_s4] sm:$0xff] %v785_v21  ;;  %v606_v31 = vmax.f32 %v580_v23, 0.0  ;;  %v581_v32 = vadd.f32 %v1066_v54, %v543_v24  ;;  %v544_v33 = vmul.f32 %v1068_v55, %v391_v26  ;;  %v560_v34 = vmul.f32 %v1068_v55, %v431_v30 }
 0x10e   :  { %717 = vst [vmem:[%s1167_s4 + $0x40] sm:$0xff] %v793_v25  ;;  %v393_v35 = vpop.f32.mrf.mxu0  ;;  %v622_v36 = vmax.f32 %v596_v28, 0.0  ;;  %v597_v37 = vadd.f32 %v1066_v54, %v559_v29  ;;  %v433_v38 = vpop.f32.mrf.mxu1 }
 0x10f   :  { %v786_v39 = vpack.c.bf16 %v606_v31, %v605_v22  ;;  %v607_v40 = vmax.f32 %v581_v32, 0.0  ;;  %v582_v41 = vadd.f32 %v1071_v59, %v544_v33  ;;  %v545_v42 = vmul.f32 %v1064_v53, %v393_v35 }
 0x110   :  { %v794_v43 = vpack.c.bf16 %v622_v36, %v621_v27  ;;  %v395_v44 = vpop.f32.mrf.mxu0  ;;  %v623_v45 = vmax.f32 %v597_v37, 0.0  ;;  %v598_v46 = vadd.f32 %v1071_v59, %v560_v34  ;;  %v561_v47 = vmul.f32 %v1064_v53, %v433_v38  ;;  %v435_v48 = vpop.f32.mrf.mxu1 }
 0x111   :  { %710 = vst [vmem:[%s1167_s4 + $0x8] sm:$0xff] %v786_v39  ;;  %v608_v49 = vmax.f32 %v582_v41, 0.0  ;;  %v583_v50 = vadd.f32 %v1066_v54, %v545_v42  ;;  %v546_v51 = vmul.f32 %v1068_v55, %v395_v44  ;;  %v562_v52 = vmul.f32 %v1068_v55, %v435_v48 }
 0x112   :  { %718 = vst [vmem:[%s1167_s4 + $0x48] sm:$0xff] %v794_v43  ;;  %v399_v56 = vpop.f32.mrf.mxu0  ;;  %v624_v57 = vmax.f32 %v598_v46, 0.0  ;;  %v599_v58 = vadd.f32 %v1066_v54, %v561_v47  ;;  %v439_v60 = vpop.f32.mrf.mxu1 }
 0x113   :  { %v787_v61 = vpack.c.bf16 %v608_v49, %v607_v40  ;;  %v609_v62 = vmax.f32 %v583_v50, 0.0  ;;  %v584_v63 = vadd.f32 %v1071_v59, %v546_v51  ;;  %v547_v0 = vmul.f32 %v1064_v53, %v399_v56 }
 0x114   :  { %v795_v1 = vpack.c.bf16 %v624_v57, %v623_v45  ;;  %v401_v2 = vpop.f32.mrf.mxu0  ;;  %v625_v3 = vmax.f32 %v599_v58, 0.0  ;;  %v600_v4 = vadd.f32 %v1071_v59, %v562_v52  ;;  %v563_v5 = vmul.f32 %v1064_v53, %v439_v60  ;;  %v441_v6 = vpop.f32.mrf.mxu1 }
 0x115   :  { %711 = vst [vmem:[%s1167_s4 + $0x10] sm:$0xff] %v787_v61  ;;  %v610_v7 = vmax.f32 %v584_v63, 0.0  ;;  %v585_v8 = vadd.f32 %v1066_v54, %v547_v0  ;;  %v548_v9 = vmul.f32 %v1068_v55, %v401_v2  ;;  %v564_v10 = vmul.f32 %v1068_v55, %v441_v6 }
 0x116   :  { %719 = vst [vmem:[%s1167_s4 + $0x50] sm:$0xff] %v795_v1  ;;  %v403_v11 = vpop.f32.mrf.mxu0  ;;  %v626_v12 = vmax.f32 %v600_v4, 0.0  ;;  %v601_v13 = vadd.f32 %v1066_v54, %v563_v5  ;;  %v443_v14 = vpop.f32.mrf.mxu1 }
 0x117   :  { %v788_v15 = vpack.c.bf16 %v610_v7, %v609_v62  ;;  %v586_v16 = vadd.f32 %v1071_v59, %v548_v9  ;;  %v549_v17 = vmul.f32 %v1064_v53, %v403_v11  ;;  %v602_v21 = vadd.f32 %v1071_v59, %v564_v10 }
 0x118   :  { %v796_v18 = vpack.c.bf16 %v626_v12, %v625_v3  ;;  %v405_v19 = vpop.f32.mrf.mxu0  ;;  %v627_v20 = vmax.f32 %v601_v13, 0.0  ;;  %v444_v22 = vpop.f32.mrf.mxu1  ;;  %v611_v23 = vmax.f32 %v585_v8, 0.0 }
 0x119   :  { %712 = vst [vmem:[%s1167_s4 + $0x18] sm:$0xff] %v788_v15  ;;  %v612_v24 = vmax.f32 %v586_v16, 0.0  ;;  %v587_v25 = vadd.f32 %v1066_v54, %v549_v17  ;;  %v550_v26 = vmul.f32 %v1068_v55, %v405_v19  ;;  %v628_v28 = vmax.f32 %v602_v21, 0.0 }
 0x11a   :  { %720 = vst [vmem:[%s1167_s4 + $0x58] sm:$0xff] %v796_v18  ;;  %v409_v27 = vpop.f32.mrf.mxu0 }
 0x11b   :  { %v789_v29 = vpack.c.bf16 %v612_v24, %v611_v23  ;;  %v588_v30 = vadd.f32 %v1071_v59, %v550_v26  ;;  %v551_v31 = vmul.f32 %v1064_v53, %v409_v27  ;;  %v797_v32 = vpack.c.bf16 %v628_v28, %v627_v20 }
 0x11c   :  { %v411_v33 = vpop.f32.mrf.mxu0  ;;  %v613_v34 = vmax.f32 %v587_v25, 0.0 }
 0x11d   :  { %713 = vst [vmem:[%s1167_s4 + $0x20] sm:$0xff] %v789_v29  ;;  %v614_v35 = vmax.f32 %v588_v30, 0.0  ;;  %v589_v36 = vadd.f32 %v1066_v54, %v551_v31  ;;  %v552_v37 = vmul.f32 %v1068_v55, %v411_v33  ;;  %721 = vst [vmem:[%s1167_s4 + $0x60] sm:$0xff] %v797_v32 }
 0x11e   :  { %v413_v38 = vpop.f32.mrf.mxu0 }
 0x11f   :  { %v790_v39 = vpack.c.bf16 %v614_v35, %v613_v34  ;;  %v590_v40 = vadd.f32 %v1071_v59, %v552_v37  ;;  %v553_v41 = vmul.f32 %v1064_v53, %v413_v38  ;;  %v615_v43 = vmax.f32 %v589_v36, 0.0 }
 0x120   :  { %v415_v42 = vpop.f32.mrf.mxu0 }
 0x121   :  { %714 = vst [vmem:[%s1167_s4 + $0x28] sm:$0xff] %v790_v39  ;;  %v616_v44 = vmax.f32 %v590_v40, 0.0  ;;  %v591_v45 = vadd.f32 %v1066_v54, %v553_v41  ;;  %v554_v46 = vmul.f32 %v1068_v55, %v415_v42 }
 0x123   :  { %v791_v47 = vpack.c.bf16 %v616_v44, %v615_v43  ;;  %v592_v48 = vadd.f32 %v1071_v59, %v554_v46  ;;  %v617_v49 = vmax.f32 %v591_v45, 0.0 }
 0x125   :  { %715 = vst [vmem:[%s1167_s4 + $0x30] sm:$0xff] %v791_v47  ;;  %v618_v53 = vmax.f32 %v592_v48, 0.0 }
 0x127   :  { %v792_v50 = vpack.c.bf16 %v618_v53, %v617_v49 }
 0x129   :  { %716 = vst [vmem:[%s1167_s4 + $0x38] sm:$0xff] %v792_v50 }

// kernel: pspnet_forward.29
= control target key start
LH: loop header
LB: loop body
LE: loop exit
PB: predicated region body
PF: predicated region fallthrough
CT: control target
= control target key end

     0   :  { %s1280_s9 = smov 0   ;;  %s1282_s10 = smov 0   ;;  %s1382_s0 = inlined_call_operand.vmem [shape: bf16[64,8], index: 0, kind: input, shape index: {}]   ;;  %s1383_s1 = inlined_call_operand.vmem [shape: bf16[10,8,128], index: 1, kind: input, shape index: {}]   ;;  %s1384_s2 = inlined_call_operand.vmem [shape: bf16[10,64,128], index: 2, kind: output, shape index: {}]  }
   0x1   :  { %s1284_s11 = smov 0  }
   0x2 LB: > { %s24_s12 = sadd.s32 1, %s1259_s10  ;;  %p864_p0 = scmp.ge.s32.totalorder %s1263_s11, 1  ;;  %s1263_s11 = sphi %s1284_s11, %s12_s11   ;;  %s1259_s10 = sphi %s1282_s10, %s1386_s10   ;;  %s1255_s9 = sphi %s1280_s9, %s1385_s9  }
   0x3   : > { %p26_p1 = scmp.ge.s32.totalorder %s24_s12, 2  ;;  %p132_p2 = scmp.lt.s32.totalorder %s1263_s11, 3 }
   0x5   : > { %s1388_s12 = smov (%p26_p1, %s24_s12), 0  ;;  %p133_p3 = pnand %p864_p0, %p132_p2 }
   0x6   : > { %s161_s13 = smul.u32 (!%p133_p3), 5, %s1255_s9 }
   0x7   : > { %136 = sbr.rel (%p133_p3) target bundleno = 254 (0xfe), region = 28 }
   0x8   : > { %p162_p4 = scmp.lt.s32.totalorder (!%p133_p3), %s161_s13, 9 }
   0xc   : > { %v1237_v0 = vld [vmem:[%s1382_s0] sm:$0xff]   ;;  %vm210_vm0 = vcmask 64512   ;;  %v1238_v1 = vld [vmem:[%s1382_s0 + $0x10] sm:$0xff]   ;;  %s1390_s13 = smov (!%p162_p4, %s161_s13), 9  ;;  %vm223_vm1 = vcmask 1043456   ;;  %v1239_v6 = vld [vmem:[%s1382_s0 + $0x8] sm:$0xff]  }
   0xd   : > { %1157 = vmatprep.mubr.msk.bf16.mxu0 %vm210_vm0, %v1237_v0  ;;  %1161 = vmatprep.mubr.msk.bf16.mxu1 %vm210_vm0, %v1238_v1  ;;  %s865_s18 = sshll.u32 %s1390_s13, 2  ;;  %v1240_v7 = vld [vmem:[%s1382_s0 + $0x18] sm:$0xff]   ;;  %s970_s26 = sshll.u32 %s1390_s13, 5 }
   0xe   : > { %s168_s21 = scalar_lea.vmem %s1383_s1, %s865_s18  ;;  %s1351_s29 = scalar_lea.vmem %s1384_s2, %s970_s26 }
   0xf   : > { %v189_v2 = vld [vmem:[%s168_s21] sm:$0xf]  ;;  %v884_v3 = vld [vmem:[%s168_s21 + $0x4] sm:$0xf]  ;;  %v905_v4 = vld [vmem:[%s168_s21 + $0x8] sm:$0xf] }
  0x10   : > { %1207 = vmatprep.subr.msk.bf16.mxu0 %vm223_vm1, %v189_v2  ;;  %1208 = vmatprep.subr.msk.bf16.mxu1 %vm223_vm1, %v189_v2  ;;  %v225_v5 = vsel %vm223_vm1, %v189_v2, 0  ;;  %v335_v8 = vsel %vm223_vm1, %v884_v3, 0  ;;  %v446_v9 = vsel %vm223_vm1, %v905_v4, 0  ;;  %v926_v10 = vld [vmem:[%s168_s21 + $0xc] sm:$0xf] }
  0x11   : > { %1156 = vmatpush3.bf16.msra.mxu0 %v225_v5  ;;  %1206 = vmatpush3.bf16.msra.mxu1 %v225_v5  ;;  %v947_v11 = vld [vmem:[%s168_s21 + $0x10] sm:$0xf]  ;;  %v557_v12 = vsel %vm223_vm1, %v926_v10, 0 }
  0x12   : > { %1209 = vmatprep.subr.msk.bf16.mxu1 %vm223_vm1, %v884_v3  ;;  %1210 = vmatprep.subr.msk.bf16.mxu0 %vm223_vm1, %v905_v4  ;;  %v668_v13 = vsel %vm223_vm1, %v947_v11, 0 }
  0x14   : > { %1158 = vmatmul.mubr.msk.bf16.vlgmr.msra.gmra.mxu0 %vm210_vm0, %v1239_v6  ;;  %1162 = vmatmul.mubr.msk.bf16.vlgmr.msra.gmra.mxu1 %vm210_vm0, %v1240_v7 }
  0x15   : > { %1166 = vmatpush3.bf16.msra.mxu1 %v335_v8  ;;  %1176 = vmatpush3.bf16.msra.mxu0 %v446_v9 }
  0x16   : > { %1167 = vmatprep.mubr.msk.bf16.mxu1 %vm210_vm0, %v1237_v0  ;;  %1177 = vmatprep.mubr.msk.bf16.mxu0 %vm210_vm0, %v1237_v0 }
  0x17   : > { %1211 = vmatprep.subr.msk.bf16.mxu1 %vm223_vm1, %v926_v10  ;;  %1212 = vmatprep.subr.msk.bf16.mxu0 %vm223_vm1, %v947_v11 }
  0x1c   : > { %1168 = vmatmul.mubr.msk.bf16.vlgmr.msra.gmra.mxu1 %vm210_vm0, %v1239_v6  ;;  %1178 = vmatmul.mubr.msk.bf16.vlgmr.msra.gmra.mxu0 %vm210_vm0, %v1239_v6 }
  0x1d   : > { %1186 = vmatpush3.bf16.msra.mxu1 %v557_v12  ;;  %1196 = vmatpush3.bf16.msra.mxu0 %v668_v13 }
  0x1e   : > { %1171 = vmatprep.mubr.msk.bf16.mxu1 %vm210_vm0, %v1238_v1  ;;  %1181 = vmatprep.mubr.msk.bf16.mxu0 %vm210_vm0, %v1238_v1 }
  0x24   : > { %1172 = vmatmul.mubr.msk.bf16.gmra.mxu1 %vm210_vm0, %v1240_v7  ;;  %1182 = vmatmul.mubr.msk.bf16.gmra.mxu0 %vm210_vm0, %v1240_v7 }
  0x25   : > { %1187 = vmatprep.mubr.msk.bf16.mxu1 %vm210_vm0, %v1237_v0  ;;  %1197 = vmatprep.mubr.msk.bf16.mxu0 %vm210_vm0, %v1237_v0 }
  0x2c   : > { %1188 = vmatmul.mubr.msk.bf16.vlgmr.msra.gmra.mxu1 %vm210_vm0, %v1239_v6  ;;  %1198 = vmatmul.mubr.msk.bf16.vlgmr.msra.gmra.mxu0 %vm210_vm0, %v1239_v6 }
  0x2d   : > { %1191 = vmatprep.mubr.msk.bf16.mxu1 %vm210_vm0, %v1238_v1  ;;  %1201 = vmatprep.mubr.msk.bf16.mxu0 %vm210_vm0, %v1238_v1 }
  0x34   : > { %1192 = vmatmul.mubr.msk.bf16.gmra.mxu1 %vm210_vm0, %v1240_v7  ;;  %1202 = vmatmul.mubr.msk.bf16.gmra.mxu0 %vm210_vm0, %v1240_v7 }
  0xd4   : > { %v1159_v14 = vpop.f32.mrf.mxu0  ;;  %v1163_v15 = vpop.f32.mrf.mxu1 }
  0xd6   : > { %v261_v16 = vpop.f32.mrf.mxu0  ;;  %v277_v17 = vpop.f32.mrf.mxu1 }
  0xd8   : > { %v1160_v18 = vpop.f32.mrf.mxu0  ;;  %v1164_v19 = vpop.f32.mrf.mxu1 }
  0xd9   : > { %v1019_v20 = vpack.c.bf16 %v1160_v18, %v1159_v14  ;;  %v1029_v21 = vpack.c.bf16 %v1164_v19, %v1163_v15 }
  0xda   : > { %v264_v22 = vpop.f32.mrf.mxu0  ;;  %v280_v23 = vpop.f32.mrf.mxu1 }
  0xdb   : > { %1111 = vst [vmem:[%s1351_s29 + $0x8] sm:$0xff] %v1019_v20   ;;  %1113 = vst [vmem:[%s1351_s29 + $0x18] sm:$0xff] %v1029_v21   ;;  %v1014_v24 = vpack.c.bf16 %v264_v22, %v261_v16  ;;  %v1024_v25 = vpack.c.bf16 %v280_v23, %v277_v17 }
  0xdc   : > { %v1169_v26 = vpop.f32.mrf.mxu1  ;;  %v1179_v27 = vpop.f32.mrf.mxu0 }
  0xdd   : > { %1015 = vst [vmem:[%s1351_s29] sm:$0xff] %v1014_v24   ;;  %1112 = vst [vmem:[%s1351_s29 + $0x10] sm:$0xff] %v1024_v25  }
  0xde   : > { %v371_v28 = vpop.f32.mrf.mxu1  ;;  %v482_v29 = vpop.f32.mrf.mxu0 }
  0xe0   : > { %v1170_v30 = vpop.f32.mrf.mxu1  ;;  %v1180_v31 = vpop.f32.mrf.mxu0 }
  0xe1   : > { %v1039_v32 = vpack.c.bf16 %v1170_v30, %v1169_v26  ;;  %v1059_v33 = vpack.c.bf16 %v1180_v31, %v1179_v27 }
  0xe2   : > { %v374_v34 = vpop.f32.mrf.mxu1  ;;  %v485_v35 = vpop.f32.mrf.mxu0 }
  0xe3   : > { %1115 = vst [vmem:[%s1351_s29 + $0x28] sm:$0xff] %v1039_v32   ;;  %1119 = vst [vmem:[%s1351_s29 + $0x48] sm:$0xff] %v1059_v33   ;;  %v1034_v36 = vpack.c.bf16 %v374_v34, %v371_v28  ;;  %v1054_v37 = vpack.c.bf16 %v485_v35, %v482_v29 }
  0xe4   : > { %v1173_v38 = vpop.f32.mrf.mxu1  ;;  %v1183_v39 = vpop.f32.mrf.mxu0 }
  0xe5   : > { %1114 = vst [vmem:[%s1351_s29 + $0x20] sm:$0xff] %v1034_v36   ;;  %1118 = vst [vmem:[%s1351_s29 + $0x40] sm:$0xff] %v1054_v37  }
  0xe6   : > { %v387_v40 = vpop.f32.mrf.mxu1  ;;  %v498_v41 = vpop.f32.mrf.mxu0 }
  0xe8   : > { %v1174_v42 = vpop.f32.mrf.mxu1  ;;  %v1184_v43 = vpop.f32.mrf.mxu0 }
  0xe9   : > { %v1049_v44 = vpack.c.bf16 %v1174_v42, %v1173_v38  ;;  %v1069_v45 = vpack.c.bf16 %v1184_v43, %v1183_v39 }
  0xea   : > { %v390_v46 = vpop.f32.mrf.mxu1  ;;  %v501_v47 = vpop.f32.mrf.mxu0 }
  0xeb   : > { %1117 = vst [vmem:[%s1351_s29 + $0x38] sm:$0xff] %v1049_v44   ;;  %1121 = vst [vmem:[%s1351_s29 + $0x58] sm:$0xff] %v1069_v45   ;;  %v1044_v48 = vpack.c.bf16 %v390_v46, %v387_v40  ;;  %v1064_v49 = vpack.c.bf16 %v501_v47, %v498_v41 }
  0xec   : > { %v1189_v50 = vpop.f32.mrf.mxu1  ;;  %v1199_v51 = vpop.f32.mrf.mxu0 }
  0xed   : > { %1116 = vst [vmem:[%s1351_s29 + $0x30] sm:$0xff] %v1044_v48   ;;  %1120 = vst [vmem:[%s1351_s29 + $0x50] sm:$0xff] %v1064_v49  }
  0xee   : > { %v593_v52 = vpop.f32.mrf.mxu1  ;;  %v704_v53 = vpop.f32.mrf.mxu0 }
  0xf0   : > { %v1190_v54 = vpop.f32.mrf.mxu1  ;;  %v1200_v55 = vpop.f32.mrf.mxu0 }
  0xf1   : > { %v1079_v56 = vpack.c.bf16 %v1190_v54, %v1189_v50  ;;  %v1099_v57 = vpack.c.bf16 %v1200_v55, %v1199_v51 }
  0xf2   : > { %v596_v58 = vpop.f32.mrf.mxu1  ;;  %v707_v59 = vpop.f32.mrf.mxu0 }
  0xf3   : > { %1123 = vst [vmem:[%s1351_s29 + $0x68] sm:$0xff] %v1079_v56   ;;  %1127 = vst [vmem:[%s1351_s29 + $0x88] sm:$0xff] %v1099_v57   ;;  %v1074_v60 = vpack.c.bf16 %v596_v58, %v593_v52  ;;  %v1094_v61 = vpack.c.bf16 %v707_v59, %v704_v53 }
  0xf4   : > { %v1193_v62 = vpop.f32.mrf.mxu1  ;;  %v1203_v63 = vpop.f32.mrf.mxu0 }
  0xf5   : > { %1122 = vst [vmem:[%s1351_s29 + $0x60] sm:$0xff] %v1074_v60   ;;  %1126 = vst [vmem:[%s1351_s29 + $0x80] sm:$0xff] %v1094_v61  }
  0xf6   : > { %v609_v0 = vpop.f32.mrf.mxu1  ;;  %v720_v1 = vpop.f32.mrf.mxu0 }
  0xf8   : > { %v1194_v2 = vpop.f32.mrf.mxu1  ;;  %v1204_v3 = vpop.f32.mrf.mxu0 }
  0xf9   : > { %v1089_v4 = vpack.c.bf16 %v1194_v2, %v1193_v62  ;;  %v1109_v5 = vpack.c.bf16 %v1204_v3, %v1203_v63 }
  0xfa   : > { %v612_v6 = vpop.f32.mrf.mxu1  ;;  %v723_v7 = vpop.f32.mrf.mxu0 }
  0xfb   : > { %1125 = vst [vmem:[%s1351_s29 + $0x78] sm:$0xff] %v1089_v4   ;;  %1129 = vst [vmem:[%s1351_s29 + $0x98] sm:$0xff] %v1109_v5   ;;  %v1084_v8 = vpack.c.bf16 %v612_v6, %v609_v0  ;;  %v1104_v9 = vpack.c.bf16 %v723_v7, %v720_v1 }
  0xfd   : > { %1124 = vst [vmem:[%s1351_s29 + $0x70] sm:$0xff] %v1084_v8   ;;  %1128 = vst [vmem:[%s1351_s29 + $0x90] sm:$0xff] %v1104_v9  }
  0xfe PF: > { %s12_s11 = sadd.s32 1, %s1263_s11   ;;  %s1385_s9 = smov %s1259_s10 }
  0xff   : > { %p9_p5 = scmp.ge.s32.totalorder %s12_s11, 4   ;;  %s1386_s10 = smov %s1388_s12 }
 0x101   :  { %11 = sbr.rel (!%p9_p5) target bundleno = 2 (0x2), region = 66 }

// kernel: pspnet_forward.21
= control target key start
LH: loop header
LB: loop body
LE: loop exit
PB: predicated region body
PF: predicated region fallthrough
CT: control target
= control target key end

     0   :  { %v520_v3 = vmov 0   ;;  %vm112_vm0 = vcmask 1040384   ;;  %vm99_vm1 = vcmask 408576   ;;  %s684_s1 = inlined_call_operand.vmem [shape: bf16[2,50,256], index: 1, kind: input, shape index: {}]   ;;  %s685_s2 = inlined_call_operand.vmem [shape: bf16[50,256], index: 2, kind: input, shape index: {}]   ;;  %s686_s0 = inlined_call_operand.vmem [shape: bf16[64,50], index: 0, kind: input, shape index: {}]   ;;  %s687_s3 = inlined_call_operand.vmem [shape: bf16[2,64,256], index: 3, kind: output, shape index: {}]  }
   0x1   :  { %v29_v0 = vld [vmem:[%s685_s2 + $0x30] sm:$0x11]  ;;  %v469_v2 = vld [vmem:[%s684_s1 + $0x68] sm:$0x11]  ;;  %151 = vmatprep.mubr.bf16.mxu0 %v520_v3  ;;  %336 = vmatprep.mubr.bf16.mxu1 %v520_v3  ;;  %v27_v6 = vld [vmem:[%s685_s2 + $0x20] sm:$0xff] }
   0x2   :  { %v36_v1 = vld [vmem:[%s684_s1 + $0x30] sm:$0x11]  ;;  %v262_v5 = vmul.bf16 %v469_v2, %v29_v0  ;;  %v28_v7 = vld [vmem:[%s685_s2 + $0x28] sm:$0xff]  ;;  %v34_v8 = vld [vmem:[%s684_s1 + $0x20] sm:$0xff] }
   0x3   :  { %v43_v4 = vmul.bf16 %v36_v1, %v29_v0  ;;  %v35_v9 = vld [vmem:[%s684_s1 + $0x28] sm:$0xff]  ;;  %v41_v10 = vmul.bf16 %v34_v8, %v27_v6  ;;  %v467_v11 = vld [vmem:[%s684_s1 + $0x58] sm:$0xff]  ;;  %v468_v12 = vld [vmem:[%s684_s1 + $0x60] sm:$0xff] }
   0x4   :  { %v477_v14 = vcombine.high %v262_v5, %v262_v5  ;;  %v476_v16 = vcombine.low %v262_v5, %v262_v5  ;;  %v25_v17 = vld [vmem:[%s685_s2 + $0x10] sm:$0xff]  ;;  %v26_v18 = vld [vmem:[%s685_s2 + $0x18] sm:$0xff]  ;;  %v42_v20 = vmul.bf16 %v35_v9, %v28_v7  ;;  %v260_v21 = vmul.bf16 %v467_v11, %v27_v6  ;;  %v465_v25 = vld [vmem:[%s684_s1 + $0x48] sm:$0xff] }
   0x5   :  { %v449_v13 = vcombine.high %v43_v4, %v43_v4  ;;  %v448_v15 = vcombine.low %v43_v4, %v43_v4  ;;  %v32_v19 = vld [vmem:[%s684_s1 + $0x10] sm:$0xff]  ;;  %v261_v22 = vmul.bf16 %v468_v12, %v28_v7  ;;  %v33_v23 = vld [vmem:[%s684_s1 + $0x18] sm:$0xff]  ;;  %v258_v30 = vmul.bf16 %v465_v25, %v25_v17  ;;  %v23_v31 = vld [vmem:[%s685_s2] sm:$0xff] }
   0x6   :  { %v39_v24 = vmul.bf16 %v32_v19, %v25_v17  ;;  %v466_v26 = vld [vmem:[%s684_s1 + $0x50] sm:$0xff]  ;;  %478 = vmatprep.subr.msk.bf16.mxu1 %vm112_vm0, %v477_v14  ;;  %v299_v28 = vsel %vm112_vm0, %v476_v16, 0  ;;  %v40_v29 = vmul.bf16 %v33_v23, %v26_v18  ;;  %v24_v32 = vld [vmem:[%s685_s2 + $0x8] sm:$0xff]  ;;  %v30_v33 = vld [vmem:[%s684_s1] sm:$0xff]  ;;  %v447_v34 = vcombine.high %v41_v10, %v42_v20 }
   0x7   :  { %450 = vmatprep.subr.msk.bf16.mxu0 %vm112_vm0, %v449_v13  ;;  %v114_v27 = vsel %vm112_vm0, %v448_v15, 0  ;;  %313 = vmatpush1.bf16.msra.mxu1 %v299_v28  ;;  %v475_v35 = vcombine.high %v260_v21, %v261_v22  ;;  %v446_v36 = vcombine.low %v41_v10, %v42_v20  ;;  %v31_v37 = vld [vmem:[%s684_s1 + $0x8] sm:$0xff]  ;;  %v463_v38 = vld [vmem:[%s684_s1 + $0x38] sm:$0xff]  ;;  %v464_v39 = vld [vmem:[%s684_s1 + $0x40] sm:$0xff]  ;;  %v474_v40 = vcombine.low %v260_v21, %v261_v22 }
   0x8   :  { %128 = vmatpush1.bf16.msra.mxu0 %v114_v27  ;;  %v445_v41 = vcombine.high %v39_v24, %v40_v29  ;;  %v259_v42 = vmul.bf16 %v466_v26, %v26_v18  ;;  %v37_v43 = vmul.bf16 %v30_v33, %v23_v31  ;;  %v38_v44 = vmul.bf16 %v31_v37, %v24_v32  ;;  %v516_v54 = vld [vmem:[%s686_s0] sm:$0xff]   ;;  %v517_v55 = vld [vmem:[%s686_s0 + $0x8] sm:$0xff]   ;;  %v518_v56 = vld [vmem:[%s686_s0 + $0x10] sm:$0xff]  }
   0x9   :  { %129 = vmatprep.subr.bf16.mxu0 %v447_v34  ;;  %314 = vmatprep.subr.bf16.mxu1 %v475_v35  ;;  %v256_v45 = vmul.bf16 %v463_v38, %v23_v31  ;;  %v257_v47 = vmul.bf16 %v464_v39, %v24_v32  ;;  %v444_v48 = vcombine.low %v39_v24, %v40_v29  ;;  %v519_v57 = vld [vmem:[%s686_s0 + $0x18] sm:$0xff]  }
   0xa   :  { %v473_v46 = vcombine.high %v258_v30, %v259_v42  ;;  %v472_v49 = vcombine.low %v258_v30, %v259_v42  ;;  %v443_v50 = vcombine.high %v37_v43, %v38_v44  ;;  %v442_v52 = vcombine.low %v37_v43, %v38_v44 }
   0xb   :  { %315 = vmatpush1.bf16.msra.mxu1 %v474_v40  ;;  %v471_v51 = vcombine.high %v256_v45, %v257_v47  ;;  %v470_v53 = vcombine.low %v256_v45, %v257_v47 }
   0xc   :  { %130 = vmatpush1.bf16.msra.mxu0 %v446_v36  ;;  %316 = vmatprep.subr.bf16.mxu1 %v473_v46 }
   0xd   :  { %131 = vmatprep.subr.bf16.mxu0 %v445_v41 }
   0xf   :  { %317 = vmatpush1.bf16.msra.mxu1 %v472_v49 }
  0x10   :  { %132 = vmatpush1.bf16.msra.mxu0 %v444_v48  ;;  %318 = vmatprep.subr.bf16.mxu1 %v471_v51 }
  0x11   :  { %133 = vmatprep.subr.bf16.mxu0 %v443_v50 }
  0x13   :  { %319 = vmatpush1.bf16.msra.mxu1 %v470_v53 }
  0x14   :  { %134 = vmatpush1.bf16.msra.mxu0 %v442_v52 }
  0x16   :  { %479 = vmatmul.mubr.msk.bf16.vlgmr.msra.gmra.mxu1 %vm99_vm1, %v516_v54 }
  0x17   :  { %451 = vmatmul.mubr.msk.bf16.vlgmr.msra.gmra.mxu0 %vm99_vm1, %v516_v54  ;;  %346 = vmatprep.mubr.bf16.mxu1 %v520_v3 }
  0x18   :  { %161 = vmatprep.mubr.bf16.mxu0 %v520_v3 }
  0x1e   :  { %480 = vmatmul.mubr.msk.bf16.gmra.mxu1 %vm99_vm1, %v517_v55 }
  0x1f   :  { %452 = vmatmul.mubr.msk.bf16.gmra.mxu0 %vm99_vm1, %v517_v55  ;;  %356 = vmatprep.mubr.bf16.mxu1 %v520_v3 }
  0x20   :  { %171 = vmatprep.mubr.bf16.mxu0 %v520_v3 }
  0x26   :  { %481 = vmatmul.mubr.msk.bf16.gmra.mxu1 %vm99_vm1, %v518_v56 }
  0x27   :  { %453 = vmatmul.mubr.msk.bf16.gmra.mxu0 %vm99_vm1, %v518_v56  ;;  %366 = vmatprep.mubr.bf16.mxu1 %v520_v3 }
  0x28   :  { %181 = vmatprep.mubr.bf16.mxu0 %v520_v3 }
  0x2e   :  { %482 = vmatmul.mubr.msk.bf16.gmra.mxu1 %vm99_vm1, %v519_v57 }
  0x2f   :  { %454 = vmatmul.mubr.msk.bf16.gmra.mxu0 %vm99_vm1, %v519_v57 }
  0xd6   :  { %v338_v59 = vpop.f32.mrf.mxu1 }
  0xd7   :  { %v153_v58 = vpop.f32.mrf.mxu0 }
  0xd8   :  { %v340_v61 = vpop.f32.mrf.mxu1 }
  0xd9   :  { %v155_v60 = vpop.f32.mrf.mxu0  ;;  %v507_v63 = vpack.c.bf16 %v340_v61, %v338_v59 }
  0xda   :  { %v499_v62 = vpack.c.bf16 %v155_v60, %v153_v58  ;;  %v342_v1 = vpop.f32.mrf.mxu1 }
  0xdb   :  { %v157_v0 = vpop.f32.mrf.mxu0  ;;  %491 = vst [vmem:[%s687_s3 + $0x40] sm:$0xff] %v507_v63 }
  0xdc   :  { %240 = vst [vmem:[%s687_s3] sm:$0xff] %v499_v62  ;;  %v344_v3 = vpop.f32.mrf.mxu1 }
  0xdd   :  { %v159_v2 = vpop.f32.mrf.mxu0  ;;  %v508_v5 = vpack.c.bf16 %v344_v3, %v342_v1 }
  0xde   :  { %v500_v4 = vpack.c.bf16 %v159_v2, %v157_v0  ;;  %v348_v7 = vpop.f32.mrf.mxu1 }
  0xdf   :  { %v163_v6 = vpop.f32.mrf.mxu0  ;;  %492 = vst [vmem:[%s687_s3 + $0x48] sm:$0xff] %v508_v5 }
  0xe0   :  { %241 = vst [vmem:[%s687_s3 + $0x8] sm:$0xff] %v500_v4  ;;  %v350_v9 = vpop.f32.mrf.mxu1 }
  0xe1   :  { %v165_v8 = vpop.f32.mrf.mxu0  ;;  %v509_v11 = vpack.c.bf16 %v350_v9, %v348_v7 }
  0xe2   :  { %v501_v10 = vpack.c.bf16 %v165_v8, %v163_v6  ;;  %v352_v13 = vpop.f32.mrf.mxu1 }
  0xe3   :  { %v167_v12 = vpop.f32.mrf.mxu0  ;;  %493 = vst [vmem:[%s687_s3 + $0x50] sm:$0xff] %v509_v11 }
  0xe4   :  { %242 = vst [vmem:[%s687_s3 + $0x10] sm:$0xff] %v501_v10  ;;  %v354_v15 = vpop.f32.mrf.mxu1 }
  0xe5   :  { %v169_v14 = vpop.f32.mrf.mxu0  ;;  %v510_v17 = vpack.c.bf16 %v354_v15, %v352_v13 }
  0xe6   :  { %v502_v16 = vpack.c.bf16 %v169_v14, %v167_v12  ;;  %v358_v19 = vpop.f32.mrf.mxu1 }
  0xe7   :  { %v173_v18 = vpop.f32.mrf.mxu0  ;;  %494 = vst [vmem:[%s687_s3 + $0x58] sm:$0xff] %v510_v17 }
  0xe8   :  { %243 = vst [vmem:[%s687_s3 + $0x18] sm:$0xff] %v502_v16  ;;  %v360_v21 = vpop.f32.mrf.mxu1 }
  0xe9   :  { %v175_v20 = vpop.f32.mrf.mxu0  ;;  %v511_v23 = vpack.c.bf16 %v360_v21, %v358_v19 }
  0xea   :  { %v503_v22 = vpack.c.bf16 %v175_v20, %v173_v18  ;;  %v362_v25 = vpop.f32.mrf.mxu1 }
  0xeb   :  { %v177_v24 = vpop.f32.mrf.mxu0  ;;  %495 = vst [vmem:[%s687_s3 + $0x60] sm:$0xff] %v511_v23 }
  0xec   :  { %244 = vst [vmem:[%s687_s3 + $0x20] sm:$0xff] %v503_v22  ;;  %v364_v27 = vpop.f32.mrf.mxu1 }
  0xed   :  { %v179_v26 = vpop.f32.mrf.mxu0  ;;  %v512_v29 = vpack.c.bf16 %v364_v27, %v362_v25 }
  0xee   :  { %v504_v28 = vpack.c.bf16 %v179_v26, %v177_v24  ;;  %v368_v31 = vpop.f32.mrf.mxu1 }
  0xef   :  { %v183_v30 = vpop.f32.mrf.mxu0  ;;  %496 = vst [vmem:[%s687_s3 + $0x68] sm:$0xff] %v512_v29 }
  0xf0   :  { %245 = vst [vmem:[%s687_s3 + $0x28] sm:$0xff] %v504_v28  ;;  %v370_v33 = vpop.f32.mrf.mxu1 }
  0xf1   :  { %v185_v32 = vpop.f32.mrf.mxu0  ;;  %v513_v35 = vpack.c.bf16 %v370_v33, %v368_v31 }
  0xf2   :  { %v505_v34 = vpack.c.bf16 %v185_v32, %v183_v30  ;;  %v372_v37 = vpop.f32.mrf.mxu1 }
  0xf3   :  { %v187_v36 = vpop.f32.mrf.mxu0  ;;  %497 = vst [vmem:[%s687_s3 + $0x70] sm:$0xff] %v513_v35 }
  0xf4   :  { %246 = vst [vmem:[%s687_s3 + $0x30] sm:$0xff] %v505_v34  ;;  %v374_v39 = vpop.f32.mrf.mxu1 }
  0xf5   :  { %v189_v38 = vpop.f32.mrf.mxu0  ;;  %v514_v41 = vpack.c.bf16 %v374_v39, %v372_v37 }
  0xf6   :  { %v506_v40 = vpack.c.bf16 %v189_v38, %v187_v36 }
  0xf7   :  { %498 = vst [vmem:[%s687_s3 + $0x78] sm:$0xff] %v514_v41 }
  0xf8   :  { %247 = vst [vmem:[%s687_s3 + $0x38] sm:$0xff] %v506_v40 }

// kernel: pspnet_forward.22
= control target key start
LH: loop header
LB: loop body
LE: loop exit
PB: predicated region body
PF: predicated region fallthrough
CT: control target
= control target key end

     0   :  { %s5459_s15 = smov 0   ;;  %s5461_s16 = smov 0   ;;  %s6475_s0 = inlined_call_operand.vmem [shape: bf16[2,10,10,512], index: 0, kind: input, shape index: {}]   ;;  %s6476_s1 = inlined_call_operand.vmem [shape: bf16[9,512,128], index: 1, kind: input, shape index: {}]   ;;  %s6477_s2 = inlined_call_operand.vmem [shape: f32[1,128], index: 2, kind: input, shape index: {}]   ;;  %s6478_s3 = inlined_call_operand.vmem [shape: f32[1,128], index: 3, kind: input, shape index: {}]   ;;  %s6479_s4 = inlined_call_operand.vmem [shape: bf16[2,64,128], index: 4, kind: output, shape index: {}]  }
   0x1   :  { %s5463_s17 = smov 0   ;;  %s5465_s18 = smov 0  }
   0x2   :  { %s5467_s19 = smov 0   ;;  %s5469_s20 = smov 0  }
   0x3   :  { %s5471_s21 = smov 0   ;;  %s5473_s22 = smov 0  }
   0x4   :  { %s5475_s23 = smov 0  }
   0x5 LB: > { %s26_s24 = sadd.s32 1, %s5423_s21  ;;  %s33_s25 = sadd.s32 1, %s5427_s22  ;;  %s5431_s23 = sphi %s5475_s23, %s14_s23   ;;  %s5427_s22 = sphi %s5473_s22, %s6517_s22   ;;  %s5423_s21 = sphi %s5471_s21, %s6516_s21   ;;  %s5419_s20 = sphi %s5469_s20, %s6515_s20   ;;  %s5415_s19 = sphi %s5467_s19, %s6514_s19   ;;  %s5411_s18 = sphi %s5465_s18, %s6513_s18   ;;  %s5407_s17 = sphi %s5463_s17, %s6512_s17   ;;  %s5403_s16 = sphi %s5461_s16, %s6511_s16   ;;  %s5399_s15 = sphi %s5459_s15, %s6510_s15  }
   0x6   : > { %p27_p0 = scmp.ge.s32.totalorder %s26_s24, 2  ;;  %p49_p1 = scmp.ne.s32.totalorder %s5411_s18, %s5407_s17 }
   0x7   : > { %p50_p2 = scmp.eq.s32.totalorder %s5431_s23, 0  ;;  %s70_s28 = sadd.s32 1, %s5403_s16 }
   0x8   : > { %s6519_s24 = smov (%p27_p0, %s26_s24), 0  ;;  %s6521_s25 = smov (!%p27_p0, %s33_s25), %s5427_s22 }
   0x9   : > { %s38_s26 = ssub.s32 %s5423_s21, %s6519_s24  ;;  %p5514_p3 = por %p50_p2, %p49_p1 }
   0xa   : > { %p35_p4 = scmp.ge.s32.totalorder %s6521_s25, 2  ;;  %p68_p5 = scmp.eq.s32.totalorder %s38_s26, 0 }
   0xb   : > { %p77_p6 = scmp.ne.s32.totalorder %s5403_s16, %s5399_s15  ;;  %s42_s7 = sadd.s32 1, %s5411_s18 }
   0xc   : > { %s6523_s25 = smov (%p35_p4, %s6521_s25), 0  ;;  %p4226_p9 = scmp.ge.s32.totalorder %s5431_s23, 4 }
   0xd   : > { %s5524_s29 = scalar_select %p68_p5, %s5403_s16, %s70_s28  }
   0xe   : > { %s37_s30 = ssub.s32 %s5427_s22, %s6523_s25  ;;  %p5528_p7 = por %p77_p6, %p50_p2 }
   0xf   : > { %s39_s6 = sor.u32 %s38_s26, %s37_s30  ;;  %195 = sbr.rel (%p4226_p9) target bundleno = 115 (0x73), region = 24 }
  0x10   : > { %p40_p8 = scmp.eq.s32.totalorder %s39_s6, 0 }
  0x12   : > { %s5534_s8 = scalar_select %p40_p8, %s5411_s18, %s42_s7  }
  0x14   : > { %198 = sbr.rel (!%p5514_p3) target bundleno = 38 (0x26), region = 28  ;;  %s200_s9 = sand.u32 (%p5514_p3), 1, %s5411_s18  }
  0x15   : > { %s5121_s10 = smul.u32 (%p5514_p3), 160, %s200_s9  ;;  %s4227_s11 = sshll.u32 (%p5514_p3), %s5423_s21, 1 }
  0x16   : > { %s5122_s12 = smul.u32 (%p5514_p3), 80, %s5427_s22 }
  0x17   : > { %s5550_s27 = scalar_lea.vmem (%p5514_p3), [#allocation3], %s5121_s10 }
  0x18   : > { %s205_s13 = sadd.s32 (%p5514_p3), %s5122_s12, %s4227_s11 }
  0x19   : > { %s4228_s14 = sshll.u32 %s205_s13, 2 }
  0x1a   : > { %s5545_s30 = scalar_lea.vmem %s6475_s0, %s4228_s14 }
  0x1b   : > { %v274_v0 = vld [vmem:[%s5545_s30] sm:$0xff]  ;;  %v276_v1 = vld [vmem:[%s5545_s30 + $0x10] sm:$0xff] }
  0x1c   : > { %v278_v2 = vld [vmem:[%s5545_s30 + $0x20] sm:$0xff]  ;;  %275 = vst [vmem:[%s5550_s27] sm:$0xff] %v274_v0  ;;  %277 = vst [vmem:[%s5550_s27 + $0x8] sm:$0xff] %v276_v1  ;;  %v280_v3 = vld [vmem:[%s5545_s30 + $0x30] sm:$0xff] }
  0x1d   : > { %279 = vst [vmem:[%s5550_s27 + $0x10] sm:$0xff] %v278_v2  ;;  %v282_v4 = vld [vmem:[%s5545_s30 + $0x40] sm:$0xff]  ;;  %v284_v5 = vld [vmem:[%s5545_s30 + $0x50] sm:$0xff]  ;;  %281 = vst [vmem:[%s5550_s27 + $0x18] sm:$0xff] %v280_v3 }
  0x1e   : > { %283 = vst [vmem:[%s5550_s27 + $0x20] sm:$0xff] %v282_v4  ;;  %285 = vst [vmem:[%s5550_s27 + $0x28] sm:$0xff] %v284_v5  ;;  %v286_v6 = vld [vmem:[%s5545_s30 + $0x60] sm:$0xff]  ;;  %v288_v7 = vld [vmem:[%s5545_s30 + $0x70] sm:$0xff] }
  0x1f   : > { %v290_v8 = vld [vmem:[%s5545_s30 + $0x80] sm:$0xff]  ;;  %287 = vst [vmem:[%s5550_s27 + $0x30] sm:$0xff] %v286_v6  ;;  %289 = vst [vmem:[%s5550_s27 + $0x38] sm:$0xff] %v288_v7  ;;  %v292_v9 = vld [vmem:[%s5545_s30 + $0x90] sm:$0xff] }
  0x20   : > { %291 = vst [vmem:[%s5550_s27 + $0x40] sm:$0xff] %v290_v8  ;;  %v294_v10 = vld [vmem:[%s5545_s30 + $0xa0] sm:$0xff]  ;;  %v296_v11 = vld [vmem:[%s5545_s30 + $0xb0] sm:$0xff]  ;;  %293 = vst [vmem:[%s5550_s27 + $0x48] sm:$0xff] %v292_v9 }
  0x21   : > { %295 = vst [vmem:[%s5550_s27 + $0x50] sm:$0xff] %v294_v10  ;;  %297 = vst [vmem:[%s5550_s27 + $0x58] sm:$0xff] %v296_v11  ;;  %v298_v12 = vld [vmem:[%s5545_s30 + $0xc0] sm:$0xff]  ;;  %v300_v13 = vld [vmem:[%s5545_s30 + $0xd0] sm:$0xff] }
  0x22   : > { %v302_v14 = vld [vmem:[%s5545_s30 + $0xe0] sm:$0xff]  ;;  %299 = vst [vmem:[%s5550_s27 + $0x60] sm:$0xff] %v298_v12  ;;  %301 = vst [vmem:[%s5550_s27 + $0x68] sm:$0xff] %v300_v13  ;;  %v304_v15 = vld [vmem:[%s5545_s30 + $0xf0] sm:$0xff] }
  0x23   : > { %303 = vst [vmem:[%s5550_s27 + $0x70] sm:$0xff] %v302_v14  ;;  %v306_v16 = vld [vmem:[%s5545_s30 + $0x100] sm:$0xff]  ;;  %v308_v17 = vld [vmem:[%s5545_s30 + $0x110] sm:$0xff]  ;;  %305 = vst [vmem:[%s5550_s27 + $0x78] sm:$0xff] %v304_v15 }
  0x24   : > { %307 = vst [vmem:[%s5550_s27 + $0x80] sm:$0xff] %v306_v16  ;;  %309 = vst [vmem:[%s5550_s27 + $0x88] sm:$0xff] %v308_v17  ;;  %v310_v18 = vld [vmem:[%s5545_s30 + $0x120] sm:$0xff]  ;;  %v312_v19 = vld [vmem:[%s5545_s30 + $0x130] sm:$0xff] }
  0x25   : > { %311 = vst [vmem:[%s5550_s27 + $0x90] sm:$0xff] %v310_v18  ;;  %313 = vst [vmem:[%s5550_s27 + $0x98] sm:$0xff] %v312_v19 }
  0x26 PF: > { %319 = sbr.rel (!%p5528_p7) target bundleno = 115 (0x73), region = 66  ;;  %s321_s6 = sand.u32 (%p5528_p7), 1, %s5403_s16  }
  0x27   : > { %s4712_s7 = sshll.u32 (%p5528_p7), %s5423_s21, 7  ;;  %s5123_s9 = smul.u32 (%p5528_p7), 1152, %s321_s6 }
  0x28   : > { %s5596_s12 = scalar_lea.vmem (%p5528_p7), %s6476_s1, %s4712_s7 }
  0x29   : > { %v344_v20 = vld [vmem:[%s5596_s12] sm:$0xff] (%p5528_p7)   ;;  %v348_v21 = vld [vmem:[%s5596_s12 + $0x8] sm:$0xff] (%p5528_p7)   ;;  %v352_v22 = vld [vmem:[%s5596_s12 + $0x10] sm:$0xff] (%p5528_p7)   ;;  %s5604_s5 = scalar_lea.vmem (%p5528_p7), [#allocation4], %s5123_s9 }
  0x2a   : > { %v356_v23 = vld [vmem:[%s5596_s12 + $0x18] sm:$0xff] (%p5528_p7)   ;;  %v360_v24 = vld [vmem:[%s5596_s12 + $0x20] sm:$0xff] (%p5528_p7)   ;;  %v364_v25 = vld [vmem:[%s5596_s12 + $0x28] sm:$0xff] (%p5528_p7)   ;;  %345 = vst [vmem:[%s5604_s5] sm:$0xff] (%p5528_p7), %v344_v20  }
  0x2b   : > { %349 = vst [vmem:[%s5604_s5 + $0x8] sm:$0xff] %v348_v21   ;;  %353 = vst [vmem:[%s5604_s5 + $0x10] sm:$0xff] %v352_v22   ;;  %v368_v26 = vld [vmem:[%s5596_s12 + $0x30] sm:$0xff]   ;;  %v372_v27 = vld [vmem:[%s5596_s12 + $0x38] sm:$0xff]  }
  0x2c   : > { %357 = vst [vmem:[%s5604_s5 + $0x18] sm:$0xff] %v356_v23   ;;  %361 = vst [vmem:[%s5604_s5 + $0x20] sm:$0xff] %v360_v24   ;;  %v376_v28 = vld [vmem:[%s5596_s12 + $0x40] sm:$0xff]   ;;  %v380_v29 = vld [vmem:[%s5596_s12 + $0x48] sm:$0xff]  }
  0x2d   : > { %365 = vst [vmem:[%s5604_s5 + $0x28] sm:$0xff] %v364_v25   ;;  %369 = vst [vmem:[%s5604_s5 + $0x30] sm:$0xff] %v368_v26   ;;  %v384_v30 = vld [vmem:[%s5596_s12 + $0x50] sm:$0xff]   ;;  %v388_v31 = vld [vmem:[%s5596_s12 + $0x58] sm:$0xff]  }
  0x2e   : > { %373 = vst [vmem:[%s5604_s5 + $0x38] sm:$0xff] %v372_v27   ;;  %377 = vst [vmem:[%s5604_s5 + $0x40] sm:$0xff] %v376_v28   ;;  %v392_v32 = vld [vmem:[%s5596_s12 + $0x60] sm:$0xff]   ;;  %v396_v33 = vld [vmem:[%s5596_s12 + $0x68] sm:$0xff]  }
  0x2f   : > { %381 = vst [vmem:[%s5604_s5 + $0x48] sm:$0xff] %v380_v29   ;;  %385 = vst [vmem:[%s5604_s5 + $0x50] sm:$0xff] %v384_v30   ;;  %v400_v34 = vld [vmem:[%s5596_s12 + $0x70] sm:$0xff]   ;;  %v404_v35 = vld [vmem:[%s5596_s12 + $0x78] sm:$0xff]  }
  0x30   : > { %389 = vst [vmem:[%s5604_s5 + $0x58] sm:$0xff] %v388_v31   ;;  %393 = vst [vmem:[%s5604_s5 + $0x60] sm:$0xff] %v392_v32   ;;  %v408_v36 = vld [vmem:[%s5596_s12 + $0x100] sm:$0xff]   ;;  %v412_v37 = vld [vmem:[%s5596_s12 + $0x108] sm:$0xff]  }
  0x31   : > { %397 = vst [vmem:[%s5604_s5 + $0x68] sm:$0xff] %v396_v33   ;;  %401 = vst [vmem:[%s5604_s5 + $0x70] sm:$0xff] %v400_v34   ;;  %v416_v38 = vld [vmem:[%s5596_s12 + $0x110] sm:$0xff]   ;;  %v420_v39 = vld [vmem:[%s5596_s12 + $0x118] sm:$0xff]  }
  0x32   : > { %405 = vst [vmem:[%s5604_s5 + $0x78] sm:$0xff] %v404_v35   ;;  %409 = vst [vmem:[%s5604_s5 + $0x80] sm:$0xff] %v408_v36   ;;  %v424_v40 = vld [vmem:[%s5596_s12 + $0x120] sm:$0xff]   ;;  %v428_v41 = vld [vmem:[%s5596_s12 + $0x128] sm:$0xff]  }
  0x33   : > { %413 = vst [vmem:[%s5604_s5 + $0x88] sm:$0xff] %v412_v37   ;;  %417 = vst [vmem:[%s5604_s5 + $0x90] sm:$0xff] %v416_v38   ;;  %v432_v42 = vld [vmem:[%s5596_s12 + $0x130] sm:$0xff]   ;;  %v436_v43 = vld [vmem:[%s5596_s12 + $0x138] sm:$0xff]  }
  0x34   : > { %421 = vst [vmem:[%s5604_s5 + $0x98] sm:$0xff] %v420_v39   ;;  %425 = vst [vmem:[%s5604_s5 + $0xa0] sm:$0xff] %v424_v40   ;;  %v440_v44 = vld [vmem:[%s5596_s12 + $0x140] sm:$0xff]   ;;  %v444_v45 = vld [vmem:[%s5596_s12 + $0x148] sm:$0xff]  }
  0x35   : > { %429 = vst [vmem:[%s5604_s5 + $0xa8] sm:$0xff] %v428_v41   ;;  %433 = vst [vmem:[%s5604_s5 + $0xb0] sm:$0xff] %v432_v42   ;;  %v448_v46 = vld [vmem:[%s5596_s12 + $0x150] sm:$0xff]   ;;  %v452_v47 = vld [vmem:[%s5596_s12 + $0x158] sm:$0xff]  }
  0x36   : > { %437 = vst [vmem:[%s5604_s5 + $0xb8] sm:$0xff] %v436_v43   ;;  %441 = vst [vmem:[%s5604_s5 + $0xc0] sm:$0xff] %v440_v44   ;;  %v456_v48 = vld [vmem:[%s5596_s12 + $0x160] sm:$0xff]   ;;  %v460_v49 = vld [vmem:[%s5596_s12 + $0x168] sm:$0xff]  }
  0x37   : > { %445 = vst [vmem:[%s5604_s5 + $0xc8] sm:$0xff] %v444_v45   ;;  %449 = vst [vmem:[%s5604_s5 + $0xd0] sm:$0xff] %v448_v46   ;;  %v464_v50 = vld [vmem:[%s5596_s12 + $0x170] sm:$0xff]   ;;  %v468_v51 = vld [vmem:[%s5596_s12 + $0x178] sm:$0xff]  }
  0x38   : > { %453 = vst [vmem:[%s5604_s5 + $0xd8] sm:$0xff] %v452_v47   ;;  %457 = vst [vmem:[%s5604_s5 + $0xe0] sm:$0xff] %v456_v48   ;;  %v472_v52 = vld [vmem:[%s5596_s12 + $0x200] sm:$0xff]   ;;  %v476_v53 = vld [vmem:[%s5596_s12 + $0x208] sm:$0xff]  }
  0x39   : > { %461 = vst [vmem:[%s5604_s5 + $0xe8] sm:$0xff] %v460_v49   ;;  %465 = vst [vmem:[%s5604_s5 + $0xf0] sm:$0xff] %v464_v50   ;;  %v480_v54 = vld [vmem:[%s5596_s12 + $0x210] sm:$0xff]   ;;  %v484_v55 = vld [vmem:[%s5596_s12 + $0x218] sm:$0xff]  }
  0x3a   : > { %469 = vst [vmem:[%s5604_s5 + $0xf8] sm:$0xff] %v468_v51   ;;  %473 = vst [vmem:[%s5604_s5 + $0x100] sm:$0xff] %v472_v52   ;;  %v488_v56 = vld [vmem:[%s5596_s12 + $0x220] sm:$0xff]   ;;  %v492_v57 = vld [vmem:[%s5596_s12 + $0x228] sm:$0xff]  }
  0x3b   : > { %477 = vst [vmem:[%s5604_s5 + $0x108] sm:$0xff] %v476_v53   ;;  %481 = vst [vmem:[%s5604_s5 + $0x110] sm:$0xff] %v480_v54   ;;  %v496_v58 = vld [vmem:[%s5596_s12 + $0x230] sm:$0xff]   ;;  %v500_v59 = vld [vmem:[%s5596_s12 + $0x238] sm:$0xff]  }
  0x3c   : > { %485 = vst [vmem:[%s5604_s5 + $0x118] sm:$0xff] %v484_v55   ;;  %489 = vst [vmem:[%s5604_s5 + $0x120] sm:$0xff] %v488_v56   ;;  %v504_v60 = vld [vmem:[%s5596_s12 + $0x240] sm:$0xff]   ;;  %v508_v61 = vld [vmem:[%s5596_s12 + $0x248] sm:$0xff]  }
  0x3d   : > { %493 = vst [vmem:[%s5604_s5 + $0x128] sm:$0xff] %v492_v57   ;;  %497 = vst [vmem:[%s5604_s5 + $0x130] sm:$0xff] %v496_v58   ;;  %v512_v62 = vld [vmem:[%s5596_s12 + $0x250] sm:$0xff]   ;;  %v516_v63 = vld [vmem:[%s5596_s12 + $0x258] sm:$0xff]  }
  0x3e   : > { %501 = vst [vmem:[%s5604_s5 + $0x138] sm:$0xff] %v500_v59   ;;  %505 = vst [vmem:[%s5604_s5 + $0x140] sm:$0xff] %v504_v60   ;;  %v520_v0 = vld [vmem:[%s5596_s12 + $0x260] sm:$0xff]   ;;  %v524_v1 = vld [vmem:[%s5596_s12 + $0x268] sm:$0xff]  }
  0x3f   : > { %509 = vst [vmem:[%s5604_s5 + $0x148] sm:$0xff] %v508_v61   ;;  %513 = vst [vmem:[%s5604_s5 + $0x150] sm:$0xff] %v512_v62   ;;  %v528_v2 = vld [vmem:[%s5596_s12 + $0x270] sm:$0xff]   ;;  %v532_v3 = vld [vmem:[%s5596_s12 + $0x278] sm:$0xff]  }
  0x40   : > { %517 = vst [vmem:[%s5604_s5 + $0x158] sm:$0xff] %v516_v63   ;;  %521 = vst [vmem:[%s5604_s5 + $0x160] sm:$0xff] %v520_v0   ;;  %v536_v4 = vld [vmem:[%s5596_s12 + $0x300] sm:$0xff]   ;;  %v540_v5 = vld [vmem:[%s5596_s12 + $0x308] sm:$0xff]  }
  0x41   : > { %525 = vst [vmem:[%s5604_s5 + $0x168] sm:$0xff] %v524_v1   ;;  %529 = vst [vmem:[%s5604_s5 + $0x170] sm:$0xff] %v528_v2   ;;  %v544_v6 = vld [vmem:[%s5596_s12 + $0x310] sm:$0xff]   ;;  %v548_v7 = vld [vmem:[%s5596_s12 + $0x318] sm:$0xff]  }
  0x42   : > { %533 = vst [vmem:[%s5604_s5 + $0x178] sm:$0xff] %v532_v3   ;;  %537 = vst [vmem:[%s5604_s5 + $0x180] sm:$0xff] %v536_v4   ;;  %v552_v8 = vld [vmem:[%s5596_s12 + $0x320] sm:$0xff]   ;;  %v556_v9 = vld [vmem:[%s5596_s12 + $0x328] sm:$0xff]  }
  0x43   : > { %541 = vst [vmem:[%s5604_s5 + $0x188] sm:$0xff] %v540_v5   ;;  %545 = vst [vmem:[%s5604_s5 + $0x190] sm:$0xff] %v544_v6   ;;  %v560_v10 = vld [vmem:[%s5596_s12 + $0x330] sm:$0xff]   ;;  %v564_v11 = vld [vmem:[%s5596_s12 + $0x338] sm:$0xff]  }
  0x44   : > { %549 = vst [vmem:[%s5604_s5 + $0x198] sm:$0xff] %v548_v7   ;;  %553 = vst [vmem:[%s5604_s5 + $0x1a0] sm:$0xff] %v552_v8   ;;  %v568_v12 = vld [vmem:[%s5596_s12 + $0x340] sm:$0xff]   ;;  %v572_v13 = vld [vmem:[%s5596_s12 + $0x348] sm:$0xff]  }
  0x45   : > { %557 = vst [vmem:[%s5604_s5 + $0x1a8] sm:$0xff] %v556_v9   ;;  %561 = vst [vmem:[%s5604_s5 + $0x1b0] sm:$0xff] %v560_v10   ;;  %v576_v14 = vld [vmem:[%s5596_s12 + $0x350] sm:$0xff]   ;;  %v580_v15 = vld [vmem:[%s5596_s12 + $0x358] sm:$0xff]  }
  0x46   : > { %565 = vst [vmem:[%s5604_s5 + $0x1b8] sm:$0xff] %v564_v11   ;;  %569 = vst [vmem:[%s5604_s5 + $0x1c0] sm:$0xff] %v568_v12   ;;  %v584_v16 = vld [vmem:[%s5596_s12 + $0x360] sm:$0xff]   ;;  %v588_v17 = vld [vmem:[%s5596_s12 + $0x368] sm:$0xff]  }
  0x47   : > { %573 = vst [vmem:[%s5604_s5 + $0x1c8] sm:$0xff] %v572_v13   ;;  %577 = vst [vmem:[%s5604_s5 + $0x1d0] sm:$0xff] %v576_v14   ;;  %v592_v18 = vld [vmem:[%s5596_s12 + $0x370] sm:$0xff]   ;;  %v596_v19 = vld [vmem:[%s5596_s12 + $0x378] sm:$0xff]  }
  0x48   : > { %581 = vst [vmem:[%s5604_s5 + $0x1d8] sm:$0xff] %v580_v15   ;;  %585 = vst [vmem:[%s5604_s5 + $0x1e0] sm:$0xff] %v584_v16   ;;  %v600_v20 = vld [vmem:[%s5596_s12 + $0x400] sm:$0xff]   ;;  %v604_v21 = vld [vmem:[%s5596_s12 + $0x408] sm:$0xff]  }
  0x49   : > { %589 = vst [vmem:[%s5604_s5 + $0x1e8] sm:$0xff] %v588_v17   ;;  %593 = vst [vmem:[%s5604_s5 + $0x1f0] sm:$0xff] %v592_v18   ;;  %v608_v22 = vld [vmem:[%s5596_s12 + $0x410] sm:$0xff]   ;;  %v612_v23 = vld [vmem:[%s5596_s12 + $0x418] sm:$0xff]  }
  0x4a   : > { %597 = vst [vmem:[%s5604_s5 + $0x1f8] sm:$0xff] %v596_v19   ;;  %601 = vst [vmem:[%s5604_s5 + $0x200] sm:$0xff] %v600_v20   ;;  %v616_v24 = vld [vmem:[%s5596_s12 + $0x420] sm:$0xff]   ;;  %v620_v25 = vld [vmem:[%s5596_s12 + $0x428] sm:$0xff]  }
  0x4b   : > { %605 = vst [vmem:[%s5604_s5 + $0x208] sm:$0xff] %v604_v21   ;;  %609 = vst [vmem:[%s5604_s5 + $0x210] sm:$0xff] %v608_v22   ;;  %v624_v26 = vld [vmem:[%s5596_s12 + $0x430] sm:$0xff]   ;;  %v628_v27 = vld [vmem:[%s5596_s12 + $0x438] sm:$0xff]  }
  0x4c   : > { %613 = vst [vmem:[%s5604_s5 + $0x218] sm:$0xff] %v612_v23   ;;  %617 = vst [vmem:[%s5604_s5 + $0x220] sm:$0xff] %v616_v24   ;;  %v632_v28 = vld [vmem:[%s5596_s12 + $0x440] sm:$0xff]   ;;  %v636_v29 = vld [vmem:[%s5596_s12 + $0x448] sm:$0xff]  }
  0x4d   : > { %621 = vst [vmem:[%s5604_s5 + $0x228] sm:$0xff] %v620_v25   ;;  %625 = vst [vmem:[%s5604_s5 + $0x230] sm:$0xff] %v624_v26   ;;  %v640_v30 = vld [vmem:[%s5596_s12 + $0x450] sm:$0xff]   ;;  %v644_v31 = vld [vmem:[%s5596_s12 + $0x458] sm:$0xff]  }
  0x4e   : > { %629 = vst [vmem:[%s5604_s5 + $0x238] sm:$0xff] %v628_v27   ;;  %633 = vst [vmem:[%s5604_s5 + $0x240] sm:$0xff] %v632_v28   ;;  %v648_v32 = vld [vmem:[%s5596_s12 + $0x460] sm:$0xff]   ;;  %v652_v33 = vld [vmem:[%s5596_s12 + $0x468] sm:$0xff]  }
  0x4f   : > { %637 = vst [vmem:[%s5604_s5 + $0x248] sm:$0xff] %v636_v29   ;;  %641 = vst [vmem:[%s5604_s5 + $0x250] sm:$0xff] %v640_v30   ;;  %v656_v34 = vld [vmem:[%s5596_s12 + $0x470] sm:$0xff]   ;;  %v660_v35 = vld [vmem:[%s5596_s12 + $0x478] sm:$0xff]  }
  0x50   : > { %645 = vst [vmem:[%s5604_s5 + $0x258] sm:$0xff] %v644_v31   ;;  %649 = vst [vmem:[%s5604_s5 + $0x260] sm:$0xff] %v648_v32   ;;  %v664_v36 = vld [vmem:[%s5596_s12 + $0x500] sm:$0xff]   ;;  %v668_v37 = vld [vmem:[%s5596_s12 + $0x508] sm:$0xff]  }
  0x51   : > { %653 = vst [vmem:[%s5604_s5 + $0x268] sm:$0xff] %v652_v33   ;;  %657 = vst [vmem:[%s5604_s5 + $0x270] sm:$0xff] %v656_v34   ;;  %v672_v38 = vld [vmem:[%s5596_s12 + $0x510] sm:$0xff]   ;;  %v676_v39 = vld [vmem:[%s5596_s12 + $0x518] sm:$0xff]  }
  0x52   : > { %661 = vst [vmem:[%s5604_s5 + $0x278] sm:$0xff] %v660_v35   ;;  %665 = vst [vmem:[%s5604_s5 + $0x280] sm:$0xff] %v664_v36   ;;  %v680_v40 = vld [vmem:[%s5596_s12 + $0x520] sm:$0xff]   ;;  %v684_v41 = vld [vmem:[%s5596_s12 + $0x528] sm:$0xff]  }
  0x53   : > { %669 = vst [vmem:[%s5604_s5 + $0x288] sm:$0xff] %v668_v37   ;;  %673 = vst [vmem:[%s5604_s5 + $0x290] sm:$0xff] %v672_v38   ;;  %v688_v42 = vld [vmem:[%s5596_s12 + $0x530] sm:$0xff]   ;;  %v692_v43 = vld [vmem:[%s5596_s12 + $0x538] sm:$0xff]  }
  0x54   : > { %677 = vst [vmem:[%s5604_s5 + $0x298] sm:$0xff] %v676_v39   ;;  %681 = vst [vmem:[%s5604_s5 + $0x2a0] sm:$0xff] %v680_v40   ;;  %v696_v44 = vld [vmem:[%s5596_s12 + $0x540] sm:$0xff]   ;;  %v700_v45 = vld [vmem:[%s5596_s12 + $0x548] sm:$0xff]  }
  0x55   : > { %685 = vst [vmem:[%s5604_s5 + $0x2a8] sm:$0xff] %v684_v41   ;;  %689 = vst [vmem:[%s5604_s5 + $0x2b0] sm:$0xff] %v688_v42   ;;  %v704_v46 = vld [vmem:[%s5596_s12 + $0x550] sm:$0xff]   ;;  %v708_v47 = vld [vmem:[%s5596_s12 + $0x558] sm:$0xff]  }
  0x56   : > { %693 = vst [vmem:[%s5604_s5 + $0x2b8] sm:$0xff] %v692_v43   ;;  %697 = vst [vmem:[%s5604_s5 + $0x2c0] sm:$0xff] %v696_v44   ;;  %v712_v48 = vld [vmem:[%s5596_s12 + $0x560] sm:$0xff]   ;;  %v716_v49 = vld [vmem:[%s5596_s12 + $0x568] sm:$0xff]  }
  0x57   : > { %701 = vst [vmem:[%s5604_s5 + $0x2c8] sm:$0xff] %v700_v45   ;;  %705 = vst [vmem:[%s5604_s5 + $0x2d0] sm:$0xff] %v704_v46   ;;  %v720_v50 = vld [vmem:[%s5596_s12 + $0x570] sm:$0xff]   ;;  %v724_v51 = vld [vmem:[%s5596_s12 + $0x578] sm:$0xff]  }
  0x58   : > { %709 = vst [vmem:[%s5604_s5 + $0x2d8] sm:$0xff] %v708_v47   ;;  %713 = vst [vmem:[%s5604_s5 + $0x2e0] sm:$0xff] %v712_v48   ;;  %v728_v52 = vld [vmem:[%s5596_s12 + $0x600] sm:$0xff]   ;;  %v732_v53 = vld [vmem:[%s5596_s12 + $0x608] sm:$0xff]  }
  0x59   : > { %717 = vst [vmem:[%s5604_s5 + $0x2e8] sm:$0xff] %v716_v49   ;;  %721 = vst [vmem:[%s5604_s5 + $0x2f0] sm:$0xff] %v720_v50   ;;  %v736_v54 = vld [vmem:[%s5596_s12 + $0x610] sm:$0xff]   ;;  %v740_v55 = vld [vmem:[%s5596_s12 + $0x618] sm:$0xff]  }
  0x5a   : > { %725 = vst [vmem:[%s5604_s5 + $0x2f8] sm:$0xff] %v724_v51   ;;  %729 = vst [vmem:[%s5604_s5 + $0x300] sm:$0xff] %v728_v52   ;;  %v744_v56 = vld [vmem:[%s5596_s12 + $0x620] sm:$0xff]   ;;  %v748_v57 = vld [vmem:[%s5596_s12 + $0x628] sm:$0xff]  }
  0x5b   : > { %733 = vst [vmem:[%s5604_s5 + $0x308] sm:$0xff] %v732_v53   ;;  %737 = vst [vmem:[%s5604_s5 + $0x310] sm:$0xff] %v736_v54   ;;  %v752_v58 = vld [vmem:[%s5596_s12 + $0x630] sm:$0xff]   ;;  %v756_v59 = vld [vmem:[%s5596_s12 + $0x638] sm:$0xff]  }
  0x5c   : > { %741 = vst [vmem:[%s5604_s5 + $0x318] sm:$0xff] %v740_v55   ;;  %745 = vst [vmem:[%s5604_s5 + $0x320] sm:$0xff] %v744_v56   ;;  %v760_v60 = vld [vmem:[%s5596_s12 + $0x640] sm:$0xff]   ;;  %v764_v61 = vld [vmem:[%s5596_s12 + $0x648] sm:$0xff]  }
  0x5d   : > { %749 = vst [vmem:[%s5604_s5 + $0x328] sm:$0xff] %v748_v57   ;;  %753 = vst [vmem:[%s5604_s5 + $0x330] sm:$0xff] %v752_v58   ;;  %v768_v62 = vld [vmem:[%s5596_s12 + $0x650] sm:$0xff]   ;;  %v772_v63 = vld [vmem:[%s5596_s12 + $0x658] sm:$0xff]  }
  0x5e   : > { %757 = vst [vmem:[%s5604_s5 + $0x338] sm:$0xff] %v756_v59   ;;  %761 = vst [vmem:[%s5604_s5 + $0x340] sm:$0xff] %v760_v60   ;;  %v776_v0 = vld [vmem:[%s5596_s12 + $0x660] sm:$0xff]   ;;  %v780_v1 = vld [vmem:[%s5596_s12 + $0x668] sm:$0xff]  }
  0x5f   : > { %765 = vst [vmem:[%s5604_s5 + $0x348] sm:$0xff] %v764_v61   ;;  %769 = vst [vmem:[%s5604_s5 + $0x350] sm:$0xff] %v768_v62   ;;  %v784_v2 = vld [vmem:[%s5596_s12 + $0x670] sm:$0xff]   ;;  %v788_v3 = vld [vmem:[%s5596_s12 + $0x678] sm:$0xff]  }
  0x60   : > { %773 = vst [vmem:[%s5604_s5 + $0x358] sm:$0xff] %v772_v63   ;;  %777 = vst [vmem:[%s5604_s5 + $0x360] sm:$0xff] %v776_v0   ;;  %v792_v4 = vld [vmem:[%s5596_s12 + $0x700] sm:$0xff]   ;;  %v796_v5 = vld [vmem:[%s5596_s12 + $0x708] sm:$0xff]  }
  0x61   : > { %781 = vst [vmem:[%s5604_s5 + $0x368] sm:$0xff] %v780_v1   ;;  %785 = vst [vmem:[%s5604_s5 + $0x370] sm:$0xff] %v784_v2   ;;  %v800_v6 = vld [vmem:[%s5596_s12 + $0x710] sm:$0xff]   ;;  %v804_v7 = vld [vmem:[%s5596_s12 + $0x718] sm:$0xff]  }
  0x62   : > { %789 = vst [vmem:[%s5604_s5 + $0x378] sm:$0xff] %v788_v3   ;;  %793 = vst [vmem:[%s5604_s5 + $0x380] sm:$0xff] %v792_v4   ;;  %v808_v8 = vld [vmem:[%s5596_s12 + $0x720] sm:$0xff]   ;;  %v812_v9 = vld [vmem:[%s5596_s12 + $0x728] sm:$0xff]  }
  0x63   : > { %797 = vst [vmem:[%s5604_s5 + $0x388] sm:$0xff] %v796_v5   ;;  %801 = vst [vmem:[%s5604_s5 + $0x390] sm:$0xff] %v800_v6   ;;  %v816_v10 = vld [vmem:[%s5596_s12 + $0x730] sm:$0xff]   ;;  %v820_v11 = vld [vmem:[%s5596_s12 + $0x738] sm:$0xff]  }
  0x64   : > { %805 = vst [vmem:[%s5604_s5 + $0x398] sm:$0xff] %v804_v7   ;;  %809 = vst [vmem:[%s5604_s5 + $0x3a0] sm:$0xff] %v808_v8   ;;  %v824_v12 = vld [vmem:[%s5596_s12 + $0x740] sm:$0xff]   ;;  %v828_v13 = vld [vmem:[%s5596_s12 + $0x748] sm:$0xff]  }
  0x65   : > { %813 = vst [vmem:[%s5604_s5 + $0x3a8] sm:$0xff] %v812_v9   ;;  %817 = vst [vmem:[%s5604_s5 + $0x3b0] sm:$0xff] %v816_v10   ;;  %v832_v14 = vld [vmem:[%s5596_s12 + $0x750] sm:$0xff]   ;;  %v836_v15 = vld [vmem:[%s5596_s12 + $0x758] sm:$0xff]  }
  0x66   : > { %821 = vst [vmem:[%s5604_s5 + $0x3b8] sm:$0xff] %v820_v11   ;;  %825 = vst [vmem:[%s5604_s5 + $0x3c0] sm:$0xff] %v824_v12   ;;  %v840_v16 = vld [vmem:[%s5596_s12 + $0x760] sm:$0xff]   ;;  %v844_v17 = vld [vmem:[%s5596_s12 + $0x768] sm:$0xff]  }
  0x67   : > { %829 = vst [vmem:[%s5604_s5 + $0x3c8] sm:$0xff] %v828_v13   ;;  %833 = vst [vmem:[%s5604_s5 + $0x3d0] sm:$0xff] %v832_v14   ;;  %v848_v18 = vld [vmem:[%s5596_s12 + $0x770] sm:$0xff]   ;;  %v852_v19 = vld [vmem:[%s5596_s12 + $0x778] sm:$0xff]  }
  0x68   : > { %837 = vst [vmem:[%s5604_s5 + $0x3d8] sm:$0xff] %v836_v15   ;;  %841 = vst [vmem:[%s5604_s5 + $0x3e0] sm:$0xff] %v840_v16   ;;  %v856_v20 = vld [vmem:[%s5596_s12 + $0x800] sm:$0xff]   ;;  %v860_v21 = vld [vmem:[%s5596_s12 + $0x808] sm:$0xff]  }
  0x69   : > { %845 = vst [vmem:[%s5604_s5 + $0x3e8] sm:$0xff] %v844_v17   ;;  %849 = vst [vmem:[%s5604_s5 + $0x3f0] sm:$0xff] %v848_v18   ;;  %v864_v22 = vld [vmem:[%s5596_s12 + $0x810] sm:$0xff]   ;;  %v868_v23 = vld [vmem:[%s5596_s12 + $0x818] sm:$0xff]  }
  0x6a   : > { %853 = vst [vmem:[%s5604_s5 + $0x3f8] sm:$0xff] %v852_v19   ;;  %857 = vst [vmem:[%s5604_s5 + $0x400] sm:$0xff] %v856_v20   ;;  %v872_v24 = vld [vmem:[%s5596_s12 + $0x820] sm:$0xff]   ;;  %v876_v25 = vld [vmem:[%s5596_s12 + $0x828] sm:$0xff]  }
  0x6b   : > { %861 = vst [vmem:[%s5604_s5 + $0x408] sm:$0xff] %v860_v21   ;;  %865 = vst [vmem:[%s5604_s5 + $0x410] sm:$0xff] %v864_v22   ;;  %v880_v26 = vld [vmem:[%s5596_s12 + $0x830] sm:$0xff]   ;;  %v884_v27 = vld [vmem:[%s5596_s12 + $0x838] sm:$0xff]  }
  0x6c   : > { %869 = vst [vmem:[%s5604_s5 + $0x418] sm:$0xff] %v868_v23   ;;  %873 = vst [vmem:[%s5604_s5 + $0x420] sm:$0xff] %v872_v24   ;;  %v888_v28 = vld [vmem:[%s5596_s12 + $0x840] sm:$0xff]   ;;  %v892_v29 = vld [vmem:[%s5596_s12 + $0x848] sm:$0xff]  }
  0x6d   : > { %877 = vst [vmem:[%s5604_s5 + $0x428] sm:$0xff] %v876_v25   ;;  %881 = vst [vmem:[%s5604_s5 + $0x430] sm:$0xff] %v880_v26   ;;  %v896_v30 = vld [vmem:[%s5596_s12 + $0x850] sm:$0xff]   ;;  %v900_v31 = vld [vmem:[%s5596_s12 + $0x858] sm:$0xff]  }
  0x6e   : > { %885 = vst [vmem:[%s5604_s5 + $0x438] sm:$0xff] %v884_v27   ;;  %889 = vst [vmem:[%s5604_s5 + $0x440] sm:$0xff] %v888_v28   ;;  %v904_v32 = vld [vmem:[%s5596_s12 + $0x860] sm:$0xff]   ;;  %v908_v33 = vld [vmem:[%s5596_s12 + $0x868] sm:$0xff]  }
  0x6f   : > { %893 = vst [vmem:[%s5604_s5 + $0x448] sm:$0xff] %v892_v29   ;;  %897 = vst [vmem:[%s5604_s5 + $0x450] sm:$0xff] %v896_v30   ;;  %v912_v34 = vld [vmem:[%s5596_s12 + $0x870] sm:$0xff]   ;;  %v916_v35 = vld [vmem:[%s5596_s12 + $0x878] sm:$0xff]  }
  0x70   : > { %901 = vst [vmem:[%s5604_s5 + $0x458] sm:$0xff] %v900_v31   ;;  %905 = vst [vmem:[%s5604_s5 + $0x460] sm:$0xff] %v904_v32  }
  0x71   : > { %909 = vst [vmem:[%s5604_s5 + $0x468] sm:$0xff] %v908_v33   ;;  %913 = vst [vmem:[%s5604_s5 + $0x470] sm:$0xff] %v912_v34  }
  0x72   : > { %917 = vst [vmem:[%s5604_s5 + $0x478] sm:$0xff] %v916_v35  }
  0x73 PF: > { %p4231_p10 = scmp.ge.s32.totalorder %s5431_s23, 1  ;;  %p1518_p11 = scmp.lt.s32.totalorder %s5431_s23, 5 }
  0x75   : > { %p1519_p12 = pnand %p4231_p10, %p1518_p11 }
  0x77   : > { %1522 = sbr.rel (%p1519_p12) target bundleno = 533 (0x215), region = 107 }
  0x7c   : > { %s1525_s13 = sand.u32 1, %s5407_s17   ;;  %s1532_s14 = sand.u32 1, %s5399_s15  }
  0x7d   : > { %s5124_s26 = smul.u32 160, %s1525_s13  ;;  %p1578_p13 = scmp.lt.s32.totalorder %s5419_s20, 1 }
  0x7e   : > { %s5125_s28 = smul.u32 1152, %s1532_s14  ;;  %p4234_p0 = scmp.ne.s32.totalorder %s5415_s19, 0 }
  0x7f   : > { %s6525_s20 = smov (!%p1578_p13, %s5419_s20), 1  ;;  %s5899_s9 = scalar_lea.vmem [#allocation3], %s5124_s26 }
  0x80   : > { %s4713_s30 = sshll.u32 %s6525_s20, 5  ;;  %s5901_s10 = scalar_lea.vmem [#allocation4], %s5125_s28 }
  0x81   : > { %s5897_s7 = scalar_lea.vmem %s6479_s4, %s4713_s30  ;;  %1590 = sbr.rel (%p4234_p0) target bundleno = 139 (0x8b), region = 119 }
  0x86   : > { %v5433_v36 = vmov 0.0  }
  0x87   : > { %1591 = vst [vmem:[#allocation2 + $0x30] sm:$0xff] %v5433_v36  ;;  %1592 = vst [vmem:[#allocation2] sm:$0xff] %v5433_v36 }
  0x88   : > { %1593 = vst [vmem:[#allocation2 + $0x18] sm:$0xff] %v5433_v36  ;;  %1594 = vst [vmem:[#allocation2 + $0x10] sm:$0xff] %v5433_v36 }
  0x89   : > { %1595 = vst [vmem:[#allocation2 + $0x8] sm:$0xff] %v5433_v36  ;;  %1596 = vst [vmem:[#allocation2 + $0x20] sm:$0xff] %v5433_v36 }
  0x8a   : > { %1597 = vst [vmem:[#allocation2 + $0x28] sm:$0xff] %v5433_v36  ;;  %1598 = vst [vmem:[#allocation2 + $0x38] sm:$0xff] %v5433_v36 }
  0x8b PF: > { %v5199_v37 = vld [vmem:[%s5901_s10 + $0x78] sm:$0xff]   ;;  %v5203_v41 = vld [vmem:[%s5901_s10 + $0x70] sm:$0xff]   ;;  %v5207_v45 = vld [vmem:[%s5901_s10 + $0x68] sm:$0xff]   ;;  %vm2348_vm0 = vsmask.f32 3328  ;;  %vm3237_vm3 = vcmask 1042432  }
  0x8c   : > { %v5200_v38 = vld [vmem:[%s5901_s10 + $0x1f8] sm:$0xff]   ;;  %4745 = vmatprep.subr.bf16.mxu0 %v5199_v37  ;;  %v5204_v42 = vld [vmem:[%s5901_s10 + $0x1f0] sm:$0xff]   ;;  %v5208_v46 = vld [vmem:[%s5901_s10 + $0x1e8] sm:$0xff]   ;;  %vm2349_vm1 = vsmask.f32 7440  ;;  %vm3238_vm4 = vcmask 1046532  }
  0x8d   : > { %v5201_v39 = vld [vmem:[%s5901_s10 + $0x38] sm:$0xff]   ;;  %4785 = vmatprep.subr.bf16.mxu1 %v5200_v38  ;;  %v5205_v43 = vld [vmem:[%s5901_s10 + $0x30] sm:$0xff]   ;;  %v5209_v47 = vld [vmem:[%s5901_s10 + $0x28] sm:$0xff]   ;;  %p4699_p1 = scmp.ne.s32.totalorder %s5415_s19, 1 }
  0x8e   : > { %v5202_v40 = vld [vmem:[%s5901_s10 + $0x1b8] sm:$0xff]   ;;  %4746 = vmatpush3.bf16.msra.mxu0 %v5201_v39  ;;  %v5206_v44 = vld [vmem:[%s5901_s10 + $0x1b0] sm:$0xff]   ;;  %v5210_v48 = vld [vmem:[%s5901_s10 + $0x1a8] sm:$0xff]  }
  0x8f   : > { %4786 = vmatpush3.bf16.msra.mxu1 %v5202_v40  ;;  %4747 = vmatprep.subr.bf16.mxu0 %v5203_v41  ;;  %v5211_v49 = vld [vmem:[%s5901_s10 + $0x60] sm:$0xff]   ;;  %v5215_v53 = vld [vmem:[%s5901_s10 + $0x58] sm:$0xff]   ;;  %v5219_v57 = vld [vmem:[%s5901_s10 + $0x50] sm:$0xff]  }
  0x90   : > { %4787 = vmatprep.subr.bf16.mxu1 %v5204_v42  ;;  %v5212_v50 = vld [vmem:[%s5901_s10 + $0x1e0] sm:$0xff]   ;;  %v5216_v54 = vld [vmem:[%s5901_s10 + $0x1d8] sm:$0xff]   ;;  %v5220_v58 = vld [vmem:[%s5901_s10 + $0x1d0] sm:$0xff]  }
  0x91   : > { %v5213_v51 = vld [vmem:[%s5901_s10 + $0x20] sm:$0xff]   ;;  %v5217_v55 = vld [vmem:[%s5901_s10 + $0x18] sm:$0xff]   ;;  %v5221_v59 = vld [vmem:[%s5901_s10 + $0x10] sm:$0xff]  }
  0x92   : > { %4748 = vmatpush3.bf16.msra.mxu0 %v5205_v43  ;;  %v5214_v52 = vld [vmem:[%s5901_s10 + $0x1a0] sm:$0xff]   ;;  %v5218_v56 = vld [vmem:[%s5901_s10 + $0x198] sm:$0xff]   ;;  %v5222_v60 = vld [vmem:[%s5901_s10 + $0x190] sm:$0xff]  }
  0x93   : > { %4788 = vmatpush3.bf16.msra.mxu1 %v5206_v44  ;;  %4749 = vmatprep.subr.bf16.mxu0 %v5207_v45  ;;  %v5223_v61 = vld [vmem:[%s5901_s10 + $0x48] sm:$0xff]   ;;  %v5227_v1 = vld [vmem:[%s5901_s10 + $0x40] sm:$0xff]   ;;  %v5938_v6 = vld [vmem:[%s5899_s9 + $0x10] sm:$0xff] }
  0x94   : > { %4789 = vmatprep.subr.bf16.mxu1 %v5208_v46  ;;  %v5224_v62 = vld [vmem:[%s5901_s10 + $0x1c8] sm:$0xff]   ;;  %v5228_v2 = vld [vmem:[%s5901_s10 + $0x1c0] sm:$0xff]   ;;  %v5235_v12 = vld [vmem:[%s5901_s10 + $0x378] sm:$0xff]   ;;  %v2366_v33 = vshrl.u32 %v5938_v6, 16  ;;  %v2369_v35 = vshll.u32 %v5938_v6, 16 }
  0x95   : > { %v5225_v63 = vld [vmem:[%s5901_s10 + $0x8] sm:$0xff]   ;;  %v5229_v3 = vld [vmem:[%s5901_s10] sm:$0xff]   ;;  %v5236_v13 = vld [vmem:[%s5901_s10 + $0xf8] sm:$0xff]  }
  0x96   : > { %4750 = vmatpush3.bf16.msra.mxu0 %v5209_v47  ;;  %v5226_v0 = vld [vmem:[%s5901_s10 + $0x188] sm:$0xff]   ;;  %v5230_v4 = vld [vmem:[%s5901_s10 + $0x180] sm:$0xff]   ;;  %v5237_v14 = vld [vmem:[%s5901_s10 + $0x338] sm:$0xff]   ;;  %v2368_v43 = vrot.slane %v2366_v33, 4  ;;  %v2371_v47 = vrot.slane %v2369_v35, 5 }
  0x97   : > { %4790 = vmatpush3.bf16.msra.mxu1 %v5210_v48  ;;  %4751 = vmatprep.subr.bf16.mxu0 %v5211_v49  ;;  %v1599_v5 = vld [vmem:[%s5899_s9] sm:$0xff]  ;;  %v5238_v15 = vld [vmem:[%s5901_s10 + $0xb8] sm:$0xff]   ;;  %v5239_v16 = vld [vmem:[%s5901_s10 + $0x370] sm:$0xff]  }
  0x98   : > { %4791 = vmatprep.subr.bf16.mxu1 %v5212_v50  ;;  %v5941_v7 = vld [vmem:[%s5899_s9 + $0x20] sm:$0xff]  ;;  %v4235_v8 = vcombine.low %v1599_v5, %v5938_v6  ;;  %v4236_v9 = vcombine.high %v1599_v5, %v5938_v6  ;;  %v5240_v17 = vld [vmem:[%s5901_s10 + $0xf0] sm:$0xff]   ;;  %v2352_v20 = vshrl.u32 %v1599_v5, 16  ;;  %v5247_v26 = vld [vmem:[%s5901_s10 + $0x368] sm:$0xff]   ;;  %v2355_v29 = vshll.u32 %v1599_v5, 16 }
  0x99   : > { %v4292_v10 = vcombine.high %v5938_v6, %v5941_v7  ;;  %v4291_v11 = vcombine.low %v5938_v6, %v5941_v7  ;;  %v5241_v18 = vld [vmem:[%s5901_s10 + $0x330] sm:$0xff]   ;;  %v5961_v22 = vld [vmem:[%s5899_s9 + $0x40] sm:$0xff]  ;;  %v5248_v28 = vld [vmem:[%s5901_s10 + $0xe8] sm:$0xff]   ;;  %v2380_v37 = vshrl.u32 %v5941_v7, 16  ;;  %v2383_v39 = vshll.u32 %v5941_v7, 16 }
  0x9a   : > { %4752 = vmatpush3.bf16.msra.mxu0 %v5213_v51  ;;  %1817 = vmatprep.mubr.bf16.mxu0 %v4236_v9  ;;  %v5242_v19 = vld [vmem:[%s5901_s10 + $0xb0] sm:$0xff]   ;;  %v5249_v30 = vld [vmem:[%s5901_s10 + $0x328] sm:$0xff]   ;;  %v2354_v31 = vrot.slane %v2352_v20, 4  ;;  %v5251_v34 = vld [vmem:[%s5901_s10 + $0x360] sm:$0xff]   ;;  %v2357_v42 = vrot.slane %v2355_v29, 5 }
  0x9b   : > { %4792 = vmatpush3.bf16.msra.mxu1 %v5214_v52  ;;  %4753 = vmatprep.subr.bf16.mxu0 %v5215_v53  ;;  %v5958_v21 = vld [vmem:[%s5899_s9 + $0x30] sm:$0xff]  ;;  %v5250_v32 = vld [vmem:[%s5901_s10 + $0xa8] sm:$0xff]   ;;  %v5252_v36 = vld [vmem:[%s5901_s10 + $0xe0] sm:$0xff]   ;;  %v2382_v51 = vrot.slane %v2380_v37, 4  ;;  %v2385_v53 = vrot.slane %v2383_v39, 5 }
  0x9c   : > { %4793 = vmatprep.subr.bf16.mxu1 %v5216_v54  ;;  %2054 = vmatprep.mubr.bf16.mxu1 %v4292_v10  ;;  %v5965_v23 = vcombine.high %v5941_v7, %v5958_v21  ;;  %v4294_v24 = vcombine.high %v5958_v21, %v5961_v22  ;;  %v5971_v25 = vcombine.low %v5941_v7, %v5958_v21  ;;  %v5253_v38 = vld [vmem:[%s5901_s10 + $0x320] sm:$0xff]   ;;  %v5990_v41 = vld [vmem:[%s5899_s9 + $0x50] sm:$0xff]  ;;  %v5259_v50 = vld [vmem:[%s5901_s10 + $0x358] sm:$0xff]  }
  0x9d   : > { %v4293_v27 = vcombine.low %v5958_v21, %v5961_v22  ;;  %v5254_v40 = vld [vmem:[%s5901_s10 + $0xa0] sm:$0xff]   ;;  %v5994_v44 = vcombine.high %v5961_v22, %v5990_v41  ;;  %v6001_v46 = vcombine.low %v5961_v22, %v5990_v41  ;;  %v5260_v52 = vld [vmem:[%s5901_s10 + $0xd8] sm:$0xff]   ;;  %v5271_v10 = vld [vmem:[%s5901_s10 + $0x348] sm:$0xff]  }
  0x9e   : > { %4754 = vmatpush3.bf16.msra.mxu0 %v5217_v55  ;;  %v5997_v45 = vld [vmem:[%s5899_s9 + $0x60] sm:$0xff]  ;;  %v5261_v54 = vld [vmem:[%s5901_s10 + $0x318] sm:$0xff]   ;;  %v2394_v55 = vshrl.u32 %v5958_v21, 16  ;;  %vm6058_vm2 = vmor %vm2348_vm0, %vm2349_vm1 }
  0x9f   : > { %4794 = vmatpush3.bf16.msra.mxu1 %v5218_v56  ;;  %4755 = vmatprep.subr.bf16.mxu0 %v5219_v57  ;;  %v4296_v48 = vcombine.high %v5990_v41, %v5997_v45  ;;  %v4295_v49 = vcombine.low %v5990_v41, %v5997_v45  ;;  %v5262_v56 = vld [vmem:[%s5901_s10 + $0x98] sm:$0xff]   ;;  %v2358_v57 = vor.u32 %v2357_v42, %v2354_v31  ;;  %v5276_v20 = vld [vmem:[%s5901_s10 + $0xc0] sm:$0xff]   ;;  %v2425_v31 = vshll.u32 %v5990_v41, 16  ;;  %vm6231_vm5 = vmor %vm3237_vm3, %vm3238_vm4 }
  0xa0   : > { %4795 = vmatprep.subr.bf16.mxu1 %v5220_v58  ;;  %v2397_v58 = vshll.u32 %v5958_v21, 16  ;;  %v2331_v29 = vld [vmem:[%s5899_s9 + $0x18] sm:$0x11]  ;;  %v2436_v35 = vshrl.u32 %v5997_v45, 16 }
  0xa1   : > { %v2375_v33 = vshll.u32 %v2331_v29, 16  ;;  %v5281_v39 = vld [vmem:[%s5901_s10 + $0x238] sm:$0xff]  }
  0xa2   : > { %4756 = vmatpush3.bf16.msra.mxu0 %v5221_v59  ;;  %v5263_v59 = vld [vmem:[%s5901_s10 + $0x350] sm:$0xff]   ;;  %v2399_v5 = vrot.slane %v2397_v58, 5  ;;  %v2439_v58 = vshll.u32 %v5997_v45, 16 }
  0xa3   : > { %4796 = vmatpush3.bf16.msra.mxu1 %v5222_v60  ;;  %4757 = vmatprep.subr.bf16.mxu0 %v5223_v61  ;;  %v5264_v60 = vld [vmem:[%s5901_s10 + $0xd0] sm:$0xff]   ;;  %v2377_v37 = vrot.slane %v2375_v33, 5 }
  0xa4   : > { %4797 = vmatprep.subr.bf16.mxu1 %v5224_v62  ;;  %v5265_v61 = vld [vmem:[%s5901_s10 + $0x310] sm:$0xff]   ;;  %v2372_v62 = vor.u32 %v2371_v47, %v2368_v43  ;;  %v5282_v43 = vld [vmem:[%s5901_s10 + $0x3b8] sm:$0xff]  }
  0xa6   : > { %4758 = vmatpush3.bf16.msra.mxu0 %v5225_v63  ;;  %v5266_v63 = vld [vmem:[%s5901_s10 + $0x90] sm:$0xff]  }
  0xa7   : > { %4798 = vmatpush3.bf16.msra.mxu1 %v5226_v0  ;;  %4759 = vmatprep.subr.bf16.mxu0 %v5227_v1  ;;  %v6020_v0 = vld [vmem:[%s5899_s9 + $0x70] sm:$0xff]  ;;  %v6023_v1 = vld [vmem:[%s5899_s9 + $0x80] sm:$0xff] }
  0xa8   : > { %4799 = vmatprep.subr.bf16.mxu1 %v5228_v2  ;;  %v2359_v2 = vrot.slane %v2358_v57, 4  ;;  %v6027_v6 = vcombine.high %v5997_v45, %v6020_v0  ;;  %v4298_v7 = vcombine.high %v6020_v0, %v6023_v1  ;;  %v4297_v9 = vcombine.low %v6020_v0, %v6023_v1  ;;  %v2335_v57 = vld [vmem:[%s5899_s9 + $0x38] sm:$0x11] }
  0xaa   : > { %4760 = vmatpush3.bf16.msra.mxu0 %v5229_v3  ;;  %v2386_v3 = vor.u32 %v2385_v53, %v2382_v51  ;;  %v5284_v51 = vld [vmem:[%s5901_s10 + $0x3f0] sm:$0xff]  }
  0xab   : > { %4800 = vmatpush3.bf16.msra.mxu1 %v5230_v4  ;;  %4825 = vmatprep.subr.bf16.mxu0 %v5235_v12  ;;  %v2396_v4 = vrot.slane %v2394_v55, 4  ;;  %v2408_v12 = vshrl.u32 %v5961_v22, 16  ;;  %v5285_v53 = vld [vmem:[%s5901_s10 + $0x230] sm:$0xff]  }
  0xac   : > { %4865 = vmatprep.subr.bf16.mxu1 %v5236_v13  ;;  %v5273_v13 = vld [vmem:[%s5901_s10 + $0x308] sm:$0xff]   ;;  %v5286_v55 = vld [vmem:[%s5901_s10 + $0x3b0] sm:$0xff]  }
  0xad   : > { %1818 = vmatmul.mubr.bf16.vlgmr.msra.gmra.mxu0 %v4235_v8  ;;  %v6033_v8 = vcombine.low %v5997_v45, %v6020_v0  ;;  %v2410_v21 = vrot.slane %v2408_v12, 4  ;;  %v5292_v12 = vld [vmem:[%s5901_s10 + $0x3e0] sm:$0xff]  }
  0xae   : > { %2055 = vmatmul.mubr.bf16.vlgmr.msra.gmra.mxu1 %v4291_v11  ;;  %4826 = vmatpush3.bf16.msra.mxu0 %v5237_v14  ;;  %v5272_v11 = vld [vmem:[%s5901_s10 + $0xc8] sm:$0xff]   ;;  %v2373_v14 = vrot.slane %v2372_v62, 4  ;;  %v2450_v62 = vshrl.u32 %v6020_v0, 16 }
  0xaf   : > { %4866 = vmatpush3.bf16.msra.mxu1 %v5238_v15  ;;  %4827 = vmatprep.subr.bf16.mxu0 %v5239_v16  ;;  %v5274_v15 = vld [vmem:[%s5901_s10 + $0x88] sm:$0xff]   ;;  %v2411_v16 = vshll.u32 %v5961_v22, 16  ;;  %v5278_v22 = vld [vmem:[%s5901_s10 + $0x80] sm:$0xff]  }
  0xb0   : > { %4867 = vmatprep.subr.bf16.mxu1 %v5240_v17  ;;  %1825 = vmatprep.mubr.bf16.mxu0 %v5965_v23  ;;  %v5275_v17 = vld [vmem:[%s5901_s10 + $0x340] sm:$0xff]   ;;  %v6071_v42 = vsel %vm6058_vm2, %v2373_v14, %v2377_v37  ;;  %v5302_v37 = vld [vmem:[%s5901_s10 + $0x390] sm:$0xff]  }
  0xb1   : > { %2062 = vmatprep.mubr.bf16.mxu1 %v4294_v24  ;;  %v5277_v24 = vld [vmem:[%s5901_s10 + $0x300] sm:$0xff]  }
  0xb2   : > { %4828 = vmatpush3.bf16.msra.mxu0 %v5241_v18  ;;  %v6046_v18 = vrot.slane %v2386_v3, 4  ;;  %v5288_v3 = vld [vmem:[%s5901_s10 + $0x3e8] sm:$0xff]   ;;  %v5293_v14 = vld [vmem:[%s5901_s10 + $0x220] sm:$0xff]  }
  0xb3   : > { %4868 = vmatpush3.bf16.msra.mxu1 %v5242_v19  ;;  %4829 = vmatprep.subr.bf16.mxu0 %v5247_v26  ;;  %v2400_v19 = vor.u32 %v2399_v5, %v2396_v4  ;;  %v2422_v26 = vshrl.u32 %v5990_v41, 16  ;;  %v5289_v4 = vld [vmem:[%s5901_s10 + $0x228] sm:$0xff]  }
  0xb4   : > { %4869 = vmatprep.subr.bf16.mxu1 %v5248_v28  ;;  %v2329_v28 = vld [vmem:[%s5899_s9 + $0x8] sm:$0x11] }
  0xb5   : > { %1826 = vmatmul.mubr.bf16.gmra.mxu0 %v5971_v25  ;;  %v2424_v47 = vrot.slane %v2422_v26, 4 }
  0xb6   : > { %2063 = vmatmul.mubr.bf16.gmra.mxu1 %v4293_v27  ;;  %4830 = vmatpush3.bf16.msra.mxu0 %v5249_v30  ;;  %v2413_v27 = vrot.slane %v2411_v16, 5  ;;  %v2401_v30 = vrot.slane %v2400_v19, 4  ;;  %v2337_v16 = vld [vmem:[%s5899_s9 + $0x48] sm:$0x11] }
  0xb7   : > { %4870 = vmatpush3.bf16.msra.mxu1 %v5250_v32  ;;  %4831 = vmatprep.subr.bf16.mxu0 %v5251_v34  ;;  %v5279_v34 = vld [vmem:[%s5901_s10 + $0x278] sm:$0xff]   ;;  %v2417_v19 = vshll.u32 %v2337_v16, 16  ;;  %v5323_v16 = vld [vmem:[%s5901_s10 + $0x128] sm:$0xff]   ;;  %v5343_v32 = vld [vmem:[%s5901_s10 + $0x100] sm:$0xff]  }
  0xb8   : > { %4871 = vmatprep.subr.bf16.mxu1 %v5252_v36  ;;  %1833 = vmatprep.mubr.bf16.mxu0 %v5994_v44 }
  0xb9   : > { %2070 = vmatprep.mubr.bf16.mxu1 %v4296_v48 }
  0xba   : > { %4832 = vmatpush3.bf16.msra.mxu0 %v5253_v38  ;;  %v5280_v38 = vld [vmem:[%s5901_s10 + $0x3f8] sm:$0xff]  }
  0xbb   : > { %4872 = vmatpush3.bf16.msra.mxu1 %v5254_v40  ;;  %4833 = vmatprep.subr.bf16.mxu0 %v5259_v50  ;;  %v2414_v40 = vor.u32 %v2413_v27, %v2410_v21  ;;  %v2427_v50 = vrot.slane %v2425_v31, 5  ;;  %v5295_v21 = vld [vmem:[%s5901_s10 + $0x258] sm:$0xff]  }
  0xbc   : > { %4873 = vmatprep.subr.bf16.mxu1 %v5260_v52  ;;  %v5297_v27 = vld [vmem:[%s5901_s10 + $0x218] sm:$0xff]  }
  0xbd   : > { %1834 = vmatmul.mubr.bf16.gmra.mxu0 %v6001_v46  ;;  %v2415_v52 = vrot.slane %v2414_v40, 4 }
  0xbe   : > { %2071 = vmatmul.mubr.bf16.gmra.mxu1 %v4295_v49  ;;  %4834 = vmatpush3.bf16.msra.mxu0 %v5261_v54  ;;  %v5283_v49 = vld [vmem:[%s5901_s10 + $0x270] sm:$0xff]   ;;  %v6080_v54 = vrot.slane %v2436_v35, 4 }
  0xbf   : > { %4874 = vmatpush3.bf16.msra.mxu1 %v5262_v56  ;;  %4835 = vmatprep.subr.bf16.mxu0 %v5263_v59  ;;  %v2333_v56 = vld [vmem:[%s5899_s9 + $0x28] sm:$0x11]  ;;  %v2403_v59 = vshll.u32 %v2335_v57, 16  ;;  %v5300_v35 = vld [vmem:[%s5901_s10 + $0x3d0] sm:$0xff]  }
  0xc0   : > { %4875 = vmatprep.subr.bf16.mxu1 %v5264_v60  ;;  %1841 = vmatprep.mubr.bf16.mxu0 %v6027_v6  ;;  %v5287_v60 = vld [vmem:[%s5901_s10 + $0x268] sm:$0xff]  }
  0xc1   : > { %2078 = vmatprep.mubr.bf16.mxu1 %v4298_v7  ;;  %v2453_v7 = vshll.u32 %v6020_v0, 16  ;;  %v2452_v0 = vrot.slane %v2450_v62, 4  ;;  %v5311_v62 = vld [vmem:[%s5901_s10 + $0x200] sm:$0xff]  }
  0xc2   : > { %4836 = vmatpush3.bf16.msra.mxu0 %v5265_v61  ;;  %v2428_v61 = vor.u32 %v2427_v50, %v2424_v47  ;;  %v2343_v47 = vld [vmem:[%s5899_s9 + $0x78] sm:$0x11] }
  0xc3   : > { %4876 = vmatpush3.bf16.msra.mxu1 %v5266_v63  ;;  %4837 = vmatprep.subr.bf16.mxu0 %v5271_v10  ;;  %v5291_v10 = vld [vmem:[%s5901_s10 + $0x260] sm:$0xff]   ;;  %v2459_v50 = vshll.u32 %v2343_v47, 16 }
  0xc4   : > { %4877 = vmatprep.subr.bf16.mxu1 %v5272_v11  ;;  %v2429_v11 = vrot.slane %v2428_v61, 4  ;;  %v5310_v61 = vld [vmem:[%s5901_s10 + $0x3c0] sm:$0xff]  }
  0xc5   : > { %1842 = vmatmul.mubr.bf16.gmra.mxu0 %v6033_v8 }
  0xc6   : > { %2079 = vmatmul.mubr.bf16.gmra.mxu1 %v4297_v9  ;;  %4838 = vmatpush3.bf16.msra.mxu0 %v5273_v13  ;;  %v2441_v13 = vrot.slane %v2439_v58, 5 }
  0xc7   : > { %4878 = vmatpush3.bf16.msra.mxu1 %v5274_v15  ;;  %4839 = vmatprep.subr.bf16.mxu0 %v5275_v17  ;;  %v5294_v15 = vld [vmem:[%s5901_s10 + $0x3a0] sm:$0xff]   ;;  %v2339_v17 = vld [vmem:[%s5899_s9 + $0x58] sm:$0x11] }
  0xc8   : > { %2279 = vmatprep.mubr.bf16.mxu0 %v5965_v23  ;;  %4879 = vmatprep.subr.bf16.mxu1 %v5276_v20  ;;  %v2361_v23 = vshll.u32 %v2329_v28, 16  ;;  %v2431_v20 = vshll.u32 %v2339_v17, 16  ;;  %v2442_v28 = vor.u32 %v2441_v13, %v6080_v54  ;;  %v5307_v54 = vld [vmem:[%s5901_s10 + $0x208] sm:$0xff]  }
  0xc9   : > { %v5321_v13 = vld [vmem:[%s5901_s10 + $0x168] sm:$0xff]  }
  0xca   : > { %4840 = vmatpush3.bf16.msra.mxu0 %v5277_v24  ;;  %v2363_v36 = vrot.slane %v2361_v23, 5  ;;  %v2419_v24 = vrot.slane %v2417_v19, 5  ;;  %v2433_v26 = vrot.slane %v2431_v20, 5  ;;  %v2443_v40 = vrot.slane %v2442_v28, 4  ;;  %v5325_v19 = vld [vmem:[%s5901_s10 + $0x160] sm:$0xff]  }
  0xcb   : > { %4880 = vmatpush3.bf16.msra.mxu1 %v5278_v22  ;;  %4905 = vmatprep.subr.bf16.mxu0 %v5279_v34  ;;  %v5296_v22 = vld [vmem:[%s5901_s10 + $0x3d8] sm:$0xff]   ;;  %v5299_v34 = vld [vmem:[%s5901_s10 + $0x250] sm:$0xff]  }
  0xcc   : > { %v2364_v41 = vsel %vm6058_vm2, %v2359_v2, %v2363_v36  ;;  %4945 = vmatprep.subr.bf16.mxu1 %v5280_v38  ;;  %v2405_v2 = vrot.slane %v2403_v59, 5  ;;  %v6126_v29 = vsel %vm6058_vm2, %v2415_v52, %v2419_v24  ;;  %v5301_v36 = vld [vmem:[%s5901_s10 + $0x210] sm:$0xff]   ;;  %v5327_v24 = vld [vmem:[%s5901_s10 + $0x120] sm:$0xff]  }
  0xcd   : > { %2280 = vmatmul.mubr.bf16.vlgmr.msra.gmra.mxu0 %v5971_v25  ;;  %v4397_v48 = vcombine.low %v2364_v41, %v6071_v42  ;;  %v4398_v25 = vcombine.high %v2364_v41, %v6071_v42  ;;  %v6148_v38 = vld [vmem:[%s5899_s9 + $0x90] sm:$0xff] }
  0xce   : > { %4906 = vmatpush3.bf16.msra.mxu0 %v5281_v39  ;;  %2287 = vmatprep.mubr.bf16.mxu0 %v5994_v44  ;;  %v2389_v44 = vshll.u32 %v2333_v56, 16  ;;  %v6099_v5 = vsel %vm6058_vm2, %v2401_v30, %v2405_v2  ;;  %v5298_v30 = vld [vmem:[%s5901_s10 + $0x398] sm:$0xff]   ;;  %v2341_v39 = vld [vmem:[%s5899_s9 + $0x68] sm:$0x11] }
  0xcf   : > { %2664 = vmatprep.mubr.bf16.mxu1 %v4398_v25  ;;  %4907 = vmatprep.subr.bf16.mxu0 %v5283_v49  ;;  %v4347_v25 = vcombine.low %v6023_v1, %v6148_v38  ;;  %v5305_v49 = vld [vmem:[%s5901_s10 + $0x248] sm:$0xff]  }
  0xd0   : > { %2665 = vmatmul.mubr.bf16.vlgmr.msra.gmra.mxu1 %v4397_v48  ;;  %v2391_v63 = vrot.slane %v2389_v44, 5  ;;  %v2445_v48 = vshll.u32 %v2341_v39, 16  ;;  %v5308_v56 = vld [vmem:[%s5901_s10 + $0x388] sm:$0xff]   ;;  %v5309_v44 = vld [vmem:[%s5901_s10 + $0x240] sm:$0xff]  }
  0xd1   : > { %4946 = vmatpush3.bf16.msra.mxu1 %v5282_v43  ;;  %v4348_v43 = vcombine.high %v6023_v1, %v6148_v38  ;;  %v2345_v39 = vld [vmem:[%s5899_s9 + $0x88] sm:$0x11] }
  0xd2   : > { %4908 = vmatpush3.bf16.msra.mxu0 %v5285_v53  ;;  %4947 = vmatprep.subr.bf16.mxu1 %v5284_v51  ;;  %v6095_v45 = vsel %vm6058_vm2, %v6046_v18, %v2391_v63  ;;  %v2455_v18 = vrot.slane %v2453_v7, 5  ;;  %v5306_v51 = vld [vmem:[%s5901_s10 + $0x3c8] sm:$0xff]   ;;  %v2447_v53 = vrot.slane %v2445_v48, 5  ;;  %v5312_v63 = vld [vmem:[%s5901_s10 + $0x380] sm:$0xff]   ;;  %v5315_v7 = vld [vmem:[%s5901_s10 + $0x138] sm:$0xff]  }
  0xd3   : > { %4909 = vmatprep.subr.bf16.mxu0 %v5287_v60  ;;  %v6109_v9 = vcombine.low %v6095_v45, %v6099_v5  ;;  %v4454_v52 = vcombine.high %v6071_v42, %v6095_v45  ;;  %v4453_v2 = vcombine.low %v6071_v42, %v6095_v45  ;;  %v5318_v42 = vld [vmem:[%s5901_s10 + $0x2f0] sm:$0xff]  }
  0xd4   : > { %v2456_v31 = vor.u32 %v2455_v18, %v2452_v0  ;;  %v6164_v57 = vsel %vm6058_vm2, %v2443_v40, %v2447_v53  ;;  %v5322_v0 = vld [vmem:[%s5901_s10 + $0x2e8] sm:$0xff]   ;;  %v2967_v18 = vshll.u32 %v6148_v38, 16  ;;  %v2347_v40 = vld [vmem:[%s5899_s9 + $0x98] sm:$0x11] }
  0xd5   : > { %2288 = vmatmul.mubr.bf16.gmra.mxu0 %v6001_v46  ;;  %4948 = vmatpush3.bf16.msra.mxu1 %v5286_v55  ;;  %v5290_v46 = vld [vmem:[%s5901_s10 + $0x3a8] sm:$0xff]   ;;  %v2461_v55 = vrot.slane %v2459_v50, 5  ;;  %v2973_v47 = vshll.u32 %v2347_v40, 16 }
  0xd6   : > { %2295 = vmatprep.mubr.bf16.mxu0 %v6027_v6  ;;  %4910 = vmatpush3.bf16.msra.mxu0 %v5289_v4  ;;  %v6105_v6 = vcombine.high %v6095_v45, %v6099_v5  ;;  %v2457_v41 = vrot.slane %v2456_v31, 4  ;;  %v5314_v4 = vld [vmem:[%s5901_s10 + $0x2f8] sm:$0xff]   ;;  %v5319_v45 = vld [vmem:[%s5901_s10 + $0x130] sm:$0xff]  }
  0xd7   : > { %4949 = vmatprep.subr.bf16.mxu1 %v5288_v3  ;;  %4911 = vmatprep.subr.bf16.mxu0 %v5291_v10  ;;  %v5313_v3 = vld [vmem:[%s5901_s10 + $0x178] sm:$0xff]   ;;  %v2975_v50 = vrot.slane %v2973_v47, 5 }
  0xd8   : > { %2672 = vmatprep.mubr.bf16.mxu1 %v6105_v6  ;;  %v6168_v58 = vsel %vm6058_vm2, %v2457_v41, %v2461_v55  ;;  %v5316_v10 = vld [vmem:[%s5901_s10 + $0x2b8] sm:$0xff]   ;;  %v5340_v55 = vld [vmem:[%s5901_s10 + $0x288] sm:$0xff]  }
  0xd9   : > { %2673 = vmatmul.mubr.bf16.gmra.mxu1 %v6109_v9  ;;  %v6173_v59 = vcombine.high %v6164_v57, %v6168_v58  ;;  %v6177_v60 = vcombine.low %v6164_v57, %v6168_v58  ;;  %v5331_v31 = vld [vmem:[%s5901_s10 + $0x118] sm:$0xff]  }
  0xda   : > { %4950 = vmatpush3.bf16.msra.mxu1 %v5290_v46  ;;  %4912 = vmatpush3.bf16.msra.mxu0 %v5293_v14  ;;  %v4456_v46 = vcombine.high %v6099_v5, %v6126_v29  ;;  %v2714_v14 = vshrl.u32 %v6023_v1, 16 }
  0xdb   : > { %4951 = vmatprep.subr.bf16.mxu1 %v5292_v12  ;;  %4913 = vmatprep.subr.bf16.mxu0 %v5295_v21  ;;  %v4455_v12 = vcombine.low %v6099_v5, %v6126_v29  ;;  %v5324_v5 = vld [vmem:[%s5901_s10 + $0x2a8] sm:$0xff]  }
  0xdc   : > { %v2716_v20 = vrot.slane %v2714_v14, 4  ;;  %v5345_v14 = vld [vmem:[%s5901_s10 + $0x478] sm:$0xff]  }
  0xdd   : > { %2296 = vmatmul.mubr.bf16.gmra.mxu0 %v6033_v8  ;;  %v6130_v8 = vsel %vm6058_vm2, %v2429_v11, %v2433_v26  ;;  %v5317_v11 = vld [vmem:[%s5901_s10 + $0x170] sm:$0xff]  }
  0xde   : > { %4952 = vmatpush3.bf16.msra.mxu1 %v5294_v15  ;;  %4914 = vmatpush3.bf16.msra.mxu0 %v5297_v27  ;;  %v6135_v23 = vcombine.high %v6126_v29, %v6130_v8  ;;  %v6139_v33 = vcombine.low %v6126_v29, %v6130_v8  ;;  %v2717_v15 = vshll.u32 %v6023_v1, 16  ;;  %v4458_v17 = vcombine.high %v6130_v8, %v6164_v57  ;;  %v5326_v1 = vld [vmem:[%s5901_s10 + $0x2e0] sm:$0xff]   ;;  %v5329_v29 = vld [vmem:[%s5901_s10 + $0x158] sm:$0xff]  }
  0xdf   : > { %4953 = vmatprep.subr.bf16.mxu1 %v5296_v22  ;;  %4915 = vmatprep.subr.bf16.mxu0 %v5299_v34  ;;  %v5328_v22 = vld [vmem:[%s5901_s10 + $0x2a0] sm:$0xff]   ;;  %v2969_v27 = vrot.slane %v2967_v18, 5  ;;  %v4457_v28 = vcombine.low %v6130_v8, %v6164_v57  ;;  %v5332_v34 = vld [vmem:[%s5901_s10 + $0x298] sm:$0xff]   ;;  %v5334_v8 = vld [vmem:[%s5901_s10 + $0x2d0] sm:$0xff]  }
  0xe0   : > { %2680 = vmatprep.mubr.bf16.mxu1 %v6135_v23  ;;  %2303 = vmatprep.mubr.bf16.mxu0 %v4348_v43  ;;  %v2719_v21 = vrot.slane %v2717_v15, 5  ;;  %v2723_v43 = vshll.u32 %v2345_v39, 16  ;;  %v5347_v18 = vld [vmem:[%s5901_s10 + $0x470] sm:$0xff]  }
  0xe1   : > { %2681 = vmatmul.mubr.bf16.gmra.mxu1 %v6139_v33 }
  0xe2   : > { %4954 = vmatpush3.bf16.msra.mxu1 %v5298_v30  ;;  %4916 = vmatpush3.bf16.msra.mxu0 %v5301_v36  ;;  %v5330_v30 = vld [vmem:[%s5901_s10 + $0x2d8] sm:$0xff]   ;;  %v5335_v36 = vld [vmem:[%s5901_s10 + $0x110] sm:$0xff]  }
  0xe3   : > { %4955 = vmatprep.subr.bf16.mxu1 %v5300_v35  ;;  %4917 = vmatprep.subr.bf16.mxu0 %v5305_v49  ;;  %v5333_v35 = vld [vmem:[%s5901_s10 + $0x150] sm:$0xff]   ;;  %v2725_v49 = vrot.slane %v2723_v43, 5  ;;  %v3214_v43 = vld [vmem:[%s5899_s9 + $0x68] sm:$0x11] }
  0xe4   : > { %2688 = vmatprep.mubr.bf16.mxu1 %v6173_v59 }
  0xe5   : > { %2304 = vmatmul.mubr.bf16.gmra.mxu0 %v4347_v25  ;;  %v5337_v25 = vld [vmem:[%s5901_s10 + $0x148] sm:$0xff]  }
  0xe6   : > { %4956 = vmatpush3.bf16.msra.mxu1 %v5302_v37  ;;  %4918 = vmatpush3.bf16.msra.mxu0 %v5307_v54 }
  0xe7   : > { %4957 = vmatprep.subr.bf16.mxu1 %v5306_v51  ;;  %2914 = vmatprep.mubr.bf16.mxu0 %v4454_v52  ;;  %v5338_v51 = vld [vmem:[%s5901_s10 + $0x2c8] sm:$0xff]  }
  0xe8   : > { %4919 = vmatprep.subr.bf16.mxu0 %v5309_v44  ;;  %v5339_v52 = vld [vmem:[%s5901_s10 + $0x108] sm:$0xff]  }
  0xe9   : > { %2689 = vmatmul.mubr.bf16.gmra.mxu1 %v6177_v60 }
  0xea   : > { %4958 = vmatpush3.bf16.msra.mxu1 %v5308_v56  ;;  %4920 = vmatpush3.bf16.msra.mxu0 %v5311_v62  ;;  %v5344_v62 = vld [vmem:[%s5901_s10 + $0x280] sm:$0xff]  }
  0xeb   : > { %4959 = vmatprep.subr.bf16.mxu1 %v5310_v61  ;;  %3152 = vmatprep.mubr.bf16.mxu1 %v6105_v6  ;;  %v5320_v6 = vld [vmem:[%s5901_s10 + $0x2b0] sm:$0xff]   ;;  %v5342_v61 = vld [vmem:[%s5901_s10 + $0x2c0] sm:$0xff]  }
  0xec   : > { %4985 = vmatprep.subr.bf16.mxu0 %v5313_v3  ;;  %v3204_v3 = vld [vmem:[%s5899_s9 + $0x18] sm:$0x11] }
  0xed   : > { %2915 = vmatmul.mubr.bf16.vlgmr.msra.gmra.mxu0 %v4453_v2  ;;  %v3202_v2 = vld [vmem:[%s5899_s9 + $0x8] sm:$0x11] }
  0xee   : > { %4960 = vmatpush3.bf16.msra.mxu1 %v5312_v63  ;;  %4986 = vmatpush3.bf16.msra.mxu0 %v5315_v7  ;;  %v3201_v63 = vld [vmem:[%s5899_s9] sm:$0xee] }
  0xef   : > { %5025 = vmatprep.subr.bf16.mxu1 %v5314_v4  ;;  %2922 = vmatprep.mubr.bf16.mxu0 %v4456_v46  ;;  %v4527_v4 = vrot.slane %v3201_v63, 9  ;;  %v3242_v46 = vrot.slane %v3202_v2, 5 }
  0xf0   : > { %4987 = vmatprep.subr.bf16.mxu0 %v5317_v11  ;;  %v3205_v11 = vld [vmem:[%s5899_s9 + $0x20] sm:$0xee] }
  0xf1   : > { %3153 = vmatmul.mubr.bf16.vlgmr.msra.gmra.mxu1 %v6109_v9  ;;  %v2964_v9 = vshrl.u32 %v6148_v38, 16  ;;  %v5336_v38 = vld [vmem:[%s5901_s10 + $0x290] sm:$0xff]  }
  0xf2   : > { %5026 = vmatpush3.bf16.msra.mxu1 %v5316_v10  ;;  %4988 = vmatpush3.bf16.msra.mxu0 %v5319_v45  ;;  %v3246_v10 = vrot.slane %v3204_v3, 5  ;;  %v3243_v45 = vsel %vm6231_vm5, %v4527_v4, %v3242_v46 }
  0xf3   : > { %5027 = vmatprep.subr.bf16.mxu1 %v5318_v42  ;;  %3160 = vmatprep.mubr.bf16.mxu1 %v6135_v23  ;;  %v2966_v26 = vrot.slane %v2964_v9, 4  ;;  %v2720_v23 = vor.u32 %v2719_v21, %v2716_v20  ;;  %v3206_v42 = vld [vmem:[%s5899_s9 + $0x28] sm:$0x11]  ;;  %v5346_v9 = vld [vmem:[%s5901_s10 + $0x438] sm:$0xff]   ;;  %v3207_v20 = vld [vmem:[%s5899_s9 + $0x30] sm:$0xee] }
  0xf4   : > { %4989 = vmatprep.subr.bf16.mxu0 %v5321_v13  ;;  %v4530_v21 = vrot.slane %v3207_v20, 9  ;;  %v1609_v20 = vld [vmem:[#allocation2 + $0x30] sm:$0xff] }
  0xf5   : > { %2923 = vmatmul.mubr.bf16.gmra.mxu0 %v4455_v12  ;;  %v2721_v37 = vrot.slane %v2720_v23, 4  ;;  %v3250_v12 = vrot.slane %v3206_v42, 5  ;;  %v5349_v23 = vld [vmem:[%s5901_s10 + $0x468] sm:$0xff]  }
  0xf6   : > { %5028 = vmatpush3.bf16.msra.mxu1 %v5320_v6  ;;  %4990 = vmatpush3.bf16.msra.mxu0 %v5323_v16  ;;  %v4529_v6 = vrot.slane %v3205_v11, 9  ;;  %v5357_v11 = vld [vmem:[%s5901_s10 + $0x448] sm:$0xff]  }
  0xf7   : > { %5029 = vmatprep.subr.bf16.mxu1 %v5322_v0  ;;  %4991 = vmatprep.subr.bf16.mxu0 %v5325_v19  ;;  %v2726_v53 = vsel %vm6058_vm2, %v2721_v37, %v2725_v49  ;;  %v5348_v19 = vld [vmem:[%s5901_s10 + $0x430] sm:$0xff]  }
  0xf8   : > { %2930 = vmatprep.mubr.bf16.mxu0 %v4458_v17  ;;  %v4460_v56 = vcombine.high %v6168_v58, %v2726_v53  ;;  %v4459_v44 = vcombine.low %v6168_v58, %v2726_v53  ;;  %v3203_v58 = vld [vmem:[%s5899_s9 + $0x10] sm:$0xee]  ;;  %v3251_v16 = vsel %vm6231_vm5, %v4529_v6, %v3250_v12  ;;  %v3220_v6 = vld [vmem:[%s5899_s9 + $0x98] sm:$0x11] }
  0xf9   : > { %3161 = vmatmul.mubr.bf16.gmra.mxu1 %v6139_v33  ;;  %v2970_v33 = vor.u32 %v2969_v27, %v2966_v26  ;;  %v4528_v7 = vrot.slane %v3203_v58, 9  ;;  %v3209_v26 = vld [vmem:[%s5899_s9 + $0x40] sm:$0xee]  ;;  %v3211_v37 = vld [vmem:[%s5899_s9 + $0x50] sm:$0xee] }
  0xfa   : > { %5030 = vmatpush3.bf16.msra.mxu1 %v5324_v5  ;;  %4992 = vmatpush3.bf16.msra.mxu0 %v5327_v24  ;;  %v4531_v27 = vrot.slane %v3209_v26, 9  ;;  %v4532_v39 = vrot.slane %v3211_v37, 9  ;;  %v5355_v58 = vld [vmem:[%s5901_s10 + $0x450] sm:$0xff]   ;;  %v1611_v37 = vld [vmem:[#allocation2 + $0x18] sm:$0xff] }
  0xfb   : > { %5031 = vmatprep.subr.bf16.mxu1 %v5326_v1  ;;  %3168 = vmatprep.mubr.bf16.mxu1 %v6173_v59  ;;  %v2971_v41 = vrot.slane %v2970_v33, 4  ;;  %v3247_v13 = vsel %vm6231_vm5, %v4528_v7, %v3246_v10  ;;  %v3208_v1 = vld [vmem:[%s5899_s9 + $0x38] sm:$0x11]  ;;  %v5356_v10 = vld [vmem:[%s5901_s10 + $0x410] sm:$0xff]  }
  0xfc   : > { %4993 = vmatprep.subr.bf16.mxu0 %v5329_v29  ;;  %v4567_v0 = vcombine.low %v3243_v45, %v3247_v13  ;;  %v4568_v15 = vcombine.high %v3243_v45, %v3247_v13  ;;  %v4625_v5 = vcombine.high %v3247_v13, %v3251_v16  ;;  %v4624_v17 = vcombine.low %v3247_v13, %v3251_v16  ;;  %v3219_v45 = vld [vmem:[%s5899_s9 + $0x90] sm:$0xee]  ;;  %v5358_v13 = vld [vmem:[%s5901_s10 + $0x408] sm:$0xff]  }
  0xfd   : > { %2931 = vmatmul.mubr.bf16.gmra.mxu0 %v4457_v28  ;;  %v2976_v54 = vsel %vm6058_vm2, %v2971_v41, %v2975_v50  ;;  %v3254_v24 = vrot.slane %v3208_v1, 5  ;;  %v3213_v41 = vld [vmem:[%s5899_s9 + $0x60] sm:$0xee] }
  0xfe   : > { %5032 = vmatpush3.bf16.msra.mxu1 %v5328_v22  ;;  %4994 = vmatpush3.bf16.msra.mxu0 %v5331_v31  ;;  %v4510_v57 = vcombine.high %v2726_v53, %v2976_v54  ;;  %v4509_v59 = vcombine.low %v2726_v53, %v2976_v54  ;;  %v3210_v22 = vld [vmem:[%s5899_s9 + $0x48] sm:$0x11]  ;;  %v4533_v47 = vrot.slane %v3213_v41, 9  ;;  %v5352_v50 = vld [vmem:[%s5901_s10 + $0x420] sm:$0xff]   ;;  %v5353_v54 = vld [vmem:[%s5901_s10 + $0x458] sm:$0xff]  }
  0xff   : > { %5033 = vmatprep.subr.bf16.mxu1 %v5330_v30  ;;  %4995 = vmatprep.subr.bf16.mxu0 %v5333_v35  ;;  %v3258_v28 = vrot.slane %v3210_v22, 5  ;;  %v3255_v29 = vsel %vm6231_vm5, %v4530_v21, %v3254_v24  ;;  %v5350_v35 = vld [vmem:[%s5901_s10 + $0x428] sm:$0xff]  }
 0x100   : > { %2938 = vmatprep.mubr.bf16.mxu0 %v4460_v56  ;;  %v6271_v30 = vcombine.high %v3251_v16, %v3255_v29  ;;  %v6276_v33 = vcombine.low %v3251_v16, %v3255_v29  ;;  %v3215_v56 = vld [vmem:[%s5899_s9 + $0x70] sm:$0xee]  ;;  %v5360_v16 = vld [vmem:[%s5901_s10 + $0x400] sm:$0xff]  }
 0x101   : > { %3169 = vmatmul.mubr.bf16.gmra.mxu1 %v6177_v60  ;;  %v5341_v60 = vld [vmem:[%s5901_s10 + $0x140] sm:$0xff]   ;;  %v3259_v31 = vsel %vm6231_vm5, %v4531_v27, %v3258_v28 }
 0x102   : > { %5034 = vmatpush3.bf16.msra.mxu1 %v5332_v34  ;;  %4996 = vmatpush3.bf16.msra.mxu0 %v5335_v36  ;;  %v4627_v34 = vcombine.high %v3255_v29, %v3259_v31  ;;  %v5351_v36 = vld [vmem:[%s5901_s10 + $0x460] sm:$0xff]  }
 0x103   : > { %5035 = vmatprep.subr.bf16.mxu1 %v5334_v8  ;;  %4997 = vmatprep.subr.bf16.mxu0 %v5337_v25  ;;  %v4626_v8 = vcombine.low %v3255_v29, %v3259_v31  ;;  %v3266_v25 = vrot.slane %v3214_v43, 5  ;;  %v1610_v28 = vld [vmem:[#allocation2] sm:$0xff] }
 0x104   : > { %3176 = vmatprep.mubr.bf16.mxu1 %v4510_v57  ;;  %v3216_v57 = vld [vmem:[%s5899_s9 + $0x78] sm:$0x11] }
 0x105   : > { %2939 = vmatmul.mubr.bf16.gmra.mxu0 %v4459_v44 }
 0x106   : > { %5036 = vmatpush3.bf16.msra.mxu1 %v5336_v38  ;;  %4998 = vmatpush3.bf16.msra.mxu0 %v5339_v52  ;;  %v3212_v38 = vld [vmem:[%s5899_s9 + $0x58] sm:$0x11]  ;;  %v3267_v52 = vsel %vm6231_vm5, %v4533_v47, %v3266_v25 }
 0x107   : > { %5037 = vmatprep.subr.bf16.mxu1 %v5338_v51  ;;  %4999 = vmatprep.subr.bf16.mxu0 %v5341_v60  ;;  %v3262_v40 = vrot.slane %v3212_v38, 5  ;;  %v3270_v60 = vrot.slane %v3216_v57, 5 }
 0x108   : > { %3473 = vmatprep.mubr.bf16.mxu0 %v4568_v15  ;;  %v3768_v15 = vrot.slane %v3220_v6, 5 }
 0x109   : > { %3177 = vmatmul.mubr.bf16.gmra.mxu1 %v4509_v59  ;;  %v3263_v49 = vsel %vm6231_vm5, %v4532_v39, %v3262_v40  ;;  %v4534_v59 = vrot.slane %v3215_v56, 9 }
 0x10a   : > { %5038 = vmatpush3.bf16.msra.mxu1 %v5340_v55  ;;  %5000 = vmatpush3.bf16.msra.mxu0 %v5343_v32  ;;  %v6289_v51 = vcombine.high %v3259_v31, %v3263_v49  ;;  %v4629_v53 = vcombine.high %v3263_v49, %v3267_v52  ;;  %v5354_v55 = vld [vmem:[%s5901_s10 + $0x418] sm:$0xff]   ;;  %v4571_v44 = vcombine.low %v3259_v31, %v3263_v49  ;;  %v3218_v32 = vld [vmem:[%s5899_s9 + $0x88] sm:$0x11] }
 0x10b   : > { %5039 = vmatprep.subr.bf16.mxu1 %v5342_v61  ;;  %5065 = vmatprep.subr.bf16.mxu0 %v5345_v14  ;;  %v3217_v61 = vld [vmem:[%s5899_s9 + $0x80] sm:$0xee]  ;;  %v3526_v2 = vrot.slane %v3218_v32, 5  ;;  %v3271_v3 = vsel %vm6231_vm5, %v4534_v59, %v3270_v60 }
 0x10c   : > { %3715 = vmatprep.mubr.bf16.mxu1 %v4625_v5  ;;  %v4591_v63 = vrot.slane %v3217_v61, 9  ;;  %v4574_v4 = vcombine.high %v3267_v52, %v3271_v3  ;;  %v4573_v42 = vcombine.low %v3267_v52, %v3271_v3 }
 0x10d   : > { %3474 = vmatmul.mubr.bf16.vlgmr.msra.gmra.mxu0 %v4567_v0  ;;  %v4648_v0 = vrot.slane %v3219_v45, 9 }
 0x10e   : > { %5040 = vmatpush3.bf16.msra.mxu1 %v5344_v62  ;;  %5066 = vmatpush3.bf16.msra.mxu0 %v5346_v9  ;;  %v4628_v62 = vcombine.low %v3263_v49, %v3267_v52  ;;  %v3527_v46 = vsel %vm6231_vm5, %v4591_v63, %v3526_v2  ;;  %v1612_v49 = vld [vmem:[#allocation2 + $0x10] sm:$0xff] }
 0x10f   : > { %5105 = vmatprep.subr.bf16.mxu1 %v5345_v14  ;;  %5067 = vmatprep.subr.bf16.mxu0 %v5347_v18  ;;  %v4631_v7 = vcombine.high %v3271_v3, %v3527_v46  ;;  %v4630_v12 = vcombine.low %v3271_v3, %v3527_v46  ;;  %v5359_v14 = vld [vmem:[%s5901_s10 + $0x440] sm:$0xff]  }
 0x110   : > { %3481 = vmatprep.mubr.bf16.mxu0 %v6271_v30  ;;  %v1614_v3 = vld [vmem:[#allocation2 + $0x20] sm:$0xff] }
 0x111   : > { %3716 = vmatmul.mubr.bf16.vlgmr.msra.gmra.mxu1 %v4624_v17 }
 0x112   : > { %5113 = vmatpush3.bf16.msra.mxu1 %v5346_v9  ;;  %5068 = vmatpush3.bf16.msra.mxu0 %v5348_v19  ;;  %v3769_v9 = vsel %vm6231_vm5, %v4648_v0, %v3768_v15 }
 0x113   : > { %5106 = vmatprep.subr.bf16.mxu1 %v5347_v18  ;;  %3723 = vmatprep.mubr.bf16.mxu1 %v4627_v34  ;;  %v4682_v5 = vcombine.high %v3527_v46, %v3769_v9  ;;  %v4681_v17 = vcombine.low %v3527_v46, %v3769_v9 }
 0x114   : > { %5069 = vmatprep.subr.bf16.mxu0 %v5349_v23 }
 0x115   : > { %3482 = vmatmul.mubr.bf16.gmra.mxu0 %v6276_v33 }
 0x116   : > { %5114 = vmatpush3.bf16.msra.mxu1 %v5348_v19  ;;  %5070 = vmatpush3.bf16.msra.mxu0 %v5350_v35 }
 0x117   : > { %5107 = vmatprep.subr.bf16.mxu1 %v5349_v23  ;;  %5071 = vmatprep.subr.bf16.mxu0 %v5351_v36 }
 0x118   : > { %3489 = vmatprep.mubr.bf16.mxu0 %v6289_v51 }
 0x119   : > { %3724 = vmatmul.mubr.bf16.gmra.mxu1 %v4626_v8 }
 0x11a   : > { %5115 = vmatpush3.bf16.msra.mxu1 %v5350_v35  ;;  %3731 = vmatprep.mubr.bf16.mxu1 %v4629_v53 }
 0x11b   : > { %5108 = vmatprep.subr.bf16.mxu1 %v5351_v36  ;;  %5072 = vmatpush3.bf16.msra.mxu0 %v5352_v50 }
 0x11c   : > { %5073 = vmatprep.subr.bf16.mxu0 %v5353_v54 }
 0x11d   : > { %3490 = vmatmul.mubr.bf16.gmra.mxu0 %v4571_v44 }
 0x11e   : > { %5116 = vmatpush3.bf16.msra.mxu1 %v5352_v50  ;;  %3497 = vmatprep.mubr.bf16.mxu0 %v4574_v4 }
 0x11f   : > { %5109 = vmatprep.subr.bf16.mxu1 %v5353_v54  ;;  %5074 = vmatpush3.bf16.msra.mxu0 %v5354_v55 }
 0x120   : > { %5075 = vmatprep.subr.bf16.mxu0 %v5355_v58 }
 0x121   : > { %3732 = vmatmul.mubr.bf16.gmra.mxu1 %v4628_v62 }
 0x122   : > { %5117 = vmatpush3.bf16.msra.mxu1 %v5354_v55  ;;  %3739 = vmatprep.mubr.bf16.mxu1 %v4631_v7 }
 0x123   : > { %5110 = vmatprep.subr.bf16.mxu1 %v5355_v58  ;;  %5076 = vmatpush3.bf16.msra.mxu0 %v5356_v10 }
 0x124   : > { %5077 = vmatprep.subr.bf16.mxu0 %v5357_v11 }
 0x125   : > { %3498 = vmatmul.mubr.bf16.gmra.mxu0 %v4573_v42 }
 0x126   : > { %5118 = vmatpush3.bf16.msra.mxu1 %v5356_v10  ;;  %3945 = vmatprep.mubr.bf16.mxu0 %v6271_v30 }
 0x127   : > { %5111 = vmatprep.subr.bf16.mxu1 %v5357_v11  ;;  %5078 = vmatpush3.bf16.msra.mxu0 %v5358_v13 }
 0x128   : > { %5079 = vmatprep.subr.bf16.mxu0 %v5359_v14 }
 0x129   : > { %3740 = vmatmul.mubr.bf16.gmra.mxu1 %v4630_v12 }
 0x12a   : > { %5119 = vmatpush3.bf16.msra.mxu1 %v5358_v13  ;;  %3961 = vmatprep.mubr.bf16.mxu1 %v4574_v4  ;;  %v1615_v13 = vld [vmem:[#allocation2 + $0x28] sm:$0xff] }
 0x12b   : > { %5112 = vmatprep.subr.bf16.mxu1 %v5359_v14  ;;  %5080 = vmatpush3.bf16.msra.mxu0 %v5360_v16 }
 0x12e   : > { %5120 = vmatpush3.bf16.msra.mxu1 %v5360_v16  ;;  %3946 = vmatmul.mubr.bf16.vlgmr.msra.gmra.mxu0 %v6276_v33 }
 0x12f   : > { %3953 = vmatprep.mubr.bf16.mxu0 %v6289_v51 }
 0x131   : > { %3962 = vmatmul.mubr.bf16.vlgmr.msra.gmra.mxu1 %v4573_v42 }
 0x132   : > { %3969 = vmatprep.mubr.bf16.mxu1 %v4682_v5 }
 0x136   : > { %3954 = vmatmul.mubr.bf16.gmra.mxu0 %v4571_v44  ;;  %v1613_v44 = vld [vmem:[#allocation2 + $0x8] sm:$0xff] }
 0x139   : > { %3970 = vmatmul.mubr.bf16.gmra.mxu1 %v4681_v17 }
 0x16d   : > { %v4761_v18 = vpop.f32.mrf.mxu0 }
 0x16e   : > { %v4801_v19 = vpop.f32.mrf.mxu1 }
 0x16f   : > { %v4762_v1 = vpop.f32.mrf.mxu0 }
 0x170   : > { %v4802_v21 = vpop.f32.mrf.mxu1  ;;  %v4763_v48 = vadd.f32 %v4762_v1, %v4761_v18  ;;  %v1616_v18 = vld [vmem:[#allocation2 + $0x38] sm:$0xff] }
 0x171   : > { %v4803_v24 = vadd.f32 %v4802_v21, %v4801_v19  ;;  %v4764_v26 = vpop.f32.mrf.mxu0 }
 0x172   : > { %v4804_v22 = vpop.f32.mrf.mxu1  ;;  %v1850_v27 = vadd.f32 %v4763_v48, %v1609_v20 }
 0x173   : > { %v4765_v29 = vpop.f32.mrf.mxu0 }
 0x174   : > { %v4805_v30 = vpop.f32.mrf.mxu1  ;;  %v6317_v31 = vadd.f32 %v4803_v24, %v1850_v27  ;;  %v4766_v23 = vadd.f32 %v4765_v29, %v4764_v26 }
 0x175   : > { %v4806_v34 = vadd.f32 %v4805_v30, %v4804_v22  ;;  %v4767_v35 = vpop.f32.mrf.mxu0 }
 0x176   : > { %v1851_v33 = vadd.f32 %v4766_v23, %v1610_v28  ;;  %v4807_v8 = vpop.f32.mrf.mxu1 }
 0x177   : > { %v4768_v38 = vpop.f32.mrf.mxu0 }
 0x178   : > { %v6319_v36 = vadd.f32 %v4806_v34, %v1851_v33  ;;  %v4808_v39 = vpop.f32.mrf.mxu1  ;;  %v4769_v40 = vadd.f32 %v4768_v38, %v4767_v35 }
 0x179   : > { %v4809_v41 = vadd.f32 %v4808_v39, %v4807_v8  ;;  %v4770_v43 = vpop.f32.mrf.mxu0 }
 0x17a   : > { %v4810_v47 = vpop.f32.mrf.mxu1  ;;  %v1852_v25 = vadd.f32 %v4769_v40, %v1611_v37 }
 0x17b   : > { %v4771_v50 = vpop.f32.mrf.mxu0 }
 0x17c   : > { %v4811_v51 = vpop.f32.mrf.mxu1  ;;  %v2089_v52 = vadd.f32 %v4809_v41, %v1852_v25  ;;  %v4772_v53 = vadd.f32 %v4771_v50, %v4770_v43 }
 0x17d   : > { %v4812_v54 = vadd.f32 %v4811_v51, %v4810_v47  ;;  %v4773_v55 = vpop.f32.mrf.mxu0 }
 0x17e   : > { %v1853_v56 = vadd.f32 %v4772_v53, %v1612_v49  ;;  %v4813_v57 = vpop.f32.mrf.mxu1 }
 0x17f   : > { %v4774_v59 = vpop.f32.mrf.mxu0 }
 0x180   : > { %v2090_v60 = vadd.f32 %v4812_v54, %v1853_v56  ;;  %v4775_v61 = vadd.f32 %v4774_v59, %v4773_v55  ;;  %v4814_v32 = vpop.f32.mrf.mxu1 }
 0x181   : > { %v4815_v62 = vadd.f32 %v4814_v32, %v4813_v57  ;;  %v4776_v63 = vpop.f32.mrf.mxu0 }
 0x182   : > { %v1854_v2 = vadd.f32 %v4775_v61, %v1613_v44  ;;  %v4816_v58 = vpop.f32.mrf.mxu1 }
 0x183   : > { %v4777_v4 = vpop.f32.mrf.mxu0 }
 0x184   : > { %v2091_v46 = vadd.f32 %v4815_v62, %v1854_v2  ;;  %v4778_v7 = vadd.f32 %v4777_v4, %v4776_v63  ;;  %v4817_v10 = vpop.f32.mrf.mxu1 }
 0x185   : > { %v4818_v11 = vadd.f32 %v4817_v10, %v4816_v58  ;;  %v4779_v45 = vpop.f32.mrf.mxu0 }
 0x186   : > { %v1855_v42 = vadd.f32 %v4778_v7, %v1614_v3  ;;  %v4819_v6 = vpop.f32.mrf.mxu1 }
 0x187   : > { %v4780_v14 = vpop.f32.mrf.mxu0 }
 0x188   : > { %v2092_v12 = vadd.f32 %v4818_v11, %v1855_v42  ;;  %v4820_v0 = vpop.f32.mrf.mxu1  ;;  %v4781_v15 = vadd.f32 %v4780_v14, %v4779_v45 }
 0x189   : > { %v4821_v16 = vadd.f32 %v4820_v0, %v4819_v6  ;;  %v4782_v9 = vpop.f32.mrf.mxu0 }
 0x18a   : > { %v4822_v5 = vpop.f32.mrf.mxu1  ;;  %v1856_v17 = vadd.f32 %v4781_v15, %v1615_v13 }
 0x18b   : > { %v4783_v19 = vpop.f32.mrf.mxu0 }
 0x18c   : > { %v4823_v20 = vpop.f32.mrf.mxu1  ;;  %v2093_v1 = vadd.f32 %v4821_v16, %v1856_v17  ;;  %v4784_v21 = vadd.f32 %v4783_v19, %v4782_v9 }
 0x18d   : > { %v4824_v48 = vadd.f32 %v4823_v20, %v4822_v5  ;;  %v4841_v26 = vpop.f32.mrf.mxu0 }
 0x18e   : > { %v1857_v24 = vadd.f32 %v4784_v21, %v1616_v18 }
 0x18f   : > { %v4842_v27 = vpop.f32.mrf.mxu0 }
 0x190   : > { %v2094_v22 = vadd.f32 %v4824_v48, %v1857_v24  ;;  %v4843_v28 = vadd.f32 %v4842_v27, %v4841_v26  ;;  %v4881_v30 = vpop.f32.mrf.mxu1 }
 0x191   : > { %v4844_v29 = vpop.f32.mrf.mxu0 }
 0x192   : > { %v2312_v23 = vadd.f32 %v4843_v28, %v6317_v31  ;;  %v4882_v33 = vpop.f32.mrf.mxu1 }
 0x193   : > { %v4845_v34 = vpop.f32.mrf.mxu0  ;;  %v4883_v8 = vadd.f32 %v4882_v33, %v4881_v30 }
 0x194   : > { %v4846_v35 = vadd.f32 %v4845_v34, %v4844_v29  ;;  %v4884_v38 = vpop.f32.mrf.mxu1 }
 0x195   : > { %v4847_v37 = vpop.f32.mrf.mxu0  ;;  %v6323_v40 = vadd.f32 %v4883_v8, %v2312_v23 }
 0x196   : > { %v2313_v39 = vadd.f32 %v4846_v35, %v6319_v36  ;;  %v4885_v43 = vpop.f32.mrf.mxu1 }
 0x197   : > { %v4848_v41 = vpop.f32.mrf.mxu0  ;;  %v4886_v25 = vadd.f32 %v4885_v43, %v4884_v38 }
 0x198   : > { %v4849_v47 = vadd.f32 %v4848_v41, %v4847_v37 }
 0x199   : > { %v4850_v49 = vpop.f32.mrf.mxu0  ;;  %v6325_v51 = vadd.f32 %v4886_v25, %v2313_v39  ;;  %v4887_v53 = vpop.f32.mrf.mxu1 }
 0x19a   : > { %v2314_v50 = vadd.f32 %v4849_v47, %v2089_v52 }
 0x19b   : > { %v4851_v31 = vpop.f32.mrf.mxu0  ;;  %v4888_v55 = vpop.f32.mrf.mxu1 }
 0x19c   : > { %v4852_v54 = vadd.f32 %v4851_v31, %v4850_v49  ;;  %v4889_v57 = vadd.f32 %v4888_v55, %v4887_v53 }
 0x19d   : > { %v4853_v56 = vpop.f32.mrf.mxu0  ;;  %v4890_v59 = vpop.f32.mrf.mxu1 }
 0x19e   : > { %v2315_v44 = vadd.f32 %v4852_v54, %v2090_v60  ;;  %v6327_v36 = vadd.f32 %v4889_v57, %v2314_v50 }
 0x19f   : > { %v4854_v61 = vpop.f32.mrf.mxu0  ;;  %v4891_v62 = vpop.f32.mrf.mxu1 }
 0x1a0   : > { %v4855_v32 = vadd.f32 %v4854_v61, %v4853_v56  ;;  %v4892_v2 = vadd.f32 %v4891_v62, %v4890_v59 }
 0x1a1   : > { %v4856_v63 = vpop.f32.mrf.mxu0  ;;  %v4893_v4 = vpop.f32.mrf.mxu1 }
 0x1a2   : > { %v2316_v58 = vadd.f32 %v4855_v32, %v2091_v46  ;;  %v6329_v52 = vadd.f32 %v4892_v2, %v2315_v44 }
 0x1a3   : > { %v4857_v3 = vpop.f32.mrf.mxu0  ;;  %v4894_v10 = vpop.f32.mrf.mxu1 }
 0x1a4   : > { %v4858_v7 = vadd.f32 %v4857_v3, %v4856_v63  ;;  %v4895_v42 = vadd.f32 %v4894_v10, %v4893_v4 }
 0x1a5   : > { %v4896_v45 = vpop.f32.mrf.mxu1  ;;  %v4859_v6 = vpop.f32.mrf.mxu0 }
 0x1a6   : > { %v2317_v11 = vadd.f32 %v4858_v7, %v2092_v12  ;;  %v6331_v60 = vadd.f32 %v4895_v42, %v2316_v58 }
 0x1a7   : > { %v4897_v13 = vpop.f32.mrf.mxu1  ;;  %v4860_v14 = vpop.f32.mrf.mxu0 }
 0x1a8   : > { %v4898_v0 = vadd.f32 %v4897_v13, %v4896_v45  ;;  %v4861_v15 = vadd.f32 %v4860_v14, %v4859_v6 }
 0x1a9   : > { %v4862_v16 = vpop.f32.mrf.mxu0  ;;  %v4899_v5 = vpop.f32.mrf.mxu1 }
 0x1aa   : > { %v6333_v9 = vadd.f32 %v4898_v0, %v2317_v11  ;;  %v2318_v46 = vadd.f32 %v4861_v15, %v2093_v1 }
 0x1ab   : > { %v4863_v17 = vpop.f32.mrf.mxu0  ;;  %v4900_v19 = vpop.f32.mrf.mxu1 }
 0x1ac   : > { %v4864_v18 = vadd.f32 %v4863_v17, %v4862_v16  ;;  %v4901_v20 = vadd.f32 %v4900_v19, %v4899_v5 }
 0x1ad   : > { %v4902_v12 = vpop.f32.mrf.mxu1  ;;  %v4921_v48 = vpop.f32.mrf.mxu0 }
 0x1ae   : > { %v2319_v21 = vadd.f32 %v4864_v18, %v2094_v22  ;;  %v6335_v24 = vadd.f32 %v4901_v20, %v2318_v46 }
 0x1af   : > { %v4903_v26 = vpop.f32.mrf.mxu1  ;;  %v4922_v27 = vpop.f32.mrf.mxu0 }
 0x1b0   : > { %v4904_v28 = vadd.f32 %v4903_v26, %v4902_v12  ;;  %v4923_v12 = vadd.f32 %v4922_v27, %v4921_v48 }
 0x1b1   : > { %v6337_v29 = vpop.f32.mrf.mxu1  ;;  %v4924_v30 = vpop.f32.mrf.mxu0 }
 0x1b2   : > { %v6339_v23 = vadd.f32 %v4904_v28, %v2319_v21 }
 0x1b3   : > { %v4962_v34 = vpop.f32.mrf.mxu1  ;;  %v4925_v1 = vpop.f32.mrf.mxu0 }
 0x1b4   : > { %6486 = vst [vmem:[#allocation5_spill] sm:$0xff] %v6339_v23 }
 0x1b5   : > { %v6341_v33 = vpop.f32.mrf.mxu1  ;;  %v4927_v35 = vpop.f32.mrf.mxu0 }
 0x1b7   : > { %v6343_v8 = vpop.f32.mrf.mxu1  ;;  %v4928_v22 = vpop.f32.mrf.mxu0 }
 0x1b9   : > { %v6345_v37 = vpop.f32.mrf.mxu1  ;;  %v6347_v38 = vpop.f32.mrf.mxu0 }
 0x1bb   : > { %v6349_v39 = vpop.f32.mrf.mxu1  ;;  %v4931_v41 = vpop.f32.mrf.mxu0 }
 0x1bd   : > { %v6351_v43 = vpop.f32.mrf.mxu1  ;;  %v4933_v47 = vpop.f32.mrf.mxu0 }
 0x1bf   : > { %v6353_v25 = vpop.f32.mrf.mxu1  ;;  %v4934_v49 = vpop.f32.mrf.mxu0 }
 0x1c0   : > { %6487 = vst [vmem:[#allocation6_spill] sm:$0xff] %v6353_v25  ;;  %v4935_v28 = vadd.f32 %v4934_v49, %v4933_v47 }
 0x1c1   : > { %v4973_v50 = vpop.f32.mrf.mxu1  ;;  %v4936_v53 = vpop.f32.mrf.mxu0 }
 0x1c3   : > { %v4974_v31 = vpop.f32.mrf.mxu1  ;;  %v4937_v55 = vpop.f32.mrf.mxu0 }
 0x1c4   : > { %v4975_v47 = vadd.f32 %v4974_v31, %v4973_v50 }
 0x1c5   : > { %v6355_v54 = vpop.f32.mrf.mxu1  ;;  %v4939_v57 = vpop.f32.mrf.mxu0 }
 0x1c7   : > { %v6357_v56 = vpop.f32.mrf.mxu1  ;;  %v4940_v59 = vpop.f32.mrf.mxu0 }
 0x1c9   : > { %v6359_v44 = vpop.f32.mrf.mxu1  ;;  %v6363_v32 = vpop.f32.mrf.mxu0 }
 0x1cb   : > { %v6361_v61 = vpop.f32.mrf.mxu1  ;;  %v6367_v63 = vpop.f32.mrf.mxu0 }
 0x1cd   : > { %v6365_v62 = vpop.f32.mrf.mxu1  ;;  %v5001_v58 = vpop.f32.mrf.mxu0 }
 0x1ce   : > { %6488 = vst [vmem:[#allocation7_spill] sm:$0xff] %v6365_v62 }
 0x1cf   : > { %v6369_v2 = vpop.f32.mrf.mxu1  ;;  %v5002_v4 = vpop.f32.mrf.mxu0 }
 0x1d0   : > { %6489 = vst [vmem:[#allocation8_spill] sm:$0xff] %v6369_v2  ;;  %v5003_v25 = vadd.f32 %v5002_v4, %v5001_v58 }
 0x1d1   : > { %v5041_v3 = vpop.f32.mrf.mxu1  ;;  %v5004_v10 = vpop.f32.mrf.mxu0 }
 0x1d3   : > { %v5042_v7 = vpop.f32.mrf.mxu1  ;;  %v5005_v42 = vpop.f32.mrf.mxu0 }
 0x1d4   : > { %v5006_v31 = vadd.f32 %v5005_v42, %v5004_v10 }
 0x1d5   : > { %v6371_v11 = vpop.f32.mrf.mxu1  ;;  %v6375_v6 = vpop.f32.mrf.mxu0 }
 0x1d6   : > { %6490 = vst [vmem:[#allocation9_spill] sm:$0xff] %v6371_v11  ;;  %v4963_v11 = vadd.f32 %v4962_v34, %v6337_v29 }
 0x1d7   : > { %v6373_v45 = vpop.f32.mrf.mxu1  ;;  %v5008_v14 = vpop.f32.mrf.mxu0 }
 0x1d8   : > { %6491 = vst [vmem:[#allocation10_spill] sm:$0xff] %v6373_v45  ;;  %v5009_v42 = vadd.f32 %v5008_v14, %v6375_v6  ;;  %v6503_v6 = vld [vmem:[#allocation8_spill] sm:$0xff] }
 0x1d9   : > { %v6377_v13 = vpop.f32.mrf.mxu1  ;;  %v6381_v15 = vpop.f32.mrf.mxu0 }
 0x1da   : > { %6492 = vst [vmem:[#allocation11_spill] sm:$0xff] %v6377_v13  ;;  %6494 = vst [vmem:[#allocation13_spill] sm:$0xff] %v6381_v15  ;;  %v2947_v15 = vadd.f32 %v4923_v12, %v6323_v40 }
 0x1db   : > { %v6379_v0 = vpop.f32.mrf.mxu1  ;;  %v6385_v46 = vpop.f32.mrf.mxu0 }
 0x1dc   : > { %6493 = vst [vmem:[#allocation12_spill] sm:$0xff] %v6379_v0  ;;  %6496 = vst [vmem:[#allocation15_spill] sm:$0xff] %v6385_v46  ;;  %v4926_v0 = vadd.f32 %v4925_v1, %v4924_v30  ;;  %v4938_v46 = vadd.f32 %v4937_v55, %v4936_v53  ;;  %v3185_v1 = vadd.f32 %v4963_v11, %v2947_v15 }
 0x1dd   : > { %v6383_v16 = vpop.f32.mrf.mxu1  ;;  %v5013_v17 = vpop.f32.mrf.mxu0 }
 0x1de   : > { %6495 = vst [vmem:[#allocation14_spill] sm:$0xff] %v6383_v16  ;;  %v4929_v16 = vadd.f32 %v4928_v22, %v4927_v35  ;;  %v2948_v27 = vadd.f32 %v4926_v0, %v6325_v51  ;;  %v4932_v35 = vadd.f32 %v4931_v41, %v6347_v38  ;;  %v4941_v22 = vadd.f32 %v4940_v59, %v4939_v57 }
 0x1df   : > { %v6387_v5 = vpop.f32.mrf.mxu1  ;;  %v5014_v19 = vpop.f32.mrf.mxu0  ;;  %v2952_v34 = vadd.f32 %v4938_v46, %v6333_v9  ;;  %v4969_v51 = vadd.f32 %v6349_v39, %v6345_v37  ;;  %v3506_v50 = vadd.f32 %v5003_v25, %v3185_v1  ;;  %v4978_v38 = vadd.f32 %v6357_v56, %v6355_v54 }
 0x1e0   : > { %6497 = vst [vmem:[#allocation16_spill] sm:$0xff] %v6387_v5  ;;  %v2951_v5 = vadd.f32 %v4935_v28, %v6331_v60  ;;  %v5015_v49 = vadd.f32 %v5014_v19, %v5013_v17  ;;  %v2949_v40 = vadd.f32 %v4929_v16, %v6327_v36  ;;  %v4966_v60 = vadd.f32 %v6343_v8, %v6341_v33  ;;  %v6498_v16 = vld [vmem:[#allocation6_spill] sm:$0xff] }
 0x1e1   : > { %v5053_v18 = vpop.f32.mrf.mxu1  ;;  %v5016_v21 = vpop.f32.mrf.mxu0  ;;  %v2950_v33 = vadd.f32 %v4932_v35, %v6329_v52  ;;  %v2953_v9 = vadd.f32 %v4941_v22, %v6335_v24  ;;  %v5043_v8 = vadd.f32 %v5042_v7, %v5041_v3  ;;  %v3190_v11 = vadd.f32 %v4978_v38, %v2952_v34 }
 0x1e2   : > { %v3189_v29 = vadd.f32 %v4975_v47, %v2951_v5  ;;  %v3186_v36 = vadd.f32 %v4966_v60, %v2948_v27  ;;  %v3187_v58 = vadd.f32 %v4969_v51, %v2949_v40  ;;  %v4981_v37 = vadd.f32 %v6361_v61, %v6359_v44  ;;  %v6499_v61 = vld [vmem:[#allocation9_spill] sm:$0xff]  ;;  %v6500_v5 = vld [vmem:[#allocation10_spill] sm:$0xff] }
 0x1e3   : > { %v5054_v20 = vpop.f32.mrf.mxu1  ;;  %v5017_v13 = vpop.f32.mrf.mxu0  ;;  %v4944_v39 = vadd.f32 %v6367_v63, %v6363_v32  ;;  %v3748_v54 = vadd.f32 %v5043_v8, %v3506_v50  ;;  %v4972_v46 = vadd.f32 %v6498_v16, %v6351_v43  ;;  %v5046_v32 = vadd.f32 %v6500_v5, %v6499_v61  ;;  %v6504_v47 = vld [vmem:[#allocation13_spill] sm:$0xff]  ;;  %v6506_v50 = vld [vmem:[#allocation11_spill] sm:$0xff] }
 0x1e4   : > { %v3510_v41 = vadd.f32 %v5015_v49, %v3189_v29  ;;  %v5018_v57 = vadd.f32 %v5017_v13, %v5016_v21  ;;  %v5055_v25 = vadd.f32 %v5054_v20, %v5053_v18  ;;  %v3507_v56 = vadd.f32 %v5006_v31, %v3186_v36  ;;  %v6501_v18 = vld [vmem:[#allocation5_spill] sm:$0xff]  ;;  %v6502_v20 = vld [vmem:[#allocation7_spill] sm:$0xff]  ;;  %v6507_v31 = vld [vmem:[#allocation12_spill] sm:$0xff] }
 0x1e5   : > { %v6389_v26 = vpop.f32.mrf.mxu1  ;;  %v5019_v62 = vpop.f32.mrf.mxu0  ;;  %v3191_v44 = vadd.f32 %v4981_v37, %v2953_v9  ;;  %v2954_v19 = vadd.f32 %v4944_v39, %v6501_v18  ;;  %v4984_v14 = vadd.f32 %v6503_v6, %v6502_v20  ;;  %v3508_v27 = vadd.f32 %v5009_v42, %v3187_v58  ;;  %v6505_v49 = vld [vmem:[#allocation15_spill] sm:$0xff]  ;;  %v6508_v37 = vld [vmem:[#allocation14_spill] sm:$0xff] }
 0x1e6   : > { %v3752_v52 = vadd.f32 %v5055_v25, %v3510_v41  ;;  %v3511_v15 = vadd.f32 %v5018_v57, %v3190_v11  ;;  %v5012_v43 = vadd.f32 %v6505_v49, %v6504_v47  ;;  %v3188_v51 = vadd.f32 %v4972_v46, %v2950_v33 }
 0x1e7   : > { %v5057_v2 = vpop.f32.mrf.mxu1  ;;  %v5020_v45 = vpop.f32.mrf.mxu0  ;;  %v3192_v38 = vadd.f32 %v4984_v14, %v2954_v19  ;;  %v6509_v39 = vld [vmem:[#allocation16_spill] sm:$0xff] }
 0x1e8   : > { %v5021_v24 = vadd.f32 %v5020_v45, %v5019_v62  ;;  %v5058_v21 = vadd.f32 %v5057_v2, %v6389_v26  ;;  %v3749_v45 = vadd.f32 %v5046_v32, %v3507_v56  ;;  %v5049_v2 = vadd.f32 %v6507_v31, %v6506_v50 }
 0x1e9   : > { %v6392_v23 = vpop.f32.mrf.mxu1  ;;  %v5022_v30 = vpop.f32.mrf.mxu0  ;;  %v3509_v9 = vadd.f32 %v5012_v43, %v3188_v51  ;;  %v5052_v25 = vadd.f32 %v6509_v39, %v6508_v37 }
 0x1ea   : > { %v3753_v35 = vadd.f32 %v5058_v21, %v3511_v15  ;;  %v3512_v22 = vadd.f32 %v5021_v24, %v3191_v44  ;;  %v3750_v58 = vadd.f32 %v5049_v2, %v3508_v27 }
 0x1eb   : > { %v6396_v48 = vpop.f32.mrf.mxu1  ;;  %v5023_v53 = vpop.f32.mrf.mxu0  ;;  %v3751_v42 = vadd.f32 %v5052_v25, %v3509_v9 }
 0x1ec   : > { %v5024_v60 = vadd.f32 %v5023_v53, %v5022_v30  ;;  %v5061_v41 = vadd.f32 %v6396_v48, %v6392_v23 }
 0x1ed   : > { %v6401_v12 = vpop.f32.mrf.mxu1 }
 0x1ee   : > { %v5081_v59 = vpop.f32.mrf.mxu0  ;;  %v3754_v53 = vadd.f32 %v5061_v41, %v3512_v22 }
 0x1ef   : > { %v6408_v55 = vpop.f32.mrf.mxu1 }
 0x1f0   : > { %v5082_v10 = vpop.f32.mrf.mxu0  ;;  %v5064_v23 = vadd.f32 %v6408_v55, %v6401_v12 }
 0x1f1   : > { %v5093_v4 = vpop.f32.mrf.mxu1  ;;  %v5083_v13 = vadd.f32 %v5082_v10, %v5081_v59 }
 0x1f2   : > { %v5084_v7 = vpop.f32.mrf.mxu0 }
 0x1f3   : > { %v5094_v0 = vpop.f32.mrf.mxu1  ;;  %v3978_v63 = vadd.f32 %v5083_v13, %v3748_v54 }
 0x1f4   : > { %v5095_v3 = vadd.f32 %v5094_v0, %v5093_v4  ;;  %v5085_v62 = vpop.f32.mrf.mxu0  ;;  %v3513_v4 = vadd.f32 %v5024_v60, %v3192_v38 }
 0x1f5   : > { %v5096_v17 = vpop.f32.mrf.mxu1  ;;  %3986 = vst [vmem:[#allocation2 + $0x30] sm:$0xff] %v3978_v63  ;;  %v5086_v1 = vadd.f32 %v5085_v62, %v5084_v7 }
 0x1f6   : > { %v3982_v28 = vadd.f32 %v5095_v3, %v3752_v52  ;;  %v5087_v34 = vpop.f32.mrf.mxu0  ;;  %v3755_v52 = vadd.f32 %v5064_v23, %v3513_v4 }
 0x1f7   : > { %v5097_v40 = vpop.f32.mrf.mxu1  ;;  %v3979_v26 = vadd.f32 %v5086_v1, %v3749_v45 }
 0x1f8   : > { %3990 = vst [vmem:[#allocation2 + $0x8] sm:$0xff] %v3982_v28  ;;  %v5098_v29 = vadd.f32 %v5097_v40, %v5096_v17  ;;  %v5088_v59 = vpop.f32.mrf.mxu0 }
 0x1f9   : > { %v5099_v36 = vpop.f32.mrf.mxu1  ;;  %3987 = vst [vmem:[#allocation2] sm:$0xff] %v3979_v26  ;;  %v5089_v8 = vadd.f32 %v5088_v59, %v5087_v34 }
 0x1fa   : > { %v3983_v57 = vadd.f32 %v5098_v29, %v3753_v35  ;;  %v5090_v11 = vpop.f32.mrf.mxu0 }
 0x1fb   : > { %v5100_v30 = vpop.f32.mrf.mxu1  ;;  %v3980_v10 = vadd.f32 %v5089_v8, %v3750_v58 }
 0x1fc   : > { %3991 = vst [vmem:[#allocation2 + $0x20] sm:$0xff] %v3983_v57  ;;  %v5101_v33 = vadd.f32 %v5100_v30, %v5099_v36  ;;  %v5091_v56 = vpop.f32.mrf.mxu0 }
 0x1fd   : > { %v5102_v54 = vpop.f32.mrf.mxu1  ;;  %3988 = vst [vmem:[#allocation2 + $0x18] sm:$0xff] %v3980_v10  ;;  %v5092_v13 = vadd.f32 %v5091_v56, %v5090_v11 }
 0x1fe   : > { %v3984_v48 = vadd.f32 %v5101_v33, %v3754_v53 }
 0x1ff   : > { %v5103_v0 = vpop.f32.mrf.mxu1  ;;  %v3981_v24 = vadd.f32 %v5092_v13, %v3751_v42 }
 0x200   : > { %3992 = vst [vmem:[#allocation2 + $0x28] sm:$0xff] %v3984_v48  ;;  %v5104_v15 = vadd.f32 %v5103_v0, %v5102_v54  ;;  %3997 = sbr.rel (%p4699_p1) target bundleno = 533 (0x215), region = 123 }
 0x201   : > { %3989 = vst [vmem:[#allocation2 + $0x10] sm:$0xff] %v3981_v24 }
 0x202   : > { %v3985_v3 = vadd.f32 %v5104_v15, %v3755_v52 }
 0x204   : > { %3993 = vst [vmem:[#allocation2 + $0x38] sm:$0xff] %v3985_v3 }
 0x205   : > { %v3998_v7 = vld [vmem:[#allocation2 + $0x30] sm:$0xff]  ;;  %v3999_v16 = vld [vmem:[#allocation2] sm:$0xff]  ;;  %v4000_v61 = vld [vmem:[#allocation2 + $0x18] sm:$0xff] }
 0x206   : > { %v4700_v12 = vld [vmem:[%s6477_s2] ss:$0 sm:$0xff]  ;;  %v4002_v17 = vld [vmem:[#allocation2 + $0x8] sm:$0xff] }
 0x207   : > { %v4013_v55 = vmul.f32 %v4700_v12, %v3998_v7  ;;  %v4014_v46 = vmul.f32 %v4700_v12, %v3999_v16  ;;  %v4701_v44 = vld [vmem:[%s6478_s3] ss:$0 sm:$0xff]  ;;  %v4015_v32 = vmul.f32 %v4700_v12, %v4000_v61  ;;  %v4004_v19 = vld [vmem:[#allocation2 + $0x28] sm:$0xff]  ;;  %v4017_v14 = vmul.f32 %v4700_v12, %v4002_v17 }
 0x208   : > { %v4001_v5 = vld [vmem:[#allocation2 + $0x10] sm:$0xff]  ;;  %v4003_v18 = vld [vmem:[#allocation2 + $0x20] sm:$0xff]  ;;  %v4019_v27 = vmul.f32 %v4700_v12, %v4004_v19 }
 0x209   : > { %v4016_v63 = vmul.f32 %v4700_v12, %v4001_v5  ;;  %v4028_v20 = vadd.f32 %v4701_v44, %v4013_v55  ;;  %v4029_v6 = vadd.f32 %v4701_v44, %v4014_v46  ;;  %v4018_v21 = vmul.f32 %v4700_v12, %v4003_v18 }
 0x20a   : > { %v4030_v62 = vadd.f32 %v4701_v44, %v4015_v32  ;;  %v4032_v1 = vadd.f32 %v4701_v44, %v4017_v14  ;;  %v4034_v60 = vadd.f32 %v4701_v44, %v4019_v27 }
 0x20b   : > { %v4005_v28 = vld [vmem:[#allocation2 + $0x38] sm:$0xff]  ;;  %v4031_v45 = vadd.f32 %v4701_v44, %v4016_v63  ;;  %v4036_v49 = vmax.f32 %v4028_v20, 0.0  ;;  %v4037_v43 = vmax.f32 %v4029_v6, 0.0  ;;  %v4033_v40 = vadd.f32 %v4701_v44, %v4018_v21 }
 0x20c   : > { %v4020_v47 = vmul.f32 %v4700_v12, %v4005_v28  ;;  %v4038_v35 = vmax.f32 %v4030_v62, 0.0  ;;  %v4040_v51 = vmax.f32 %v4032_v1, 0.0  ;;  %v4042_v2 = vmax.f32 %v4034_v60, 0.0 }
 0x20d   : > { %v4039_v22 = vmax.f32 %v4031_v45, 0.0  ;;  %v4725_v34 = vpack.c.bf16 %v4037_v43, %v4036_v49  ;;  %v4041_v50 = vmax.f32 %v4033_v40, 0.0 }
 0x20e   : > { %v4035_v29 = vadd.f32 %v4701_v44, %v4020_v47 }
 0x20f   : > { %v4730_v31 = vpack.c.bf16 %v4039_v22, %v4038_v35  ;;  %4726 = vst [vmem:[%s5897_s7] sm:$0xff] %v4725_v34   ;;  %v4735_v36 = vpack.c.bf16 %v4041_v50, %v4040_v51 }
 0x210   : > { %v4043_v26 = vmax.f32 %v4035_v29, 0.0 }
 0x211   : > { %4742 = vst [vmem:[%s5897_s7 + $0x8] sm:$0xff] %v4730_v31   ;;  %4743 = vst [vmem:[%s5897_s7 + $0x10] sm:$0xff] %v4735_v36  }
 0x212   : > { %v4740_v38 = vpack.c.bf16 %v4043_v26, %v4042_v2 }
 0x214   : > { %4744 = vst [vmem:[%s5897_s7 + $0x18] sm:$0xff] %v4740_v38  }
 0x215 PF: > { %s14_s23 = sadd.s32 1, %s5431_s23   ;;  %s6510_s15 = smov %s5403_s16 }
 0x216   : > { %p11_p2 = scmp.ge.s32.totalorder %s14_s23, 6   ;;  %s6511_s16 = smov %s5524_s29 }
 0x217   : > { %s6512_s17 = smov %s5411_s18  ;;  %s6513_s18 = smov %s5534_s8 }
 0x218   : > { %s6514_s19 = smov %s5423_s21  ;;  %s6515_s20 = smov %s5427_s22 }
 0x219   : > { %s6516_s21 = smov %s6519_s24  ;;  %s6517_s22 = smov %s6523_s25 }
 0x21a   :  { %13 = sbr.rel (!%p11_p2) target bundleno = 5 (0x5), region = 180 }

</bundles_post_ra>
